<compile_context>
chip_gen: v6e
topology: v6e:2x2x1
jax: 0.10.0
libtpu: 0.0.40
codegen_flags: <defaults>
</compile_context>

<pallas_src>
import jax
import jax.numpy as jnp
from jax import lax
from jax.experimental import pallas as pl
from jax.experimental.pallas import tpu as pltpu

_INV_SQRT2 = 0.7071067811865476


def _gelu_exact(x):
    return 0.5 * x * (1.0 + lax.erf(x * _INV_SQRT2))


def _conv3x3_bn_gelu(xpad, w4, scale, bias):
    """xpad: (H+2, W+2, Cin) f32; w4: (3, 3, Cin, Cout) HWIO; scale/bias: (1, Cout)."""
    hp, wp, _ = xpad.shape
    h, w = hp - 2, wp - 2
    cout = w4.shape[-1]
    acc = jnp.zeros((h * w, cout), jnp.float32)
    for dh in range(3):
        for dw in range(3):
            patch = xpad[dh:dh + h, dw:dw + w, :].reshape(h * w, -1)
            acc = acc + jnp.dot(patch, w4[dh, dw],
                                preferred_element_type=jnp.float32)
    y = acc * scale + bias          # conv bias + BatchNorm (eval) folded per channel
    y = _gelu_exact(y)
    return y.reshape(h, w, cout)


def _unet_down_kernel(x_ref,
                      w1a_ref, s1a_ref, b1a_ref,
                      w1b_ref, s1b_ref, b1b_ref,
                      w2a_ref, s2a_ref, b2a_ref,
                      w2b_ref, s2b_ref, b2b_ref,
                      o_ref,
                      pad_ref, pool_ref):
    xpad = x_ref[0]                       # (H+2, W+2, Cin), pre-padded in the wrapper
    hp, wp, _ = xpad.shape
    h, w = hp - 2, wp - 2

    # Zero once per grid step; border stays zero, interior rewritten each layer.
    pad_ref[...] = jnp.zeros_like(pad_ref)

    def layer(prev, w_ref, s_ref, b_ref):
        pad_ref[1:1 + h, 1:1 + w, :] = prev
        return _conv3x3_bn_gelu(pad_ref[...], w_ref[...], s_ref[...], b_ref[...])

    a = _conv3x3_bn_gelu(xpad, w1a_ref[...], s1a_ref[...], b1a_ref[...])
    a = layer(a, w1b_ref, s1b_ref, b1b_ref)
    a = layer(a, w2a_ref, s2a_ref, b2a_ref)
    a = layer(a, w2b_ref, s2b_ref, b2b_ref)           # (H, W, Cout)

    # MaxPool2d(2): pair rows (leading dim), then pair columns (sublane dim).
    rows = [jnp.maximum(a[2 * i], a[2 * i + 1]) for i in range(h // 2)]
    pool_ref[...] = jnp.stack(rows, axis=0)           # (H//2, W, Cout)
    even = pool_ref[:, pl.ds(0, w // 2, stride=2), :]
    odd = pool_ref[:, pl.ds(1, w // 2, stride=2), :]
    o_ref[0] = jnp.maximum(even, odd).astype(o_ref.dtype)


def unet_down(x_nchw, params):
    """x_nchw: (B, Cin, H, W). params: 4 tuples (w_hwio(3,3,cin,cout), scale(1,cout), bias(1,cout)).
    Returns (B, Cout, H//2, W//2) to match the torch module's NCHW output."""
    b, cin, hh, ww = x_nchw.shape
    cout = params[0][0].shape[-1]
    x = jnp.transpose(x_nchw, (0, 2, 3, 1)).astype(jnp.float32)   # NHWC
    xpad = jnp.pad(x, ((0, 0), (1, 1), (1, 1), (0, 0)))           # zero pad for layer 1

    flat_params = []
    in_specs = [pl.BlockSpec((1, hh + 2, ww + 2, cin), lambda i: (i, 0, 0, 0))]
    for (wf, sc, bi) in params:
        flat_params += [wf, sc, bi]
        in_specs.append(pl.BlockSpec(wf.shape, lambda i: (0, 0, 0, 0)))
        in_specs.append(pl.BlockSpec(sc.shape, lambda i: (0, 0)))
        in_specs.append(pl.BlockSpec(bi.shape, lambda i: (0, 0)))

    out = pl.pallas_call(
        _unet_down_kernel,
        out_shape=jax.ShapeDtypeStruct((b, hh // 2, ww // 2, cout), jnp.float32),
        grid=(b,),
        in_specs=in_specs,
        out_specs=pl.BlockSpec((1, hh // 2, ww // 2, cout), lambda i: (i, 0, 0, 0)),
        scratch_shapes=[
            pltpu.VMEM((hh + 2, ww + 2, cout), jnp.float32),      # inter-layer padded act
            pltpu.VMEM((hh // 2, ww, cout), jnp.float32),         # max-pool staging
        ],
        compiler_params=pltpu.CompilerParams(
            dimension_semantics=("parallel",)),
    )(xpad, *flat_params)
    return jnp.transpose(out, (0, 3, 1, 2))


def reference(x_nchw, raw_params, eps=1e-5):
    """Pure-JAX reference: conv3x3(pad=1) -> BN(eval) -> exact GELU, x4, then 2x2 max pool."""
    x = jnp.transpose(x_nchw, (0, 2, 3, 1)).astype(jnp.float32)
    for (w_hwio, cb, gamma, beta, mean, var) in raw_params:
        y = lax.conv_general_dilated(
            x, w_hwio, window_strides=(1, 1), padding="SAME",
            dimension_numbers=("NHWC", "HWIO", "NHWC"),
            precision=lax.Precision.HIGHEST)
        y = y + cb
        y = (y - mean) / jnp.sqrt(var + eps) * gamma + beta
        x = _gelu_exact(y)
    b, hh, ww, c = x.shape
    x = x.reshape(b, hh // 2, 2, ww // 2, 2, c).max(axis=(2, 4))
    return jnp.transpose(x, (0, 3, 1, 2))


if __name__ == "__main__":
    B, C_IN, C_OUT, H, W = 2, 4, 8, 16, 16
    EPS = 1e-5

    key = jax.random.PRNGKey(0)
    key, kx = jax.random.split(key)
    x = jax.random.normal(kx, (B, C_IN, H, W), dtype=jnp.float32)

    layer_channels = [(C_IN, C_OUT), (C_OUT, C_OUT), (C_OUT, C_OUT), (C_OUT, C_OUT)]
    raw_params, kernel_params = [], []
    for (cin, cout) in layer_channels:
        key, kw, kb, kg, kbe, km, kv = jax.random.split(key, 7)
        bound = 1.0 / (cin * 9) ** 0.5
        w_hwio = jax.random.uniform(kw, (3, 3, cin, cout), jnp.float32, -bound, bound)
        conv_b = jax.random.uniform(kb, (cout,), jnp.float32, -bound, bound)
        gamma = jax.random.uniform(kg, (cout,), jnp.float32, 0.5, 1.5)
        beta = jax.random.uniform(kbe, (cout,), jnp.float32, -0.1, 0.1)
        mean = jax.random.uniform(km, (cout,), jnp.float32, -0.1, 0.1)
        var = jax.random.uniform(kv, (cout,), jnp.float32, 0.5, 1.5)
        raw_params.append((w_hwio, conv_b, gamma, beta, mean, var))

        scale = gamma / jnp.sqrt(var + EPS)                 # fold BN (eval) into scale/bias
        bias = (conv_b - mean) * scale + beta
        kernel_params.append((w_hwio, scale.reshape(1, cout), bias.reshape(1, cout)))

    out = unet_down(x, kernel_params)
    out = jax.block_until_ready(out)

    ref = reference(x, raw_params, eps=EPS)
    assert out.shape == (B, C_OUT, H // 2, W // 2), out.shape
    err = float(jnp.max(jnp.abs(out - ref)))
    assert jnp.allclose(out, ref, atol=1e-4, rtol=1e-4), f"mismatch vs reference, max err {err}"

    print("KERNEL_OK")
</pallas_src>

<mosaic_0001>
module attributes {stable_mosaic.version = 11 : i64} {
  func.func @_unet_down_kernel(%arg0: i32, %arg1: memref<1x18x18x4xf32, #tpu.memory_space<vmem>>, %arg2: memref<3x3x4x8xf32, #tpu.memory_space<vmem>>, %arg3: memref<1x8xf32, #tpu.memory_space<vmem>>, %arg4: memref<1x8xf32, #tpu.memory_space<vmem>>, %arg5: memref<3x3x8x8xf32, #tpu.memory_space<vmem>>, %arg6: memref<1x8xf32, #tpu.memory_space<vmem>>, %arg7: memref<1x8xf32, #tpu.memory_space<vmem>>, %arg8: memref<3x3x8x8xf32, #tpu.memory_space<vmem>>, %arg9: memref<1x8xf32, #tpu.memory_space<vmem>>, %arg10: memref<1x8xf32, #tpu.memory_space<vmem>>, %arg11: memref<3x3x8x8xf32, #tpu.memory_space<vmem>>, %arg12: memref<1x8xf32, #tpu.memory_space<vmem>>, %arg13: memref<1x8xf32, #tpu.memory_space<vmem>>, %arg14: memref<1x8x8x8xf32, #tpu.memory_space<vmem>>, %arg15: memref<18x18x8xf32, #tpu.memory_space<vmem>>, %arg16: memref<8x16x8xf32, #tpu.memory_space<vmem>>) attributes {dimension_semantics = [#tpu.dimension_semantics<parallel>], iteration_bounds = array<i64: 2>, scalar_prefetch = 0 : i64, scratch_operands = 2 : i64, tpu.core_type = #tpu.core_type<tc>, window_params = [{transform_indices = @transform_0, window_bounds = array<i64: 1, 18, 18, 4>}, {pipeline_mode = #tpu.pipeline_mode<synchronous>, transform_indices = @transform_1, window_bounds = array<i64: 3, 3, 4, 8>}, {pipeline_mode = #tpu.pipeline_mode<synchronous>, transform_indices = @transform_2, window_bounds = array<i64: 1, 8>}, {pipeline_mode = #tpu.pipeline_mode<synchronous>, transform_indices = @transform_3, window_bounds = array<i64: 1, 8>}, {pipeline_mode = #tpu.pipeline_mode<synchronous>, transform_indices = @transform_4, window_bounds = array<i64: 3, 3, 8, 8>}, {pipeline_mode = #tpu.pipeline_mode<synchronous>, transform_indices = @transform_5, window_bounds = array<i64: 1, 8>}, {pipeline_mode = #tpu.pipeline_mode<synchronous>, transform_indices = @transform_6, window_bounds = array<i64: 1, 8>}, {pipeline_mode = #tpu.pipeline_mode<synchronous>, transform_indices = @transform_7, window_bounds = array<i64: 3, 3, 8, 8>}, {pipeline_mode = #tpu.pipeline_mode<synchronous>, transform_indices = @transform_8, window_bounds = array<i64: 1, 8>}, {pipeline_mode = #tpu.pipeline_mode<synchronous>, transform_indices = @transform_9, window_bounds = array<i64: 1, 8>}, {pipeline_mode = #tpu.pipeline_mode<synchronous>, transform_indices = @transform_10, window_bounds = array<i64: 3, 3, 8, 8>}, {pipeline_mode = #tpu.pipeline_mode<synchronous>, transform_indices = @transform_11, window_bounds = array<i64: 1, 8>}, {pipeline_mode = #tpu.pipeline_mode<synchronous>, transform_indices = @transform_12, window_bounds = array<i64: 1, 8>}, {transform_indices = @transform_13, window_bounds = array<i64: 1, 8, 8, 8>}]} {
    %c0 = arith.constant 0 : index
    %c0_0 = arith.constant 0 : index
    %c0_1 = arith.constant 0 : index
    %c0_2 = arith.constant 0 : index
    %0 = vector.load %arg1[%c0, %c0_0, %c0_1, %c0_2] : memref<1x18x18x4xf32, #tpu.memory_space<vmem>>, vector<1x18x18x4xf32>
    %1 = vector.shape_cast %0 : vector<1x18x18x4xf32> to vector<18x18x4xf32>
    %cst = arith.constant 0.000000e+00 : f32
    %2 = vector.broadcast %cst : f32 to vector<18x18x8xf32>
    %c0_3 = arith.constant 0 : index
    %c0_4 = arith.constant 0 : index
    %c0_5 = arith.constant 0 : index
    %3 = vector.load %arg15[%c0_3, %c0_4, %c0_5] : memref<18x18x8xf32, #tpu.memory_space<vmem>>, vector<18x18x8xf32>
    tpu.vector_store %arg15[%c0_3, %c0_4, %c0_5], %2 {strides = array<i32>} : memref<18x18x8xf32, #tpu.memory_space<vmem>>, vector<18x18x8xf32>,
    %c0_6 = arith.constant 0 : index
    %c0_7 = arith.constant 0 : index
    %c0_8 = arith.constant 0 : index
    %c0_9 = arith.constant 0 : index
    %4 = vector.load %arg2[%c0_6, %c0_7, %c0_8, %c0_9] : memref<3x3x4x8xf32, #tpu.memory_space<vmem>>, vector<3x3x4x8xf32>
    %c0_10 = arith.constant 0 : index
    %c0_11 = arith.constant 0 : index
    %5 = vector.load %arg3[%c0_10, %c0_11] : memref<1x8xf32, #tpu.memory_space<vmem>>, vector<1x8xf32>
    %c0_12 = arith.constant 0 : index
    %c0_13 = arith.constant 0 : index
    %6 = vector.load %arg4[%c0_12, %c0_13] : memref<1x8xf32, #tpu.memory_space<vmem>>, vector<1x8xf32>
    %cst_14 = arith.constant 0.000000e+00 : f32
    %7 = vector.broadcast %cst_14 : f32 to vector<256x8xf32>
    %8 = vector.extract_strided_slice %1 {offsets = [0, 0, 0], sizes = [16, 16, 4], strides = [1, 1, 1]} : vector<18x18x4xf32> to vector<16x16x4xf32>
    %9 = vector.shape_cast %8 : vector<16x16x4xf32> to vector<256x4xf32>
    %10 = vector.extract_strided_slice %4 {offsets = [0, 0, 0, 0], sizes = [1, 1, 4, 8], strides = [1, 1, 1, 1]} : vector<3x3x4x8xf32> to vector<1x1x4x8xf32>
    %11 = vector.shape_cast %10 : vector<1x1x4x8xf32> to vector<4x8xf32>
    %cst_15 = arith.constant dense<0.000000e+00> : vector<256x8xf32>
    %12 = tpu.matmul %9, %11, %cst_15 {dimension_numbers = #tpu.dot_dimension_numbers<[1], [0], [0], [1], [0, 0, 1, 1], [], []>} : vector<256x4xf32>, vector<4x8xf32>, vector<256x8xf32> -> vector<256x8xf32>
    %13 = arith.addf %7, %12 : vector<256x8xf32>
    %14 = vector.extract_strided_slice %1 {offsets = [0, 1, 0], sizes = [16, 16, 4], strides = [1, 1, 1]} : vector<18x18x4xf32> to vector<16x16x4xf32>
    %15 = vector.shape_cast %14 : vector<16x16x4xf32> to vector<256x4xf32>
    %16 = vector.extract_strided_slice %4 {offsets = [0, 1, 0, 0], sizes = [1, 1, 4, 8], strides = [1, 1, 1, 1]} : vector<3x3x4x8xf32> to vector<1x1x4x8xf32>
    %17 = vector.shape_cast %16 : vector<1x1x4x8xf32> to vector<4x8xf32>
    %cst_16 = arith.constant dense<0.000000e+00> : vector<256x8xf32>
    %18 = tpu.matmul %15, %17, %cst_16 {dimension_numbers = #tpu.dot_dimension_numbers<[1], [0], [0], [1], [0, 0, 1, 1], [], []>} : vector<256x4xf32>, vector<4x8xf32>, vector<256x8xf32> -> vector<256x8xf32>
    %19 = arith.addf %13, %18 : vector<256x8xf32>
    %20 = vector.extract_strided_slice %1 {offsets = [0, 2, 0], sizes = [16, 16, 4], strides = [1, 1, 1]} : vector<18x18x4xf32> to vector<16x16x4xf32>
    %21 = vector.shape_cast %20 : vector<16x16x4xf32> to vector<256x4xf32>
    %22 = vector.extract_strided_slice %4 {offsets = [0, 2, 0, 0], sizes = [1, 1, 4, 8], strides = [1, 1, 1, 1]} : vector<3x3x4x8xf32> to vector<1x1x4x8xf32>
    %23 = vector.shape_cast %22 : vector<1x1x4x8xf32> to vector<4x8xf32>
    %cst_17 = arith.constant dense<0.000000e+00> : vector<256x8xf32>
    %24 = tpu.matmul %21, %23, %cst_17 {dimension_numbers = #tpu.dot_dimension_numbers<[1], [0], [0], [1], [0, 0, 1, 1], [], []>} : vector<256x4xf32>, vector<4x8xf32>, vector<256x8xf32> -> vector<256x8xf32>
    %25 = arith.addf %19, %24 : vector<256x8xf32>
    %26 = vector.extract_strided_slice %1 {offsets = [1, 0, 0], sizes = [16, 16, 4], strides = [1, 1, 1]} : vector<18x18x4xf32> to vector<16x16x4xf32>
    %27 = vector.shape_cast %26 : vector<16x16x4xf32> to vector<256x4xf32>
    %28 = vector.extract_strided_slice %4 {offsets = [1, 0, 0, 0], sizes = [1, 1, 4, 8], strides = [1, 1, 1, 1]} : vector<3x3x4x8xf32> to vector<1x1x4x8xf32>
    %29 = vector.shape_cast %28 : vector<1x1x4x8xf32> to vector<4x8xf32>
    %cst_18 = arith.constant dense<0.000000e+00> : vector<256x8xf32>
    %30 = tpu.matmul %27, %29, %cst_18 {dimension_numbers = #tpu.dot_dimension_numbers<[1], [0], [0], [1], [0, 0, 1, 1], [], []>} : vector<256x4xf32>, vector<4x8xf32>, vector<256x8xf32> -> vector<256x8xf32>
    %31 = arith.addf %25, %30 : vector<256x8xf32>
    %32 = vector.extract_strided_slice %1 {offsets = [1, 1, 0], sizes = [16, 16, 4], strides = [1, 1, 1]} : vector<18x18x4xf32> to vector<16x16x4xf32>
    %33 = vector.shape_cast %32 : vector<16x16x4xf32> to vector<256x4xf32>
    %34 = vector.extract_strided_slice %4 {offsets = [1, 1, 0, 0], sizes = [1, 1, 4, 8], strides = [1, 1, 1, 1]} : vector<3x3x4x8xf32> to vector<1x1x4x8xf32>
    %35 = vector.shape_cast %34 : vector<1x1x4x8xf32> to vector<4x8xf32>
    %cst_19 = arith.constant dense<0.000000e+00> : vector<256x8xf32>
    %36 = tpu.matmul %33, %35, %cst_19 {dimension_numbers = #tpu.dot_dimension_numbers<[1], [0], [0], [1], [0, 0, 1, 1], [], []>} : vector<256x4xf32>, vector<4x8xf32>, vector<256x8xf32> -> vector<256x8xf32>
    %37 = arith.addf %31, %36 : vector<256x8xf32>
    %38 = vector.extract_strided_slice %1 {offsets = [1, 2, 0], sizes = [16, 16, 4], strides = [1, 1, 1]} : vector<18x18x4xf32> to vector<16x16x4xf32>
    %39 = vector.shape_cast %38 : vector<16x16x4xf32> to vector<256x4xf32>
    %40 = vector.extract_strided_slice %4 {offsets = [1, 2, 0, 0], sizes = [1, 1, 4, 8], strides = [1, 1, 1, 1]} : vector<3x3x4x8xf32> to vector<1x1x4x8xf32>
    %41 = vector.shape_cast %40 : vector<1x1x4x8xf32> to vector<4x8xf32>
    %cst_20 = arith.constant dense<0.000000e+00> : vector<256x8xf32>
    %42 = tpu.matmul %39, %41, %cst_20 {dimension_numbers = #tpu.dot_dimension_numbers<[1], [0], [0], [1], [0, 0, 1, 1], [], []>} : vector<256x4xf32>, vector<4x8xf32>, vector<256x8xf32> -> vector<256x8xf32>
    %43 = arith.addf %37, %42 : vector<256x8xf32>
    %44 = vector.extract_strided_slice %1 {offsets = [2, 0, 0], sizes = [16, 16, 4], strides = [1, 1, 1]} : vector<18x18x4xf32> to vector<16x16x4xf32>
    %45 = vector.shape_cast %44 : vector<16x16x4xf32> to vector<256x4xf32>
    %46 = vector.extract_strided_slice %4 {offsets = [2, 0, 0, 0], sizes = [1, 1, 4, 8], strides = [1, 1, 1, 1]} : vector<3x3x4x8xf32> to vector<1x1x4x8xf32>
    %47 = vector.shape_cast %46 : vector<1x1x4x8xf32> to vector<4x8xf32>
    %cst_21 = arith.constant dense<0.000000e+00> : vector<256x8xf32>
    %48 = tpu.matmul %45, %47, %cst_21 {dimension_numbers = #tpu.dot_dimension_numbers<[1], [0], [0], [1], [0, 0, 1, 1], [], []>} : vector<256x4xf32>, vector<4x8xf32>, vector<256x8xf32> -> vector<256x8xf32>
    %49 = arith.addf %43, %48 : vector<256x8xf32>
    %50 = vector.extract_strided_slice %1 {offsets = [2, 1, 0], sizes = [16, 16, 4], strides = [1, 1, 1]} : vector<18x18x4xf32> to vector<16x16x4xf32>
    %51 = vector.shape_cast %50 : vector<16x16x4xf32> to vector<256x4xf32>
    %52 = vector.extract_strided_slice %4 {offsets = [2, 1, 0, 0], sizes = [1, 1, 4, 8], strides = [1, 1, 1, 1]} : vector<3x3x4x8xf32> to vector<1x1x4x8xf32>
    %53 = vector.shape_cast %52 : vector<1x1x4x8xf32> to vector<4x8xf32>
    %cst_22 = arith.constant dense<0.000000e+00> : vector<256x8xf32>
    %54 = tpu.matmul %51, %53, %cst_22 {dimension_numbers = #tpu.dot_dimension_numbers<[1], [0], [0], [1], [0, 0, 1, 1], [], []>} : vector<256x4xf32>, vector<4x8xf32>, vector<256x8xf32> -> vector<256x8xf32>
    %55 = arith.addf %49, %54 : vector<256x8xf32>
    %56 = vector.extract_strided_slice %1 {offsets = [2, 2, 0], sizes = [16, 16, 4], strides = [1, 1, 1]} : vector<18x18x4xf32> to vector<16x16x4xf32>
    %57 = vector.shape_cast %56 : vector<16x16x4xf32> to vector<256x4xf32>
    %58 = vector.extract_strided_slice %4 {offsets = [2, 2, 0, 0], sizes = [1, 1, 4, 8], strides = [1, 1, 1, 1]} : vector<3x3x4x8xf32> to vector<1x1x4x8xf32>
    %59 = vector.shape_cast %58 : vector<1x1x4x8xf32> to vector<4x8xf32>
    %cst_23 = arith.constant dense<0.000000e+00> : vector<256x8xf32>
    %60 = tpu.matmul %57, %59, %cst_23 {dimension_numbers = #tpu.dot_dimension_numbers<[1], [0], [0], [1], [0, 0, 1, 1], [], []>} : vector<256x4xf32>, vector<4x8xf32>, vector<256x8xf32> -> vector<256x8xf32>
    %61 = arith.addf %55, %60 : vector<256x8xf32>
    %62 = vector.broadcast %5 : vector<1x8xf32> to vector<256x8xf32>
    %63 = arith.mulf %61, %62 : vector<256x8xf32>
    %64 = vector.broadcast %6 : vector<1x8xf32> to vector<256x8xf32>
    %65 = arith.addf %63, %64 : vector<256x8xf32>
    %cst_24 = arith.constant 5.000000e-01 : f32
    %66 = vector.broadcast %cst_24 : f32 to vector<256x8xf32>
    %67 = arith.mulf %66, %65 : vector<256x8xf32>
    %cst_25 = arith.constant 0.707106769 : f32
    %68 = vector.broadcast %cst_25 : f32 to vector<256x8xf32>
    %69 = arith.mulf %65, %68 : vector<256x8xf32>
    %70 = math.erf %69 : vector<256x8xf32>
    %cst_26 = arith.constant 1.000000e+00 : f32
    %71 = vector.broadcast %cst_26 : f32 to vector<256x8xf32>
    %72 = arith.addf %71, %70 : vector<256x8xf32>
    %73 = arith.mulf %67, %72 : vector<256x8xf32>
    %74 = vector.shape_cast %73 : vector<256x8xf32> to vector<16x16x8xf32>
    %c1 = arith.constant 1 : index
    %c1_27 = arith.constant 1 : index
    %c0_28 = arith.constant 0 : index
    %75 = vector.load %arg15[%c1, %c1_27, %c0_28] : memref<18x18x8xf32, #tpu.memory_space<vmem>>, vector<16x16x8xf32>
    tpu.vector_store %arg15[%c1, %c1_27, %c0_28], %74 {strides = array<i32>} : memref<18x18x8xf32, #tpu.memory_space<vmem>>, vector<16x16x8xf32>,
    %c0_29 = arith.constant 0 : index
    %c0_30 = arith.constant 0 : index
    %c0_31 = arith.constant 0 : index
    %76 = vector.load %arg15[%c0_29, %c0_30, %c0_31] : memref<18x18x8xf32, #tpu.memory_space<vmem>>, vector<18x18x8xf32>
    %c0_32 = arith.constant 0 : index
    %c0_33 = arith.constant 0 : index
    %c0_34 = arith.constant 0 : index
    %c0_35 = arith.constant 0 : index
    %77 = vector.load %arg5[%c0_32, %c0_33, %c0_34, %c0_35] : memref<3x3x8x8xf32, #tpu.memory_space<vmem>>, vector<3x3x8x8xf32>
    %c0_36 = arith.constant 0 : index
    %c0_37 = arith.constant 0 : index
    %78 = vector.load %arg6[%c0_36, %c0_37] : memref<1x8xf32, #tpu.memory_space<vmem>>, vector<1x8xf32>
    %c0_38 = arith.constant 0 : index
    %c0_39 = arith.constant 0 : index
    %79 = vector.load %arg7[%c0_38, %c0_39] : memref<1x8xf32, #tpu.memory_space<vmem>>, vector<1x8xf32>
    %cst_40 = arith.constant 0.000000e+00 : f32
    %80 = vector.broadcast %cst_40 : f32 to vector<256x8xf32>
    %81 = vector.extract_strided_slice %76 {offsets = [0, 0, 0], sizes = [16, 16, 8], strides = [1, 1, 1]} : vector<18x18x8xf32> to vector<16x16x8xf32>
    %82 = vector.shape_cast %81 : vector<16x16x8xf32> to vector<256x8xf32>
    %83 = vector.extract_strided_slice %77 {offsets = [0, 0, 0, 0], sizes = [1, 1, 8, 8], strides = [1, 1, 1, 1]} : vector<3x3x8x8xf32> to vector<1x1x8x8xf32>
    %84 = vector.shape_cast %83 : vector<1x1x8x8xf32> to vector<8x8xf32>
    %cst_41 = arith.constant dense<0.000000e+00> : vector<256x8xf32>
    %85 = tpu.matmul %82, %84, %cst_41 {dimension_numbers = #tpu.dot_dimension_numbers<[1], [0], [0], [1], [0, 0, 1, 1], [], []>} : vector<256x8xf32>, vector<8x8xf32>, vector<256x8xf32> -> vector<256x8xf32>
    %86 = arith.addf %80, %85 : vector<256x8xf32>
    %87 = vector.extract_strided_slice %76 {offsets = [0, 1, 0], sizes = [16, 16, 8], strides = [1, 1, 1]} : vector<18x18x8xf32> to vector<16x16x8xf32>
    %88 = vector.shape_cast %87 : vector<16x16x8xf32> to vector<256x8xf32>
    %89 = vector.extract_strided_slice %77 {offsets = [0, 1, 0, 0], sizes = [1, 1, 8, 8], strides = [1, 1, 1, 1]} : vector<3x3x8x8xf32> to vector<1x1x8x8xf32>
    %90 = vector.shape_cast %89 : vector<1x1x8x8xf32> to vector<8x8xf32>
    %cst_42 = arith.constant dense<0.000000e+00> : vector<256x8xf32>
    %91 = tpu.matmul %88, %90, %cst_42 {dimension_numbers = #tpu.dot_dimension_numbers<[1], [0], [0], [1], [0, 0, 1, 1], [], []>} : vector<256x8xf32>, vector<8x8xf32>, vector<256x8xf32> -> vector<256x8xf32>
    %92 = arith.addf %86, %91 : vector<256x8xf32>
    %93 = vector.extract_strided_slice %76 {offsets = [0, 2, 0], sizes = [16, 16, 8], strides = [1, 1, 1]} : vector<18x18x8xf32> to vector<16x16x8xf32>
    %94 = vector.shape_cast %93 : vector<16x16x8xf32> to vector<256x8xf32>
    %95 = vector.extract_strided_slice %77 {offsets = [0, 2, 0, 0], sizes = [1, 1, 8, 8], strides = [1, 1, 1, 1]} : vector<3x3x8x8xf32> to vector<1x1x8x8xf32>
    %96 = vector.shape_cast %95 : vector<1x1x8x8xf32> to vector<8x8xf32>
    %cst_43 = arith.constant dense<0.000000e+00> : vector<256x8xf32>
    %97 = tpu.matmul %94, %96, %cst_43 {dimension_numbers = #tpu.dot_dimension_numbers<[1], [0], [0], [1], [0, 0, 1, 1], [], []>} : vector<256x8xf32>, vector<8x8xf32>, vector<256x8xf32> -> vector<256x8xf32>
    %98 = arith.addf %92, %97 : vector<256x8xf32>
    %99 = vector.extract_strided_slice %76 {offsets = [1, 0, 0], sizes = [16, 16, 8], strides = [1, 1, 1]} : vector<18x18x8xf32> to vector<16x16x8xf32>
    %100 = vector.shape_cast %99 : vector<16x16x8xf32> to vector<256x8xf32>
    %101 = vector.extract_strided_slice %77 {offsets = [1, 0, 0, 0], sizes = [1, 1, 8, 8], strides = [1, 1, 1, 1]} : vector<3x3x8x8xf32> to vector<1x1x8x8xf32>
    %102 = vector.shape_cast %101 : vector<1x1x8x8xf32> to vector<8x8xf32>
    %cst_44 = arith.constant dense<0.000000e+00> : vector<256x8xf32>
    %103 = tpu.matmul %100, %102, %cst_44 {dimension_numbers = #tpu.dot_dimension_numbers<[1], [0], [0], [1], [0, 0, 1, 1], [], []>} : vector<256x8xf32>, vector<8x8xf32>, vector<256x8xf32> -> vector<256x8xf32>
    %104 = arith.addf %98, %103 : vector<256x8xf32>
    %105 = vector.extract_strided_slice %76 {offsets = [1, 1, 0], sizes = [16, 16, 8], strides = [1, 1, 1]} : vector<18x18x8xf32> to vector<16x16x8xf32>
    %106 = vector.shape_cast %105 : vector<16x16x8xf32> to vector<256x8xf32>
    %107 = vector.extract_strided_slice %77 {offsets = [1, 1, 0, 0], sizes = [1, 1, 8, 8], strides = [1, 1, 1, 1]} : vector<3x3x8x8xf32> to vector<1x1x8x8xf32>
    %108 = vector.shape_cast %107 : vector<1x1x8x8xf32> to vector<8x8xf32>
    %cst_45 = arith.constant dense<0.000000e+00> : vector<256x8xf32>
    %109 = tpu.matmul %106, %108, %cst_45 {dimension_numbers = #tpu.dot_dimension_numbers<[1], [0], [0], [1], [0, 0, 1, 1], [], []>} : vector<256x8xf32>, vector<8x8xf32>, vector<256x8xf32> -> vector<256x8xf32>
    %110 = arith.addf %104, %109 : vector<256x8xf32>
    %111 = vector.extract_strided_slice %76 {offsets = [1, 2, 0], sizes = [16, 16, 8], strides = [1, 1, 1]} : vector<18x18x8xf32> to vector<16x16x8xf32>
    %112 = vector.shape_cast %111 : vector<16x16x8xf32> to vector<256x8xf32>
    %113 = vector.extract_strided_slice %77 {offsets = [1, 2, 0, 0], sizes = [1, 1, 8, 8], strides = [1, 1, 1, 1]} : vector<3x3x8x8xf32> to vector<1x1x8x8xf32>
    %114 = vector.shape_cast %113 : vector<1x1x8x8xf32> to vector<8x8xf32>
    %cst_46 = arith.constant dense<0.000000e+00> : vector<256x8xf32>
    %115 = tpu.matmul %112, %114, %cst_46 {dimension_numbers = #tpu.dot_dimension_numbers<[1], [0], [0], [1], [0, 0, 1, 1], [], []>} : vector<256x8xf32>, vector<8x8xf32>, vector<256x8xf32> -> vector<256x8xf32>
    %116 = arith.addf %110, %115 : vector<256x8xf32>
    %117 = vector.extract_strided_slice %76 {offsets = [2, 0, 0], sizes = [16, 16, 8], strides = [1, 1, 1]} : vector<18x18x8xf32> to vector<16x16x8xf32>
    %118 = vector.shape_cast %117 : vector<16x16x8xf32> to vector<256x8xf32>
    %119 = vector.extract_strided_slice %77 {offsets = [2, 0, 0, 0], sizes = [1, 1, 8, 8], strides = [1, 1, 1, 1]} : vector<3x3x8x8xf32> to vector<1x1x8x8xf32>
    %120 = vector.shape_cast %119 : vector<1x1x8x8xf32> to vector<8x8xf32>
    %cst_47 = arith.constant dense<0.000000e+00> : vector<256x8xf32>
    %121 = tpu.matmul %118, %120, %cst_47 {dimension_numbers = #tpu.dot_dimension_numbers<[1], [0], [0], [1], [0, 0, 1, 1], [], []>} : vector<256x8xf32>, vector<8x8xf32>, vector<256x8xf32> -> vector<256x8xf32>
    %122 = arith.addf %116, %121 : vector<256x8xf32>
    %123 = vector.extract_strided_slice %76 {offsets = [2, 1, 0], sizes = [16, 16, 8], strides = [1, 1, 1]} : vector<18x18x8xf32> to vector<16x16x8xf32>
    %124 = vector.shape_cast %123 : vector<16x16x8xf32> to vector<256x8xf32>
    %125 = vector.extract_strided_slice %77 {offsets = [2, 1, 0, 0], sizes = [1, 1, 8, 8], strides = [1, 1, 1, 1]} : vector<3x3x8x8xf32> to vector<1x1x8x8xf32>
    %126 = vector.shape_cast %125 : vector<1x1x8x8xf32> to vector<8x8xf32>
    %cst_48 = arith.constant dense<0.000000e+00> : vector<256x8xf32>
    %127 = tpu.matmul %124, %126, %cst_48 {dimension_numbers = #tpu.dot_dimension_numbers<[1], [0], [0], [1], [0, 0, 1, 1], [], []>} : vector<256x8xf32>, vector<8x8xf32>, vector<256x8xf32> -> vector<256x8xf32>
    %128 = arith.addf %122, %127 : vector<256x8xf32>
    %129 = vector.extract_strided_slice %76 {offsets = [2, 2, 0], sizes = [16, 16, 8], strides = [1, 1, 1]} : vector<18x18x8xf32> to vector<16x16x8xf32>
    %130 = vector.shape_cast %129 : vector<16x16x8xf32> to vector<256x8xf32>
    %131 = vector.extract_strided_slice %77 {offsets = [2, 2, 0, 0], sizes = [1, 1, 8, 8], strides = [1, 1, 1, 1]} : vector<3x3x8x8xf32> to vector<1x1x8x8xf32>
    %132 = vector.shape_cast %131 : vector<1x1x8x8xf32> to vector<8x8xf32>
    %cst_49 = arith.constant dense<0.000000e+00> : vector<256x8xf32>
    %133 = tpu.matmul %130, %132, %cst_49 {dimension_numbers = #tpu.dot_dimension_numbers<[1], [0], [0], [1], [0, 0, 1, 1], [], []>} : vector<256x8xf32>, vector<8x8xf32>, vector<256x8xf32> -> vector<256x8xf32>
    %134 = arith.addf %128, %133 : vector<256x8xf32>
    %135 = vector.broadcast %78 : vector<1x8xf32> to vector<256x8xf32>
    %136 = arith.mulf %134, %135 : vector<256x8xf32>
    %137 = vector.broadcast %79 : vector<1x8xf32> to vector<256x8xf32>
    %138 = arith.addf %136, %137 : vector<256x8xf32>
    %cst_50 = arith.constant 5.000000e-01 : f32
    %139 = vector.broadcast %cst_50 : f32 to vector<256x8xf32>
    %140 = arith.mulf %139, %138 : vector<256x8xf32>
    %cst_51 = arith.constant 0.707106769 : f32
    %141 = vector.broadcast %cst_51 : f32 to vector<256x8xf32>
    %142 = arith.mulf %138, %141 : vector<256x8xf32>
    %143 = math.erf %142 : vector<256x8xf32>
    %cst_52 = arith.constant 1.000000e+00 : f32
    %144 = vector.broadcast %cst_52 : f32 to vector<256x8xf32>
    %145 = arith.addf %144, %143 : vector<256x8xf32>
    %146 = arith.mulf %140, %145 : vector<256x8xf32>
    %147 = vector.shape_cast %146 : vector<256x8xf32> to vector<16x16x8xf32>
    %c1_53 = arith.constant 1 : index
    %c1_54 = arith.constant 1 : index
    %c0_55 = arith.constant 0 : index
    %148 = vector.load %arg15[%c1_53, %c1_54, %c0_55] : memref<18x18x8xf32, #tpu.memory_space<vmem>>, vector<16x16x8xf32>
    tpu.vector_store %arg15[%c1_53, %c1_54, %c0_55], %147 {strides = array<i32>} : memref<18x18x8xf32, #tpu.memory_space<vmem>>, vector<16x16x8xf32>,
    %c0_56 = arith.constant 0 : index
    %c0_57 = arith.constant 0 : index
    %c0_58 = arith.constant 0 : index
    %149 = vector.load %arg15[%c0_56, %c0_57, %c0_58] : memref<18x18x8xf32, #tpu.memory_space<vmem>>, vector<18x18x8xf32>
    %c0_59 = arith.constant 0 : index
    %c0_60 = arith.constant 0 : index
    %c0_61 = arith.constant 0 : index
    %c0_62 = arith.constant 0 : index
    %150 = vector.load %arg8[%c0_59, %c0_60, %c0_61, %c0_62] : memref<3x3x8x8xf32, #tpu.memory_space<vmem>>, vector<3x3x8x8xf32>
    %c0_63 = arith.constant 0 : index
    %c0_64 = arith.constant 0 : index
    %151 = vector.load %arg9[%c0_63, %c0_64] : memref<1x8xf32, #tpu.memory_space<vmem>>, vector<1x8xf32>
    %c0_65 = arith.constant 0 : index
    %c0_66 = arith.constant 0 : index
    %152 = vector.load %arg10[%c0_65, %c0_66] : memref<1x8xf32, #tpu.memory_space<vmem>>, vector<1x8xf32>
    %cst_67 = arith.constant 0.000000e+00 : f32
    %153 = vector.broadcast %cst_67 : f32 to vector<256x8xf32>
    %154 = vector.extract_strided_slice %149 {offsets = [0, 0, 0], sizes = [16, 16, 8], strides = [1, 1, 1]} : vector<18x18x8xf32> to vector<16x16x8xf32>
    %155 = vector.shape_cast %154 : vector<16x16x8xf32> to vector<256x8xf32>
    %156 = vector.extract_strided_slice %150 {offsets = [0, 0, 0, 0], sizes = [1, 1, 8, 8], strides = [1, 1, 1, 1]} : vector<3x3x8x8xf32> to vector<1x1x8x8xf32>
    %157 = vector.shape_cast %156 : vector<1x1x8x8xf32> to vector<8x8xf32>
    %cst_68 = arith.constant dense<0.000000e+00> : vector<256x8xf32>
    %158 = tpu.matmul %155, %157, %cst_68 {dimension_numbers = #tpu.dot_dimension_numbers<[1], [0], [0], [1], [0, 0, 1, 1], [], []>} : vector<256x8xf32>, vector<8x8xf32>, vector<256x8xf32> -> vector<256x8xf32>
    %159 = arith.addf %153, %158 : vector<256x8xf32>
    %160 = vector.extract_strided_slice %149 {offsets = [0, 1, 0], sizes = [16, 16, 8], strides = [1, 1, 1]} : vector<18x18x8xf32> to vector<16x16x8xf32>
    %161 = vector.shape_cast %160 : vector<16x16x8xf32> to vector<256x8xf32>
    %162 = vector.extract_strided_slice %150 {offsets = [0, 1, 0, 0], sizes = [1, 1, 8, 8], strides = [1, 1, 1, 1]} : vector<3x3x8x8xf32> to vector<1x1x8x8xf32>
    %163 = vector.shape_cast %162 : vector<1x1x8x8xf32> to vector<8x8xf32>
    %cst_69 = arith.constant dense<0.000000e+00> : vector<256x8xf32>
    %164 = tpu.matmul %161, %163, %cst_69 {dimension_numbers = #tpu.dot_dimension_numbers<[1], [0], [0], [1], [0, 0, 1, 1], [], []>} : vector<256x8xf32>, vector<8x8xf32>, vector<256x8xf32> -> vector<256x8xf32>
    %165 = arith.addf %159, %164 : vector<256x8xf32>
    %166 = vector.extract_strided_slice %149 {offsets = [0, 2, 0], sizes = [16, 16, 8], strides = [1, 1, 1]} : vector<18x18x8xf32> to vector<16x16x8xf32>
    %167 = vector.shape_cast %166 : vector<16x16x8xf32> to vector<256x8xf32>
    %168 = vector.extract_strided_slice %150 {offsets = [0, 2, 0, 0], sizes = [1, 1, 8, 8], strides = [1, 1, 1, 1]} : vector<3x3x8x8xf32> to vector<1x1x8x8xf32>
    %169 = vector.shape_cast %168 : vector<1x1x8x8xf32> to vector<8x8xf32>
    %cst_70 = arith.constant dense<0.000000e+00> : vector<256x8xf32>
    %170 = tpu.matmul %167, %169, %cst_70 {dimension_numbers = #tpu.dot_dimension_numbers<[1], [0], [0], [1], [0, 0, 1, 1], [], []>} : vector<256x8xf32>, vector<8x8xf32>, vector<256x8xf32> -> vector<256x8xf32>
    %171 = arith.addf %165, %170 : vector<256x8xf32>
    %172 = vector.extract_strided_slice %149 {offsets = [1, 0, 0], sizes = [16, 16, 8], strides = [1, 1, 1]} : vector<18x18x8xf32> to vector<16x16x8xf32>
    %173 = vector.shape_cast %172 : vector<16x16x8xf32> to vector<256x8xf32>
    %174 = vector.extract_strided_slice %150 {offsets = [1, 0, 0, 0], sizes = [1, 1, 8, 8], strides = [1, 1, 1, 1]} : vector<3x3x8x8xf32> to vector<1x1x8x8xf32>
    %175 = vector.shape_cast %174 : vector<1x1x8x8xf32> to vector<8x8xf32>
    %cst_71 = arith.constant dense<0.000000e+00> : vector<256x8xf32>
    %176 = tpu.matmul %173, %175, %cst_71 {dimension_numbers = #tpu.dot_dimension_numbers<[1], [0], [0], [1], [0, 0, 1, 1], [], []>} : vector<256x8xf32>, vector<8x8xf32>, vector<256x8xf32> -> vector<256x8xf32>
    %177 = arith.addf %171, %176 : vector<256x8xf32>
    %178 = vector.extract_strided_slice %149 {offsets = [1, 1, 0], sizes = [16, 16, 8], strides = [1, 1, 1]} : vector<18x18x8xf32> to vector<16x16x8xf32>
    %179 = vector.shape_cast %178 : vector<16x16x8xf32> to vector<256x8xf32>
    %180 = vector.extract_strided_slice %150 {offsets = [1, 1, 0, 0], sizes = [1, 1, 8, 8], strides = [1, 1, 1, 1]} : vector<3x3x8x8xf32> to vector<1x1x8x8xf32>
    %181 = vector.shape_cast %180 : vector<1x1x8x8xf32> to vector<8x8xf32>
    %cst_72 = arith.constant dense<0.000000e+00> : vector<256x8xf32>
    %182 = tpu.matmul %179, %181, %cst_72 {dimension_numbers = #tpu.dot_dimension_numbers<[1], [0], [0], [1], [0, 0, 1, 1], [], []>} : vector<256x8xf32>, vector<8x8xf32>, vector<256x8xf32> -> vector<256x8xf32>
    %183 = arith.addf %177, %182 : vector<256x8xf32>
    %184 = vector.extract_strided_slice %149 {offsets = [1, 2, 0], sizes = [16, 16, 8], strides = [1, 1, 1]} : vector<18x18x8xf32> to vector<16x16x8xf32>
    %185 = vector.shape_cast %184 : vector<16x16x8xf32> to vector<256x8xf32>
    %186 = vector.extract_strided_slice %150 {offsets = [1, 2, 0, 0], sizes = [1, 1, 8, 8], strides = [1, 1, 1, 1]} : vector<3x3x8x8xf32> to vector<1x1x8x8xf32>
    %187 = vector.shape_cast %186 : vector<1x1x8x8xf32> to vector<8x8xf32>
    %cst_73 = arith.constant dense<0.000000e+00> : vector<256x8xf32>
    %188 = tpu.matmul %185, %187, %cst_73 {dimension_numbers = #tpu.dot_dimension_numbers<[1], [0], [0], [1], [0, 0, 1, 1], [], []>} : vector<256x8xf32>, vector<8x8xf32>, vector<256x8xf32> -> vector<256x8xf32>
    %189 = arith.addf %183, %188 : vector<256x8xf32>
    %190 = vector.extract_strided_slice %149 {offsets = [2, 0, 0], sizes = [16, 16, 8], strides = [1, 1, 1]} : vector<18x18x8xf32> to vector<16x16x8xf32>
    %191 = vector.shape_cast %190 : vector<16x16x8xf32> to vector<256x8xf32>
    %192 = vector.extract_strided_slice %150 {offsets = [2, 0, 0, 0], sizes = [1, 1, 8, 8], strides = [1, 1, 1, 1]} : vector<3x3x8x8xf32> to vector<1x1x8x8xf32>
    %193 = vector.shape_cast %192 : vector<1x1x8x8xf32> to vector<8x8xf32>
    %cst_74 = arith.constant dense<0.000000e+00> : vector<256x8xf32>
    %194 = tpu.matmul %191, %193, %cst_74 {dimension_numbers = #tpu.dot_dimension_numbers<[1], [0], [0], [1], [0, 0, 1, 1], [], []>} : vector<256x8xf32>, vector<8x8xf32>, vector<256x8xf32> -> vector<256x8xf32>
    %195 = arith.addf %189, %194 : vector<256x8xf32>
    %196 = vector.extract_strided_slice %149 {offsets = [2, 1, 0], sizes = [16, 16, 8], strides = [1, 1, 1]} : vector<18x18x8xf32> to vector<16x16x8xf32>
    %197 = vector.shape_cast %196 : vector<16x16x8xf32> to vector<256x8xf32>
    %198 = vector.extract_strided_slice %150 {offsets = [2, 1, 0, 0], sizes = [1, 1, 8, 8], strides = [1, 1, 1, 1]} : vector<3x3x8x8xf32> to vector<1x1x8x8xf32>
    %199 = vector.shape_cast %198 : vector<1x1x8x8xf32> to vector<8x8xf32>
    %cst_75 = arith.constant dense<0.000000e+00> : vector<256x8xf32>
    %200 = tpu.matmul %197, %199, %cst_75 {dimension_numbers = #tpu.dot_dimension_numbers<[1], [0], [0], [1], [0, 0, 1, 1], [], []>} : vector<256x8xf32>, vector<8x8xf32>, vector<256x8xf32> -> vector<256x8xf32>
    %201 = arith.addf %195, %200 : vector<256x8xf32>
    %202 = vector.extract_strided_slice %149 {offsets = [2, 2, 0], sizes = [16, 16, 8], strides = [1, 1, 1]} : vector<18x18x8xf32> to vector<16x16x8xf32>
    %203 = vector.shape_cast %202 : vector<16x16x8xf32> to vector<256x8xf32>
    %204 = vector.extract_strided_slice %150 {offsets = [2, 2, 0, 0], sizes = [1, 1, 8, 8], strides = [1, 1, 1, 1]} : vector<3x3x8x8xf32> to vector<1x1x8x8xf32>
    %205 = vector.shape_cast %204 : vector<1x1x8x8xf32> to vector<8x8xf32>
    %cst_76 = arith.constant dense<0.000000e+00> : vector<256x8xf32>
    %206 = tpu.matmul %203, %205, %cst_76 {dimension_numbers = #tpu.dot_dimension_numbers<[1], [0], [0], [1], [0, 0, 1, 1], [], []>} : vector<256x8xf32>, vector<8x8xf32>, vector<256x8xf32> -> vector<256x8xf32>
    %207 = arith.addf %201, %206 : vector<256x8xf32>
    %208 = vector.broadcast %151 : vector<1x8xf32> to vector<256x8xf32>
    %209 = arith.mulf %207, %208 : vector<256x8xf32>
    %210 = vector.broadcast %152 : vector<1x8xf32> to vector<256x8xf32>
    %211 = arith.addf %209, %210 : vector<256x8xf32>
    %cst_77 = arith.constant 5.000000e-01 : f32
    %212 = vector.broadcast %cst_77 : f32 to vector<256x8xf32>
    %213 = arith.mulf %212, %211 : vector<256x8xf32>
    %cst_78 = arith.constant 0.707106769 : f32
    %214 = vector.broadcast %cst_78 : f32 to vector<256x8xf32>
    %215 = arith.mulf %211, %214 : vector<256x8xf32>
    %216 = math.erf %215 : vector<256x8xf32>
    %cst_79 = arith.constant 1.000000e+00 : f32
    %217 = vector.broadcast %cst_79 : f32 to vector<256x8xf32>
    %218 = arith.addf %217, %216 : vector<256x8xf32>
    %219 = arith.mulf %213, %218 : vector<256x8xf32>
    %220 = vector.shape_cast %219 : vector<256x8xf32> to vector<16x16x8xf32>
    %c1_80 = arith.constant 1 : index
    %c1_81 = arith.constant 1 : index
    %c0_82 = arith.constant 0 : index
    %221 = vector.load %arg15[%c1_80, %c1_81, %c0_82] : memref<18x18x8xf32, #tpu.memory_space<vmem>>, vector<16x16x8xf32>
    tpu.vector_store %arg15[%c1_80, %c1_81, %c0_82], %220 {strides = array<i32>} : memref<18x18x8xf32, #tpu.memory_space<vmem>>, vector<16x16x8xf32>,
    %c0_83 = arith.constant 0 : index
    %c0_84 = arith.constant 0 : index
    %c0_85 = arith.constant 0 : index
    %222 = vector.load %arg15[%c0_83, %c0_84, %c0_85] : memref<18x18x8xf32, #tpu.memory_space<vmem>>, vector<18x18x8xf32>
    %c0_86 = arith.constant 0 : index
    %c0_87 = arith.constant 0 : index
    %c0_88 = arith.constant 0 : index
    %c0_89 = arith.constant 0 : index
    %223 = vector.load %arg11[%c0_86, %c0_87, %c0_88, %c0_89] : memref<3x3x8x8xf32, #tpu.memory_space<vmem>>, vector<3x3x8x8xf32>
    %c0_90 = arith.constant 0 : index
    %c0_91 = arith.constant 0 : index
    %224 = vector.load %arg12[%c0_90, %c0_91] : memref<1x8xf32, #tpu.memory_space<vmem>>, vector<1x8xf32>
    %c0_92 = arith.constant 0 : index
    %c0_93 = arith.constant 0 : index
    %225 = vector.load %arg13[%c0_92, %c0_93] : memref<1x8xf32, #tpu.memory_space<vmem>>, vector<1x8xf32>
    %cst_94 = arith.constant 0.000000e+00 : f32
    %226 = vector.broadcast %cst_94 : f32 to vector<256x8xf32>
    %227 = vector.extract_strided_slice %222 {offsets = [0, 0, 0], sizes = [16, 16, 8], strides = [1, 1, 1]} : vector<18x18x8xf32> to vector<16x16x8xf32>
    %228 = vector.shape_cast %227 : vector<16x16x8xf32> to vector<256x8xf32>
    %229 = vector.extract_strided_slice %223 {offsets = [0, 0, 0, 0], sizes = [1, 1, 8, 8], strides = [1, 1, 1, 1]} : vector<3x3x8x8xf32> to vector<1x1x8x8xf32>
    %230 = vector.shape_cast %229 : vector<1x1x8x8xf32> to vector<8x8xf32>
    %cst_95 = arith.constant dense<0.000000e+00> : vector<256x8xf32>
    %231 = tpu.matmul %228, %230, %cst_95 {dimension_numbers = #tpu.dot_dimension_numbers<[1], [0], [0], [1], [0, 0, 1, 1], [], []>} : vector<256x8xf32>, vector<8x8xf32>, vector<256x8xf32> -> vector<256x8xf32>
    %232 = arith.addf %226, %231 : vector<256x8xf32>
    %233 = vector.extract_strided_slice %222 {offsets = [0, 1, 0], sizes = [16, 16, 8], strides = [1, 1, 1]} : vector<18x18x8xf32> to vector<16x16x8xf32>
    %234 = vector.shape_cast %233 : vector<16x16x8xf32> to vector<256x8xf32>
    %235 = vector.extract_strided_slice %223 {offsets = [0, 1, 0, 0], sizes = [1, 1, 8, 8], strides = [1, 1, 1, 1]} : vector<3x3x8x8xf32> to vector<1x1x8x8xf32>
    %236 = vector.shape_cast %235 : vector<1x1x8x8xf32> to vector<8x8xf32>
    %cst_96 = arith.constant dense<0.000000e+00> : vector<256x8xf32>
    %237 = tpu.matmul %234, %236, %cst_96 {dimension_numbers = #tpu.dot_dimension_numbers<[1], [0], [0], [1], [0, 0, 1, 1], [], []>} : vector<256x8xf32>, vector<8x8xf32>, vector<256x8xf32> -> vector<256x8xf32>
    %238 = arith.addf %232, %237 : vector<256x8xf32>
    %239 = vector.extract_strided_slice %222 {offsets = [0, 2, 0], sizes = [16, 16, 8], strides = [1, 1, 1]} : vector<18x18x8xf32> to vector<16x16x8xf32>
    %240 = vector.shape_cast %239 : vector<16x16x8xf32> to vector<256x8xf32>
    %241 = vector.extract_strided_slice %223 {offsets = [0, 2, 0, 0], sizes = [1, 1, 8, 8], strides = [1, 1, 1, 1]} : vector<3x3x8x8xf32> to vector<1x1x8x8xf32>
    %242 = vector.shape_cast %241 : vector<1x1x8x8xf32> to vector<8x8xf32>
    %cst_97 = arith.constant dense<0.000000e+00> : vector<256x8xf32>
    %243 = tpu.matmul %240, %242, %cst_97 {dimension_numbers = #tpu.dot_dimension_numbers<[1], [0], [0], [1], [0, 0, 1, 1], [], []>} : vector<256x8xf32>, vector<8x8xf32>, vector<256x8xf32> -> vector<256x8xf32>
    %244 = arith.addf %238, %243 : vector<256x8xf32>
    %245 = vector.extract_strided_slice %222 {offsets = [1, 0, 0], sizes = [16, 16, 8], strides = [1, 1, 1]} : vector<18x18x8xf32> to vector<16x16x8xf32>
    %246 = vector.shape_cast %245 : vector<16x16x8xf32> to vector<256x8xf32>
    %247 = vector.extract_strided_slice %223 {offsets = [1, 0, 0, 0], sizes = [1, 1, 8, 8], strides = [1, 1, 1, 1]} : vector<3x3x8x8xf32> to vector<1x1x8x8xf32>
    %248 = vector.shape_cast %247 : vector<1x1x8x8xf32> to vector<8x8xf32>
    %cst_98 = arith.constant dense<0.000000e+00> : vector<256x8xf32>
    %249 = tpu.matmul %246, %248, %cst_98 {dimension_numbers = #tpu.dot_dimension_numbers<[1], [0], [0], [1], [0, 0, 1, 1], [], []>} : vector<256x8xf32>, vector<8x8xf32>, vector<256x8xf32> -> vector<256x8xf32>
    %250 = arith.addf %244, %249 : vector<256x8xf32>
    %251 = vector.extract_strided_slice %222 {offsets = [1, 1, 0], sizes = [16, 16, 8], strides = [1, 1, 1]} : vector<18x18x8xf32> to vector<16x16x8xf32>
    %252 = vector.shape_cast %251 : vector<16x16x8xf32> to vector<256x8xf32>
    %253 = vector.extract_strided_slice %223 {offsets = [1, 1, 0, 0], sizes = [1, 1, 8, 8], strides = [1, 1, 1, 1]} : vector<3x3x8x8xf32> to vector<1x1x8x8xf32>
    %254 = vector.shape_cast %253 : vector<1x1x8x8xf32> to vector<8x8xf32>
    %cst_99 = arith.constant dense<0.000000e+00> : vector<256x8xf32>
    %255 = tpu.matmul %252, %254, %cst_99 {dimension_numbers = #tpu.dot_dimension_numbers<[1], [0], [0], [1], [0, 0, 1, 1], [], []>} : vector<256x8xf32>, vector<8x8xf32>, vector<256x8xf32> -> vector<256x8xf32>
    %256 = arith.addf %250, %255 : vector<256x8xf32>
    %257 = vector.extract_strided_slice %222 {offsets = [1, 2, 0], sizes = [16, 16, 8], strides = [1, 1, 1]} : vector<18x18x8xf32> to vector<16x16x8xf32>
    %258 = vector.shape_cast %257 : vector<16x16x8xf32> to vector<256x8xf32>
    %259 = vector.extract_strided_slice %223 {offsets = [1, 2, 0, 0], sizes = [1, 1, 8, 8], strides = [1, 1, 1, 1]} : vector<3x3x8x8xf32> to vector<1x1x8x8xf32>
    %260 = vector.shape_cast %259 : vector<1x1x8x8xf32> to vector<8x8xf32>
    %cst_100 = arith.constant dense<0.000000e+00> : vector<256x8xf32>
    %261 = tpu.matmul %258, %260, %cst_100 {dimension_numbers = #tpu.dot_dimension_numbers<[1], [0], [0], [1], [0, 0, 1, 1], [], []>} : vector<256x8xf32>, vector<8x8xf32>, vector<256x8xf32> -> vector<256x8xf32>
    %262 = arith.addf %256, %261 : vector<256x8xf32>
    %263 = vector.extract_strided_slice %222 {offsets = [2, 0, 0], sizes = [16, 16, 8], strides = [1, 1, 1]} : vector<18x18x8xf32> to vector<16x16x8xf32>
    %264 = vector.shape_cast %263 : vector<16x16x8xf32> to vector<256x8xf32>
    %265 = vector.extract_strided_slice %223 {offsets = [2, 0, 0, 0], sizes = [1, 1, 8, 8], strides = [1, 1, 1, 1]} : vector<3x3x8x8xf32> to vector<1x1x8x8xf32>
    %266 = vector.shape_cast %265 : vector<1x1x8x8xf32> to vector<8x8xf32>
    %cst_101 = arith.constant dense<0.000000e+00> : vector<256x8xf32>
    %267 = tpu.matmul %264, %266, %cst_101 {dimension_numbers = #tpu.dot_dimension_numbers<[1], [0], [0], [1], [0, 0, 1, 1], [], []>} : vector<256x8xf32>, vector<8x8xf32>, vector<256x8xf32> -> vector<256x8xf32>
    %268 = arith.addf %262, %267 : vector<256x8xf32>
    %269 = vector.extract_strided_slice %222 {offsets = [2, 1, 0], sizes = [16, 16, 8], strides = [1, 1, 1]} : vector<18x18x8xf32> to vector<16x16x8xf32>
    %270 = vector.shape_cast %269 : vector<16x16x8xf32> to vector<256x8xf32>
    %271 = vector.extract_strided_slice %223 {offsets = [2, 1, 0, 0], sizes = [1, 1, 8, 8], strides = [1, 1, 1, 1]} : vector<3x3x8x8xf32> to vector<1x1x8x8xf32>
    %272 = vector.shape_cast %271 : vector<1x1x8x8xf32> to vector<8x8xf32>
    %cst_102 = arith.constant dense<0.000000e+00> : vector<256x8xf32>
    %273 = tpu.matmul %270, %272, %cst_102 {dimension_numbers = #tpu.dot_dimension_numbers<[1], [0], [0], [1], [0, 0, 1, 1], [], []>} : vector<256x8xf32>, vector<8x8xf32>, vector<256x8xf32> -> vector<256x8xf32>
    %274 = arith.addf %268, %273 : vector<256x8xf32>
    %275 = vector.extract_strided_slice %222 {offsets = [2, 2, 0], sizes = [16, 16, 8], strides = [1, 1, 1]} : vector<18x18x8xf32> to vector<16x16x8xf32>
    %276 = vector.shape_cast %275 : vector<16x16x8xf32> to vector<256x8xf32>
    %277 = vector.extract_strided_slice %223 {offsets = [2, 2, 0, 0], sizes = [1, 1, 8, 8], strides = [1, 1, 1, 1]} : vector<3x3x8x8xf32> to vector<1x1x8x8xf32>
    %278 = vector.shape_cast %277 : vector<1x1x8x8xf32> to vector<8x8xf32>
    %cst_103 = arith.constant dense<0.000000e+00> : vector<256x8xf32>
    %279 = tpu.matmul %276, %278, %cst_103 {dimension_numbers = #tpu.dot_dimension_numbers<[1], [0], [0], [1], [0, 0, 1, 1], [], []>} : vector<256x8xf32>, vector<8x8xf32>, vector<256x8xf32> -> vector<256x8xf32>
    %280 = arith.addf %274, %279 : vector<256x8xf32>
    %281 = vector.broadcast %224 : vector<1x8xf32> to vector<256x8xf32>
    %282 = arith.mulf %280, %281 : vector<256x8xf32>
    %283 = vector.broadcast %225 : vector<1x8xf32> to vector<256x8xf32>
    %284 = arith.addf %282, %283 : vector<256x8xf32>
    %cst_104 = arith.constant 5.000000e-01 : f32
    %285 = vector.broadcast %cst_104 : f32 to vector<256x8xf32>
    %286 = arith.mulf %285, %284 : vector<256x8xf32>
    %cst_105 = arith.constant 0.707106769 : f32
    %287 = vector.broadcast %cst_105 : f32 to vector<256x8xf32>
    %288 = arith.mulf %284, %287 : vector<256x8xf32>
    %289 = math.erf %288 : vector<256x8xf32>
    %cst_106 = arith.constant 1.000000e+00 : f32
    %290 = vector.broadcast %cst_106 : f32 to vector<256x8xf32>
    %291 = arith.addf %290, %289 : vector<256x8xf32>
    %292 = arith.mulf %286, %291 : vector<256x8xf32>
    %293 = vector.shape_cast %292 : vector<256x8xf32> to vector<16x16x8xf32>
    %294 = vector.extract_strided_slice %293 {offsets = [0, 0, 0], sizes = [1, 16, 8], strides = [1, 1, 1]} : vector<16x16x8xf32> to vector<1x16x8xf32>
    %295 = vector.shape_cast %294 : vector<1x16x8xf32> to vector<16x8xf32>
    %296 = vector.extract_strided_slice %293 {offsets = [1, 0, 0], sizes = [1, 16, 8], strides = [1, 1, 1]} : vector<16x16x8xf32> to vector<1x16x8xf32>
    %297 = vector.shape_cast %296 : vector<1x16x8xf32> to vector<16x8xf32>
    %298 = arith.maximumf %295, %297 : vector<16x8xf32>
    %299 = vector.extract_strided_slice %293 {offsets = [2, 0, 0], sizes = [1, 16, 8], strides = [1, 1, 1]} : vector<16x16x8xf32> to vector<1x16x8xf32>
    %300 = vector.shape_cast %299 : vector<1x16x8xf32> to vector<16x8xf32>
    %301 = vector.extract_strided_slice %293 {offsets = [3, 0, 0], sizes = [1, 16, 8], strides = [1, 1, 1]} : vector<16x16x8xf32> to vector<1x16x8xf32>
    %302 = vector.shape_cast %301 : vector<1x16x8xf32> to vector<16x8xf32>
    %303 = arith.maximumf %300, %302 : vector<16x8xf32>
    %304 = vector.extract_strided_slice %293 {offsets = [4, 0, 0], sizes = [1, 16, 8], strides = [1, 1, 1]} : vector<16x16x8xf32> to vector<1x16x8xf32>
    %305 = vector.shape_cast %304 : vector<1x16x8xf32> to vector<16x8xf32>
    %306 = vector.extract_strided_slice %293 {offsets = [5, 0, 0], sizes = [1, 16, 8], strides = [1, 1, 1]} : vector<16x16x8xf32> to vector<1x16x8xf32>
    %307 = vector.shape_cast %306 : vector<1x16x8xf32> to vector<16x8xf32>
    %308 = arith.maximumf %305, %307 : vector<16x8xf32>
    %309 = vector.extract_strided_slice %293 {offsets = [6, 0, 0], sizes = [1, 16, 8], strides = [1, 1, 1]} : vector<16x16x8xf32> to vector<1x16x8xf32>
    %310 = vector.shape_cast %309 : vector<1x16x8xf32> to vector<16x8xf32>
    %311 = vector.extract_strided_slice %293 {offsets = [7, 0, 0], sizes = [1, 16, 8], strides = [1, 1, 1]} : vector<16x16x8xf32> to vector<1x16x8xf32>
    %312 = vector.shape_cast %311 : vector<1x16x8xf32> to vector<16x8xf32>
    %313 = arith.maximumf %310, %312 : vector<16x8xf32>
    %314 = vector.extract_strided_slice %293 {offsets = [8, 0, 0], sizes = [1, 16, 8], strides = [1, 1, 1]} : vector<16x16x8xf32> to vector<1x16x8xf32>
    %315 = vector.shape_cast %314 : vector<1x16x8xf32> to vector<16x8xf32>
    %316 = vector.extract_strided_slice %293 {offsets = [9, 0, 0], sizes = [1, 16, 8], strides = [1, 1, 1]} : vector<16x16x8xf32> to vector<1x16x8xf32>
    %317 = vector.shape_cast %316 : vector<1x16x8xf32> to vector<16x8xf32>
    %318 = arith.maximumf %315, %317 : vector<16x8xf32>
    %319 = vector.extract_strided_slice %293 {offsets = [10, 0, 0], sizes = [1, 16, 8], strides = [1, 1, 1]} : vector<16x16x8xf32> to vector<1x16x8xf32>
    %320 = vector.shape_cast %319 : vector<1x16x8xf32> to vector<16x8xf32>
    %321 = vector.extract_strided_slice %293 {offsets = [11, 0, 0], sizes = [1, 16, 8], strides = [1, 1, 1]} : vector<16x16x8xf32> to vector<1x16x8xf32>
    %322 = vector.shape_cast %321 : vector<1x16x8xf32> to vector<16x8xf32>
    %323 = arith.maximumf %320, %322 : vector<16x8xf32>
    %324 = vector.extract_strided_slice %293 {offsets = [12, 0, 0], sizes = [1, 16, 8], strides = [1, 1, 1]} : vector<16x16x8xf32> to vector<1x16x8xf32>
    %325 = vector.shape_cast %324 : vector<1x16x8xf32> to vector<16x8xf32>
    %326 = vector.extract_strided_slice %293 {offsets = [13, 0, 0], sizes = [1, 16, 8], strides = [1, 1, 1]} : vector<16x16x8xf32> to vector<1x16x8xf32>
    %327 = vector.shape_cast %326 : vector<1x16x8xf32> to vector<16x8xf32>
    %328 = arith.maximumf %325, %327 : vector<16x8xf32>
    %329 = vector.extract_strided_slice %293 {offsets = [14, 0, 0], sizes = [1, 16, 8], strides = [1, 1, 1]} : vector<16x16x8xf32> to vector<1x16x8xf32>
    %330 = vector.shape_cast %329 : vector<1x16x8xf32> to vector<16x8xf32>
    %331 = vector.extract_strided_slice %293 {offsets = [15, 0, 0], sizes = [1, 16, 8], strides = [1, 1, 1]} : vector<16x16x8xf32> to vector<1x16x8xf32>
    %332 = vector.shape_cast %331 : vector<1x16x8xf32> to vector<16x8xf32>
    %333 = arith.maximumf %330, %332 : vector<16x8xf32>
    %334 = vector.shape_cast %298 : vector<16x8xf32> to vector<1x16x8xf32>
    %335 = vector.shape_cast %303 : vector<16x8xf32> to vector<1x16x8xf32>
    %336 = vector.shape_cast %308 : vector<16x8xf32> to vector<1x16x8xf32>
    %337 = vector.shape_cast %313 : vector<16x8xf32> to vector<1x16x8xf32>
    %338 = vector.shape_cast %318 : vector<16x8xf32> to vector<1x16x8xf32>
    %339 = vector.shape_cast %323 : vector<16x8xf32> to vector<1x16x8xf32>
    %340 = vector.shape_cast %328 : vector<16x8xf32> to vector<1x16x8xf32>
    %341 = vector.shape_cast %333 : vector<16x8xf32> to vector<1x16x8xf32>
    %342 = tpu.concatenate %334, %335, %336, %337, %338, %339, %340, %341 in 0 : vector<1x16x8xf32>, vector<1x16x8xf32>, vector<1x16x8xf32>, vector<1x16x8xf32>, vector<1x16x8xf32>, vector<1x16x8xf32>, vector<1x16x8xf32>, vector<1x16x8xf32> -> vector<8x16x8xf32>
    %c0_107 = arith.constant 0 : index
    %c0_108 = arith.constant 0 : index
    %c0_109 = arith.constant 0 : index
    %343 = vector.load %arg16[%c0_107, %c0_108, %c0_109] : memref<8x16x8xf32, #tpu.memory_space<vmem>>, vector<8x16x8xf32>
    tpu.vector_store %arg16[%c0_107, %c0_108, %c0_109], %342 {strides = array<i32>} : memref<8x16x8xf32, #tpu.memory_space<vmem>>, vector<8x16x8xf32>,
    %c0_110 = arith.constant 0 : index
    %c0_111 = arith.constant 0 : index
    %c0_112 = arith.constant 0 : index
    %344 = tpu.strided_load %arg16[%c0_110, %c0_111, %c0_112] {strides = array<i32: 1, 2, 1>} : memref<8x16x8xf32, #tpu.memory_space<vmem>>, vector<8x8x8xf32>
    %c0_113 = arith.constant 0 : index
    %c1_114 = arith.constant 1 : index
    %c0_115 = arith.constant 0 : index
    %345 = tpu.strided_load %arg16[%c0_113, %c1_114, %c0_115] {strides = array<i32: 1, 2, 1>} : memref<8x16x8xf32, #tpu.memory_space<vmem>>, vector<8x8x8xf32>
    %346 = arith.maximumf %344, %345 : vector<8x8x8xf32>
    %c0_116 = arith.constant 0 : index
    %c0_117 = arith.constant 0 : index
    %c0_118 = arith.constant 0 : index
    %c0_119 = arith.constant 0 : index
    %347 = vector.load %arg14[%c0_116, %c0_117, %c0_118, %c0_119] : memref<1x8x8x8xf32, #tpu.memory_space<vmem>>, vector<1x8x8x8xf32>
    %348 = vector.shape_cast %347 : vector<1x8x8x8xf32> to vector<8x8x8xf32>
    %349 = vector.shape_cast %346 : vector<8x8x8xf32> to vector<1x8x8x8xf32>
    tpu.vector_store %arg14[%c0_116, %c0_117, %c0_118, %c0_119], %349 {strides = array<i32>} : memref<1x8x8x8xf32, #tpu.memory_space<vmem>>, vector<1x8x8x8xf32>,
    return
  }
  func.func @transform_0(%arg0: i32) -> (i32, i32, i32, i32) {
    %c0_i32 = arith.constant 0 : i32
    %c0_i32_0 = arith.constant 0 : i32
    %c0_i32_1 = arith.constant 0 : i32
    %c0_i32_2 = arith.constant 0 : i32
    return %arg0, %c0_i32, %c0_i32_0, %c0_i32_1 : i32, i32, i32, i32
  }
  func.func @transform_1(%arg0: i32) -> (i32, i32, i32, i32) {
    %c0_i32 = arith.constant 0 : i32
    %c0_i32_0 = arith.constant 0 : i32
    %c0_i32_1 = arith.constant 0 : i32
    %c0_i32_2 = arith.constant 0 : i32
    %c0_i32_3 = arith.constant 0 : i32
    return %c0_i32, %c0_i32_0, %c0_i32_1, %c0_i32_2 : i32, i32, i32, i32
  }
  func.func @transform_2(%arg0: i32) -> (i32, i32) {
    %c0_i32 = arith.constant 0 : i32
    %c0_i32_0 = arith.constant 0 : i32
    %c0_i32_1 = arith.constant 0 : i32
    return %c0_i32, %c0_i32_0 : i32, i32
  }
  func.func @transform_3(%arg0: i32) -> (i32, i32) {
    %c0_i32 = arith.constant 0 : i32
    %c0_i32_0 = arith.constant 0 : i32
    %c0_i32_1 = arith.constant 0 : i32
    return %c0_i32, %c0_i32_0 : i32, i32
  }
  func.func @transform_4(%arg0: i32) -> (i32, i32, i32, i32) {
    %c0_i32 = arith.constant 0 : i32
    %c0_i32_0 = arith.constant 0 : i32
    %c0_i32_1 = arith.constant 0 : i32
    %c0_i32_2 = arith.constant 0 : i32
    %c0_i32_3 = arith.constant 0 : i32
    return %c0_i32, %c0_i32_0, %c0_i32_1, %c0_i32_2 : i32, i32, i32, i32
  }
  func.func @transform_5(%arg0: i32) -> (i32, i32) {
    %c0_i32 = arith.constant 0 : i32
    %c0_i32_0 = arith.constant 0 : i32
    %c0_i32_1 = arith.constant 0 : i32
    return %c0_i32, %c0_i32_0 : i32, i32
  }
  func.func @transform_6(%arg0: i32) -> (i32, i32) {
    %c0_i32 = arith.constant 0 : i32
    %c0_i32_0 = arith.constant 0 : i32
    %c0_i32_1 = arith.constant 0 : i32
    return %c0_i32, %c0_i32_0 : i32, i32
  }
  func.func @transform_7(%arg0: i32) -> (i32, i32, i32, i32) {
    %c0_i32 = arith.constant 0 : i32
    %c0_i32_0 = arith.constant 0 : i32
    %c0_i32_1 = arith.constant 0 : i32
    %c0_i32_2 = arith.constant 0 : i32
    %c0_i32_3 = arith.constant 0 : i32
    return %c0_i32, %c0_i32_0, %c0_i32_1, %c0_i32_2 : i32, i32, i32, i32
  }
  func.func @transform_8(%arg0: i32) -> (i32, i32) {
    %c0_i32 = arith.constant 0 : i32
    %c0_i32_0 = arith.constant 0 : i32
    %c0_i32_1 = arith.constant 0 : i32
    return %c0_i32, %c0_i32_0 : i32, i32
  }
  func.func @transform_9(%arg0: i32) -> (i32, i32) {
    %c0_i32 = arith.constant 0 : i32
    %c0_i32_0 = arith.constant 0 : i32
    %c0_i32_1 = arith.constant 0 : i32
    return %c0_i32, %c0_i32_0 : i32, i32
  }
  func.func @transform_10(%arg0: i32) -> (i32, i32, i32, i32) {
    %c0_i32 = arith.constant 0 : i32
    %c0_i32_0 = arith.constant 0 : i32
    %c0_i32_1 = arith.constant 0 : i32
    %c0_i32_2 = arith.constant 0 : i32
    %c0_i32_3 = arith.constant 0 : i32
    return %c0_i32, %c0_i32_0, %c0_i32_1, %c0_i32_2 : i32, i32, i32, i32
  }
  func.func @transform_11(%arg0: i32) -> (i32, i32) {
    %c0_i32 = arith.constant 0 : i32
    %c0_i32_0 = arith.constant 0 : i32
    %c0_i32_1 = arith.constant 0 : i32
    return %c0_i32, %c0_i32_0 : i32, i32
  }
  func.func @transform_12(%arg0: i32) -> (i32, i32) {
    %c0_i32 = arith.constant 0 : i32
    %c0_i32_0 = arith.constant 0 : i32
    %c0_i32_1 = arith.constant 0 : i32
    return %c0_i32, %c0_i32_0 : i32, i32
  }
  func.func @transform_13(%arg0: i32) -> (i32, i32, i32, i32) {
    %c0_i32 = arith.constant 0 : i32
    %c0_i32_0 = arith.constant 0 : i32
    %c0_i32_1 = arith.constant 0 : i32
    %c0_i32_2 = arith.constant 0 : i32
    return %arg0, %c0_i32, %c0_i32_0, %c0_i32_1 : i32, i32, i32, i32
  }
}

</mosaic_0001>

<bundles_post_ra>
// kernel: tpu_custom_call.1
= control target key start
LH: loop header
LB: loop body
LE: loop exit
PB: predicated region body
PF: predicated region fallthrough
CT: control target
= control target key end

     0   :  { %s25375_s0 = inlined_call_operand.vmem [shape: f32[2,18,18,4], index: 0, kind: input, shape index: {}]   ;;  %s25376_s1 = inlined_call_operand.vmem [shape: f32[3,3,4,8], index: 1, kind: input, shape index: {}]   ;;  %s25377_s2 = inlined_call_operand.vmem [shape: f32[1,8], index: 2, kind: input, shape index: {}]   ;;  %s25378_s3 = inlined_call_operand.vmem [shape: f32[1,8], index: 3, kind: input, shape index: {}]   ;;  %s25379_s4 = inlined_call_operand.vmem [shape: f32[3,3,8,8], index: 4, kind: input, shape index: {}]   ;;  %s25380_s5 = inlined_call_operand.vmem [shape: f32[1,8], index: 5, kind: input, shape index: {}]   ;;  %s25381_s6 = inlined_call_operand.vmem [shape: f32[1,8], index: 6, kind: input, shape index: {}]   ;;  %s25382_s7 = inlined_call_operand.vmem [shape: f32[3,3,8,8], index: 7, kind: input, shape index: {}]   ;;  %s25383_s8 = inlined_call_operand.vmem [shape: f32[1,8], index: 8, kind: input, shape index: {}]   ;;  %s25384_s9 = inlined_call_operand.vmem [shape: f32[1,8], index: 9, kind: input, shape index: {}]   ;;  %s25385_s10 = inlined_call_operand.vmem [shape: f32[3,3,8,8], index: 10, kind: input, shape index: {}]   ;;  %s25386_s11 = inlined_call_operand.vmem [shape: f32[1,8], index: 11, kind: input, shape index: {}]   ;;  %s25387_s12 = inlined_call_operand.vmem [shape: f32[1,8], index: 12, kind: input, shape index: {}]   ;;  %s25388_s13 = inlined_call_operand.hbm [shape: f32[2,8,8,8], index: 13, kind: output, shape index: {}]  }
   0x1   :  { %25662 = sst [smem:[#allocation101_spill]] %s25375_s0 }
   0x2   :  { %25663 = sst [smem:[#allocation102_spill]] %s25376_s1 }
   0x3   :  { %25664 = sst [smem:[#allocation103_spill]] %s25377_s2 }
   0x4   :  { %18 = vsyncpa [#allocation5], 0 }
   0x5   :  { %20 = vsyncpa [#allocation5 + $0x1], 0  ;;  %s17423_s25 = smov 0   ;;  %s17425_s26 = smov 0  }
   0x6   :  { %s17427_s27 = smov 0   ;;  %s17429_s28 = smov 0  }
   0x7 LB: > { %s17444_s29 = sadd.s32 4294967295, %s17347_s28   ;;  %s12778_s30 = sadd.s32 4294967294, %s17347_s28   ;;  %s17347_s28 = sphi %s17429_s28, %s26705_s28   ;;  %s17343_s27 = sphi %s17427_s27, %s26704_s27   ;;  %s17339_s26 = sphi %s17425_s26, %s26703_s26   ;;  %s17335_s25 = sphi %s17423_s25, %s26702_s25  }
   0x8   : > { %s17448_s14 = sadd.s32 1, %s17347_s28   ;;  %s311_s15 = sadd.s32 1, %s17343_s27 }
   0x9   : > { %s308_s16 = ssub.s32 %s17347_s28, %s17448_s14  ;;  %p321_p0 = scmp.ne.s32.totalorder %s17343_s27, %s17339_s26 }
   0xa   : > { %p309_p1 = scmp.eq.s32.totalorder %s308_s16, 0  ;;  %p322_p2 = scmp.eq.s32.totalorder %s17444_s29, 1 }
   0xb   : > { %p327_p3 = scmp.ne.s32.totalorder %s17339_s26, %s17335_s25  ;;  %p328_p4 = scmp.eq.s32.totalorder %s12778_s30, 1 }
   0xc   : > { %s17459_s17 = scalar_select %p309_p1, %s17343_s27, %s311_s15  }
   0xd   : > { %p17461_p5 = por %p322_p2, %p321_p0  ;;  %p17465_p6 = por %p328_p4, %p327_p3 }
   0xe   : > { %p12781_p7 = scmp.ge.s32.totalorder %s17347_s28, 1  ;;  %p390_p8 = scmp.lt.s32.totalorder %s17347_s28, 3 }
  0x10   : > { %p391_p9 = pnand %p12781_p7, %p390_p8 }
  0x12   : > { %394 = sbr.rel (%p391_p9) target bundleno = 2116 (0x844), region = 72 }
  0x17   : > { %s25667_s1 = sld [smem:[#allocation102_spill]]  ;;  %vm754_vm0 = vcmask 1043456   ;;  %p434_p10 = scmp.lt.s32.totalorder %s17444_s29, 1  ;;  %vm689_vm1 = vcmask 31744   ;;  %vm608_vm2 = vcmask 1046528   ;;  %vm1275_vm3 = vcmask 1045504  }
  0x18   : > { %s25668_s0 = sld [smem:[#allocation101_spill]]  ;;  %vm493_vm4 = vcmask 64512   ;;  %vm496_vm5 = vcmask 58368   ;;  %s431_s23 = sand.u32 1, %s17339_s26  }
  0x19   : > { %s435_s20 = scalar_select %p434_p10, %s17444_s29, 1 }
  0x1a   : > { %s25944_s2 = sld [smem:[#allocation103_spill]]  ;;  %s25188_s30 = sshll.u32 %s431_s23, 6 }
  0x1b   : > { %s16947_s21 = smul.u32 432, %s435_s20  ;;  %s25213_s15 = scalar_lea.vmem [#allocation4], %s25188_s30 }
  0x1c   : > { %s13958_s16 = sshll.u32 %s17444_s29, 10  ;;  %s25335_s30 = scalar_lea.sflag [#allocation5], %s431_s23 }
  0x1d   : > { %v550_v0 = vld [vmem:[%s25667_s1 + $0x4] sm:$0xf]  ;;  %v549_v1 = vld [vmem:[%s25667_s1] sm:$0xf]  ;;  %v551_v2 = vld [vmem:[%s25667_s1 + $0x8] sm:$0xf]  ;;  %s25327_s22 = scalar_lea.hbm %s25388_s13, %s13958_s16 }
  0x1e   : > { %15147 = vmatprep.subr.msk.mxu0 %vm754_vm0, %v550_v0  ;;  %15197 = vmatprep.subr.msk.mxu1 %vm754_vm0, %v549_v1  ;;  %v552_v3 = vld [vmem:[%s25667_s1 + $0xc] sm:$0xf]  ;;  %s17494_s24 = scalar_lea.vmem %s25668_s0, %s16947_s21  ;;  %v17553_v26 = vld [vmem:[%s25667_s1 + $0x10] sm:$0xf]  ;;  %v17646_v53 = vld [vmem:[%s25667_s1 + $0x14] sm:$0xf] }
  0x1f   : > { %15148 = vmatpush3.msk.msra.mxu0 %vm754_vm0, %v550_v0  ;;  %15198 = vmatpush3.msk.msra.mxu1 %vm754_vm0, %v549_v1  ;;  %v17497_v4 = vld [vmem:[%s17494_s24] sm:$0xff]  ;;  %v17500_v5 = vld [vmem:[%s17494_s24 + $0x8] sm:$0xff]  ;;  %v17503_v6 = vld [vmem:[%s17494_s24 + $0x10] sm:$0x3]  ;;  %s17350_s0 = smov [#allocation4]  }
  0x20   : > { %15247 = vmatprep.subr.msk.mxu0 %vm754_vm0, %v551_v2  ;;  %15297 = vmatprep.subr.msk.mxu1 %vm754_vm0, %v552_v3  ;;  %v609_v7 = vrot.slane %v17497_v4, 1  ;;  %v610_v8 = vrot.slane %v17500_v5, 1  ;;  %v612_v9 = vrot.slane %v17503_v6, 1  ;;  %v17511_v10 = vld [vmem:[%s17494_s24 + $0x18] sm:$0xff]  ;;  %v17514_v11 = vld [vmem:[%s17494_s24 + $0x20] sm:$0xff]  ;;  %v17524_v15 = vld [vmem:[%s17494_s24 + $0x30] sm:$0xff] }
  0x21   : > { %15199 = vmatprep.mubr.msk.f32.mxu1 %vm689_vm1, %v17497_v4  ;;  %v614_v12 = vrot.slane %v17511_v10, 1  ;;  %v615_v13 = vrot.slane %v17514_v11, 1  ;;  %v17521_v14 = vld [vmem:[%s17494_s24 + $0x28] sm:$0x3]  ;;  %v17527_v16 = vld [vmem:[%s17494_s24 + $0x38] sm:$0xff]  ;;  %v619_v20 = vrot.slane %v17524_v15, 1 }
  0x22   : > { %15200 = vmatmul.mubr.msk.f32.vlgmr.msra.gmra.mxu1 %vm689_vm1, %v17500_v5  ;;  %v611_v17 = vsel %vm608_vm2, %v609_v7, %v610_v8  ;;  %v613_v18 = vsel %vm608_vm2, %v610_v8, %v612_v9  ;;  %v617_v19 = vrot.slane %v17521_v14, 1  ;;  %v17536_v21 = vld [vmem:[%s17494_s24 + $0x40] sm:$0x3]  ;;  %v620_v23 = vrot.slane %v17527_v16, 1  ;;  %v17545_v24 = vld [vmem:[%s17494_s24 + $0x48] sm:$0xff]  ;;  %v17548_v25 = vld [vmem:[%s17494_s24 + $0x50] sm:$0xff] }
  0x23   : > { %15202 = vmatprep.mubr.msk.f32.mxu1 %vm689_vm1, %v17511_v10  ;;  %15298 = vmatpush3.msk.msra.mxu1 %vm754_vm0, %v552_v3  ;;  %v17541_v22 = vsel %vm608_vm2, %v614_v12, %v615_v13  ;;  %v622_v28 = vrot.slane %v17536_v21, 1  ;;  %v624_v30 = vrot.slane %v17545_v24, 1  ;;  %v625_v31 = vrot.slane %v17548_v25, 1  ;;  %v17571_v32 = vld [vmem:[%s17494_s24 + $0x58] sm:$0x3]  ;;  %v17578_v33 = vld [vmem:[%s17494_s24 + $0x60] sm:$0xff] }
  0x24   : > { %15149 = vmatprep.mubr.msk.f32.mxu0 %vm689_vm1, %v611_v17  ;;  %v17560_v27 = vsel %vm608_vm2, %v615_v13, %v617_v19  ;;  %v17566_v29 = vsel %vm608_vm2, %v619_v20, %v620_v23  ;;  %v17581_v34 = vld [vmem:[%s17494_s24 + $0x68] sm:$0xff]  ;;  %v627_v36 = vrot.slane %v17571_v32, 1  ;;  %v629_v38 = vrot.slane %v17578_v33, 1  ;;  %v17599_v40 = vld [vmem:[%s17494_s24 + $0x70] sm:$0x3]  ;;  %v17604_v41 = vld [vmem:[%s17494_s24 + $0x78] sm:$0xff]  ;;  %15397 = vmatprep.subr.msk.mxu1 %vm754_vm0, %v17646_v53 }
  0x25   : > { %15150 = vmatmul.mubr.msk.f32.vlgmr.msra.gmra.mxu0 %vm689_vm1, %v613_v18  ;;  %25669 = vst [vmem:[#allocation7_spill] sm:$0xff] %v17566_v29  ;;  %v17588_v35 = vsel %vm608_vm2, %v620_v23, %v622_v28  ;;  %v17594_v37 = vsel %vm608_vm2, %v624_v30, %v625_v31  ;;  %v630_v39 = vrot.slane %v17581_v34, 1  ;;  %v17607_v42 = vld [vmem:[%s17494_s24 + $0x80] sm:$0xff]  ;;  %v632_v44 = vrot.slane %v17599_v40, 1  ;;  %v17625_v48 = vld [vmem:[%s17494_s24 + $0x88] sm:$0x3] }
  0x26   : > { %15248 = vmatpush3.msk.msra.mxu0 %vm754_vm0, %v551_v2  ;;  %15152 = vmatprep.mubr.msk.f32.mxu0 %vm689_vm1, %v17541_v22  ;;  %25670 = vst [vmem:[#allocation8_spill] sm:$0xff] %v17588_v35  ;;  %25671 = vst [vmem:[#allocation9_spill] sm:$0xff] %v17594_v37  ;;  %v17614_v43 = vsel %vm608_vm2, %v625_v31, %v627_v36  ;;  %v634_v46 = vrot.slane %v17604_v41, 1  ;;  %v635_v47 = vrot.slane %v17607_v42, 1  ;;  %v17630_v49 = vld [vmem:[%s17494_s24 + $0x90] sm:$0xff]  ;;  %v17633_v50 = vld [vmem:[%s17494_s24 + $0x98] sm:$0xff] }
  0x27   : > { %15203 = vmatmul.mubr.msk.f32.gmra.mxu1 %vm689_vm1, %v17514_v11  ;;  %15347 = vmatprep.subr.msk.mxu0 %vm754_vm0, %v17553_v26  ;;  %25672 = vst [vmem:[#allocation10_spill] sm:$0xff] %v17614_v43  ;;  %v17620_v45 = vsel %vm608_vm2, %v629_v38, %v630_v39  ;;  %25674 = vst [vmem:[#allocation12_spill] sm:$0xff] %v17630_v49  ;;  %v17640_v51 = vsel %vm608_vm2, %v630_v39, %v632_v44  ;;  %v637_v52 = vrot.slane %v17625_v48, 1  ;;  %v17656_v57 = vld [vmem:[%s17494_s24 + $0xa0] sm:$0x3]  ;;  %v17663_v58 = vld [vmem:[%s17494_s24 + $0xa8] sm:$0xff] }
  0x28   : > { %15205 = vmatprep.mubr.msk.f32.mxu1 %vm689_vm1, %v17524_v15  ;;  %25673 = vst [vmem:[#allocation11_spill] sm:$0xff] %v17620_v45  ;;  %25675 = vst [vmem:[#allocation13_spill] sm:$0xff] %v17640_v51  ;;  %v17651_v54 = vsel %vm608_vm2, %v634_v46, %v635_v47  ;;  %v639_v55 = vrot.slane %v17630_v49, 1  ;;  %v640_v56 = vrot.slane %v17633_v50, 1  ;;  %v17666_v59 = vld [vmem:[%s17494_s24 + $0xb0] sm:$0xff]  ;;  %v1281_v60 = vrot.slane %v17511_v10, 2 }
  0x29   : > { %15153 = vmatmul.mubr.msk.f32.gmra.mxu0 %vm689_vm1, %v17560_v27  ;;  %25676 = vst [vmem:[#allocation14_spill] sm:$0xff] %v17651_v54  ;;  %25677 = vst [vmem:[#allocation15_spill] sm:$0xff] %v17663_v58  ;;  %v17674_v61 = vsel %vm608_vm2, %v635_v47, %v637_v52  ;;  %v642_v62 = vrot.slane %v17656_v57, 1  ;;  %v1282_v63 = vrot.slane %v17514_v11, 2  ;;  %v1284_v0 = vrot.slane %v17521_v14, 2  ;;  %v17692_v8 = vld [vmem:[%s17494_s24 + $0xc0] sm:$0xff] }
  0x2a   : > { %15155 = vmatprep.mubr.msk.f32.mxu0 %vm689_vm1, %v17566_v29  ;;  %25678 = vst [vmem:[#allocation16_spill] sm:$0xff] %v17674_v61  ;;  %v17682_v1 = vsel %vm608_vm2, %v639_v55, %v640_v56  ;;  %v644_v2 = vrot.slane %v17663_v58, 1  ;;  %v645_v3 = vrot.slane %v17666_v59, 1  ;;  %v17687_v7 = vld [vmem:[%s17494_s24 + $0xb8] sm:$0x3]  ;;  %25680 = vst [vmem:[#allocation18_spill] sm:$0xff] %v17692_v8 }
  0x2b   : > { %15206 = vmatmul.mubr.msk.f32.gmra.mxu1 %vm689_vm1, %v17527_v16  ;;  %25679 = vst [vmem:[#allocation17_spill] sm:$0xff] %v17682_v1  ;;  %v17695_v9 = vld [vmem:[%s17494_s24 + $0xc8] sm:$0xff]  ;;  %v17698_v12 = vsel %vm1275_vm3, %v1281_v60, %v1282_v63  ;;  %v17701_v13 = vsel %vm1275_vm3, %v1282_v63, %v1284_v0  ;;  %v17708_v14 = vsel %vm608_vm2, %v640_v56, %v642_v62  ;;  %v647_v17 = vrot.slane %v17687_v7, 1  ;;  %v17719_v23 = vld [vmem:[%s17494_s24 + $0xd0] sm:$0x3]  ;;  %v17724_v28 = vld [vmem:[%s17494_s24 + $0xd8] sm:$0xff] }
  0x2c   : > { %15208 = vmatprep.mubr.msk.f32.mxu1 %vm689_vm1, %v17545_v24  ;;  %25681 = vst [vmem:[#allocation19_spill] sm:$0xff] %v17708_v14  ;;  %v17714_v18 = vsel %vm608_vm2, %v644_v2, %v645_v3  ;;  %v649_v19 = vrot.slane %v17692_v8, 1  ;;  %v650_v20 = vrot.slane %v17695_v9, 1  ;;  %25683 = vst [vmem:[#allocation21_spill] sm:$0xff] %v17724_v28  ;;  %v17727_v30 = vld [vmem:[%s17494_s24 + $0xe0] sm:$0xff]  ;;  %v652_v36 = vrot.slane %v17719_v23, 1 }
  0x2d   : > { %15156 = vmatmul.mubr.msk.f32.gmra.mxu0 %vm689_vm1, %v17588_v35  ;;  %25682 = vst [vmem:[#allocation20_spill] sm:$0xff] %v17714_v18  ;;  %v17734_v31 = vsel %vm608_vm2, %v645_v3, %v647_v17  ;;  %v654_v39 = vrot.slane %v17724_v28, 1  ;;  %v655_v44 = vrot.slane %v17727_v30, 1  ;;  %v17745_v46 = vld [vmem:[%s17494_s24 + $0xe8] sm:$0x3]  ;;  %v17750_v47 = vld [vmem:[%s17494_s24 + $0xf0] sm:$0xff] }
  0x2e   : > { %15158 = vmatprep.mubr.msk.f32.mxu0 %vm689_vm1, %v17594_v37  ;;  %25684 = vst [vmem:[#allocation22_spill] sm:$0xff] %v17734_v31  ;;  %v17740_v38 = vsel %vm608_vm2, %v649_v19, %v650_v20  ;;  %25686 = vst [vmem:[#allocation24_spill] sm:$0xff] %v17750_v47  ;;  %v17753_v52 = vld [vmem:[%s17494_s24 + $0xf8] sm:$0xff]  ;;  %v17760_v55 = vsel %vm608_vm2, %v650_v20, %v652_v36  ;;  %v657_v56 = vrot.slane %v17745_v46, 1  ;;  %v659_v62 = vrot.slane %v17750_v47, 1  ;;  %v17776_v2 = vld [vmem:[%s17494_s24 + $0x108] sm:$0xff] }
  0x2f   : > { %15209 = vmatmul.mubr.msk.f32.gmra.mxu1 %vm689_vm1, %v17548_v25  ;;  %25685 = vst [vmem:[#allocation23_spill] sm:$0xff] %v17740_v38  ;;  %25687 = vst [vmem:[#allocation25_spill] sm:$0xff] %v17760_v55  ;;  %v17766_v60 = vsel %vm608_vm2, %v654_v39, %v655_v44  ;;  %v660_v63 = vrot.slane %v17753_v52, 1  ;;  %v17771_v0 = vld [vmem:[%s17494_s24 + $0x100] sm:$0x3]  ;;  %v17779_v3 = vld [vmem:[%s17494_s24 + $0x110] sm:$0xff] }
  0x30   : > { %15211 = vmatprep.mubr.msk.f32.mxu1 %vm689_vm1, %v17578_v33  ;;  %25688 = vst [vmem:[#allocation26_spill] sm:$0xff] %v17766_v60  ;;  %25689 = vst [vmem:[#allocation27_spill] sm:$0xff] %v17776_v2  ;;  %v17786_v17 = vsel %vm608_vm2, %v655_v44, %v657_v56  ;;  %v662_v19 = vrot.slane %v17771_v0, 1  ;;  %v664_v36 = vrot.slane %v17776_v2, 1  ;;  %v665_v39 = vrot.slane %v17779_v3, 1  ;;  %v17802_v44 = vld [vmem:[%s17494_s24 + $0x120] sm:$0xff] }
  0x31   : > { %15159 = vmatmul.mubr.msk.f32.gmra.mxu0 %vm689_vm1, %v17614_v43  ;;  %25690 = vst [vmem:[#allocation28_spill] sm:$0xff] %v17786_v17  ;;  %v17792_v20 = vsel %vm608_vm2, %v659_v62, %v660_v63  ;;  %25692 = vst [vmem:[#allocation30_spill] sm:$0xff] %v17802_v44  ;;  %v17805_v56 = vld [vmem:[%s17494_s24 + $0x128] sm:$0xff]  ;;  %v17901_v29 = vld [vmem:[%s17494_s24 + $0x178] sm:$0x3]  ;;  %s17291_s20 = sshll.u32 %s17350_s0, 4  ;;  %s17292_s20 = int_to_ptr.vmem [resolvable:$false] %s17291_s20 }
  0x32   : > { %15161 = vmatprep.mubr.msk.f32.mxu0 %vm689_vm1, %v17620_v45  ;;  %25691 = vst [vmem:[#allocation29_spill] sm:$0xff] %v17792_v20  ;;  %v17812_v62 = vsel %vm608_vm2, %v660_v63, %v662_v19  ;;  %v17828_v63 = vld [vmem:[%s17494_s24 + $0x138] sm:$0xff]  ;;  %v17831_v19 = vld [vmem:[%s17494_s24 + $0x140] sm:$0xff]  ;;  %s17293_s16 = scalar_lea.vmem %s17292_s20, 2048 }
  0x33   : > { %15212 = vmatmul.mubr.msk.f32.gmra.mxu1 %vm689_vm1, %v17581_v34  ;;  %25693 = vst [vmem:[#allocation31_spill] sm:$0xff] %v17812_v62  ;;  %25695 = vst [vmem:[#allocation33_spill] sm:$0xff] %v17828_v63 }
  0x34   : > { %15214 = vmatprep.mubr.msk.f32.mxu1 %vm689_vm1, %v17604_v41 }
  0x35   : > { %15162 = vmatmul.mubr.msk.f32.gmra.mxu0 %vm689_vm1, %v17640_v51 }
  0x36   : > { %15164 = vmatprep.mubr.msk.f32.mxu0 %vm689_vm1, %v17651_v54 }
  0x37   : > { %15215 = vmatmul.mubr.msk.f32.gmra.mxu1 %vm689_vm1, %v17607_v42 }
  0x38   : > { %15217 = vmatprep.mubr.msk.f32.mxu1 %vm689_vm1, %v17630_v49 }
  0x39   : > { %15165 = vmatmul.mubr.msk.f32.gmra.mxu0 %vm689_vm1, %v17674_v61  ;;  %v17849_v61 = vld [vmem:[%s17494_s24 + $0x148] sm:$0x3] }
  0x3a   : > { %15167 = vmatprep.mubr.msk.f32.mxu0 %vm689_vm1, %v17682_v1  ;;  %v674_v1 = vrot.slane %v17828_v63, 1 }
  0x3b   : > { %15218 = vmatmul.mubr.msk.f32.gmra.mxu1 %vm689_vm1, %v17633_v50 }
  0x3c   : > { %15220 = vmatprep.mubr.msk.f32.mxu1 %vm689_vm1, %v17663_v58 }
  0x3d   : > { %15168 = vmatmul.mubr.msk.f32.gmra.mxu0 %vm689_vm1, %v17708_v14 }
  0x3e   : > { %15170 = vmatprep.mubr.msk.f32.mxu0 %vm689_vm1, %v17714_v18  ;;  %v17823_v18 = vld [vmem:[%s17494_s24 + $0x130] sm:$0x3] }
  0x3f   : > { %15221 = vmatmul.mubr.msk.f32.gmra.mxu1 %vm689_vm1, %v17666_v59 }
  0x40   : > { %15223 = vmatprep.mubr.msk.f32.mxu1 %vm689_vm1, %v17692_v8 }
  0x41   : > { %15171 = vmatmul.mubr.msk.f32.gmra.mxu0 %vm689_vm1, %v17734_v31  ;;  %v669_v31 = vrot.slane %v17802_v44, 1 }
  0x42   : > { %15173 = vmatprep.mubr.msk.f32.mxu0 %vm689_vm1, %v17740_v38  ;;  %v17818_v38 = vsel %vm608_vm2, %v664_v36, %v665_v39 }
  0x43   : > { %15224 = vmatmul.mubr.msk.f32.gmra.mxu1 %vm689_vm1, %v17695_v9  ;;  %25694 = vst [vmem:[#allocation32_spill] sm:$0xff] %v17818_v38 }
  0x44   : > { %15226 = vmatprep.mubr.msk.f32.mxu1 %vm689_vm1, %v17724_v28 }
  0x45   : > { %15174 = vmatmul.mubr.msk.f32.gmra.mxu0 %vm689_vm1, %v17760_v55  ;;  %v17797_v55 = vld [vmem:[%s17494_s24 + $0x118] sm:$0x3] }
  0x46   : > { %15176 = vmatprep.mubr.msk.f32.mxu0 %vm689_vm1, %v17766_v60  ;;  %v667_v60 = vrot.slane %v17797_v55, 1 }
  0x47   : > { %15227 = vmatmul.mubr.msk.f32.gmra.mxu1 %vm689_vm1, %v17727_v30 }
  0x48   : > { %15229 = vmatprep.mubr.msk.f32.mxu1 %vm689_vm1, %v17750_v47  ;;  %v17838_v36 = vsel %vm608_vm2, %v665_v39, %v667_v60  ;;  %v17854_v60 = vld [vmem:[%s17494_s24 + $0x150] sm:$0xff]  ;;  %v17857_v39 = vld [vmem:[%s17494_s24 + $0x158] sm:$0xff] }
  0x49   : > { %15177 = vmatmul.mubr.msk.f32.gmra.mxu0 %vm689_vm1, %v17786_v17  ;;  %v670_v17 = vrot.slane %v17805_v56, 1  ;;  %25696 = vst [vmem:[#allocation34_spill] sm:$0xff] %v17838_v36  ;;  %25698 = vst [vmem:[#allocation36_spill] sm:$0xff] %v17854_v60  ;;  %v679_v51 = vrot.slane %v17854_v60, 1  ;;  %v680_v45 = vrot.slane %v17857_v39, 1 }
  0x4a   : > { %15179 = vmatprep.mubr.msk.f32.mxu0 %vm689_vm1, %v17792_v20  ;;  %v672_v20 = vrot.slane %v17823_v18, 1 }
  0x4b   : > { %15230 = vmatmul.mubr.msk.f32.gmra.mxu1 %vm689_vm1, %v17753_v52  ;;  %v17844_v14 = vsel %vm608_vm2, %v669_v31, %v670_v17  ;;  %v17896_v43 = vsel %vm608_vm2, %v679_v51, %v680_v45  ;;  %v687_v51 = vrot.slane %v17901_v29, 1 }
  0x4c   : > { %15232 = vmatprep.mubr.msk.f32.mxu1 %vm689_vm1, %v17776_v2  ;;  %25697 = vst [vmem:[#allocation35_spill] sm:$0xff] %v17844_v14  ;;  %v17864_v31 = vsel %vm608_vm2, %v670_v17, %v672_v20  ;;  %v17880_v17 = vld [vmem:[%s17494_s24 + $0x168] sm:$0xff]  ;;  %v17883_v20 = vld [vmem:[%s17494_s24 + $0x170] sm:$0xff] }
  0x4d   : > { %15180 = vmatmul.mubr.msk.f32.gmra.mxu0 %vm689_vm1, %v17812_v62  ;;  %v675_v62 = vrot.slane %v17831_v19, 1  ;;  %25699 = vst [vmem:[#allocation37_spill] sm:$0xff] %v17864_v31  ;;  %25701 = vst [vmem:[#allocation39_spill] sm:$0xff] %v17880_v17  ;;  %v684_v37 = vrot.slane %v17880_v17, 1  ;;  %v685_v35 = vrot.slane %v17883_v20, 1 }
  0x4e   : > { %15182 = vmatprep.mubr.msk.f32.mxu0 %vm689_vm1, %v17818_v38  ;;  %v677_v38 = vrot.slane %v17849_v61, 1 }
  0x4f   : > { %15233 = vmatmul.mubr.msk.f32.gmra.mxu1 %vm689_vm1, %v17779_v3  ;;  %v17870_v54 = vsel %vm608_vm2, %v674_v1, %v675_v62 }
  0x50   : > { %15235 = vmatprep.mubr.msk.f32.mxu1 %vm689_vm1, %v17802_v44  ;;  %25700 = vst [vmem:[#allocation38_spill] sm:$0xff] %v17870_v54  ;;  %v17890_v1 = vsel %vm608_vm2, %v675_v62, %v677_v38  ;;  %v17916_v62 = vsel %vm608_vm2, %v684_v37, %v685_v35  ;;  %v1287_v37 = vrot.slane %v17527_v16, 2 }
  0x51   : > { %15183 = vmatmul.mubr.msk.f32.gmra.mxu0 %vm689_vm1, %v17838_v36  ;;  %v17875_v36 = vld [vmem:[%s17494_s24 + $0x160] sm:$0x3] }
  0x52   : > { %15185 = vmatprep.mubr.msk.f32.mxu0 %vm689_vm1, %v17844_v14  ;;  %v682_v14 = vrot.slane %v17875_v36, 1 }
  0x53   : > { %15236 = vmatmul.mubr.msk.f32.gmra.mxu1 %vm689_vm1, %v17805_v56 }
  0x54   : > { %15238 = vmatprep.mubr.msk.f32.mxu1 %vm689_vm1, %v17828_v63  ;;  %v17910_v38 = vsel %vm608_vm2, %v680_v45, %v682_v14  ;;  %v1279_v45 = vrot.slane %v17503_v6, 2  ;;  %v17928_v14 = vsel %vm608_vm2, %v685_v35, %v687_v51  ;;  %v17942_v6 = vld [vmem:[%s25667_s1 + $0x1c] sm:$0xf]  ;;  %v1286_v35 = vrot.slane %v17524_v15, 2 }
  0x55   : > { %15186 = vmatmul.mubr.msk.f32.gmra.mxu0 %vm689_vm1, %v17864_v31  ;;  %v1277_v31 = vrot.slane %v17500_v5, 2 }
  0x56   : > { %15188 = vmatprep.mubr.msk.f32.mxu0 %vm689_vm1, %v17870_v54  ;;  %v1276_v54 = vrot.slane %v17497_v4, 2 }
  0x57   : > { %15239 = vmatmul.mubr.msk.f32.gmra.mxu1 %vm689_vm1, %v17831_v19  ;;  %v1280_v5 = vsel %vm1275_vm3, %v1277_v31, %v1279_v45  ;;  %v1296_v45 = vrot.slane %v17578_v33, 2 }
  0x58   : > { %15241 = vmatprep.mubr.msk.f32.mxu1 %vm689_vm1, %v17854_v60  ;;  %v1278_v4 = vsel %vm1275_vm3, %v1276_v54, %v1277_v31  ;;  %v1291_v54 = vrot.slane %v17545_v24, 2  ;;  %v1292_v31 = vrot.slane %v17548_v25, 2 }
  0x59   : > { %15189 = vmatmul.mubr.msk.f32.gmra.mxu0 %vm689_vm1, %v17890_v1 }
  0x5a   : > { %15191 = vmatprep.mubr.msk.f32.mxu0 %vm689_vm1, %v17896_v43  ;;  %v17987_v51 = vsel %vm1275_vm3, %v1291_v54, %v1292_v31  ;;  %v1304_v54 = vrot.slane %v17625_v48, 2 }
  0x5b   : > { %15242 = vmatmul.mubr.msk.f32.gmra.mxu1 %vm689_vm1, %v17857_v39 }
  0x5c   : > { %15244 = vmatprep.mubr.msk.f32.mxu1 %vm689_vm1, %v17880_v17 }
  0x5d   : > { %15192 = vmatmul.mubr.msk.f32.gmra.mxu0 %vm689_vm1, %v17910_v38 }
  0x5e   : > { %15194 = vmatprep.mubr.msk.f32.mxu0 %vm689_vm1, %v17916_v62 }
  0x5f   : > { %15245 = vmatmul.mubr.msk.f32.gmra.mxu1 %vm689_vm1, %v17883_v20 }
  0x60   : > { %15299 = vmatprep.mubr.msk.f32.mxu1 %vm689_vm1, %v17511_v10  ;;  %v17955_v10 = vld [vmem:[%s25667_s1 + $0x18] sm:$0xf] }
  0x61   : > { %15195 = vmatmul.mubr.msk.f32.gmra.mxu0 %vm689_vm1, %v17928_v14 }
  0x62   : > { %15249 = vmatprep.mubr.msk.f32.mxu0 %vm689_vm1, %v1278_v4  ;;  %v1297_v4 = vrot.slane %v17581_v34, 2 }
  0x63   : > { %15300 = vmatmul.mubr.msk.f32.vlgmr.msra.gmra.mxu1 %vm689_vm1, %v17514_v11  ;;  %v1289_v11 = vrot.slane %v17536_v21, 2 }
  0x64   : > { %15302 = vmatprep.mubr.msk.f32.mxu1 %vm689_vm1, %v17524_v15  ;;  %15398 = vmatpush3.msk.msra.mxu1 %vm754_vm0, %v17646_v53  ;;  %v17968_v53 = vsel %vm1275_vm3, %v1286_v35, %v1287_v37  ;;  %v18004_v35 = vsel %vm1275_vm3, %v1296_v45, %v1297_v4  ;;  %v1307_v45 = vrot.slane %v17633_v50, 2 }
  0x65   : > { %15250 = vmatmul.mubr.msk.f32.vlgmr.msra.gmra.mxu0 %vm689_vm1, %v1280_v5  ;;  %15497 = vmatprep.subr.msk.mxu1 %vm754_vm0, %v17942_v6  ;;  %v17981_v21 = vsel %vm1275_vm3, %v1287_v37, %v1289_v11  ;;  %v1299_v5 = vrot.slane %v17599_v40, 2  ;;  %25702 = vst [vmem:[#allocation40_spill] sm:$0xff] %v18004_v35  ;;  %v1301_v37 = vrot.slane %v17604_v41, 2  ;;  %v1302_v11 = vrot.slane %v17607_v42, 2 }
  0x66   : > { %15348 = vmatpush3.msk.msra.mxu0 %vm754_vm0, %v17553_v26  ;;  %15252 = vmatprep.mubr.msk.f32.mxu0 %vm689_vm1, %v17698_v12  ;;  %v1294_v26 = vrot.slane %v17571_v32, 2 }
  0x67   : > { %15303 = vmatmul.mubr.msk.f32.gmra.mxu1 %vm689_vm1, %v17527_v16  ;;  %15447 = vmatprep.subr.msk.mxu0 %vm754_vm0, %v17955_v10  ;;  %v18015_v40 = vsel %vm1275_vm3, %v1297_v4, %v1299_v5  ;;  %v18032_v48 = vsel %vm1275_vm3, %v1302_v11, %v1304_v54  ;;  %v1309_v4 = vrot.slane %v17656_v57, 2 }
  0x68   : > { %15305 = vmatprep.mubr.msk.f32.mxu1 %vm689_vm1, %v17545_v24  ;;  %v17998_v32 = vsel %vm1275_vm3, %v1292_v31, %v1294_v26  ;;  %25703 = vst [vmem:[#allocation41_spill] sm:$0xff] %v18015_v40  ;;  %v18021_v31 = vsel %vm1275_vm3, %v1301_v37, %v1302_v11  ;;  %v1306_v26 = vrot.slane %v17630_v49, 2  ;;  %25705 = vst [vmem:[#allocation43_spill] sm:$0xff] %v18032_v48  ;;  %v1311_v37 = vrot.slane %v17663_v58, 2 }
  0x69   : > { %15253 = vmatmul.mubr.msk.f32.gmra.mxu0 %vm689_vm1, %v17701_v13  ;;  %25704 = vst [vmem:[#allocation42_spill] sm:$0xff] %v18021_v31  ;;  %v18049_v57 = vsel %vm1275_vm3, %v1307_v45, %v1309_v4  ;;  %v1314_v11 = vrot.slane %v17687_v7, 2 }
  0x6a   : > { %15255 = vmatprep.mubr.msk.f32.mxu0 %vm689_vm1, %v17968_v53  ;;  %v18038_v5 = vsel %vm1275_vm3, %v1306_v26, %v1307_v45  ;;  %25707 = vst [vmem:[#allocation45_spill] sm:$0xff] %v18049_v57  ;;  %v1316_v26 = vrot.slane %v17692_v8, 2  ;;  %v1319_v45 = vrot.slane %v17719_v23, 2  ;;  %v1324_v23 = vrot.slane %v17745_v46, 2 }
  0x6b   : > { %15306 = vmatmul.mubr.msk.f32.gmra.mxu1 %vm689_vm1, %v17548_v25  ;;  %25706 = vst [vmem:[#allocation44_spill] sm:$0xff] %v18038_v5  ;;  %v1329_v46 = vrot.slane %v17771_v0, 2  ;;  %v1334_v0 = vrot.slane %v17797_v55, 2  ;;  %v1339_v55 = vrot.slane %v17823_v18, 2 }
  0x6c   : > { %15308 = vmatprep.mubr.msk.f32.mxu1 %vm689_vm1, %v17578_v33 }
  0x6d   : > { %15256 = vmatmul.mubr.msk.f32.gmra.mxu0 %vm689_vm1, %v17981_v21 }
  0x6e   : > { %15258 = vmatprep.mubr.msk.f32.mxu0 %vm689_vm1, %v17987_v51 }
  0x6f   : > { %15309 = vmatmul.mubr.msk.f32.gmra.mxu1 %vm689_vm1, %v17581_v34 }
  0x70   : > { %15311 = vmatprep.mubr.msk.f32.mxu1 %vm689_vm1, %v17604_v41 }
  0x71   : > { %15259 = vmatmul.mubr.msk.f32.gmra.mxu0 %vm689_vm1, %v17998_v32 }
  0x72   : > { %15261 = vmatprep.mubr.msk.f32.mxu0 %vm689_vm1, %v18004_v35 }
  0x73   : > { %15312 = vmatmul.mubr.msk.f32.gmra.mxu1 %vm689_vm1, %v17607_v42 }
  0x74   : > { %15314 = vmatprep.mubr.msk.f32.mxu1 %vm689_vm1, %v17630_v49  ;;  %v1312_v49 = vrot.slane %v17666_v59, 2 }
  0x75   : > { %15262 = vmatmul.mubr.msk.f32.gmra.mxu0 %vm689_vm1, %v18015_v40 }
  0x76   : > { %15264 = vmatprep.mubr.msk.f32.mxu0 %vm689_vm1, %v18021_v31  ;;  %v18055_v54 = vsel %vm1275_vm3, %v1311_v37, %v1312_v49  ;;  %v18066_v7 = vsel %vm1275_vm3, %v1312_v49, %v1314_v11  ;;  %v1321_v37 = vrot.slane %v17724_v28, 2 }
  0x77   : > { %15315 = vmatmul.mubr.msk.f32.gmra.mxu1 %vm689_vm1, %v17633_v50  ;;  %25708 = vst [vmem:[#allocation46_spill] sm:$0xff] %v18055_v54  ;;  %25709 = vst [vmem:[#allocation47_spill] sm:$0xff] %v18066_v7 }
  0x78   : > { %15317 = vmatprep.mubr.msk.f32.mxu1 %vm689_vm1, %v17663_v58  ;;  %v1317_v58 = vrot.slane %v17695_v9, 2 }
  0x79   : > { %15265 = vmatmul.mubr.msk.f32.gmra.mxu0 %vm689_vm1, %v18032_v48 }
  0x7a   : > { %15267 = vmatprep.mubr.msk.f32.mxu0 %vm689_vm1, %v18038_v5  ;;  %v18072_v4 = vsel %vm1275_vm3, %v1316_v26, %v1317_v58  ;;  %v18083_v49 = vsel %vm1275_vm3, %v1317_v58, %v1319_v45  ;;  %v1326_v26 = vrot.slane %v17750_v47, 2 }
  0x7b   : > { %15318 = vmatmul.mubr.msk.f32.gmra.mxu1 %vm689_vm1, %v17666_v59  ;;  %25710 = vst [vmem:[#allocation48_spill] sm:$0xff] %v18072_v4  ;;  %25711 = vst [vmem:[#allocation49_spill] sm:$0xff] %v18083_v49 }
  0x7c   : > { %15320 = vmatprep.mubr.msk.f32.mxu1 %vm689_vm1, %v17692_v8  ;;  %v1322_v8 = vrot.slane %v17727_v30, 2 }
  0x7d   : > { %15268 = vmatmul.mubr.msk.f32.gmra.mxu0 %vm689_vm1, %v18049_v57 }
  0x7e   : > { %15270 = vmatprep.mubr.msk.f32.mxu0 %vm689_vm1, %v18055_v54  ;;  %v18089_v11 = vsel %vm1275_vm3, %v1321_v37, %v1322_v8  ;;  %v18100_v58 = vsel %vm1275_vm3, %v1322_v8, %v1324_v23  ;;  %v1331_v37 = vrot.slane %v17776_v2, 2 }
  0x7f   : > { %15321 = vmatmul.mubr.msk.f32.gmra.mxu1 %vm689_vm1, %v17695_v9  ;;  %25712 = vst [vmem:[#allocation50_spill] sm:$0xff] %v18089_v11  ;;  %25713 = vst [vmem:[#allocation51_spill] sm:$0xff] %v18100_v58 }
  0x80   : > { %15323 = vmatprep.mubr.msk.f32.mxu1 %vm689_vm1, %v17724_v28  ;;  %v1327_v28 = vrot.slane %v17753_v52, 2 }
  0x81   : > { %15271 = vmatmul.mubr.msk.f32.gmra.mxu0 %vm689_vm1, %v18066_v7 }
  0x82   : > { %15273 = vmatprep.mubr.msk.f32.mxu0 %vm689_vm1, %v18072_v4  ;;  %v18106_v45 = vsel %vm1275_vm3, %v1326_v26, %v1327_v28  ;;  %v18117_v8 = vsel %vm1275_vm3, %v1327_v28, %v1329_v46  ;;  %v1336_v26 = vrot.slane %v17802_v44, 2 }
  0x83   : > { %15324 = vmatmul.mubr.msk.f32.gmra.mxu1 %vm689_vm1, %v17727_v30  ;;  %25714 = vst [vmem:[#allocation52_spill] sm:$0xff] %v18106_v45  ;;  %25715 = vst [vmem:[#allocation53_spill] sm:$0xff] %v18117_v8 }
  0x84   : > { %15326 = vmatprep.mubr.msk.f32.mxu1 %vm689_vm1, %v17750_v47  ;;  %v1332_v47 = vrot.slane %v17779_v3, 2 }
  0x85   : > { %15274 = vmatmul.mubr.msk.f32.gmra.mxu0 %vm689_vm1, %v18083_v49 }
  0x86   : > { %15276 = vmatprep.mubr.msk.f32.mxu0 %vm689_vm1, %v18089_v11  ;;  %v18123_v23 = vsel %vm1275_vm3, %v1331_v37, %v1332_v47  ;;  %v18134_v28 = vsel %vm1275_vm3, %v1332_v47, %v1334_v0  ;;  %v1341_v37 = vrot.slane %v17828_v63, 2  ;;  %v1344_v47 = vrot.slane %v17849_v61, 2 }
  0x87   : > { %15327 = vmatmul.mubr.msk.f32.gmra.mxu1 %vm689_vm1, %v17753_v52  ;;  %25716 = vst [vmem:[#allocation54_spill] sm:$0xff] %v18123_v23  ;;  %25717 = vst [vmem:[#allocation55_spill] sm:$0xff] %v18134_v28 }
  0x88   : > { %15329 = vmatprep.mubr.msk.f32.mxu1 %vm689_vm1, %v17776_v2  ;;  %v1337_v2 = vrot.slane %v17805_v56, 2 }
  0x89   : > { %15277 = vmatmul.mubr.msk.f32.gmra.mxu0 %vm689_vm1, %v18100_v58 }
  0x8a   : > { %15279 = vmatprep.mubr.msk.f32.mxu0 %vm689_vm1, %v18106_v45  ;;  %v18140_v46 = vsel %vm1275_vm3, %v1336_v26, %v1337_v2  ;;  %v18151_v18 = vsel %vm1275_vm3, %v1337_v2, %v1339_v55  ;;  %v1346_v26 = vrot.slane %v17854_v60, 2  ;;  %v1349_v2 = vrot.slane %v17875_v36, 2 }
  0x8b   : > { %15330 = vmatmul.mubr.msk.f32.gmra.mxu1 %vm689_vm1, %v17779_v3  ;;  %25718 = vst [vmem:[#allocation56_spill] sm:$0xff] %v18140_v46  ;;  %25719 = vst [vmem:[#allocation57_spill] sm:$0xff] %v18151_v18 }
  0x8c   : > { %15332 = vmatprep.mubr.msk.f32.mxu1 %vm689_vm1, %v17802_v44  ;;  %v1342_v44 = vrot.slane %v17831_v19, 2 }
  0x8d   : > { %15280 = vmatmul.mubr.msk.f32.gmra.mxu0 %vm689_vm1, %v18117_v8 }
  0x8e   : > { %15282 = vmatprep.mubr.msk.f32.mxu0 %vm689_vm1, %v18123_v23  ;;  %v18157_v0 = vsel %vm1275_vm3, %v1341_v37, %v1342_v44  ;;  %v18168_v61 = vsel %vm1275_vm3, %v1342_v44, %v1344_v47  ;;  %v1351_v37 = vrot.slane %v17880_v17, 2  ;;  %v18183_v44 = vld [vmem:[%s17494_s24 + $0x180] sm:$0xff]  ;;  %v1354_v47 = vrot.slane %v17901_v29, 2 }
  0x8f   : > { %15333 = vmatmul.mubr.msk.f32.gmra.mxu1 %vm689_vm1, %v17805_v56  ;;  %25720 = vst [vmem:[#allocation58_spill] sm:$0xff] %v18157_v0  ;;  %25721 = vst [vmem:[#allocation59_spill] sm:$0xff] %v18168_v61  ;;  %v18225_v29 = vld [vmem:[%s25667_s1 + $0x20] sm:$0xf] }
  0x90   : > { %15335 = vmatprep.mubr.msk.f32.mxu1 %vm689_vm1, %v17828_v63  ;;  %v1347_v63 = vrot.slane %v17857_v39, 2 }
  0x91   : > { %15283 = vmatmul.mubr.msk.f32.gmra.mxu0 %vm689_vm1, %v18134_v28 }
  0x92   : > { %15285 = vmatprep.mubr.msk.f32.mxu0 %vm689_vm1, %v18140_v46  ;;  %v18174_v55 = vsel %vm1275_vm3, %v1346_v26, %v1347_v63  ;;  %v18188_v36 = vsel %vm1275_vm3, %v1347_v63, %v1349_v2  ;;  %v25732_v2 = vld [vmem:[#allocation16_spill] sm:$0xff] }
  0x93   : > { %15336 = vmatmul.mubr.msk.f32.gmra.mxu1 %vm689_vm1, %v17831_v19  ;;  %25722 = vst [vmem:[#allocation60_spill] sm:$0xff] %v18174_v55  ;;  %25723 = vst [vmem:[#allocation61_spill] sm:$0xff] %v18188_v36 }
  0x94   : > { %15338 = vmatprep.mubr.msk.f32.mxu1 %vm689_vm1, %v17854_v60  ;;  %v1352_v60 = vrot.slane %v17883_v20, 2 }
  0x95   : > { %15286 = vmatmul.mubr.msk.f32.gmra.mxu0 %vm689_vm1, %v18151_v18 }
  0x96   : > { %15288 = vmatprep.mubr.msk.f32.mxu0 %vm689_vm1, %v18157_v0  ;;  %v18194_v26 = vsel %vm1275_vm3, %v1351_v37, %v1352_v60  ;;  %v18206_v63 = vsel %vm1275_vm3, %v1352_v60, %v1354_v47  ;;  %v25729_v60 = vld [vmem:[#allocation11_spill] sm:$0xff]  ;;  %v25733_v37 = vld [vmem:[#allocation17_spill] sm:$0xff] }
  0x97   : > { %15339 = vmatmul.mubr.msk.f32.gmra.mxu1 %vm689_vm1, %v17857_v39  ;;  %25724 = vst [vmem:[#allocation62_spill] sm:$0xff] %v18194_v26  ;;  %v25734_v47 = vld [vmem:[#allocation19_spill] sm:$0xff] }
  0x98   : > { %15341 = vmatprep.mubr.msk.f32.mxu1 %vm689_vm1, %v17880_v17  ;;  %v18199_v17 = vld [vmem:[%s17494_s24 + $0x188] sm:$0xff] }
  0x99   : > { %15289 = vmatmul.mubr.msk.f32.gmra.mxu0 %vm689_vm1, %v18168_v61 }
  0x9a   : > { %15291 = vmatprep.mubr.msk.f32.mxu0 %vm689_vm1, %v18174_v55 }
  0x9b   : > { %15342 = vmatmul.mubr.msk.f32.gmra.mxu1 %vm689_vm1, %v17883_v20 }
  0x9c   : > { %15344 = vmatprep.mubr.msk.f32.mxu1 %vm689_vm1, %v18183_v44 }
  0x9d   : > { %15292 = vmatmul.mubr.msk.f32.gmra.mxu0 %vm689_vm1, %v18188_v36 }
  0x9e   : > { %15294 = vmatprep.mubr.msk.f32.mxu0 %vm689_vm1, %v18194_v26 }
  0x9f   : > { %15345 = vmatmul.mubr.msk.f32.gmra.mxu1 %vm689_vm1, %v18199_v17 }
  0xa0   : > { %15399 = vmatprep.mubr.msk.f32.mxu1 %vm689_vm1, %v17698_v12  ;;  %v25726_v12 = vld [vmem:[#allocation8_spill] sm:$0xff] }
  0xa1   : > { %15295 = vmatmul.mubr.msk.f32.gmra.mxu0 %vm689_vm1, %v18206_v63 }
  0xa2   : > { %15349 = vmatprep.mubr.msk.f32.mxu0 %vm689_vm1, %v17541_v22  ;;  %v25725_v22 = vld [vmem:[#allocation7_spill] sm:$0xff] }
  0xa3   : > { %15400 = vmatmul.mubr.msk.f32.vlgmr.msra.gmra.mxu1 %vm689_vm1, %v17701_v13  ;;  %v25727_v13 = vld [vmem:[#allocation9_spill] sm:$0xff] }
  0xa4   : > { %15402 = vmatprep.mubr.msk.f32.mxu1 %vm689_vm1, %v17968_v53  ;;  %15498 = vmatpush3.msk.msra.mxu1 %vm754_vm0, %v17942_v6  ;;  %v25730_v6 = vld [vmem:[#allocation13_spill] sm:$0xff] }
  0xa5   : > { %15350 = vmatmul.mubr.msk.f32.vlgmr.msra.gmra.mxu0 %vm689_vm1, %v17560_v27  ;;  %v25728_v27 = vld [vmem:[#allocation10_spill] sm:$0xff] }
  0xa6   : > { %15448 = vmatpush3.msk.msra.mxu0 %vm754_vm0, %v17955_v10  ;;  %15352 = vmatprep.mubr.msk.f32.mxu0 %vm689_vm1, %v25725_v22  ;;  %v25731_v10 = vld [vmem:[#allocation14_spill] sm:$0xff] }
  0xa7   : > { %15403 = vmatmul.mubr.msk.f32.gmra.mxu1 %vm689_vm1, %v17981_v21  ;;  %15547 = vmatprep.subr.msk.mxu0 %vm754_vm0, %v18225_v29 }
  0xa8   : > { %15405 = vmatprep.mubr.msk.f32.mxu1 %vm689_vm1, %v17987_v51 }
  0xa9   : > { %15353 = vmatmul.mubr.msk.f32.gmra.mxu0 %vm689_vm1, %v25726_v12 }
  0xaa   : > { %15355 = vmatprep.mubr.msk.f32.mxu0 %vm689_vm1, %v25727_v13 }
  0xab   : > { %15406 = vmatmul.mubr.msk.f32.gmra.mxu1 %vm689_vm1, %v17998_v32 }
  0xac   : > { %15408 = vmatprep.mubr.msk.f32.mxu1 %vm689_vm1, %v18004_v35 }
  0xad   : > { %15356 = vmatmul.mubr.msk.f32.gmra.mxu0 %vm689_vm1, %v25728_v27 }
  0xae   : > { %15358 = vmatprep.mubr.msk.f32.mxu0 %vm689_vm1, %v25729_v60 }
  0xaf   : > { %15409 = vmatmul.mubr.msk.f32.gmra.mxu1 %vm689_vm1, %v18015_v40 }
  0xb0   : > { %15411 = vmatprep.mubr.msk.f32.mxu1 %vm689_vm1, %v18021_v31  ;;  %v25735_v31 = vld [vmem:[#allocation20_spill] sm:$0xff] }
  0xb1   : > { %15359 = vmatmul.mubr.msk.f32.gmra.mxu0 %vm689_vm1, %v25730_v6 }
  0xb2   : > { %15361 = vmatprep.mubr.msk.f32.mxu0 %vm689_vm1, %v25731_v10 }
  0xb3   : > { %15412 = vmatmul.mubr.msk.f32.gmra.mxu1 %vm689_vm1, %v18032_v48  ;;  %v25737_v48 = vld [vmem:[#allocation23_spill] sm:$0xff] }
  0xb4   : > { %15414 = vmatprep.mubr.msk.f32.mxu1 %vm689_vm1, %v18038_v5  ;;  %v25736_v5 = vld [vmem:[#allocation22_spill] sm:$0xff] }
  0xb5   : > { %15362 = vmatmul.mubr.msk.f32.gmra.mxu0 %vm689_vm1, %v25732_v2 }
  0xb6   : > { %15364 = vmatprep.mubr.msk.f32.mxu0 %vm689_vm1, %v25733_v37 }
  0xb7   : > { %15415 = vmatmul.mubr.msk.f32.gmra.mxu1 %vm689_vm1, %v18049_v57  ;;  %v25739_v57 = vld [vmem:[#allocation26_spill] sm:$0xff] }
  0xb8   : > { %15417 = vmatprep.mubr.msk.f32.mxu1 %vm689_vm1, %v18055_v54  ;;  %v25738_v54 = vld [vmem:[#allocation25_spill] sm:$0xff] }
  0xb9   : > { %15365 = vmatmul.mubr.msk.f32.gmra.mxu0 %vm689_vm1, %v25734_v47 }
  0xba   : > { %15367 = vmatprep.mubr.msk.f32.mxu0 %vm689_vm1, %v25735_v31 }
  0xbb   : > { %15418 = vmatmul.mubr.msk.f32.gmra.mxu1 %vm689_vm1, %v18066_v7  ;;  %v25741_v7 = vld [vmem:[#allocation29_spill] sm:$0xff] }
  0xbc   : > { %15420 = vmatprep.mubr.msk.f32.mxu1 %vm689_vm1, %v18072_v4  ;;  %v25740_v4 = vld [vmem:[#allocation28_spill] sm:$0xff] }
  0xbd   : > { %15368 = vmatmul.mubr.msk.f32.gmra.mxu0 %vm689_vm1, %v25736_v5 }
  0xbe   : > { %15370 = vmatprep.mubr.msk.f32.mxu0 %vm689_vm1, %v25737_v48 }
  0xbf   : > { %15421 = vmatmul.mubr.msk.f32.gmra.mxu1 %vm689_vm1, %v18083_v49  ;;  %v25743_v49 = vld [vmem:[#allocation32_spill] sm:$0xff] }
  0xc0   : > { %15423 = vmatprep.mubr.msk.f32.mxu1 %vm689_vm1, %v18089_v11  ;;  %v25742_v11 = vld [vmem:[#allocation31_spill] sm:$0xff] }
  0xc1   : > { %15371 = vmatmul.mubr.msk.f32.gmra.mxu0 %vm689_vm1, %v25738_v54 }
  0xc2   : > { %15373 = vmatprep.mubr.msk.f32.mxu0 %vm689_vm1, %v25739_v57 }
  0xc3   : > { %15424 = vmatmul.mubr.msk.f32.gmra.mxu1 %vm689_vm1, %v18100_v58  ;;  %v2217_v58 = vrot.slane %v18199_v17, 2 }
  0xc4   : > { %15426 = vmatprep.mubr.msk.f32.mxu1 %vm689_vm1, %v18106_v45  ;;  %v25744_v45 = vld [vmem:[#allocation34_spill] sm:$0xff] }
  0xc5   : > { %15374 = vmatmul.mubr.msk.f32.gmra.mxu0 %vm689_vm1, %v25740_v4 }
  0xc6   : > { %15376 = vmatprep.mubr.msk.f32.mxu0 %vm689_vm1, %v25741_v7 }
  0xc7   : > { %15427 = vmatmul.mubr.msk.f32.gmra.mxu1 %vm689_vm1, %v18117_v8  ;;  %v25745_v8 = vld [vmem:[#allocation35_spill] sm:$0xff] }
  0xc8   : > { %15429 = vmatprep.mubr.msk.f32.mxu1 %vm689_vm1, %v18123_v23  ;;  %v25746_v23 = vld [vmem:[#allocation37_spill] sm:$0xff] }
  0xc9   : > { %15377 = vmatmul.mubr.msk.f32.gmra.mxu0 %vm689_vm1, %v25742_v11 }
  0xca   : > { %15379 = vmatprep.mubr.msk.f32.mxu0 %vm689_vm1, %v25743_v49 }
  0xcb   : > { %15430 = vmatmul.mubr.msk.f32.gmra.mxu1 %vm689_vm1, %v18134_v28  ;;  %v25747_v28 = vld [vmem:[#allocation38_spill] sm:$0xff] }
  0xcc   : > { %15432 = vmatprep.mubr.msk.f32.mxu1 %vm689_vm1, %v18140_v46  ;;  %v2216_v46 = vrot.slane %v18183_v44, 2 }
  0xcd   : > { %15380 = vmatmul.mubr.msk.f32.gmra.mxu0 %vm689_vm1, %v25744_v45 }
  0xce   : > { %15382 = vmatprep.mubr.msk.f32.mxu0 %vm689_vm1, %v25745_v8  ;;  %v18343_v40 = vsel %vm1275_vm3, %v2216_v46, %v2217_v58 }
  0xcf   : > { %15433 = vmatmul.mubr.msk.f32.gmra.mxu1 %vm689_vm1, %v18151_v18  ;;  %v1948_v18 = vrot.slane %v18199_v17, 1 }
  0xd0   : > { %15435 = vmatprep.mubr.msk.f32.mxu1 %vm689_vm1, %v18157_v0  ;;  %v1947_v0 = vrot.slane %v18183_v44, 1 }
  0xd1   : > { %15383 = vmatmul.mubr.msk.f32.gmra.mxu0 %vm689_vm1, %v25746_v23 }
  0xd2   : > { %15385 = vmatprep.mubr.msk.f32.mxu0 %vm689_vm1, %v25747_v28 }
  0xd3   : > { %15436 = vmatmul.mubr.msk.f32.gmra.mxu1 %vm689_vm1, %v18168_v61  ;;  %v489_v61 = vld [vmem:[%s17494_s24 + $0x190] sm:$0x3] }
  0xd4   : > { %15438 = vmatprep.mubr.msk.f32.mxu1 %vm689_vm1, %v18174_v55  ;;  %v2219_v55 = vrot.slane %v489_v61, 2  ;;  %v1950_v35 = vrot.slane %v489_v61, 1 }
  0xd5   : > { %15386 = vmatmul.mubr.msk.f32.gmra.mxu0 %vm689_vm1, %v17890_v1 }
  0xd6   : > { %15388 = vmatprep.mubr.msk.f32.mxu0 %vm689_vm1, %v17896_v43  ;;  %v18362_v46 = vsel %vm608_vm2, %v1948_v18, %v1950_v35 }
  0xd7   : > { %15439 = vmatmul.mubr.msk.f32.gmra.mxu1 %vm689_vm1, %v18188_v36  ;;  %v18350_v36 = vsel %vm608_vm2, %v1947_v0, %v1948_v18 }
  0xd8   : > { %15441 = vmatprep.mubr.msk.f32.mxu1 %vm689_vm1, %v18194_v26  ;;  %v18355_v26 = vsel %vm1275_vm3, %v2217_v58, %v2219_v55 }
  0xd9   : > { %15389 = vmatmul.mubr.msk.f32.gmra.mxu0 %vm689_vm1, %v17910_v38 }
  0xda   : > { %15391 = vmatprep.mubr.msk.f32.mxu0 %vm689_vm1, %v17916_v62 }
  0xdb   : > { %15442 = vmatmul.mubr.msk.f32.gmra.mxu1 %vm689_vm1, %v18206_v63 }
  0xdc   : > { %15444 = vmatprep.mubr.msk.f32.mxu1 %vm689_vm1, %v18343_v40 }
  0xdd   : > { %15392 = vmatmul.mubr.msk.f32.gmra.mxu0 %vm689_vm1, %v17928_v14 }
  0xde   : > { %15394 = vmatprep.mubr.msk.f32.mxu0 %vm689_vm1, %v18350_v36 }
  0xdf   : > { %15445 = vmatmul.mubr.msk.f32.gmra.mxu1 %vm689_vm1, %v18355_v26 }
  0xe0   : > { %15499 = vmatprep.mubr.msk.f32.mxu1 %vm689_vm1, %v25725_v22 }
  0xe1   : > { %15395 = vmatmul.mubr.msk.f32.gmra.mxu0 %vm689_vm1, %v18362_v46 }
  0xe2   : > { %15449 = vmatprep.mubr.msk.f32.mxu0 %vm689_vm1, %v17524_v15  ;;  %v15201_v58 = vpop.f32.mrf.mxu1 }
  0xe3   : > { %15500 = vmatmul.mubr.msk.f32.vlgmr.msra.gmra.mxu1 %vm689_vm1, %v25726_v12 }
  0xe4   : > { %v1116_v0 = vpop.f32.mrf.mxu1  ;;  %15502 = vmatprep.mubr.msk.f32.mxu1 %vm689_vm1, %v25727_v13 }
  0xe5   : > { %v15151_v35 = vpop.f32.mrf.mxu0  ;;  %15450 = vmatmul.mubr.msk.f32.vlgmr.msra.gmra.mxu0 %vm689_vm1, %v17527_v16 }
  0xe6   : > { %v18378_v18 = vadd.f32 %v15201_v58, %v15151_v35  ;;  %15548 = vmatpush3.msk.msra.mxu0 %vm754_vm0, %v18225_v29  ;;  %15452 = vmatprep.mubr.msk.f32.mxu0 %vm689_vm1, %v17545_v24  ;;  %v25748_v35 = vld [vmem:[#allocation12_spill] sm:$0xff] }
  0xe7   : > { %v824_v15 = vpop.f32.mrf.mxu0  ;;  %v15204_v61 = vpop.f32.mrf.mxu1  ;;  %15503 = vmatmul.mubr.msk.f32.gmra.mxu1 %vm689_vm1, %v25728_v27 }
  0xe8   : > { %v18386_v55 = vadd.f32 %v1116_v0, %v824_v15  ;;  %15505 = vmatprep.mubr.msk.f32.mxu1 %vm689_vm1, %v25729_v60 }
  0xe9   : > { %v15154_v22 = vpop.f32.mrf.mxu0  ;;  %15453 = vmatmul.mubr.msk.f32.gmra.mxu0 %vm689_vm1, %v17548_v25  ;;  %v1126_v16 = vpop.f32.mrf.mxu1 }
  0xea   : > { %v18392_v12 = vadd.f32 %v15204_v61, %v15154_v22  ;;  %15455 = vmatprep.mubr.msk.f32.mxu0 %vm689_vm1, %v17578_v33  ;;  %v25749_v22 = vld [vmem:[#allocation15_spill] sm:$0xff] }
  0xeb   : > { %v834_v24 = vpop.f32.mrf.mxu0  ;;  %v15207_v29 = vpop.f32.mrf.mxu1  ;;  %15506 = vmatmul.mubr.msk.f32.gmra.mxu1 %vm689_vm1, %v25730_v6 }
  0xec   : > { %v18398_v13 = vadd.f32 %v1126_v16, %v834_v24  ;;  %15508 = vmatprep.mubr.msk.f32.mxu1 %vm689_vm1, %v25731_v10 }
  0xed   : > { %v15157_v27 = vpop.f32.mrf.mxu0  ;;  %15456 = vmatmul.mubr.msk.f32.gmra.mxu0 %vm689_vm1, %v17581_v34  ;;  %v1136_v25 = vpop.f32.mrf.mxu1 }
  0xee   : > { %v18404_v60 = vadd.f32 %v15207_v29, %v15157_v27  ;;  %15458 = vmatprep.mubr.msk.f32.mxu0 %vm689_vm1, %v17604_v41  ;;  %v25750_v27 = vld [vmem:[#allocation18_spill] sm:$0xff] }
  0xef   : > { %v844_v33 = vpop.f32.mrf.mxu0  ;;  %v15210_v58 = vpop.f32.mrf.mxu1  ;;  %15509 = vmatmul.mubr.msk.f32.gmra.mxu1 %vm689_vm1, %v25732_v2 }
  0xf0   : > { %v18410_v6 = vadd.f32 %v1136_v25, %v844_v33  ;;  %15511 = vmatprep.mubr.msk.f32.mxu1 %vm689_vm1, %v25733_v37 }
  0xf1   : > { %v15160_v10 = vpop.f32.mrf.mxu0  ;;  %15459 = vmatmul.mubr.msk.f32.gmra.mxu0 %vm689_vm1, %v17607_v42  ;;  %v1146_v34 = vpop.f32.mrf.mxu1 }
  0xf2   : > { %v18416_v0 = vadd.f32 %v15210_v58, %v15160_v10  ;;  %15461 = vmatprep.mubr.msk.f32.mxu0 %vm689_vm1, %v25748_v35  ;;  %v25751_v10 = vld [vmem:[#allocation21_spill] sm:$0xff] }
  0xf3   : > { %v854_v41 = vpop.f32.mrf.mxu0  ;;  %v15213_v15 = vpop.f32.mrf.mxu1  ;;  %15512 = vmatmul.mubr.msk.f32.gmra.mxu1 %vm689_vm1, %v25734_v47 }
  0xf4   : > { %v18422_v2 = vadd.f32 %v1146_v34, %v854_v41  ;;  %15514 = vmatprep.mubr.msk.f32.mxu1 %vm689_vm1, %v25735_v31 }
  0xf5   : > { %v15163_v37 = vpop.f32.mrf.mxu0  ;;  %15462 = vmatmul.mubr.msk.f32.gmra.mxu0 %vm689_vm1, %v17633_v50  ;;  %v1156_v42 = vpop.f32.mrf.mxu1 }
  0xf6   : > { %v18428_v61 = vadd.f32 %v15213_v15, %v15163_v37  ;;  %15464 = vmatprep.mubr.msk.f32.mxu0 %vm689_vm1, %v25749_v22  ;;  %v25752_v15 = vld [vmem:[#allocation24_spill] sm:$0xff] }
  0xf7   : > { %v864_v16 = vpop.f32.mrf.mxu0  ;;  %v15216_v24 = vpop.f32.mrf.mxu1  ;;  %15515 = vmatmul.mubr.msk.f32.gmra.mxu1 %vm689_vm1, %v25736_v5 }
  0xf8   : > { %v18434_v47 = vadd.f32 %v1156_v42, %v864_v16  ;;  %15517 = vmatprep.mubr.msk.f32.mxu1 %vm689_vm1, %v25737_v48  ;;  %v25753_v16 = vld [vmem:[#allocation27_spill] sm:$0xff] }
  0xf9   : > { %v15166_v31 = vpop.f32.mrf.mxu0  ;;  %15465 = vmatmul.mubr.msk.f32.gmra.mxu0 %vm689_vm1, %v17666_v59  ;;  %v1166_v50 = vpop.f32.mrf.mxu1 }
  0xfa   : > { %v18440_v29 = vadd.f32 %v15216_v24, %v15166_v31  ;;  %15467 = vmatprep.mubr.msk.f32.mxu0 %vm689_vm1, %v25750_v27 }
  0xfb   : > { %v874_v25 = vpop.f32.mrf.mxu0  ;;  %v15219_v33 = vpop.f32.mrf.mxu1  ;;  %15518 = vmatmul.mubr.msk.f32.gmra.mxu1 %vm689_vm1, %v25738_v54 }
  0xfc   : > { %v18446_v5 = vadd.f32 %v1166_v50, %v874_v25  ;;  %15520 = vmatprep.mubr.msk.f32.mxu1 %vm689_vm1, %v25739_v57  ;;  %v25754_v50 = vld [vmem:[#allocation30_spill] sm:$0xff] }
  0xfd   : > { %v15169_v48 = vpop.f32.mrf.mxu0  ;;  %15468 = vmatmul.mubr.msk.f32.gmra.mxu0 %vm689_vm1, %v17695_v9  ;;  %v1176_v59 = vpop.f32.mrf.mxu1 }
  0xfe   : > { %v18452_v58 = vadd.f32 %v15219_v33, %v15169_v48  ;;  %15470 = vmatprep.mubr.msk.f32.mxu0 %vm689_vm1, %v25751_v10  ;;  %v25755_v33 = vld [vmem:[#allocation33_spill] sm:$0xff]  ;;  %v25756_v10 = vld [vmem:[#allocation36_spill] sm:$0xff] }
  0xff   : > { %v884_v34 = vpop.f32.mrf.mxu0  ;;  %v15222_v35 = vpop.f32.mrf.mxu1  ;;  %15521 = vmatmul.mubr.msk.f32.gmra.mxu1 %vm689_vm1, %v25740_v4 }
 0x100   : > { %v18458_v54 = vadd.f32 %v1176_v59, %v884_v34  ;;  %15523 = vmatprep.mubr.msk.f32.mxu1 %vm689_vm1, %v25741_v7  ;;  %v18525_v34 = vld [vmem:[%s17494_s24 + $0x198] sm:$0xff] }
 0x101   : > { %v15172_v57 = vpop.f32.mrf.mxu0  ;;  %15471 = vmatmul.mubr.msk.f32.gmra.mxu0 %vm689_vm1, %v17727_v30  ;;  %v1186_v9 = vpop.f32.mrf.mxu1 }
 0x102   : > { %v18464_v41 = vadd.f32 %v15222_v35, %v15172_v57  ;;  %15473 = vmatprep.mubr.msk.f32.mxu0 %vm689_vm1, %v25752_v15  ;;  %v18528_v35 = vld [vmem:[%s17494_s24 + $0x1a0] sm:$0xff] }
 0x103   : > { %v894_v37 = vpop.f32.mrf.mxu0  ;;  %v15225_v42 = vpop.f32.mrf.mxu1  ;;  %15524 = vmatmul.mubr.msk.f32.gmra.mxu1 %vm689_vm1, %v25742_v11  ;;  %v2753_v15 = vrot.slane %v18528_v35, 1 }
 0x104   : > { %v18470_v4 = vadd.f32 %v1186_v9, %v894_v37  ;;  %15526 = vmatprep.mubr.msk.f32.mxu1 %vm689_vm1, %v25743_v49  ;;  %v2752_v9 = vrot.slane %v18525_v34, 1  ;;  %v18543_v37 = vld [vmem:[%s17494_s24 + $0x1a8] sm:$0x3]  ;;  %s12716_s24 = sshll.u32 %s25213_s15, 4  ;;  %s25329_s24 = int_to_ptr.vmem [resolvable:$true] %s12716_s24 }
 0x105   : > { %v15175_v7 = vpop.f32.mrf.mxu0  ;;  %15474 = vmatmul.mubr.msk.f32.gmra.mxu0 %vm689_vm1, %v17753_v52  ;;  %v18476_v30 = vpop.f32.mrf.mxu1  ;;  %s17287_s29 = scalar_lea.vmem %s25329_s24, 1024  ;;  %p17294_p0 = scmp.lt.s32.totalorder %s25329_s24, %s17292_s20 }
 0x106   : > { %v18478_v22 = vadd.f32 %v15225_v42, %v15175_v7  ;;  %15476 = vmatprep.mubr.msk.f32.mxu0 %vm689_vm1, %v25753_v16  ;;  %v25757_v7 = vld [vmem:[#allocation39_spill] sm:$0xff]  ;;  %p17288_p11 = scmp.ne.s32.totalorder %s25329_s24, %s17287_s29  ;;  %p17295_p1 = scmp.lt.s32.totalorder %s17293_s16, %s17287_s29 }
 0x107   : > { %v18482_v24 = vpop.f32.mrf.mxu0  ;;  %v15228_v31 = vpop.f32.mrf.mxu1  ;;  %15527 = vmatmul.mubr.msk.f32.gmra.mxu1 %vm689_vm1, %v25744_v45 }
 0x108   : > { %15529 = vmatprep.mubr.msk.f32.mxu1 %vm689_vm1, %v25745_v8  ;;  %p17289_p12 = pnand %p17288_p11, %p17461_p5  ;;  %p17296_p2 = por %p17295_p1, %p17294_p0 }
 0x109   : > { %v15178_v49 = vpop.f32.mrf.mxu0  ;;  %15477 = vmatmul.mubr.msk.f32.gmra.mxu0 %vm689_vm1, %v17779_v3  ;;  %v18490_v52 = vpop.f32.mrf.mxu1 }
 0x10a   : > { %v18492_v11 = vadd.f32 %v15228_v31, %v15178_v49  ;;  %15479 = vmatprep.mubr.msk.f32.mxu0 %vm689_vm1, %v25754_v50  ;;  %v2754_v49 = vsel %vm608_vm2, %v2752_v9, %v2753_v15  ;;  %p17290_p13 = pneg %p17289_p12 }
 0x10b   : > { %v18496_v27 = vpop.f32.mrf.mxu0  ;;  %v15231_v25 = vpop.f32.mrf.mxu1  ;;  %15530 = vmatmul.mubr.msk.f32.gmra.mxu1 %vm689_vm1, %v25746_v23 }
 0x10c   : > { %15532 = vmatprep.mubr.msk.f32.mxu1 %vm689_vm1, %v25747_v28  ;;  %p17297_p3 = pnand %p17296_p2, %p17290_p13 }
 0x10d   : > { %v15181_v45 = vpop.f32.mrf.mxu0  ;;  %15480 = vmatmul.mubr.msk.f32.gmra.mxu0 %vm689_vm1, %v17805_v56  ;;  %v18504_v3 = vpop.f32.mrf.mxu1 }
 0x10e   : > { %v18506_v8 = vadd.f32 %v15231_v25, %v15181_v45  ;;  %15482 = vmatprep.mubr.msk.f32.mxu0 %vm689_vm1, %v25755_v33 }
 0x10f   : > { %v18510_v48 = vpop.f32.mrf.mxu0  ;;  %v15234_v59 = vpop.f32.mrf.mxu1  ;;  %15533 = vmatmul.mubr.msk.f32.gmra.mxu1 %vm689_vm1, %v17890_v1 }
 0x110   : > { %15535 = vmatprep.mubr.msk.f32.mxu1 %vm689_vm1, %v17896_v43 }
 0x111   : > { %v15184_v23 = vpop.f32.mrf.mxu0  ;;  %15483 = vmatmul.mubr.msk.f32.gmra.mxu0 %vm689_vm1, %v17831_v19  ;;  %v18518_v56 = vpop.f32.mrf.mxu1 }
 0x112   : > { %v18520_v28 = vadd.f32 %v15234_v59, %v15184_v23  ;;  %15485 = vmatprep.mubr.msk.f32.mxu0 %vm689_vm1, %v25756_v10 }
 0x113   : > { %v18530_v1 = vpop.f32.mrf.mxu0  ;;  %v15237_v57 = vpop.f32.mrf.mxu1  ;;  %15536 = vmatmul.mubr.msk.f32.gmra.mxu1 %vm689_vm1, %v17910_v38 }
 0x114   : > { %15538 = vmatprep.mubr.msk.f32.mxu1 %vm689_vm1, %v17916_v62 }
 0x115   : > { %v15187_v43 = vpop.f32.mrf.mxu0  ;;  %15486 = vmatmul.mubr.msk.f32.gmra.mxu0 %vm689_vm1, %v17857_v39  ;;  %v18538_v19 = vpop.f32.mrf.mxu1  ;;  %v2755_v39 = vrot.slane %v18543_v37, 1 }
 0x116   : > { %v18545_v42 = vadd.f32 %v15237_v57, %v15187_v43  ;;  %15488 = vmatprep.mubr.msk.f32.mxu0 %vm689_vm1, %v25757_v7 }
 0x117   : > { %v18549_v38 = vpop.f32.mrf.mxu0  ;;  %v15240_v62 = vpop.f32.mrf.mxu1  ;;  %15539 = vmatmul.mubr.msk.f32.gmra.mxu1 %vm689_vm1, %v17928_v14 }
 0x118   : > { %15541 = vmatprep.mubr.msk.f32.mxu1 %vm689_vm1, %v18350_v36  ;;  %v2756_v36 = vsel %vm608_vm2, %v2753_v15, %v2755_v39 }
 0x119   : > { %v15190_v16 = vpop.f32.mrf.mxu0  ;;  %15489 = vmatmul.mubr.msk.f32.gmra.mxu0 %vm689_vm1, %v17883_v20  ;;  %v18558_v31 = vpop.f32.mrf.mxu1 }
 0x11a   : > { %v18561_v50 = vadd.f32 %v15240_v62, %v15190_v16  ;;  %15491 = vmatprep.mubr.msk.f32.mxu0 %vm689_vm1, %v18183_v44 }
 0x11b   : > { %v18565_v25 = vpop.f32.mrf.mxu0  ;;  %v15243_v14 = vpop.f32.mrf.mxu1  ;;  %15542 = vmatmul.mubr.msk.f32.gmra.mxu1 %vm689_vm1, %v18362_v46 }
 0x11c   : > { %15544 = vmatprep.mubr.msk.f32.mxu1 %vm689_vm1, %v2754_v49 }
 0x11d   : > { %v15193_v20 = vpop.f32.mrf.mxu0  ;;  %15492 = vmatmul.mubr.msk.f32.gmra.mxu0 %vm689_vm1, %v18199_v17  ;;  %v18573_v45 = vpop.f32.mrf.mxu1 }
 0x11e   : > { %v18575_v33 = vadd.f32 %v15243_v14, %v15193_v20  ;;  %15494 = vmatprep.mubr.msk.f32.mxu0 %vm689_vm1, %v18525_v34  ;;  %v25758_v14 = vld [vmem:[#allocation40_spill] sm:$0xff] }
 0x11f   : > { %v18579_v44 = vpop.f32.mrf.mxu0  ;;  %v15246_v59 = vpop.f32.mrf.mxu1  ;;  %15545 = vmatmul.mubr.msk.f32.gmra.mxu1 %vm689_vm1, %v2756_v36 }
 0x121   : > { %v15196_v46 = vpop.f32.mrf.mxu0  ;;  %15495 = vmatmul.mubr.msk.f32.gmra.mxu0 %vm689_vm1, %v18528_v35  ;;  %v18584_v23 = vpop.f32.mrf.mxu1 }
 0x122   : > { %v18586_v10 = vadd.f32 %v15246_v59, %v15196_v46  ;;  %15549 = vmatprep.mubr.msk.f32.mxu0 %vm689_vm1, %v17968_v53  ;;  %v25759_v59 = vld [vmem:[#allocation41_spill] sm:$0xff] }
 0x123   : > { %v18590_v17 = vpop.f32.mrf.mxu0  ;;  %v15301_v57 = vpop.f32.mrf.mxu1 }
 0x125   : > { %v15251_v43 = vpop.f32.mrf.mxu0  ;;  %15550 = vmatmul.mubr.msk.f32.vlgmr.msra.gmra.mxu0 %vm689_vm1, %v17981_v21  ;;  %v18594_v9 = vpop.f32.mrf.mxu1 }
 0x126   : > { %v1649_v15 = vadd.f32 %v15251_v43, %v18378_v18  ;;  %15552 = vmatprep.mubr.msk.f32.mxu0 %vm689_vm1, %v17987_v51 }
 0x127   : > { %v1489_v7 = vpop.f32.mrf.mxu0  ;;  %v15304_v62 = vpop.f32.mrf.mxu1 }
 0x128   : > { %v18600_v39 = vadd.f32 %v1489_v7, %v18386_v55  ;;  %v18602_v53 = vadd.f32 %v15301_v57, %v1649_v15  ;;  %v25760_v57 = vld [vmem:[#allocation42_spill] sm:$0xff] }
 0x129   : > { %v15254_v16 = vpop.f32.mrf.mxu0  ;;  %15553 = vmatmul.mubr.msk.f32.gmra.mxu0 %vm689_vm1, %v17998_v32  ;;  %v18606_v49 = vpop.f32.mrf.mxu1 }
 0x12a   : > { %v1651_v21 = vadd.f32 %v15254_v16, %v18392_v12  ;;  %15555 = vmatprep.mubr.msk.f32.mxu0 %vm689_vm1, %v25758_v14  ;;  %v25762_v14 = vld [vmem:[#allocation44_spill] sm:$0xff] }
 0x12b   : > { %v1499_v18 = vpop.f32.mrf.mxu0  ;;  %v15307_v51 = vpop.f32.mrf.mxu1 }
 0x12c   : > { %v18612_v36 = vadd.f32 %v1499_v18, %v18398_v13  ;;  %v18614_v55 = vadd.f32 %v15304_v62, %v1651_v21  ;;  %v25761_v62 = vld [vmem:[#allocation43_spill] sm:$0xff] }
 0x12d   : > { %v15257_v20 = vpop.f32.mrf.mxu0  ;;  %15556 = vmatmul.mubr.msk.f32.gmra.mxu0 %vm689_vm1, %v25759_v59  ;;  %v18618_v46 = vpop.f32.mrf.mxu1  ;;  %v25763_v59 = vld [vmem:[#allocation45_spill] sm:$0xff] }
 0x12e   : > { %v1653_v32 = vadd.f32 %v15257_v20, %v18404_v60  ;;  %15558 = vmatprep.mubr.msk.f32.mxu0 %vm689_vm1, %v25760_v57 }
 0x12f   : > { %v1509_v12 = vpop.f32.mrf.mxu0  ;;  %v15310_v43 = vpop.f32.mrf.mxu1 }
 0x130   : > { %v18624_v15 = vadd.f32 %v1509_v12, %v18410_v6  ;;  %v18626_v13 = vadd.f32 %v15307_v51, %v1653_v32  ;;  %v25764_v12 = vld [vmem:[#allocation46_spill] sm:$0xff] }
 0x131   : > { %v15260_v7 = vpop.f32.mrf.mxu0  ;;  %15559 = vmatmul.mubr.msk.f32.gmra.mxu0 %vm689_vm1, %v25761_v62  ;;  %v18630_v16 = vpop.f32.mrf.mxu1 }
 0x132   : > { %v1655_v21 = vadd.f32 %v15260_v7, %v18416_v0  ;;  %15561 = vmatprep.mubr.msk.f32.mxu0 %vm689_vm1, %v25762_v14 }
 0x133   : > { %v1519_v60 = vpop.f32.mrf.mxu0  ;;  %v15313_v18 = vpop.f32.mrf.mxu1 }
 0x134   : > { %v18636_v20 = vadd.f32 %v1519_v60, %v18422_v2  ;;  %v18638_v6 = vadd.f32 %v15310_v43, %v1655_v21  ;;  %v25765_v21 = vld [vmem:[#allocation47_spill] sm:$0xff] }
 0x135   : > { %v15263_v51 = vpop.f32.mrf.mxu0  ;;  %15562 = vmatmul.mubr.msk.f32.gmra.mxu0 %vm689_vm1, %v25763_v59  ;;  %v18642_v32 = vpop.f32.mrf.mxu1  ;;  %v25767_v59 = vld [vmem:[#allocation48_spill] sm:$0xff] }
 0x136   : > { %v1657_v57 = vadd.f32 %v15263_v51, %v18428_v61  ;;  %15564 = vmatprep.mubr.msk.f32.mxu0 %vm689_vm1, %v25764_v12 }
 0x137   : > { %v1529_v0 = vpop.f32.mrf.mxu0  ;;  %v15316_v7 = vpop.f32.mrf.mxu1 }
 0x138   : > { %v18648_v62 = vadd.f32 %v1529_v0, %v18434_v47  ;;  %v18650_v2 = vadd.f32 %v15313_v18, %v1657_v57  ;;  %v25769_v57 = vld [vmem:[#allocation49_spill] sm:$0xff] }
 0x139   : > { %v15266_v43 = vpop.f32.mrf.mxu0  ;;  %15565 = vmatmul.mubr.msk.f32.gmra.mxu0 %vm689_vm1, %v25765_v21  ;;  %v18654_v14 = vpop.f32.mrf.mxu1 }
 0x13a   : > { %25766 = vst [vmem:[#allocation7_spill] sm:$0xff] %v18654_v14  ;;  %v1659_v60 = vadd.f32 %v15266_v43, %v18440_v29  ;;  %15567 = vmatprep.mubr.msk.f32.mxu0 %vm689_vm1, %v25767_v59  ;;  %v25771_v14 = vld [vmem:[#allocation50_spill] sm:$0xff] }
 0x13b   : > { %v1539_v61 = vpop.f32.mrf.mxu0  ;;  %v15319_v51 = vpop.f32.mrf.mxu1 }
 0x13c   : > { %v18660_v12 = vadd.f32 %v1539_v61, %v18446_v5  ;;  %v18662_v47 = vadd.f32 %v15316_v7, %v1659_v60  ;;  %v25773_v60 = vld [vmem:[#allocation51_spill] sm:$0xff] }
 0x13d   : > { %v15269_v18 = vpop.f32.mrf.mxu0  ;;  %15568 = vmatmul.mubr.msk.f32.gmra.mxu0 %vm689_vm1, %v25769_v57  ;;  %v18666_v0 = vpop.f32.mrf.mxu1 }
 0x13e   : > { %25768 = vst [vmem:[#allocation8_spill] sm:$0xff] %v18660_v12  ;;  %25770 = vst [vmem:[#allocation9_spill] sm:$0xff] %v18666_v0  ;;  %v1661_v21 = vadd.f32 %v15269_v18, %v18452_v58  ;;  %15570 = vmatprep.mubr.msk.f32.mxu0 %vm689_vm1, %v25771_v14  ;;  %v25775_v0 = vld [vmem:[#allocation52_spill] sm:$0xff]  ;;  %v25789_v12 = vld [vmem:[#allocation61_spill] sm:$0xff] }
 0x13f   : > { %v1549_v29 = vpop.f32.mrf.mxu0  ;;  %v15322_v43 = vpop.f32.mrf.mxu1 }
 0x140   : > { %v18672_v59 = vadd.f32 %v1549_v29, %v18458_v54  ;;  %v18674_v5 = vadd.f32 %v15319_v51, %v1661_v21  ;;  %v25777_v21 = vld [vmem:[#allocation53_spill] sm:$0xff] }
 0x141   : > { %v15272_v7 = vpop.f32.mrf.mxu0  ;;  %15571 = vmatmul.mubr.msk.f32.gmra.mxu0 %vm689_vm1, %v25773_v60  ;;  %v18678_v61 = vpop.f32.mrf.mxu1 }
 0x142   : > { %25772 = vst [vmem:[#allocation10_spill] sm:$0xff] %v18672_v59  ;;  %25774 = vst [vmem:[#allocation11_spill] sm:$0xff] %v18678_v61  ;;  %v1663_v57 = vadd.f32 %v15272_v7, %v18464_v41  ;;  %15573 = vmatprep.mubr.msk.f32.mxu0 %vm689_vm1, %v25775_v0  ;;  %v25779_v61 = vld [vmem:[#allocation54_spill] sm:$0xff] }
 0x143   : > { %v1559_v58 = vpop.f32.mrf.mxu0  ;;  %v15325_v14 = vpop.f32.mrf.mxu1 }
 0x144   : > { %v18684_v18 = vadd.f32 %v1559_v58, %v18470_v4  ;;  %v18686_v54 = vadd.f32 %v15322_v43, %v1663_v57  ;;  %v25780_v58 = vld [vmem:[#allocation55_spill] sm:$0xff] }
 0x145   : > { %v15275_v51 = vpop.f32.mrf.mxu0  ;;  %15574 = vmatmul.mubr.msk.f32.gmra.mxu0 %vm689_vm1, %v25777_v21  ;;  %v18690_v29 = vpop.f32.mrf.mxu1  ;;  %v25782_v21 = vld [vmem:[#allocation56_spill] sm:$0xff] }
 0x146   : > { %25776 = vst [vmem:[#allocation13_spill] sm:$0xff] %v18684_v18  ;;  %25778 = vst [vmem:[#allocation14_spill] sm:$0xff] %v18690_v29  ;;  %v1665_v60 = vadd.f32 %v15275_v51, %v18478_v22  ;;  %15576 = vmatprep.mubr.msk.f32.mxu0 %vm689_vm1, %v25779_v61  ;;  %v3614_v22 = vld [vmem:[%s25379_s4 + $0x8] sm:$0xff] }
 0x147   : > { %v18695_v41 = vpop.f32.mrf.mxu0  ;;  %v15328_v0 = vpop.f32.mrf.mxu1  ;;  %15597 = vmatprep.subr.mxu1 %v3614_v22 }
 0x148   : > { %v18697_v7 = vadd.f32 %v15325_v14, %v1665_v60  ;;  %15598 = vmatpush3.msra.mxu1 %v3614_v22 }
 0x149   : > { %v15278_v4 = vpop.f32.mrf.mxu0  ;;  %15577 = vmatmul.mubr.msk.f32.gmra.mxu0 %vm689_vm1, %v25780_v58  ;;  %v18701_v43 = vpop.f32.mrf.mxu1  ;;  %v25783_v58 = vld [vmem:[#allocation57_spill] sm:$0xff] }
 0x14a   : > { %25781 = vst [vmem:[#allocation16_spill] sm:$0xff] %v18701_v43  ;;  %v1667_v57 = vadd.f32 %v15278_v4, %v18492_v11  ;;  %15579 = vmatprep.mubr.msk.f32.mxu0 %vm689_vm1, %v25782_v21  ;;  %v25785_v4 = vld [vmem:[#allocation58_spill] sm:$0xff] }
 0x14b   : > { %v18709_v61 = vpop.f32.mrf.mxu0  ;;  %v15331_v51 = vpop.f32.mrf.mxu1 }
 0x14c   : > { %v18711_v14 = vadd.f32 %v15328_v0, %v1667_v57  ;;  %v25786_v0 = vld [vmem:[#allocation59_spill] sm:$0xff] }
 0x14d   : > { %v15281_v60 = vpop.f32.mrf.mxu0  ;;  %15580 = vmatmul.mubr.msk.f32.gmra.mxu0 %vm689_vm1, %v25783_v58  ;;  %v18715_v43 = vpop.f32.mrf.mxu1  ;;  %v25788_v58 = vld [vmem:[#allocation60_spill] sm:$0xff] }
 0x14e   : > { %25784 = vst [vmem:[#allocation17_spill] sm:$0xff] %v18715_v43  ;;  %v1669_v11 = vadd.f32 %v15281_v60, %v18506_v8  ;;  %15582 = vmatprep.mubr.msk.f32.mxu0 %vm689_vm1, %v25785_v4 }
 0x14f   : > { %v18720_v21 = vpop.f32.mrf.mxu0  ;;  %v15334_v29 = vpop.f32.mrf.mxu1 }
 0x150   : > { %v18722_v18 = vadd.f32 %v15331_v51, %v1669_v11 }
 0x151   : > { %v15284_v59 = vpop.f32.mrf.mxu0  ;;  %15583 = vmatmul.mubr.msk.f32.gmra.mxu0 %vm689_vm1, %v25786_v0  ;;  %v18726_v57 = vpop.f32.mrf.mxu1  ;;  %v25790_v0 = vld [vmem:[#allocation62_spill] sm:$0xff] }
 0x152   : > { %25787 = vst [vmem:[#allocation19_spill] sm:$0xff] %v18726_v57  ;;  %v1671_v22 = vadd.f32 %v15284_v59, %v18520_v28  ;;  %15585 = vmatprep.mubr.msk.f32.mxu0 %vm689_vm1, %v25788_v58  ;;  %v3021_v28 = vrot.slane %v18525_v34, 2  ;;  %v3022_v57 = vrot.slane %v18528_v35, 2  ;;  %v3024_v34 = vrot.slane %v18543_v37, 2 }
 0x153   : > { %v18731_v8 = vpop.f32.mrf.mxu0  ;;  %v15337_v60 = vpop.f32.mrf.mxu1 }
 0x154   : > { %v18733_v4 = vadd.f32 %v15334_v29, %v1671_v22  ;;  %v3023_v35 = vsel %vm1275_vm3, %v3021_v28, %v3022_v57 }
 0x155   : > { %v15287_v43 = vpop.f32.mrf.mxu0  ;;  %15586 = vmatmul.mubr.msk.f32.gmra.mxu0 %vm689_vm1, %v25789_v12  ;;  %v18737_v51 = vpop.f32.mrf.mxu1 }
 0x156   : > { %v1673_v11 = vadd.f32 %v15287_v43, %v18545_v42  ;;  %15588 = vmatprep.mubr.msk.f32.mxu0 %vm689_vm1, %v25790_v0 }
 0x157   : > { %v18743_v59 = vpop.f32.mrf.mxu0  ;;  %v15340_v58 = vpop.f32.mrf.mxu1 }
 0x158   : > { %v18746_v29 = vadd.f32 %v15337_v60, %v1673_v11 }
 0x159   : > { %v15290_v22 = vpop.f32.mrf.mxu0  ;;  %15589 = vmatmul.mubr.msk.f32.gmra.mxu0 %vm689_vm1, %v18206_v63  ;;  %v18750_v12 = vpop.f32.mrf.mxu1 }
 0x15a   : > { %25791 = vst [vmem:[#allocation20_spill] sm:$0xff] %v18750_v12  ;;  %v1675_v42 = vadd.f32 %v15290_v22, %v18561_v50  ;;  %15591 = vmatprep.mubr.msk.f32.mxu0 %vm689_vm1, %v18343_v40  ;;  %v3025_v40 = vsel %vm1275_vm3, %v3022_v57, %v3024_v34 }
 0x15b   : > { %v18756_v43 = vpop.f32.mrf.mxu0  ;;  %v15343_v0 = vpop.f32.mrf.mxu1 }
 0x15c   : > { %v18759_v60 = vadd.f32 %v15340_v58, %v1675_v42 }
 0x15d   : > { %v15293_v11 = vpop.f32.mrf.mxu0  ;;  %15592 = vmatmul.mubr.msk.f32.gmra.mxu0 %vm689_vm1, %v18355_v26  ;;  %v18763_v63 = vpop.f32.mrf.mxu1 }
 0x15e   : > { %25792 = vst [vmem:[#allocation22_spill] sm:$0xff] %v18763_v63  ;;  %v1677_v50 = vadd.f32 %v15293_v11, %v18575_v33  ;;  %15594 = vmatprep.mubr.msk.f32.mxu0 %vm689_vm1, %v3023_v35 }
 0x15f   : > { %v18768_v37 = vpop.f32.mrf.mxu0  ;;  %v15346_v22 = vpop.f32.mrf.mxu1 }
 0x160   : > { %v18770_v12 = vadd.f32 %v15343_v0, %v1677_v50  ;;  %v17349_v50 = vmov 0.0  }
 0x161   : > { %v15296_v28 = vpop.f32.mrf.mxu0  ;;  %15595 = vmatmul.mubr.msk.f32.gmra.mxu0 %vm689_vm1, %v3025_v40  ;;  %v18773_v58 = vpop.f32.mrf.mxu1  ;;  %499 = vst.msk [vmem:[#allocation2 + $0x20] sm:$0xff] %vm493_vm4, %v17349_v50  ;;  %494 = vst.msk [vmem:[#allocation2] sm:$0xff] %vm493_vm4, %v17349_v50 }
 0x162   : > { %v1679_v26 = vadd.f32 %v15296_v28, %v18586_v10  ;;  %495 = vst.msk [vmem:[#allocation2 + $0x8] sm:$0xff] %vm493_vm4, %v17349_v50  ;;  %498 = vst.msk [vmem:[#allocation2 + $0x18] sm:$0xff] %vm493_vm4, %v17349_v50 }
 0x163   : > { %v18776_v42 = vpop.f32.mrf.mxu0  ;;  %v18778_v63 = vpop.f32.mrf.mxu1  ;;  %501 = vst.msk [vmem:[#allocation2 + $0x30] sm:$0xff] %vm493_vm4, %v17349_v50  ;;  %502 = vst.msk [vmem:[#allocation2 + $0x38] sm:$0xff] %vm493_vm4, %v17349_v50 }
 0x164   : > { %25793 = vst [vmem:[#allocation23_spill] sm:$0xff] %v18778_v63  ;;  %v18780_v33 = vadd.f32 %v15346_v22, %v1679_v26  ;;  %504 = vst.msk [vmem:[#allocation2 + $0x48] sm:$0xff] %vm493_vm4, %v17349_v50 }
 0x165   : > { %v15351_v35 = vpop.f32.mrf.mxu0  ;;  %v18782_v57 = vpop.f32.mrf.mxu1  ;;  %505 = vst.msk [vmem:[#allocation2 + $0x50] sm:$0xff] %vm493_vm4, %v17349_v50  ;;  %507 = vst.msk [vmem:[#allocation2 + $0x60] sm:$0xff] %vm493_vm4, %v17349_v50 }
 0x166   : > { %25794 = vst [vmem:[#allocation25_spill] sm:$0xff] %v18782_v57  ;;  %v18785_v34 = vadd.f32 %v15351_v35, %v18602_v53  ;;  %508 = vst.msk [vmem:[#allocation2 + $0x68] sm:$0xff] %vm493_vm4, %v17349_v50 }
 0x167   : > { %v18787_v0 = vpop.f32.mrf.mxu0  ;;  %v18789_v11 = vpop.f32.mrf.mxu1  ;;  %510 = vst.msk [vmem:[#allocation2 + $0x78] sm:$0xff] %vm493_vm4, %v17349_v50  ;;  %511 = vst.msk [vmem:[#allocation2 + $0x80] sm:$0xff] %vm493_vm4, %v17349_v50 }
 0x168   : > { %25795 = vst [vmem:[#allocation26_spill] sm:$0xff] %v18785_v34  ;;  %25796 = vst [vmem:[#allocation28_spill] sm:$0xff] %v18789_v11 }
 0x169   : > { %513 = vst.msk [vmem:[#allocation2 + $0x90] sm:$0xff] %vm493_vm4, %v17349_v50  ;;  %514 = vst.msk [vmem:[#allocation2 + $0x98] sm:$0xff] %vm493_vm4, %v17349_v50  ;;  %v15354_v10 = vpop.f32.mrf.mxu0  ;;  %v18845_v53 = vpop.f32.mrf.mxu1 }
 0x16a   : > { %516 = vst.msk [vmem:[#allocation2 + $0xa8] sm:$0xff] %vm493_vm4, %v17349_v50  ;;  %517 = vst.msk [vmem:[#allocation2 + $0xb0] sm:$0xff] %vm493_vm4, %v17349_v50  ;;  %v18848_v40 = vadd.f32 %v15354_v10, %v18614_v55 }
 0x16b   : > { %519 = vst.msk [vmem:[#allocation2 + $0xc0] sm:$0xff] %vm493_vm4, %v17349_v50  ;;  %520 = vst.msk [vmem:[#allocation2 + $0xc8] sm:$0xff] %vm493_vm4, %v17349_v50  ;;  %v18850_v22 = vpop.f32.mrf.mxu0  ;;  %v18852_v28 = vpop.f32.mrf.mxu1 }
 0x16c   : > { %522 = vst.msk [vmem:[#allocation2 + $0xd8] sm:$0xff] %vm493_vm4, %v17349_v50  ;;  %523 = vst.msk [vmem:[#allocation2 + $0xe0] sm:$0xff] %vm493_vm4, %v17349_v50 }
 0x16d   : > { %525 = vst.msk [vmem:[#allocation2 + $0xf0] sm:$0xff] %vm493_vm4, %v17349_v50  ;;  %526 = vst.msk [vmem:[#allocation2 + $0xf8] sm:$0xff] %vm493_vm4, %v17349_v50  ;;  %v15357_v26 = vpop.f32.mrf.mxu0  ;;  %v18854_v35 = vpop.f32.mrf.mxu1 }
 0x16e   : > { %528 = vst.msk [vmem:[#allocation2 + $0x108] sm:$0xff] %vm493_vm4, %v17349_v50  ;;  %529 = vst.msk [vmem:[#allocation2 + $0x110] sm:$0xff] %vm493_vm4, %v17349_v50  ;;  %v18857_v11 = vadd.f32 %v15357_v26, %v18626_v13 }
 0x16f   : > { %531 = vst.msk [vmem:[#allocation2 + $0x120] sm:$0xff] %vm493_vm4, %v17349_v50  ;;  %532 = vst.msk [vmem:[#allocation2 + $0x128] sm:$0xff] %vm493_vm4, %v17349_v50  ;;  %v18859_v57 = vpop.f32.mrf.mxu0  ;;  %v18861_v63 = vpop.f32.mrf.mxu1 }
 0x170   : > { %534 = vst.msk [vmem:[#allocation2 + $0x138] sm:$0xff] %vm493_vm4, %v17349_v50  ;;  %535 = vst.msk [vmem:[#allocation2 + $0x140] sm:$0xff] %vm493_vm4, %v17349_v50 }
 0x171   : > { %537 = vst.msk [vmem:[#allocation2 + $0x150] sm:$0xff] %vm493_vm4, %v17349_v50  ;;  %538 = vst.msk [vmem:[#allocation2 + $0x158] sm:$0xff] %vm493_vm4, %v17349_v50  ;;  %v18863_v34 = vpop.f32.mrf.mxu1 }
 0x172   : > { %540 = vst.msk [vmem:[#allocation2 + $0x168] sm:$0xff] %vm493_vm4, %v17349_v50  ;;  %541 = vst.msk [vmem:[#allocation2 + $0x170] sm:$0xff] %vm493_vm4, %v17349_v50 }
 0x173   : > { %543 = vst.msk [vmem:[#allocation2 + $0x180] sm:$0xff] %vm493_vm4, %v17349_v50  ;;  %544 = vst.msk [vmem:[#allocation2 + $0x188] sm:$0xff] %vm493_vm4, %v17349_v50 }
 0x174   : > { %546 = vst.msk [vmem:[#allocation2 + $0x198] sm:$0xff] %vm493_vm4, %v17349_v50  ;;  %547 = vst.msk [vmem:[#allocation2 + $0x1a0] sm:$0xff] %vm493_vm4, %v17349_v50 }
 0x175   : > { %500 = vst.msk [vmem:[#allocation2 + $0x28] sm:$0x3] %vm496_vm5, %v17349_v50  ;;  %497 = vst.msk [vmem:[#allocation2 + $0x10] sm:$0x3] %vm496_vm5, %v17349_v50 }
 0x176   : > { %503 = vst.msk [vmem:[#allocation2 + $0x40] sm:$0x3] %vm496_vm5, %v17349_v50  ;;  %506 = vst.msk [vmem:[#allocation2 + $0x58] sm:$0x3] %vm496_vm5, %v17349_v50 }
 0x177   : > { %509 = vst.msk [vmem:[#allocation2 + $0x70] sm:$0x3] %vm496_vm5, %v17349_v50  ;;  %512 = vst.msk [vmem:[#allocation2 + $0x88] sm:$0x3] %vm496_vm5, %v17349_v50 }
 0x178   : > { %515 = vst.msk [vmem:[#allocation2 + $0xa0] sm:$0x3] %vm496_vm5, %v17349_v50  ;;  %518 = vst.msk [vmem:[#allocation2 + $0xb8] sm:$0x3] %vm496_vm5, %v17349_v50 }
 0x179   : > { %521 = vst.msk [vmem:[#allocation2 + $0xd0] sm:$0x3] %vm496_vm5, %v17349_v50  ;;  %524 = vst.msk [vmem:[#allocation2 + $0xe8] sm:$0x3] %vm496_vm5, %v17349_v50 }
 0x17a   : > { %527 = vst.msk [vmem:[#allocation2 + $0x100] sm:$0x3] %vm496_vm5, %v17349_v50  ;;  %530 = vst.msk [vmem:[#allocation2 + $0x118] sm:$0x3] %vm496_vm5, %v17349_v50 }
 0x17b   : > { %533 = vst.msk [vmem:[#allocation2 + $0x130] sm:$0x3] %vm496_vm5, %v17349_v50  ;;  %536 = vst.msk [vmem:[#allocation2 + $0x148] sm:$0x3] %vm496_vm5, %v17349_v50 }
 0x17c   : > { %539 = vst.msk [vmem:[#allocation2 + $0x160] sm:$0x3] %vm496_vm5, %v17349_v50  ;;  %542 = vst.msk [vmem:[#allocation2 + $0x178] sm:$0x3] %vm496_vm5, %v17349_v50 }
 0x17d   : > { %545 = vst.msk [vmem:[#allocation2 + $0x190] sm:$0x3] %vm496_vm5, %v17349_v50  ;;  %548 = vst.msk [vmem:[#allocation2 + $0x1a8] sm:$0x3] %vm496_vm5, %v17349_v50  ;;  %v15360_v50 = vpop.f32.mrf.mxu0 }
 0x17e   : > { %25797 = vst [vmem:[#allocation29_spill] sm:$0xff] %v18845_v53  ;;  %25798 = vst [vmem:[#allocation31_spill] sm:$0xff] %v18848_v40  ;;  %v18866_v55 = vadd.f32 %v15360_v50, %v18638_v6  ;;  %v18870_v53 = vpop.f32.mrf.mxu1 }
 0x17f   : > { %25799 = vst [vmem:[#allocation32_spill] sm:$0xff] %v18852_v28  ;;  %25800 = vst [vmem:[#allocation34_spill] sm:$0xff] %v18854_v35  ;;  %v18868_v10 = vpop.f32.mrf.mxu0 }
 0x180   : > { %25801 = vst [vmem:[#allocation35_spill] sm:$0xff] %v18857_v11  ;;  %25802 = vst [vmem:[#allocation37_spill] sm:$0xff] %v18861_v63  ;;  %v18872_v40 = vpop.f32.mrf.mxu1 }
 0x181   : > { %25803 = vst [vmem:[#allocation38_spill] sm:$0xff] %v18863_v34  ;;  %25804 = vst [vmem:[#allocation12_spill] sm:$0xff] %v18866_v55  ;;  %v15363_v28 = vpop.f32.mrf.mxu0 }
 0x182   : > { %25805 = vst [vmem:[#allocation15_spill] sm:$0xff] %v18870_v53  ;;  %25806 = vst [vmem:[#allocation18_spill] sm:$0xff] %v18872_v40  ;;  %v18875_v13 = vadd.f32 %v15363_v28, %v18650_v2  ;;  %v18879_v35 = vpop.f32.mrf.mxu1 }
 0x183   : > { %v18877_v26 = vpop.f32.mrf.mxu0  ;;  %25808 = vst [vmem:[#allocation24_spill] sm:$0xff] %v18879_v35 }
 0x184   : > { %25807 = vst [vmem:[#allocation21_spill] sm:$0xff] %v18875_v13  ;;  %v18881_v11 = vpop.f32.mrf.mxu1 }
 0x185   : > { %v15366_v63 = vpop.f32.mrf.mxu0  ;;  %25809 = vst [vmem:[#allocation27_spill] sm:$0xff] %v18881_v11 }
 0x186   : > { %v18884_v6 = vadd.f32 %v15366_v63, %v18662_v47  ;;  %v18888_v34 = vpop.f32.mrf.mxu1 }
 0x187   : > { %v18886_v50 = vpop.f32.mrf.mxu0  ;;  %25811 = vst [vmem:[#allocation33_spill] sm:$0xff] %v18888_v34 }
 0x188   : > { %25810 = vst [vmem:[#allocation30_spill] sm:$0xff] %v18884_v6  ;;  %v18890_v55 = vpop.f32.mrf.mxu1 }
 0x189   : > { %v15369_v53 = vpop.f32.mrf.mxu0  ;;  %25812 = vst [vmem:[#allocation36_spill] sm:$0xff] %v18890_v55  ;;  %v3560_v55 = vld [vmem:[#allocation2 + $0x8] sm:$0xff] }
 0x18a   : > { %v18893_v2 = vadd.f32 %v15369_v53, %v18674_v5  ;;  %v18897_v40 = vpop.f32.mrf.mxu1  ;;  %v3559_v53 = vld [vmem:[#allocation2] sm:$0xff] }
 0x18b   : > { %v18895_v28 = vpop.f32.mrf.mxu0  ;;  %25814 = vst [vmem:[#allocation40_spill] sm:$0xff] %v18897_v40  ;;  %15649 = vmatprep.mubr.msk.f32.mxu0 %vm493_vm4, %v3559_v53 }
 0x18c   : > { %25813 = vst [vmem:[#allocation39_spill] sm:$0xff] %v18893_v2  ;;  %v18899_v13 = vpop.f32.mrf.mxu1 }
 0x18d   : > { %v15372_v35 = vpop.f32.mrf.mxu0  ;;  %25815 = vst [vmem:[#allocation41_spill] sm:$0xff] %v18899_v13  ;;  %v3561_v13 = vld [vmem:[#allocation2 + $0x10] sm:$0x3] }
 0x18e   : > { %v18902_v47 = vadd.f32 %v15372_v35, %v18686_v54  ;;  %v18906_v11 = vpop.f32.mrf.mxu1  ;;  %v3613_v54 = vld [vmem:[%s25379_s4] sm:$0xff]  ;;  %v3672_v35 = vrot.slane %v3559_v53, 1 }
 0x18f   : > { %v18904_v63 = vpop.f32.mrf.mxu0  ;;  %25817 = vst [vmem:[#allocation43_spill] sm:$0xff] %v18906_v11  ;;  %v3673_v11 = vrot.slane %v3560_v55, 1  ;;  %15647 = vmatprep.subr.mxu0 %v3613_v54 }
 0x190   : > { %25816 = vst [vmem:[#allocation42_spill] sm:$0xff] %v18902_v47  ;;  %v18908_v6 = vpop.f32.mrf.mxu1  ;;  %15648 = vmatpush3.msra.mxu0 %v3613_v54 }
 0x191   : > { %v15375_v34 = vpop.f32.mrf.mxu0  ;;  %25818 = vst [vmem:[#allocation44_spill] sm:$0xff] %v18908_v6  ;;  %v3675_v6 = vrot.slane %v3561_v13, 1  ;;  %15650 = vmatmul.mubr.msk.f32.vlgmr.msra.gmra.mxu0 %vm493_vm4, %v3560_v55 }
 0x192   : > { %v18911_v5 = vadd.f32 %v15375_v34, %v18697_v7  ;;  %v18915_v40 = vpop.f32.mrf.mxu1  ;;  %v3674_v34 = vsel %vm608_vm2, %v3672_v35, %v3673_v11 }
 0x193   : > { %v18913_v2 = vpop.f32.mrf.mxu0  ;;  %25821 = vst [vmem:[#allocation47_spill] sm:$0xff] %v18915_v40  ;;  %15599 = vmatprep.mubr.msk.f32.mxu1 %vm493_vm4, %v3674_v34  ;;  %v3676_v40 = vsel %vm608_vm2, %v3673_v11, %v3675_v6 }
 0x194   : > { %25819 = vst [vmem:[#allocation45_spill] sm:$0xff] %v18911_v5  ;;  %25820 = vst [vmem:[#allocation46_spill] sm:$0xff] %v18913_v2  ;;  %v18921_v7 = vpop.f32.mrf.mxu1  ;;  %15600 = vmatmul.mubr.msk.f32.vlgmr.msra.gmra.mxu1 %vm493_vm4, %v3676_v40 }
 0x195   : > { %v15378_v47 = vpop.f32.mrf.mxu0  ;;  %25822 = vst [vmem:[#allocation48_spill] sm:$0xff] %v18921_v7 }
 0x196   : > { %v18925_v5 = vadd.f32 %v15378_v47, %v18711_v14  ;;  %v18932_v2 = vpop.f32.mrf.mxu1 }
 0x197   : > { %v18930_v53 = vpop.f32.mrf.mxu0  ;;  %25825 = vst [vmem:[#allocation51_spill] sm:$0xff] %v18932_v2 }
 0x198   : > { %25823 = vst [vmem:[#allocation49_spill] sm:$0xff] %v18925_v5  ;;  %25824 = vst [vmem:[#allocation50_spill] sm:$0xff] %v18930_v53  ;;  %v18935_v7 = vpop.f32.mrf.mxu1 }
 0x199   : > { %v15381_v13 = vpop.f32.mrf.mxu0  ;;  %25826 = vst [vmem:[#allocation52_spill] sm:$0xff] %v18935_v7 }
 0x19a   : > { %v18938_v54 = vadd.f32 %v15381_v13, %v18722_v18  ;;  %v15434_v47 = vpop.f32.mrf.mxu1 }
 0x19b   : > { %v18940_v14 = vpop.f32.mrf.mxu0 }
 0x19c   : > { %25827 = vst [vmem:[#allocation53_spill] sm:$0xff] %v18938_v54  ;;  %25828 = vst [vmem:[#allocation54_spill] sm:$0xff] %v18940_v14  ;;  %v18942_v34 = vpop.f32.mrf.mxu1 }
 0x19d   : > { %v15384_v35 = vpop.f32.mrf.mxu0  ;;  %25829 = vst [vmem:[#allocation55_spill] sm:$0xff] %v18942_v34 }
 0x19e   : > { %v2207_v11 = vadd.f32 %v15384_v35, %v18733_v4  ;;  %v15437_v6 = vpop.f32.mrf.mxu1 }
 0x19f   : > { %v18945_v55 = vpop.f32.mrf.mxu0 }
 0x1a0   : > { %25830 = vst [vmem:[#allocation56_spill] sm:$0xff] %v18945_v55  ;;  %v18947_v2 = vadd.f32 %v15434_v47, %v2207_v11  ;;  %v18949_v5 = vpop.f32.mrf.mxu1 }
 0x1a1   : > { %v15387_v40 = vpop.f32.mrf.mxu0  ;;  %25831 = vst [vmem:[#allocation57_spill] sm:$0xff] %v18949_v5 }
 0x1a2   : > { %v2209_v7 = vadd.f32 %v15387_v40, %v18746_v29  ;;  %v15440_v13 = vpop.f32.mrf.mxu1 }
 0x1a3   : > { %v18952_v18 = vpop.f32.mrf.mxu0 }
 0x1a4   : > { %25832 = vst [vmem:[#allocation58_spill] sm:$0xff] %v18952_v18  ;;  %v18954_v54 = vadd.f32 %v15437_v6, %v2209_v7  ;;  %v18956_v53 = vpop.f32.mrf.mxu1 }
 0x1a5   : > { %v15390_v14 = vpop.f32.mrf.mxu0  ;;  %25833 = vst [vmem:[#allocation59_spill] sm:$0xff] %v18956_v53 }
 0x1a6   : > { %v2211_v4 = vadd.f32 %v15390_v14, %v18759_v60  ;;  %v15443_v34 = vpop.f32.mrf.mxu1 }
 0x1a7   : > { %v18959_v35 = vpop.f32.mrf.mxu0 }
 0x1a8   : > { %v18961_v47 = vadd.f32 %v15440_v13, %v2211_v4  ;;  %v18963_v55 = vpop.f32.mrf.mxu1 }
 0x1a9   : > { %v15393_v11 = vpop.f32.mrf.mxu0  ;;  %25834 = vst [vmem:[#allocation60_spill] sm:$0xff] %v18963_v55 }
 0x1aa   : > { %v2213_v29 = vadd.f32 %v15393_v11, %v18770_v12  ;;  %v15446_v5 = vpop.f32.mrf.mxu1  ;;  %v3615_v12 = vld [vmem:[%s25379_s4 + $0x10] sm:$0xff] }
 0x1ab   : > { %v18966_v40 = vpop.f32.mrf.mxu0  ;;  %15697 = vmatprep.subr.mxu1 %v3615_v12 }
 0x1ac   : > { %v18968_v7 = vadd.f32 %v15443_v34, %v2213_v29  ;;  %v18970_v18 = vpop.f32.mrf.mxu1  ;;  %15698 = vmatpush3.msra.mxu1 %v3615_v12 }
 0x1ad   : > { %v15396_v6 = vpop.f32.mrf.mxu0  ;;  %25835 = vst [vmem:[#allocation61_spill] sm:$0xff] %v18970_v18 }
 0x1ae   : > { %v2215_v60 = vadd.f32 %v15396_v6, %v18780_v33  ;;  %v18975_v53 = vpop.f32.mrf.mxu1 }
 0x1af   : > { %v18973_v14 = vpop.f32.mrf.mxu0  ;;  %25836 = vst [vmem:[#allocation62_spill] sm:$0xff] %v18975_v53 }
 0x1b0   : > { %v18977_v13 = vadd.f32 %v15446_v5, %v2215_v60  ;;  %v18981_v55 = vpop.f32.mrf.mxu1 }
 0x1b1   : > { %v18979_v4 = vpop.f32.mrf.mxu0  ;;  %25838 = vst [vmem:[#allocation64_spill] sm:$0xff] %v18981_v55 }
 0x1b2   : > { %25837 = vst [vmem:[#allocation63_spill] sm:$0xff] %v18977_v13  ;;  %v18988_v11 = vpop.f32.mrf.mxu1 }
 0x1b3   : > { %v18986_v34 = vpop.f32.mrf.mxu0  ;;  %25839 = vst [vmem:[#allocation65_spill] sm:$0xff] %v18988_v11 }
 0x1b4   : > { %v18992_v29 = vpop.f32.mrf.mxu1 }
 0x1b5   : > { %v18990_v33 = vpop.f32.mrf.mxu0  ;;  %25841 = vst [vmem:[#allocation67_spill] sm:$0xff] %v18992_v29 }
 0x1b6   : > { %25840 = vst [vmem:[#allocation66_spill] sm:$0xff] %v18990_v33  ;;  %v18996_v6 = vpop.f32.mrf.mxu1 }
 0x1b7   : > { %v18994_v5 = vpop.f32.mrf.mxu0  ;;  %25843 = vst [vmem:[#allocation69_spill] sm:$0xff] %v18996_v6 }
 0x1b8   : > { %25842 = vst [vmem:[#allocation68_spill] sm:$0xff] %v18994_v5  ;;  %v19000_v55 = vpop.f32.mrf.mxu1 }
 0x1b9   : > { %v18998_v60 = vpop.f32.mrf.mxu0  ;;  %25845 = vst [vmem:[#allocation71_spill] sm:$0xff] %v19000_v55 }
 0x1ba   : > { %25844 = vst [vmem:[#allocation70_spill] sm:$0xff] %v18998_v60  ;;  %v19004_v18 = vpop.f32.mrf.mxu1 }
 0x1bb   : > { %v19002_v53 = vpop.f32.mrf.mxu0  ;;  %25847 = vst [vmem:[#allocation73_spill] sm:$0xff] %v19004_v18 }
 0x1bc   : > { %25846 = vst [vmem:[#allocation72_spill] sm:$0xff] %v19002_v53  ;;  %v19008_v11 = vpop.f32.mrf.mxu1 }
 0x1bd   : > { %v19006_v13 = vpop.f32.mrf.mxu0  ;;  %25849 = vst [vmem:[#allocation75_spill] sm:$0xff] %v19008_v11 }
 0x1be   : > { %25848 = vst [vmem:[#allocation74_spill] sm:$0xff] %v19006_v13  ;;  %v19012_v33 = vpop.f32.mrf.mxu1 }
 0x1bf   : > { %v19010_v12 = vpop.f32.mrf.mxu0  ;;  %25851 = vst [vmem:[#allocation77_spill] sm:$0xff] %v19012_v33 }
 0x1c0   : > { %25850 = vst [vmem:[#allocation76_spill] sm:$0xff] %v19010_v12  ;;  %v19016_v5 = vpop.f32.mrf.mxu1 }
 0x1c1   : > { %v19014_v29 = vpop.f32.mrf.mxu0  ;;  %25853 = vst [vmem:[#allocation79_spill] sm:$0xff] %v19016_v5 }
 0x1c2   : > { %25852 = vst [vmem:[#allocation78_spill] sm:$0xff] %v19014_v29  ;;  %v19020_v60 = vpop.f32.mrf.mxu1 }
 0x1c3   : > { %v19018_v6 = vpop.f32.mrf.mxu0  ;;  %25855 = vst [vmem:[#allocation81_spill] sm:$0xff] %v19020_v60 }
 0x1c4   : > { %25854 = vst [vmem:[#allocation80_spill] sm:$0xff] %v19018_v6  ;;  %v19024_v53 = vpop.f32.mrf.mxu1 }
 0x1c5   : > { %v19022_v55 = vpop.f32.mrf.mxu0  ;;  %25857 = vst [vmem:[#allocation83_spill] sm:$0xff] %v19024_v53 }
 0x1c6   : > { %25856 = vst [vmem:[#allocation82_spill] sm:$0xff] %v19022_v55  ;;  %v19028_v13 = vpop.f32.mrf.mxu1 }
 0x1c7   : > { %v19026_v18 = vpop.f32.mrf.mxu0  ;;  %25859 = vst [vmem:[#allocation85_spill] sm:$0xff] %v19028_v13 }
 0x1c8   : > { %25858 = vst [vmem:[#allocation84_spill] sm:$0xff] %v19026_v18  ;;  %v19032_v12 = vpop.f32.mrf.mxu1 }
 0x1c9   : > { %v19030_v11 = vpop.f32.mrf.mxu0  ;;  %25861 = vst [vmem:[#allocation87_spill] sm:$0xff] %v19032_v12 }
 0x1ca   : > { %25860 = vst [vmem:[#allocation86_spill] sm:$0xff] %v19030_v11  ;;  %v19036_v29 = vpop.f32.mrf.mxu1 }
 0x1cb   : > { %v19034_v33 = vpop.f32.mrf.mxu0  ;;  %25863 = vst [vmem:[#allocation89_spill] sm:$0xff] %v19036_v29 }
 0x1cc   : > { %25862 = vst [vmem:[#allocation88_spill] sm:$0xff] %v19034_v33  ;;  %v19040_v6 = vpop.f32.mrf.mxu1 }
 0x1cd   : > { %v19038_v5 = vpop.f32.mrf.mxu0  ;;  %25865 = vst [vmem:[#allocation91_spill] sm:$0xff] %v19040_v6  ;;  %v1197_v6 = vadd.f32 %v18476_v30, %v18482_v24  ;;  %v1267_v30 = vadd.f32 %v18584_v23, %v18590_v17  ;;  %v1914_v24 = vadd.f32 %v18594_v9, %v18600_v39  ;;  %v1922_v23 = vadd.f32 %v18642_v32, %v18648_v62  ;;  %v25873_v17 = vld [vmem:[#allocation8_spill] sm:$0xff]  ;;  %v25874_v9 = vld [vmem:[#allocation7_spill] sm:$0xff]  ;;  %v25879_v32 = vld [vmem:[#allocation14_spill] sm:$0xff] }
 0x1ce   : > { %25864 = vst [vmem:[#allocation90_spill] sm:$0xff] %v19038_v5  ;;  %v19044_v55 = vpop.f32.mrf.mxu1  ;;  %v1924_v39 = vadd.f32 %v25874_v9, %v25873_v17 }
 0x1cf   : > { %v19042_v60 = vpop.f32.mrf.mxu0  ;;  %25866 = vst [vmem:[#allocation92_spill] sm:$0xff] %v19044_v55  ;;  %v1207_v55 = vadd.f32 %v18490_v52, %v18496_v27  ;;  %v1916_v52 = vadd.f32 %v18606_v49, %v18612_v36  ;;  %v1664_v27 = vadd.f32 %v18695_v41, %v1197_v6  ;;  %v1678_v36 = vadd.f32 %v18776_v42, %v1267_v30 }
 0x1d0   : > { %v19048_v18 = vpop.f32.mrf.mxu1 }
 0x1d1   : > { %v19046_v53 = vpop.f32.mrf.mxu0  ;;  %25867 = vst [vmem:[#allocation93_spill] sm:$0xff] %v19048_v18  ;;  %v1217_v18 = vadd.f32 %v18504_v3, %v18510_v48  ;;  %v1918_v48 = vadd.f32 %v18618_v46, %v18624_v15  ;;  %v3616_v15 = vld [vmem:[%s25379_s4 + $0x18] sm:$0xff]  ;;  %v1930_v62 = vadd.f32 %v25879_v32, %v1664_v27 }
 0x1d2   : > { %v19052_v11 = vpop.f32.mrf.mxu1  ;;  %15747 = vmatprep.subr.mxu0 %v3616_v15  ;;  %v25894_v32 = vld [vmem:[#allocation12_spill] sm:$0xff] }
 0x1d3   : > { %v19050_v13 = vpop.f32.mrf.mxu0  ;;  %25868 = vst [vmem:[#allocation94_spill] sm:$0xff] %v19052_v11  ;;  %v1227_v11 = vadd.f32 %v18518_v56, %v18530_v1  ;;  %v1666_v56 = vadd.f32 %v18709_v61, %v1207_v55  ;;  %v1668_v1 = vadd.f32 %v18720_v21, %v1217_v18  ;;  %v25877_v61 = vld [vmem:[#allocation13_spill] sm:$0xff]  ;;  %v25878_v21 = vld [vmem:[#allocation11_spill] sm:$0xff]  ;;  %15748 = vmatpush3.msra.mxu0 %v3616_v15 }
 0x1d4   : > { %v19058_v29 = vpop.f32.mrf.mxu1  ;;  %v25882_v18 = vld [vmem:[#allocation19_spill] sm:$0xff]  ;;  %v2188_v27 = vadd.f32 %v18859_v57, %v1918_v48  ;;  %v25887_v48 = vld [vmem:[#allocation25_spill] sm:$0xff] }
 0x1d5   : > { %v19054_v12 = vpop.f32.mrf.mxu0  ;;  %25871 = vst [vmem:[#allocation97_spill] sm:$0xff] %v19058_v29  ;;  %v1247_v29 = vadd.f32 %v18558_v31, %v18565_v25  ;;  %v1920_v31 = vadd.f32 %v18630_v16, %v18636_v20  ;;  %v25875_v16 = vld [vmem:[#allocation10_spill] sm:$0xff]  ;;  %v25876_v20 = vld [vmem:[#allocation9_spill] sm:$0xff] }
 0x1d6   : > { %25869 = vst [vmem:[#allocation95_spill] sm:$0xff] %v19054_v12  ;;  %v1237_v12 = vadd.f32 %v18538_v19, %v18549_v38  ;;  %v19085_v3 = vpop.f32.mrf.mxu1  ;;  %v1670_v19 = vadd.f32 %v18731_v8, %v1227_v11  ;;  %v1926_v41 = vadd.f32 %v25876_v20, %v25875_v16  ;;  %v1928_v8 = vadd.f32 %v25878_v21, %v25877_v61  ;;  %v25893_v61 = vld [vmem:[#allocation34_spill] sm:$0xff] }
 0x1d7   : > { %v19056_v33 = vpop.f32.mrf.mxu0  ;;  %v2457_v21 = vadd.f32 %v25893_v61, %v2188_v27  ;;  %v25903_v27 = vld [vmem:[#allocation27_spill] sm:$0xff] }
 0x1d8   : > { %25870 = vst [vmem:[#allocation96_spill] sm:$0xff] %v19056_v33  ;;  %v1672_v25 = vadd.f32 %v18743_v59, %v1237_v12  ;;  %v2184_v59 = vadd.f32 %v18787_v0, %v1914_v24  ;;  %v1936_v11 = vadd.f32 %v25882_v18, %v1670_v19  ;;  %v25883_v12 = vld [vmem:[#allocation20_spill] sm:$0xff]  ;;  %v25884_v24 = vld [vmem:[#allocation22_spill] sm:$0xff]  ;;  %v2192_v19 = vadd.f32 %v18877_v26, %v1922_v23  ;;  %v25890_v23 = vld [vmem:[#allocation29_spill] sm:$0xff] }
 0x1d9   : > { %v19060_v5 = vpop.f32.mrf.mxu0  ;;  %v2196_v17 = vadd.f32 %v18895_v28, %v1926_v41  ;;  %v25889_v26 = vld [vmem:[#allocation28_spill] sm:$0xff]  ;;  %v2198_v16 = vadd.f32 %v18904_v63, %v1928_v8  ;;  %v25896_v28 = vld [vmem:[#allocation46_spill] sm:$0xff]  ;;  %v25898_v18 = vld [vmem:[#allocation21_spill] sm:$0xff] }
 0x1da   : > { %25872 = vst [vmem:[#allocation98_spill] sm:$0xff] %v19060_v5  ;;  %v1257_v5 = vadd.f32 %v18573_v45, %v18579_v44  ;;  %v1674_v45 = vadd.f32 %v18756_v43, %v1247_v29  ;;  %v19116_v43 = vpop.f32.mrf.mxu1  ;;  %v2186_v29 = vadd.f32 %v18850_v22, %v1916_v52  ;;  %v1938_v6 = vadd.f32 %v18737_v51, %v1672_v25  ;;  %v3617_v51 = vld [vmem:[%s25379_s4 + $0x20] sm:$0xff]  ;;  %v25885_v52 = vld [vmem:[#allocation26_spill] sm:$0xff]  ;;  %v25886_v25 = vld [vmem:[#allocation23_spill] sm:$0xff] }
 0x1db   : > { %v19076_v33 = vpop.f32.mrf.mxu0  ;;  %v2454_v57 = vadd.f32 %v25886_v25, %v25885_v52  ;;  %15797 = vmatprep.subr.mxu1 %v3617_v51  ;;  %v2200_v41 = vadd.f32 %v25896_v28, %v1930_v62  ;;  %v25901_v51 = vld [vmem:[#allocation30_spill] sm:$0xff]  ;;  %v25902_v63 = vld [vmem:[#allocation24_spill] sm:$0xff] }
 0x1dc   : > { %v1676_v49 = vadd.f32 %v18768_v37, %v1257_v5  ;;  %v25880_v37 = vld [vmem:[#allocation16_spill] sm:$0xff]  ;;  %v1940_v30 = vadd.f32 %v25883_v12, %v1674_v45  ;;  %v2194_v45 = vadd.f32 %v18886_v50, %v1924_v39  ;;  %v2455_v9 = vadd.f32 %v25890_v23, %v2186_v29  ;;  %v25895_v50 = vld [vmem:[#allocation37_spill] sm:$0xff]  ;;  %v25899_v29 = vld [vmem:[#allocation15_spill] sm:$0xff] }
 0x1dd   : > { %v15484_v38 = vpop.f32.mrf.mxu0  ;;  %v1932_v42 = vadd.f32 %v25880_v37, %v1666_v56  ;;  %v1944_v56 = vadd.f32 %v18773_v58, %v1678_v36  ;;  %v19142_v58 = vpop.f32.mrf.mxu1  ;;  %v25892_v36 = vld [vmem:[#allocation32_spill] sm:$0xff]  ;;  %v2460_v39 = vadd.f32 %v25895_v50, %v25894_v32  ;;  %v25897_v37 = vld [vmem:[#allocation38_spill] sm:$0xff]  ;;  %v2464_v8 = vadd.f32 %v25902_v63, %v25901_v51 }
 0x1de   : > { %v19097_v44 = vadd.f32 %v15484_v38, %v18947_v2  ;;  %v25881_v2 = vld [vmem:[#allocation17_spill] sm:$0xff]  ;;  %v1942_v38 = vadd.f32 %v25884_v24, %v1676_v49  ;;  %v25891_v49 = vld [vmem:[#allocation35_spill] sm:$0xff]  ;;  %v25900_v12 = vld [vmem:[#allocation18_spill] sm:$0xff]  ;;  %v2463_v25 = vadd.f32 %v25903_v27, %v2194_v45 }
 0x1df   : > { %v19105_v46 = vpop.f32.mrf.mxu0  ;;  %v1934_v55 = vadd.f32 %v25881_v2, %v1668_v1  ;;  %v2190_v1 = vadd.f32 %v18868_v10, %v1920_v31  ;;  %v25888_v10 = vld [vmem:[#allocation31_spill] sm:$0xff]  ;;  %v2458_v15 = vadd.f32 %v25892_v36, %v25891_v49  ;;  %v2461_v24 = vadd.f32 %v25900_v12, %v2192_v19  ;;  %v25907_v23 = vld [vmem:[#allocation50_spill] sm:$0xff]  ;;  %v25910_v19 = vld [vmem:[#allocation41_spill] sm:$0xff] }
 0x1e0   : > { %v2456_v31 = vadd.f32 %v25889_v26, %v25888_v10  ;;  %v25905_v10 = vld [vmem:[#allocation33_spill] sm:$0xff]  ;;  %v25906_v26 = vld [vmem:[#allocation36_spill] sm:$0xff]  ;;  %v2202_v49 = vadd.f32 %v25907_v23, %v1932_v42  ;;  %v25908_v36 = vld [vmem:[#allocation42_spill] sm:$0xff]  ;;  %v2467_v32 = vadd.f32 %v25910_v19, %v2198_v16  ;;  %v2214_v16 = vadd.f32 %v18973_v14, %v1944_v56 }
 0x1e1   : > { %v15487_v5 = vpop.f32.mrf.mxu0  ;;  %v2459_v2 = vadd.f32 %v25897_v37, %v2190_v1  ;;  %v19170_v1 = vpop.f32.mrf.mxu1  ;;  %v25911_v50 = vld [vmem:[#allocation54_spill] sm:$0xff]  ;;  %v25912_v37 = vld [vmem:[#allocation56_spill] sm:$0xff]  ;;  %v25913_v45 = vld [vmem:[#allocation45_spill] sm:$0xff] }
 0x1e2   : > { %v19126_v0 = vadd.f32 %v15487_v5, %v18954_v54  ;;  %v2453_v54 = vadd.f32 %v25887_v48, %v2184_v59  ;;  %v2462_v5 = vadd.f32 %v25899_v29, %v25898_v18  ;;  %v25904_v48 = vld [vmem:[#allocation39_spill] sm:$0xff]  ;;  %v2204_v28 = vadd.f32 %v25911_v50, %v1934_v55  ;;  %v25915_v63 = vld [vmem:[#allocation44_spill] sm:$0xff]  ;;  %v25920_v19 = vld [vmem:[#allocation53_spill] sm:$0xff] }
 0x1e3   : > { %v19132_v22 = vpop.f32.mrf.mxu0  ;;  %v2466_v62 = vadd.f32 %v25905_v10, %v25904_v48  ;;  %v2206_v18 = vadd.f32 %v25912_v37, %v1936_v11  ;;  %v25914_v12 = vld [vmem:[#allocation43_spill] sm:$0xff]  ;;  %v19180_v27 = vadd.f32 %v25915_v63, %v2200_v41  ;;  %v25917_v10 = vld [vmem:[#allocation49_spill] sm:$0xff]  ;;  %v2210_v55 = vadd.f32 %v18959_v35, %v1940_v30  ;;  %v25922_v35 = vld [vmem:[#allocation52_spill] sm:$0xff] }
 0x1e4   : > { %v2470_v51 = vadd.f32 %v25914_v12, %v25913_v45  ;;  %v2212_v11 = vadd.f32 %v18966_v40, %v1942_v38  ;;  %v2719_v37 = vadd.f32 %v18986_v34, %v2453_v54  ;;  %v19207_v30 = vadd.f32 %v25922_v35, %v2204_v28  ;;  %v25923_v40 = vld [vmem:[#allocation55_spill] sm:$0xff]  ;;  %v25924_v38 = vld [vmem:[#allocation66_spill] sm:$0xff]  ;;  %v25926_v63 = vld [vmem:[#allocation57_spill] sm:$0xff] }
 0x1e5   : > { %v15490_v20 = vpop.f32.mrf.mxu0  ;;  %v19210_v14 = vadd.f32 %v25923_v40, %v2206_v18  ;;  %v2722_v56 = vadd.f32 %v25924_v38, %v2456_v31  ;;  %v25929_v54 = vld [vmem:[#allocation63_spill] sm:$0xff]  ;;  %v25932_v18 = vld [vmem:[#allocation60_spill] sm:$0xff]  ;;  %v25933_v31 = vld [vmem:[#allocation61_spill] sm:$0xff] }
 0x1e6   : > { %v19155_v59 = vadd.f32 %v15490_v20, %v18961_v47  ;;  %v2465_v47 = vadd.f32 %v25906_v26, %v2196_v17  ;;  %v25909_v20 = vld [vmem:[#allocation40_spill] sm:$0xff]  ;;  %v25916_v17 = vld [vmem:[#allocation58_spill] sm:$0xff]  ;;  %v25918_v26 = vld [vmem:[#allocation47_spill] sm:$0xff] }
 0x1e7   : > { %v19163_v52 = vpop.f32.mrf.mxu0  ;;  %v2468_v61 = vadd.f32 %v25909_v20, %v25908_v36  ;;  %v2208_v42 = vadd.f32 %v25916_v17, %v1938_v6  ;;  %v19188_v23 = vadd.f32 %v25918_v26, %v25917_v10  ;;  %v25919_v20 = vld [vmem:[#allocation48_spill] sm:$0xff]  ;;  %v25921_v6 = vld [vmem:[#allocation51_spill] sm:$0xff]  ;;  %v25927_v10 = vld [vmem:[#allocation70_spill] sm:$0xff] }
 0x1e8   : > { %v19196_v41 = vadd.f32 %v25919_v20, %v2202_v49  ;;  %v19200_v50 = vadd.f32 %v25921_v6, %v25920_v19  ;;  %v25925_v49 = vld [vmem:[#allocation68_spill] sm:$0xff]  ;;  %v25931_v28 = vld [vmem:[#allocation59_spill] sm:$0xff]  ;;  %v19226_v19 = vadd.f32 %v25932_v18, %v2212_v11  ;;  %v19229_v6 = vadd.f32 %v25933_v31, %v2214_v16  ;;  %v25936_v40 = vld [vmem:[#allocation62_spill] sm:$0xff] }
 0x1e9   : > { %v15493_v29 = vpop.f32.mrf.mxu0  ;;  %v2721_v45 = vadd.f32 %v25925_v49, %v2455_v9  ;;  %v19215_v17 = vadd.f32 %v25926_v63, %v2208_v42  ;;  %v19223_v20 = vadd.f32 %v25931_v28, %v2210_v55  ;;  %v25934_v9 = vld [vmem:[#allocation74_spill] sm:$0xff]  ;;  %v25937_v38 = vld [vmem:[#allocation64_spill] sm:$0xff] }
 0x1ea   : > { %v19184_v48 = vadd.f32 %v15493_v29, %v18968_v7  ;;  %v2720_v7 = vadd.f32 %v18979_v4, %v2454_v57  ;;  %v19204_v29 = vpop.f32.mrf.mxu1  ;;  %v2724_v4 = vadd.f32 %v25927_v10, %v2458_v15  ;;  %v25928_v57 = vld [vmem:[#allocation72_spill] sm:$0xff]  ;;  %v2726_v35 = vadd.f32 %v25934_v9, %v2460_v39  ;;  %v25939_v63 = vld [vmem:[#allocation78_spill] sm:$0xff]  ;;  %v25945_v9 = vld [vmem:[#allocation69_spill] sm:$0xff] }
 0x1eb   : > { %v19193_v36 = vpop.f32.mrf.mxu0  ;;  %v2723_v34 = vadd.f32 %v25928_v57, %v2457_v21  ;;  %v2989_v21 = vadd.f32 %v25937_v38, %v2719_v37  ;;  %v25938_v49 = vld [vmem:[#allocation76_spill] sm:$0xff]  ;;  %v2728_v10 = vadd.f32 %v25939_v63, %v2462_v5  ;;  %v25940_v57 = vld [vmem:[#allocation65_spill] sm:$0xff]  ;;  %v25943_v31 = vld [vmem:[#allocation82_spill] sm:$0xff] }
 0x1ec   : > { %v2990_v15 = vadd.f32 %v25936_v40, %v2720_v7  ;;  %v19238_v55 = vpop.f32.mrf.mxu1  ;;  %v2992_v11 = vadd.f32 %v25940_v57, %v2722_v56  ;;  %v25942_v16 = vld [vmem:[#allocation80_spill] sm:$0xff]  ;;  %v2730_v39 = vadd.f32 %v25943_v31, %v2464_v8  ;;  %v19247_v7 = vld [vmem:[%s25944_s2] ss:$0 sm:$0xff]  ;;  %v25946_v40 = vld [vmem:[#allocation71_spill] sm:$0xff] }
 0x1ed   : > { %v15496_v12 = vpop.f32.mrf.mxu0  ;;  %v2727_v18 = vadd.f32 %v25942_v16, %v2461_v24  ;;  %v2993_v5 = vadd.f32 %v25946_v40, %v2723_v34  ;;  %v25947_v38 = vld [vmem:[#allocation84_spill] sm:$0xff]  ;;  %v25948_v56 = vld [vmem:[#allocation73_spill] sm:$0xff]  ;;  %v25951_v8 = vld [vmem:[#allocation90_spill] sm:$0xff] }
 0x1ee   : > { %v19220_v26 = vadd.f32 %v15496_v12, %v25929_v54  ;;  %v2725_v12 = vadd.f32 %v25938_v49, %v2459_v2  ;;  %v25941_v54 = vld [vmem:[#allocation67_spill] sm:$0xff]  ;;  %v2994_v2 = vadd.f32 %v25945_v9, %v2724_v4  ;;  %v2729_v49 = vadd.f32 %v25947_v38, %v2463_v25  ;;  %v25950_v24 = vld [vmem:[#allocation88_spill] sm:$0xff]  ;;  %v25953_v34 = vld [vmem:[#allocation77_spill] sm:$0xff]  ;;  %v19265_v25 = vpop.f32.mrf.mxu1 }
 0x1ef   : > { %v19232_v42 = vpop.f32.mrf.mxu0  ;;  %v2991_v28 = vadd.f32 %v25941_v54, %v2721_v45  ;;  %v2996_v57 = vadd.f32 %v25948_v56, %v2726_v35  ;;  %v25949_v45 = vld [vmem:[#allocation86_spill] sm:$0xff]  ;;  %v2731_v16 = vadd.f32 %v25950_v24, %v2465_v47  ;;  %v2734_v31 = vadd.f32 %v25951_v8, %v2468_v61  ;;  %v25952_v4 = vld [vmem:[#allocation75_spill] sm:$0xff]  ;;  %v25955_v61 = vld [vmem:[#allocation81_spill] sm:$0xff] }
 0x1f0   : > { %25930 = vst [vmem:[#allocation8_spill] sm:$0xff] %v19220_v26  ;;  %25935 = vst [vmem:[#allocation7_spill] sm:$0xff] %v19232_v42  ;;  %v2732_v54 = vadd.f32 %v25949_v45, %v2466_v62  ;;  %v19259_v26 = vld [vmem:[%s25378_s3] ss:$0 sm:$0xff]  ;;  %v2995_v9 = vadd.f32 %v25952_v4, %v2725_v12  ;;  %v19263_v40 = vadd.f32 %v25953_v34, %v2728_v10  ;;  %v25956_v12 = vld [vmem:[#allocation83_spill] sm:$0xff]  ;;  %v2960_v34 = vpop.f32.mrf.mxu1 }
 0x1f1   : > { %v15551_v37 = vpop.f32.mrf.mxu0  ;;  %v2733_v38 = vadd.f32 %v19042_v60, %v2467_v32  ;;  %v2736_v56 = vadd.f32 %v19046_v53, %v2470_v51  ;;  %v19277_v24 = vadd.f32 %v25956_v12, %v2729_v49  ;;  %v25958_v8 = vld [vmem:[#allocation87_spill] sm:$0xff]  ;;  %v25959_v4 = vld [vmem:[#allocation89_spill] sm:$0xff]  ;;  %v2735_v53 = vadd.f32 %v19050_v13, %v19180_v27  ;;  %v25963_v13 = vld [vmem:[#allocation96_spill] sm:$0xff] }
 0x1f2   : > { %v3259_v63 = vadd.f32 %v15551_v37, %v2990_v15  ;;  %v25954_v15 = vld [vmem:[#allocation79_spill] sm:$0xff]  ;;  %v19272_v37 = vadd.f32 %v25955_v61, %v2730_v39  ;;  %v19287_v39 = vadd.f32 %v25958_v8, %v2731_v16  ;;  %v19290_v60 = vadd.f32 %v25959_v4, %v2734_v31  ;;  %v25962_v31 = vld [vmem:[#allocation92_spill] sm:$0xff]  ;;  %v25966_v4 = vld [vmem:[#allocation94_spill] sm:$0xff] }
 0x1f3   : > { %v3099_v42 = vpop.f32.mrf.mxu0  ;;  %v19269_v47 = vadd.f32 %v25954_v15, %v2727_v18  ;;  %v25960_v51 = vld [vmem:[#allocation95_spill] sm:$0xff]  ;;  %v19305_v15 = vadd.f32 %v25962_v31, %v2736_v56  ;;  %v2737_v27 = vadd.f32 %v25963_v13, %v19196_v41  ;;  %v2739_v56 = vadd.f32 %v19076_v33, %v19207_v30 }
 0x1f4   : > { %v3297_v35 = vmul.f32 %v19247_v7, %v3259_v63  ;;  %v3258_v62 = vadd.f32 %v3099_v42, %v2989_v21  ;;  %v25957_v21 = vld [vmem:[#allocation85_spill] sm:$0xff]  ;;  %v2738_v49 = vadd.f32 %v25960_v51, %v19188_v23  ;;  %v25961_v16 = vld [vmem:[#allocation91_spill] sm:$0xff]  ;;  %v25964_v23 = vld [vmem:[#allocation98_spill] sm:$0xff] }
 0x1f5   : > { %v15554_v45 = vpop.f32.mrf.mxu0  ;;  %v19284_v18 = vadd.f32 %v25957_v21, %v2732_v54  ;;  %v2740_v12 = vadd.f32 %v25964_v23, %v19200_v50  ;;  %v15543_v50 = vpop.f32.mrf.mxu1 }
 0x1f6   : > { %v19280_v10 = vadd.f32 %v19259_v26, %v3297_v35  ;;  %v3296_v63 = vmul.f32 %v19247_v7, %v3258_v62  ;;  %v3261_v42 = vadd.f32 %v15554_v45, %v2992_v11  ;;  %v19302_v62 = vadd.f32 %v25961_v16, %v2733_v38 }
 0x1f7   : > { %v3109_v32 = vpop.f32.mrf.mxu0 }
 0x1f8   : > { %v3399_v35 = vmul.f32 0.70710677, %v19280_v10  ;;  %v19298_v11 = vadd.f32 %v19259_v26, %v3296_v63  ;;  %v3299_v54 = vmul.f32 %v19247_v7, %v3261_v42  ;;  %v3260_v61 = vadd.f32 %v3109_v32, %v2991_v28  ;;  %v25965_v42 = vld [vmem:[#allocation93_spill] sm:$0xff] }
 0x1f9   : > { %v15557_v45 = vpop.f32.mrf.mxu0  ;;  %v19316_v38 = vadd.f32 %v25965_v42, %v2735_v53  ;;  %v19322_v32 = vadd.f32 %v25966_v4, %v2738_v49  ;;  %v2741_v53 = vadd.f32 %v19105_v46, %v19210_v14  ;;  %v19335_v49 = vadd.f32 %v19085_v3, %v2740_v12 }
 0x1fa   : > { %16990 = verf.f32 %v3399_v35  ;;  %v3398_v63 = vmul.f32 0.70710677, %v19298_v11  ;;  %v19313_v21 = vadd.f32 %v19259_v26, %v3299_v54  ;;  %v3298_v8 = vmul.f32 %v19247_v7, %v3260_v61  ;;  %v25967_v54 = vld [vmem:[#allocation97_spill] sm:$0xff] }
 0x1fb   : > { %v3263_v41 = vadd.f32 %v15557_v45, %v2994_v2  ;;  %v3119_v28 = vpop.f32.mrf.mxu0  ;;  %v19326_v16 = vadd.f32 %v25967_v54, %v2737_v27  ;;  %v2743_v27 = vadd.f32 %v19132_v22, %v19215_v17  ;;  %v19349_v3 = vadd.f32 %v19142_v58, %v19097_v44  ;;  %v2970_v45 = vpop.f32.mrf.mxu1 }
 0x1fc   : > { %16992 = verf.f32 %v3398_v63  ;;  %v3401_v51 = vmul.f32 0.70710677, %v19313_v21  ;;  %v3262_v35 = vadd.f32 %v3119_v28, %v2993_v5  ;;  %v19331_v33 = vadd.f32 %v19259_v26, %v3298_v8 }
 0x1fd   : > { %v3301_v30 = vmul.f32 %v19247_v7, %v3263_v41  ;;  %v15560_v2 = vpop.f32.mrf.mxu0  ;;  %v19339_v5 = vadd.f32 %v19116_v43, %v2739_v56  ;;  %v19356_v12 = vadd.f32 %v19170_v1, %v2741_v53  ;;  %v2745_v22 = vadd.f32 %v19163_v52, %v19223_v20 }
 0x1fe   : > { %16994 = verf.f32 %v3401_v51  ;;  %v3300_v31 = vmul.f32 %v19247_v7, %v3262_v35  ;;  %v3265_v13 = vadd.f32 %v15560_v2, %v2996_v57  ;;  %v3400_v46 = vmul.f32 0.70710677, %v19331_v33  ;;  %v25968_v35 = vld [vmem:[#allocation7_spill] sm:$0xff] }
 0x1ff   : > { %v19345_v14 = vadd.f32 %v19259_v26, %v3301_v30  ;;  %v3129_v61 = vpop.f32.mrf.mxu0  ;;  %v2747_v44 = vadd.f32 %v19193_v36, %v19226_v19  ;;  %v19370_v1 = vadd.f32 %v19204_v29, %v19126_v0  ;;  %v19373_v52 = vadd.f32 %v19238_v55, %v2743_v27  ;;  %v15546_v19 = vpop.f32.mrf.mxu1 }
 0x200   : > { %v19352_v23 = vadd.f32 %v19259_v26, %v3300_v31  ;;  %v3303_v43 = vmul.f32 %v19247_v7, %v3265_v13  ;;  %v3264_v57 = vadd.f32 %v3129_v61, %v2995_v9  ;;  %16996 = verf.f32 %v3400_v46  ;;  %v25969_v13 = vld [vmem:[#allocation8_spill] sm:$0xff] }
 0x201   : > { %v3403_v17 = vmul.f32 0.70710677, %v19345_v14  ;;  %v15563_v63 = vpop.f32.mrf.mxu0  ;;  %v19378_v36 = vadd.f32 %v19265_v25, %v19155_v59  ;;  %v19384_v0 = vadd.f32 %v2960_v34, %v2745_v22  ;;  %v19387_v29 = vadd.f32 %v15543_v50, %v19184_v48  ;;  %v2980_v53 = vpop.f32.mrf.mxu1 }
 0x202   : > { %v3402_v58 = vmul.f32 0.70710677, %v19352_v23  ;;  %v19365_v42 = vadd.f32 %v19259_v26, %v3303_v43  ;;  %v3302_v9 = vmul.f32 %v19247_v7, %v3264_v57  ;;  %v3267_v20 = vadd.f32 %v15563_v63, %v19263_v40 }
 0x203   : > { %16998 = verf.f32 %v3403_v17  ;;  %v3139_v56 = vpop.f32.mrf.mxu0  ;;  %v19391_v4 = vadd.f32 %v2970_v45, %v2747_v44  ;;  %v2749_v34 = vadd.f32 %v25968_v35, %v19229_v6  ;;  %v3367_v54 = vmul.f32 0.5, %v19280_v10 }
 0x204   : > { %17000 = verf.f32 %v3402_v58  ;;  %v3405_v8 = vmul.f32 0.70710677, %v19365_v42  ;;  %v19382_v41 = vadd.f32 %v19259_v26, %v3302_v9  ;;  %v3305_v55 = vmul.f32 %v19247_v7, %v3267_v20 }
 0x205   : > { %v3266_v40 = vadd.f32 %v3139_v56, %v19269_v47  ;;  %v15566_v28 = vpop.f32.mrf.mxu0  ;;  %v19405_v27 = vadd.f32 %v15546_v19, %v25969_v13  ;;  %v3366_v6 = vmul.f32 0.5, %v19298_v11  ;;  %v3369_v9 = vmul.f32 0.5, %v19313_v21 }
 0x206   : > { %17002 = verf.f32 %v3405_v8  ;;  %v3404_v59 = vmul.f32 0.70710677, %v19382_v41  ;;  %v3269_v25 = vadd.f32 %v15566_v28, %v19272_v37  ;;  %v19399_v48 = vadd.f32 %v19259_v26, %v3305_v55 }
 0x207   : > { %v16991_v51 = vpop.eup %16990  ;;  %v3304_v50 = vmul.f32 %v19247_v7, %v3266_v40  ;;  %v3149_v47 = vpop.f32.mrf.mxu0 }
 0x208   : > { %v3463_v30 = vadd.f32 1.0, %v16991_v51  ;;  %17004 = verf.f32 %v3404_v59  ;;  %v3307_v2 = vmul.f32 %v19247_v7, %v3269_v25  ;;  %v3268_v31 = vadd.f32 %v3149_v47, %v19277_v24 }
 0x209   : > { %v16993_v37 = vpop.eup %16992  ;;  %v3407_v10 = vmul.f32 0.70710677, %v19399_v48  ;;  %v3342_v46 = vadd.f32 %v19259_v26, %v3304_v50  ;;  %v15569_v61 = vpop.f32.mrf.mxu0  ;;  %v19414_v24 = vadd.f32 %v2980_v53, %v2749_v34  ;;  %v3368_v59 = vmul.f32 0.5, %v19331_v33 }
 0x20a   : > { %v3495_v45 = vmul.f32 %v3463_v30, %v3367_v54  ;;  %v3462_v43 = vadd.f32 1.0, %v16993_v37  ;;  %v19411_v57 = vadd.f32 %v19259_v26, %v3307_v2  ;;  %v3306_v22 = vmul.f32 %v19247_v7, %v3268_v31 }
 0x20b   : > { %v16995_v17 = vpop.eup %16994  ;;  %17006 = verf.f32 %v3407_v10  ;;  %v3406_v63 = vmul.f32 0.70710677, %v3342_v46  ;;  %v3271_v44 = vadd.f32 %v15569_v61, %v19284_v18  ;;  %v3159_v11 = vpop.f32.mrf.mxu0  ;;  %v3371_v51 = vmul.f32 0.5, %v19345_v14 }
 0x20c   : > { %3528 = vst.msk [vmem:[#allocation2 + $0x21] sm:$0xff] %vm493_vm4, %v3495_v45  ;;  %v3494_v58 = vmul.f32 %v3462_v43, %v3366_v6  ;;  %v3465_v20 = vadd.f32 1.0, %v16995_v17  ;;  %v3409_v56 = vmul.f32 0.70710677, %v19411_v57  ;;  %v19421_v19 = vadd.f32 %v19259_v26, %v3306_v22 }
 0x20d   : > { %17008 = verf.f32 %v3406_v63  ;;  %v3309_v8 = vmul.f32 %v19247_v7, %v3271_v44  ;;  %v3270_v55 = vadd.f32 %v3159_v11, %v19287_v39  ;;  %v15572_v40 = vpop.f32.mrf.mxu0  ;;  %v16997_v28 = vpop.eup %16996  ;;  %v3370_v50 = vmul.f32 0.5, %v19352_v23 }
 0x20e   : > { %3527 = vst.msk [vmem:[#allocation2 + $0x19] sm:$0xff] %vm493_vm4, %v3494_v58  ;;  %v3497_v18 = vmul.f32 %v3465_v20, %v3369_v9  ;;  %17010 = verf.f32 %v3409_v56  ;;  %v3273_v21 = vadd.f32 %v15572_v40, %v19290_v60  ;;  %v3464_v25 = vadd.f32 1.0, %v16997_v28 }
 0x20f   : > { %v3408_v35 = vmul.f32 0.70710677, %v19421_v19  ;;  %v19431_v34 = vadd.f32 %v19259_v26, %v3309_v8  ;;  %v3169_v54 = vpop.f32.mrf.mxu0  ;;  %v3308_v47 = vmul.f32 %v19247_v7, %v3270_v55  ;;  %v3373_v2 = vmul.f32 0.5, %v19365_v42 }
 0x210   : > { %v16999_v39 = vpop.eup %16998  ;;  %3530 = vst.msk [vmem:[#allocation2 + $0x39] sm:$0xff] %vm493_vm4, %v3497_v18  ;;  %v3311_v33 = vmul.f32 %v19247_v7, %v3273_v21  ;;  %v3272_v60 = vadd.f32 %v3169_v54, %v19302_v62  ;;  %v3496_v30 = vmul.f32 %v3464_v25, %v3368_v59  ;;  %v3372_v61 = vmul.f32 0.5, %v19382_v41 }
 0x211   : > { %v17001_v53 = vpop.eup %17000  ;;  %v3467_v14 = vadd.f32 1.0, %v16999_v39  ;;  %17012 = verf.f32 %v3408_v35  ;;  %v15575_v31 = vpop.f32.mrf.mxu0  ;;  %v3411_v13 = vmul.f32 0.70710677, %v19431_v34  ;;  %v19441_v6 = vadd.f32 %v19259_v26, %v3308_v47 }
 0x212   : > { %v3466_v37 = vadd.f32 1.0, %v17001_v53  ;;  %v19444_v23 = vadd.f32 %v19259_v26, %v3311_v33  ;;  %3529 = vst.msk [vmem:[#allocation2 + $0x31] sm:$0xff] %vm493_vm4, %v3496_v30  ;;  %v3310_v45 = vmul.f32 %v19247_v7, %v3272_v60  ;;  %v3275_v42 = vadd.f32 %v15575_v31, %v19305_v15 }
 0x213   : > { %v17003_v10 = vpop.eup %17002  ;;  %v3499_v62 = vmul.f32 %v3467_v14, %v3371_v51  ;;  %v3179_v43 = vpop.f32.mrf.mxu0  ;;  %v3375_v63 = vmul.f32 0.5, %v19399_v48  ;;  %17014 = verf.f32 %v3411_v13  ;;  %v3374_v11 = vmul.f32 0.5, %v3342_v46 }
 0x214   : > { %v3498_v22 = vmul.f32 %v3466_v37, %v3370_v50  ;;  %v3469_v17 = vadd.f32 1.0, %v17003_v10  ;;  %v3410_v58 = vmul.f32 0.70710677, %v19441_v6  ;;  %v3413_v9 = vmul.f32 0.70710677, %v19444_v23 }
 0x215   : > { %v17005_v44 = vpop.eup %17004  ;;  %3532 = vst.msk [vmem:[#allocation2 + $0x51] sm:$0xff] %vm493_vm4, %v3499_v62  ;;  %v19455_v41 = vadd.f32 %v19259_v26, %v3310_v45  ;;  %v15578_v20 = vpop.f32.mrf.mxu0  ;;  %v19457_v56 = vld [vmem:[#allocation2 + $0x18] sm:$0xff]  ;;  %v3313_v48 = vmul.f32 %v19247_v7, %v3275_v42  ;;  %v3274_v55 = vadd.f32 %v3179_v43, %v19316_v38  ;;  %v19464_v46 = vld [vmem:[#allocation2 + $0x20] sm:$0xff]  ;;  %v3377_v40 = vmul.f32 0.5, %v19411_v57  ;;  %v19497_v62 = vld [vmem:[#allocation2 + $0x28] sm:$0x3] }
 0x216   : > { %3531 = vst.msk [vmem:[#allocation2 + $0x49] sm:$0xff] %vm493_vm4, %v3498_v22  ;;  %v3501_v15 = vmul.f32 %v3469_v17, %v3373_v2  ;;  %v3468_v8 = vadd.f32 1.0, %v17005_v44  ;;  %15652 = vmatprep.mubr.msk.f32.mxu0 %vm493_vm4, %v19457_v56  ;;  %17016 = verf.f32 %v3410_v58  ;;  %v3277_v18 = vadd.f32 %v15578_v20, %v19322_v32 }
 0x217   : > { %v3412_v28 = vmul.f32 0.70710677, %v19455_v41  ;;  %v3189_v59 = vpop.f32.mrf.mxu0  ;;  %15653 = vmatmul.mubr.msk.f32.gmra.mxu0 %vm493_vm4, %v19464_v46  ;;  %17018 = verf.f32 %v3413_v9  ;;  %v19473_v25 = vadd.f32 %v19259_v26, %v3313_v48  ;;  %v3312_v51 = vmul.f32 %v19247_v7, %v3274_v55 }
 0x218   : > { %v17007_v21 = vpop.eup %17006  ;;  %3534 = vst.msk [vmem:[#allocation2 + $0x69] sm:$0xff] %vm493_vm4, %v3501_v15  ;;  %v3500_v38 = vmul.f32 %v3468_v8, %v3372_v61  ;;  %v3315_v35 = vmul.f32 %v19247_v7, %v3277_v18  ;;  %v3276_v32 = vadd.f32 %v3189_v59, %v19326_v16  ;;  %v3376_v50 = vmul.f32 0.5, %v19421_v19 }
 0x219   : > { %v3471_v57 = vadd.f32 1.0, %v17007_v21  ;;  %17020 = verf.f32 %v3412_v28  ;;  %v15581_v54 = vpop.f32.mrf.mxu0  ;;  %v3415_v47 = vmul.f32 0.70710677, %v19473_v25  ;;  %v19482_v33 = vadd.f32 %v19259_v26, %v3312_v51  ;;  %v19485_v53 = vld [vmem:[#allocation2 + $0x30] sm:$0xff]  ;;  %v19487_v30 = vld [vmem:[#allocation2 + $0x38] sm:$0xff] }
 0x21a   : > { %v17009_v39 = vpop.eup %17008  ;;  %3533 = vst.msk [vmem:[#allocation2 + $0x61] sm:$0xff] %vm493_vm4, %v3500_v38  ;;  %v3279_v60 = vadd.f32 %v15581_v54, %v19335_v49  ;;  %v19490_v31 = vadd.f32 %v19259_v26, %v3315_v35  ;;  %v3314_v37 = vmul.f32 %v19247_v7, %v3276_v32  ;;  %15655 = vmatprep.mubr.msk.f32.mxu0 %vm493_vm4, %v19485_v53  ;;  %v3379_v10 = vmul.f32 0.5, %v19431_v34  ;;  %v19536_v38 = vld [vmem:[#allocation2 + $0x40] sm:$0x3] }
 0x21b   : > { %v17011_v14 = vpop.eup %17010  ;;  %v3503_v2 = vmul.f32 %v3471_v57, %v3375_v63  ;;  %v3470_v16 = vadd.f32 1.0, %v17009_v39  ;;  %v3199_v19 = vpop.f32.mrf.mxu0  ;;  %17022 = verf.f32 %v3415_v47  ;;  %v3414_v49 = vmul.f32 0.70710677, %v19482_v33  ;;  %15656 = vmatmul.mubr.msk.f32.gmra.mxu0 %vm493_vm4, %v19487_v30 }
 0x21c   : > { %v3473_v13 = vadd.f32 1.0, %v17011_v14  ;;  %v19503_v45 = vmul.f32 0.5, %v19441_v6  ;;  %v3417_v42 = vmul.f32 0.70710677, %v19490_v31  ;;  %v19507_v43 = vadd.f32 %v19259_v26, %v3314_v37 }
 0x21d   : > { %3536 = vst.msk [vmem:[#allocation2 + $0x81] sm:$0xff] %vm493_vm4, %v3503_v2  ;;  %v3502_v61 = vmul.f32 %v3470_v16, %v3374_v11  ;;  %v15584_v34 = vpop.f32.mrf.mxu0  ;;  %v19509_v22 = vld [vmem:[#allocation2 + $0x48] sm:$0xff]  ;;  %v19511_v17 = vld [vmem:[#allocation2 + $0x50] sm:$0xff]  ;;  %17024 = verf.f32 %v3414_v49  ;;  %v3317_v58 = vmul.f32 %v19247_v7, %v3279_v60  ;;  %v3677_v11 = vrot.slane %v19457_v56, 1 }
 0x21e   : > { %v17013_v63 = vpop.eup %17012  ;;  %v3505_v44 = vmul.f32 %v3473_v13, %v3377_v40  ;;  %15658 = vmatprep.mubr.msk.f32.mxu0 %vm493_vm4, %v19509_v22  ;;  %v3381_v9 = vmul.f32 0.5, %v19444_v23  ;;  %17026 = verf.f32 %v3417_v42  ;;  %v3416_v20 = vmul.f32 0.70710677, %v19507_v43  ;;  %v19532_v23 = vld [vmem:[%s25379_s4 + $0x28] sm:$0xff] }
 0x21f   : > { %3535 = vst.msk [vmem:[#allocation2 + $0x79] sm:$0xff] %vm493_vm4, %v3502_v61  ;;  %v3472_v6 = vadd.f32 1.0, %v17013_v63  ;;  %v3209_v15 = vpop.f32.mrf.mxu0  ;;  %v19522_v8 = vadd.f32 %v19259_v26, %v3317_v58  ;;  %v3678_v48 = vrot.slane %v19464_v46, 1  ;;  %v3680_v55 = vrot.slane %v19497_v62, 1  ;;  %15659 = vmatmul.mubr.msk.f32.gmra.mxu0 %vm493_vm4, %v19511_v17  ;;  %15847 = vmatprep.subr.mxu0 %v19532_v23 }
 0x220   : > { %3538 = vst.msk [vmem:[#allocation2 + $0x99] sm:$0xff] %vm493_vm4, %v3505_v44  ;;  %v3278_v40 = vadd.f32 %v3199_v19, %v19339_v5  ;;  %v17015_v28 = vpop.eup %17014  ;;  %17028 = verf.f32 %v3416_v20  ;;  %v3281_v59 = vadd.f32 %v15584_v34, %v19349_v3  ;;  %v3682_v21 = vrot.slane %v19485_v53, 1 }
 0x221   : > { %v3504_v18 = vmul.f32 %v3472_v6, %v3376_v50  ;;  %v15587_v51 = vpop.f32.mrf.mxu0  ;;  %v19538_v57 = vld [vmem:[#allocation2 + $0x60] sm:$0xff]  ;;  %v19540_v5 = vld [vmem:[#allocation2 + $0x68] sm:$0xff]  ;;  %v3475_v35 = vadd.f32 1.0, %v17015_v28  ;;  %v3380_v32 = vmul.f32 0.5, %v19455_v41  ;;  %v3419_v54 = vmul.f32 0.70710677, %v19522_v8 }
 0x222   : > { %v19546_v39 = vsel %vm608_vm2, %v3677_v11, %v3678_v48  ;;  %15661 = vmatprep.mubr.msk.f32.mxu0 %vm493_vm4, %v19538_v57  ;;  %v19554_v3 = vsel %vm608_vm2, %v3678_v48, %v3680_v55  ;;  %v3316_v50 = vmul.f32 %v19247_v7, %v3278_v40  ;;  %v3319_v41 = vmul.f32 %v19247_v7, %v3281_v59  ;;  %v19600_v59 = vld [vmem:[#allocation2 + $0x58] sm:$0x3] }
 0x223   : > { %3537 = vst.msk [vmem:[#allocation2 + $0x91] sm:$0xff] %vm493_vm4, %v3504_v18  ;;  %15602 = vmatprep.mubr.msk.f32.mxu1 %vm493_vm4, %v19546_v39  ;;  %v3683_v47 = vrot.slane %v19487_v30, 1  ;;  %v3219_v60 = vpop.f32.mrf.mxu0  ;;  %v17017_v14 = vpop.eup %17016  ;;  %v3507_v2 = vmul.f32 %v3475_v35, %v3379_v10  ;;  %17030 = verf.f32 %v3419_v54  ;;  %v3685_v16 = vrot.slane %v19536_v38, 1  ;;  %15662 = vmatmul.mubr.msk.f32.gmra.mxu0 %vm493_vm4, %v19540_v5 }
 0x224   : > { %15603 = vmatmul.mubr.msk.f32.gmra.mxu1 %vm493_vm4, %v19554_v3  ;;  %v3280_v37 = vadd.f32 %v3209_v15, %v19356_v12  ;;  %v17019_v19 = vpop.eup %17018  ;;  %v3474_v13 = vadd.f32 1.0, %v17017_v14  ;;  %v19566_v49 = vadd.f32 %v19259_v26, %v3316_v50  ;;  %v19569_v61 = vadd.f32 %v19259_v26, %v3319_v41 }
 0x225   : > { %v19572_v10 = vsel %vm608_vm2, %v3682_v21, %v3683_v47  ;;  %v15590_v42 = vpop.f32.mrf.mxu0  ;;  %3540 = vst.msk [vmem:[#allocation2 + $0xb1] sm:$0xff] %vm493_vm4, %v3507_v2  ;;  %v3477_v63 = vadd.f32 1.0, %v17019_v19  ;;  %v19578_v12 = vsel %vm608_vm2, %v3683_v47, %v3685_v16  ;;  %v3283_v58 = vadd.f32 %v15587_v51, %v19370_v1 }
 0x226   : > { %v17021_v34 = vpop.eup %17020  ;;  %15605 = vmatprep.mubr.msk.f32.mxu1 %vm493_vm4, %v19572_v10  ;;  %v3318_v44 = vmul.f32 %v19247_v7, %v3280_v37  ;;  %v19582_v11 = vld [vmem:[#allocation2 + $0x78] sm:$0xff]  ;;  %v19584_v6 = vld [vmem:[#allocation2 + $0x80] sm:$0xff]  ;;  %v3506_v20 = vmul.f32 %v3474_v13, %v19503_v45  ;;  %v3383_v48 = vmul.f32 0.5, %v19473_v25  ;;  %v3418_v55 = vmul.f32 0.70710677, %v19566_v49 }
 0x227   : > { %v3476_v15 = vadd.f32 1.0, %v17021_v34  ;;  %15664 = vmatprep.mubr.msk.f32.mxu0 %vm493_vm4, %v19582_v11  ;;  %v19591_v40 = vpop.f32.mrf.mxu0  ;;  %v3509_v28 = vmul.f32 %v3477_v63, %v3381_v9  ;;  %v3382_v18 = vmul.f32 0.5, %v19482_v33  ;;  %v3421_v1 = vmul.f32 0.70710677, %v19569_v61 }
 0x228   : > { %15606 = vmatmul.mubr.msk.f32.gmra.mxu1 %vm493_vm4, %v19578_v12  ;;  %v19598_v45 = vadd.f32 %v19259_v26, %v3318_v44  ;;  %15665 = vmatmul.mubr.msk.f32.gmra.mxu0 %vm493_vm4, %v19584_v6  ;;  %v17023_v25 = vpop.eup %17022  ;;  %3539 = vst.msk [vmem:[#allocation2 + $0xa9] sm:$0xff] %vm493_vm4, %v3506_v20  ;;  %17032 = verf.f32 %v3418_v55  ;;  %v3321_v33 = vmul.f32 %v19247_v7, %v3283_v58  ;;  %v3687_v9 = vrot.slane %v19509_v22, 1 }
 0x229   : > { %v3508_v21 = vmul.f32 %v3476_v15, %v3380_v32  ;;  %3542 = vst.msk [vmem:[#allocation2 + $0xc9] sm:$0xff] %vm493_vm4, %v3509_v28  ;;  %v3479_v51 = vadd.f32 1.0, %v17023_v25  ;;  %v3385_v35 = vmul.f32 0.5, %v19490_v31  ;;  %17034 = verf.f32 %v3421_v1  ;;  %v15593_v31 = vpop.f32.mrf.mxu0 }
 0x22a   : > { %v3420_v54 = vmul.f32 0.70710677, %v19598_v45  ;;  %v19610_v50 = vld [vmem:[#allocation2 + $0x90] sm:$0xff]  ;;  %v19612_v41 = vld [vmem:[#allocation2 + $0x98] sm:$0xff]  ;;  %v17025_v47 = vpop.eup %17024  ;;  %v19616_v32 = vadd.f32 %v19259_v26, %v3321_v33  ;;  %v3688_v14 = vrot.slane %v19511_v17, 1  ;;  %v3690_v2 = vrot.slane %v19600_v59, 1 }
 0x22b   : > { %3541 = vst.msk [vmem:[#allocation2 + $0xc1] sm:$0xff] %vm493_vm4, %v3508_v21  ;;  %v3282_v16 = vadd.f32 %v3219_v60, %v19373_v52  ;;  %15667 = vmatprep.mubr.msk.f32.mxu0 %vm493_vm4, %v19610_v50  ;;  %v17027_v37 = vpop.eup %17026  ;;  %v3511_v19 = vmul.f32 %v3479_v51, %v3383_v48  ;;  %v3478_v13 = vadd.f32 1.0, %v17025_v47  ;;  %v3285_v34 = vadd.f32 %v15590_v42, %v19378_v36 }
 0x22c   : > { %17036 = verf.f32 %v3420_v54  ;;  %15668 = vmatmul.mubr.msk.f32.gmra.mxu0 %vm493_vm4, %v19612_v41  ;;  %v3481_v63 = vadd.f32 1.0, %v17027_v37  ;;  %v3384_v44 = vmul.f32 0.5, %v19507_v43  ;;  %v3423_v58 = vmul.f32 0.70710677, %v19616_v32  ;;  %v19639_v43 = vld [vmem:[#allocation2 + $0x70] sm:$0x3] }
 0x22d   : > { %v19629_v52 = vsel %vm608_vm2, %v3687_v9, %v3688_v14  ;;  %v17029_v60 = vpop.eup %17028  ;;  %3544 = vst.msk [vmem:[#allocation2 + $0xe1] sm:$0xff] %vm493_vm4, %v3511_v19  ;;  %v3510_v20 = vmul.f32 %v3478_v13, %v3382_v18  ;;  %v19635_v36 = vsel %vm608_vm2, %v3688_v14, %v3690_v2  ;;  %v3320_v42 = vmul.f32 %v19247_v7, %v3282_v16  ;;  %v3239_v18 = vpop.f32.mrf.mxu0  ;;  %v19662_v2 = vld [vmem:[#allocation2 + $0x88] sm:$0x3] }
 0x22e   : > { %15608 = vmatprep.mubr.msk.f32.mxu1 %vm493_vm4, %v19629_v52  ;;  %v3323_v15 = vmul.f32 %v19247_v7, %v3285_v34  ;;  %v3513_v48 = vmul.f32 %v3481_v63, %v3385_v35  ;;  %v3480_v55 = vadd.f32 1.0, %v17029_v60  ;;  %17038 = verf.f32 %v3423_v58 }
 0x22f   : > { %15609 = vmatmul.mubr.msk.f32.gmra.mxu1 %vm493_vm4, %v19635_v36  ;;  %v3692_v28 = vrot.slane %v19538_v57, 1  ;;  %3543 = vst.msk [vmem:[#allocation2 + $0xd9] sm:$0xff] %vm493_vm4, %v3510_v20  ;;  %v3387_v1 = vmul.f32 0.5, %v19522_v8  ;;  %v19647_v25 = vadd.f32 %v19259_v26, %v3320_v42  ;;  %v3693_v33 = vrot.slane %v19540_v5, 1  ;;  %v19653_v9 = vld [vmem:[#allocation2 + $0xa8] sm:$0xff]  ;;  %v19655_v51 = vld [vmem:[#allocation2 + $0xb0] sm:$0xff] }
 0x230   : > { %v19650_v21 = vadd.f32 %v19259_v26, %v3323_v15  ;;  %v17031_v35 = vpop.eup %17030  ;;  %3546 = vst.msk [vmem:[#allocation2 + $0xf9] sm:$0xff] %vm493_vm4, %v3513_v48  ;;  %v3512_v54 = vmul.f32 %v3480_v55, %v3384_v44  ;;  %v3695_v47 = vrot.slane %v19639_v43, 1  ;;  %v3284_v8 = vadd.f32 %v19591_v40, %v19384_v0  ;;  %15670 = vmatprep.mubr.msk.f32.mxu0 %vm493_vm4, %v19653_v9 }
 0x231   : > { %v3287_v14 = vadd.f32 %v15593_v31, %v19387_v29  ;;  %v3483_v16 = vadd.f32 1.0, %v17031_v35  ;;  %v3386_v37 = vmul.f32 0.5, %v19566_v49  ;;  %v3422_v19 = vmul.f32 0.70710677, %v19647_v25  ;;  %15671 = vmatmul.mubr.msk.f32.gmra.mxu0 %vm493_vm4, %v19655_v51  ;;  %v15596_v31 = vpop.f32.mrf.mxu0 }
 0x232   : > { %v3697_v13 = vrot.slane %v19582_v11, 1  ;;  %v19671_v34 = vld [vmem:[#allocation2 + $0xc0] sm:$0xff]  ;;  %3545 = vst.msk [vmem:[#allocation2 + $0xf1] sm:$0xff] %vm493_vm4, %v3512_v54  ;;  %v3425_v0 = vmul.f32 0.70710677, %v19650_v21  ;;  %v19676_v29 = vsel %vm608_vm2, %v3692_v28, %v3693_v33  ;;  %v19679_v40 = vsel %vm608_vm2, %v3693_v33, %v3695_v47  ;;  %v19684_v63 = vld [vmem:[#allocation2 + $0xc8] sm:$0xff] }
 0x233   : > { %25970 = vst [vmem:[#allocation10_spill] sm:$0xff] %v19676_v29  ;;  %25971 = vst [vmem:[#allocation9_spill] sm:$0xff] %v19679_v40  ;;  %v3322_v49 = vmul.f32 %v19247_v7, %v3284_v8  ;;  %15673 = vmatprep.mubr.msk.f32.mxu0 %vm493_vm4, %v19671_v34  ;;  %v3515_v44 = vmul.f32 %v3483_v16, %v3387_v1  ;;  %17040 = verf.f32 %v3422_v19  ;;  %15611 = vmatprep.mubr.msk.f32.mxu1 %vm493_vm4, %v19676_v29 }
 0x234   : > { %v3325_v58 = vmul.f32 %v19247_v7, %v3287_v14  ;;  %v3698_v60 = vrot.slane %v19584_v6, 1  ;;  %17042 = verf.f32 %v3425_v0  ;;  %15612 = vmatmul.mubr.msk.f32.gmra.mxu1 %vm493_vm4, %v19679_v40  ;;  %v3700_v42 = vrot.slane %v19662_v2, 1  ;;  %v3249_v0 = vpop.f32.mrf.mxu0  ;;  %v17247_v40 = vld [vmem:[#allocation2 + $0x8] sm:$0xff] }
 0x235   : > { %v19693_v20 = vadd.f32 %v19259_v26, %v3322_v49  ;;  %v3286_v15 = vadd.f32 %v3239_v18, %v19391_v4  ;;  %v17033_v48 = vpop.eup %17032  ;;  %3548 = vst.msk [vmem:[#allocation2 + $0x111] sm:$0xff] %vm493_vm4, %v3515_v44  ;;  %v3389_v55 = vmul.f32 0.5, %v19569_v61  ;;  %v3289_v33 = vadd.f32 %v15596_v31, %v19405_v27  ;;  %15674 = vmatmul.mubr.msk.f32.gmra.mxu0 %vm493_vm4, %v19684_v63 }
 0x236   : > { %v19700_v28 = vadd.f32 %v19259_v26, %v3325_v58  ;;  %v19703_v1 = vsel %vm608_vm2, %v3697_v13, %v3698_v60  ;;  %v17035_v35 = vpop.eup %17034  ;;  %v3482_v54 = vadd.f32 1.0, %v17033_v48  ;;  %v19712_v61 = vsel %vm608_vm2, %v3698_v60, %v3700_v42  ;;  %v19715_v47 = vld [vmem:[#allocation2 + $0xd8] sm:$0xff]  ;;  %v19717_v8 = vld [vmem:[#allocation2 + $0xe0] sm:$0xff] }
 0x237   : > { %25972 = vst [vmem:[#allocation13_spill] sm:$0xff] %v19703_v1  ;;  %v3424_v4 = vmul.f32 0.70710677, %v19693_v20  ;;  %15614 = vmatprep.mubr.msk.f32.mxu1 %vm493_vm4, %v19703_v1  ;;  %25973 = vst [vmem:[#allocation11_spill] sm:$0xff] %v19712_v61  ;;  %v3702_v18 = vrot.slane %v19610_v50, 1  ;;  %v3485_v27 = vadd.f32 1.0, %v17035_v35  ;;  %v3324_v19 = vmul.f32 %v19247_v7, %v3286_v15  ;;  %15676 = vmatprep.mubr.msk.f32.mxu0 %vm493_vm4, %v19715_v47 }
 0x238   : > { %v3388_v14 = vmul.f32 0.5, %v19598_v45  ;;  %v3427_v16 = vmul.f32 0.70710677, %v19700_v28  ;;  %v19722_v13 = vld [vmem:[#allocation2 + $0xa0] sm:$0x3]  ;;  %v3514_v31 = vmul.f32 %v3482_v54, %v3386_v37  ;;  %15615 = vmatmul.mubr.msk.f32.gmra.mxu1 %vm493_vm4, %v19712_v61  ;;  %v3327_v44 = vmul.f32 %v19247_v7, %v3289_v33 }
 0x239   : > { %v17037_v49 = vpop.eup %17036  ;;  %17044 = verf.f32 %v3424_v4  ;;  %v3703_v45 = vrot.slane %v19612_v41, 1  ;;  %v3517_v58 = vmul.f32 %v3485_v27, %v3389_v55  ;;  %v19731_v42 = vadd.f32 %v19259_v26, %v3324_v19  ;;  %15677 = vmatmul.mubr.msk.f32.gmra.mxu0 %vm493_vm4, %v19717_v8  ;;  %v19735_v15 = vld [vmem:[#allocation2 + $0xf0] sm:$0xff]  ;;  %v19746_v35 = vld [vmem:[#allocation2 + $0xb8] sm:$0x3] }
 0x23a   : > { %v3484_v60 = vadd.f32 1.0, %v17037_v49  ;;  %17046 = verf.f32 %v3427_v16  ;;  %3547 = vst.msk [vmem:[#allocation2 + $0x109] sm:$0xff] %vm493_vm4, %v3514_v31  ;;  %v19739_v37 = vadd.f32 %v19259_v26, %v3327_v44  ;;  %v3705_v55 = vrot.slane %v19722_v13, 1  ;;  %15679 = vmatprep.mubr.msk.f32.mxu0 %vm493_vm4, %v19735_v15  ;;  %v19750_v54 = vld [vmem:[#allocation2 + $0xf8] sm:$0xff] }
 0x23b   : > { %v19742_v48 = vsel %vm608_vm2, %v3702_v18, %v3703_v45  ;;  %v3288_v33 = vadd.f32 %v3249_v0, %v19414_v24  ;;  %v17039_v4 = vpop.eup %17038  ;;  %3550 = vst.msk [vmem:[#allocation2 + $0x129] sm:$0xff] %vm493_vm4, %v3517_v58  ;;  %v3426_v16 = vmul.f32 0.70710677, %v19731_v42  ;;  %v3707_v18 = vrot.slane %v19653_v9, 1  ;;  %v19768_v58 = vld [vmem:[#allocation2 + $0xd0] sm:$0x3] }
 0x23c   : > { %25974 = vst [vmem:[#allocation14_spill] sm:$0xff] %v19742_v48  ;;  %v3516_v27 = vmul.f32 %v3484_v60, %v3388_v14  ;;  %15617 = vmatprep.mubr.msk.f32.mxu1 %vm493_vm4, %v19742_v48  ;;  %v3391_v24 = vmul.f32 0.5, %v19616_v32  ;;  %v3487_v19 = vadd.f32 1.0, %v17039_v4  ;;  %v3429_v0 = vmul.f32 0.70710677, %v19739_v37 }
 0x23d   : > { %v19760_v49 = vsel %vm608_vm2, %v3703_v45, %v3705_v55  ;;  %17048 = verf.f32 %v3426_v16  ;;  %v3326_v14 = vmul.f32 %v19247_v7, %v3288_v33  ;;  %v3708_v31 = vrot.slane %v19655_v51, 1  ;;  %15680 = vmatmul.mubr.msk.f32.gmra.mxu0 %vm493_vm4, %v19750_v54 }
 0x23e   : > { %25975 = vst [vmem:[#allocation16_spill] sm:$0xff] %v19760_v49  ;;  %3549 = vst.msk [vmem:[#allocation2 + $0x121] sm:$0xff] %vm493_vm4, %v3516_v27  ;;  %15618 = vmatmul.mubr.msk.f32.gmra.mxu1 %vm493_vm4, %v19760_v49  ;;  %v3710_v44 = vrot.slane %v19746_v35, 1  ;;  %v3519_v32 = vmul.f32 %v3487_v19, %v3391_v24  ;;  %17050 = verf.f32 %v3429_v0  ;;  %v3712_v45 = vrot.slane %v19671_v34, 1 }
 0x23f   : > { %v3713_v60 = vrot.slane %v19684_v63, 1  ;;  %v19775_v55 = vadd.f32 %v19259_v26, %v3326_v14  ;;  %v19778_v7 = vsel %vm608_vm2, %v3707_v18, %v3708_v31  ;;  %v3715_v16 = vrot.slane %v19768_v58, 1  ;;  %v19792_v18 = vld [vmem:[#allocation2 + $0xe8] sm:$0x3] }
 0x240   : > { %25976 = vst [vmem:[#allocation17_spill] sm:$0xff] %v19778_v7  ;;  %v19781_v33 = vsel %vm608_vm2, %v3708_v31, %v3710_v44  ;;  %v17041_v4 = vpop.eup %17040  ;;  %3552 = vst.msk [vmem:[#allocation2 + $0x141] sm:$0xff] %vm493_vm4, %v3519_v32  ;;  %15620 = vmatprep.mubr.msk.f32.mxu1 %vm493_vm4, %v19778_v7  ;;  %v3717_v26 = vrot.slane %v19715_v47, 1  ;;  %v3718_v24 = vrot.slane %v19717_v8, 1  ;;  %v3390_v0 = vmul.f32 0.5, %v19647_v25 }
 0x241   : > { %25977 = vst [vmem:[#allocation19_spill] sm:$0xff] %v19781_v33  ;;  %v19787_v27 = vsel %vm608_vm2, %v3712_v45, %v3713_v60  ;;  %v17043_v19 = vpop.eup %17042  ;;  %v3486_v14 = vadd.f32 1.0, %v17041_v4  ;;  %v3428_v31 = vmul.f32 0.70710677, %v19775_v55  ;;  %v19798_v44 = vld [vmem:[#allocation2 + $0x108] sm:$0xff]  ;;  %v19800_v32 = vld [vmem:[#allocation2 + $0x110] sm:$0xff]  ;;  %v19806_v49 = vsel %vm608_vm2, %v3713_v60, %v3715_v16 }
 0x242   : > { %25978 = vst [vmem:[#allocation20_spill] sm:$0xff] %v19787_v27  ;;  %15621 = vmatmul.mubr.msk.f32.gmra.mxu1 %vm493_vm4, %v19781_v33  ;;  %v3393_v45 = vmul.f32 0.5, %v19650_v21  ;;  %v3489_v7 = vadd.f32 1.0, %v17043_v19  ;;  %25979 = vst [vmem:[#allocation22_spill] sm:$0xff] %v19806_v49  ;;  %v19809_v25 = vsel %vm608_vm2, %v3717_v26, %v3718_v24  ;;  %15682 = vmatprep.mubr.msk.f32.mxu0 %vm493_vm4, %v19798_v44  ;;  %v3722_v33 = vrot.slane %v19735_v15, 1 }
 0x243   : > { %15623 = vmatprep.mubr.msk.f32.mxu1 %vm493_vm4, %v19787_v27  ;;  %25980 = vst [vmem:[#allocation26_spill] sm:$0xff] %v19809_v25  ;;  %v3518_v4 = vmul.f32 %v3486_v14, %v3390_v0  ;;  %17052 = verf.f32 %v3428_v31  ;;  %v3723_v48 = vrot.slane %v19750_v54, 1  ;;  %15683 = vmatmul.mubr.msk.f32.gmra.mxu0 %vm493_vm4, %v19800_v32  ;;  %v3720_v19 = vrot.slane %v19792_v18, 1  ;;  %v19825_v0 = vld [vmem:[#allocation2 + $0x100] sm:$0x3] }
 0x244   : > { %v3521_v21 = vmul.f32 %v3489_v7, %v3393_v45  ;;  %v3392_v7 = vmul.f32 0.5, %v19693_v20  ;;  %v3395_v45 = vmul.f32 0.5, %v19700_v28  ;;  %v3727_v61 = vrot.slane %v19798_v44, 1 }
 0x245   : > { %v19818_v60 = vld [vmem:[#allocation2 + $0x120] sm:$0xff]  ;;  %v19820_v16 = vld [vmem:[#allocation2 + $0x128] sm:$0xff]  ;;  %3551 = vst.msk [vmem:[#allocation2 + $0x139] sm:$0xff] %vm493_vm4, %v3518_v4  ;;  %v19835_v4 = vsel %vm608_vm2, %v3718_v24, %v3720_v19  ;;  %v19838_v27 = vsel %vm608_vm2, %v3722_v33, %v3723_v48  ;;  %v3728_v1 = vrot.slane %v19800_v32, 1  ;;  %v3725_v28 = vrot.slane %v19825_v0, 1 }
 0x246   : > { %v17045_v26 = vpop.eup %17044  ;;  %15624 = vmatmul.mubr.msk.f32.gmra.mxu1 %vm493_vm4, %v19806_v49  ;;  %15685 = vmatprep.mubr.msk.f32.mxu0 %vm493_vm4, %v19818_v60  ;;  %3554 = vst.msk [vmem:[#allocation2 + $0x159] sm:$0xff] %vm493_vm4, %v3521_v21  ;;  %25981 = vst [vmem:[#allocation23_spill] sm:$0xff] %v19835_v4  ;;  %v19847_v24 = vld [vmem:[#allocation2 + $0x118] sm:$0x3]  ;;  %v3394_v33 = vmul.f32 0.5, %v19731_v42  ;;  %v4331_v29 = vrot.slane %v17247_v40, 2 }
 0x247   : > { %v17047_v14 = vpop.eup %17046  ;;  %v3488_v31 = vadd.f32 1.0, %v17045_v26  ;;  %15626 = vmatprep.mubr.msk.f32.mxu1 %vm493_vm4, %v19809_v25  ;;  %25982 = vst [vmem:[#allocation25_spill] sm:$0xff] %v19838_v27  ;;  %15686 = vmatmul.mubr.msk.f32.gmra.mxu0 %vm493_vm4, %v19820_v16  ;;  %v19854_v26 = vsel %vm608_vm2, %v3723_v48, %v3725_v28  ;;  %v19967_v40 = vld [vmem:[%s25379_s4 + $0x38] sm:$0xff] }
 0x248   : > { %v3491_v49 = vadd.f32 1.0, %v17047_v14  ;;  %25983 = vst [vmem:[#allocation31_spill] sm:$0xff] %v19854_v26 }
 0x249   : > { %v3520_v20 = vmul.f32 %v3488_v31, %v3392_v7  ;;  %v19858_v7 = vsel %vm608_vm2, %v3727_v61, %v3728_v1  ;;  %v3732_v31 = vrot.slane %v19818_v60, 1 }
 0x24a   : > { %v3523_v21 = vmul.f32 %v3491_v49, %v3395_v45  ;;  %15627 = vmatmul.mubr.msk.f32.gmra.mxu1 %vm493_vm4, %v19835_v4  ;;  %v17049_v19 = vpop.eup %17048  ;;  %25984 = vst [vmem:[#allocation28_spill] sm:$0xff] %v19858_v7  ;;  %v3733_v45 = vrot.slane %v19820_v16, 1  ;;  %v3730_v4 = vrot.slane %v19847_v24, 1 }
 0x24b   : > { %3553 = vst.msk [vmem:[#allocation2 + $0x151] sm:$0xff] %vm493_vm4, %v3520_v20  ;;  %15629 = vmatprep.mubr.msk.f32.mxu1 %vm493_vm4, %v19838_v27  ;;  %v17051_v14 = vpop.eup %17050  ;;  %v3490_v49 = vadd.f32 1.0, %v17049_v19  ;;  %v3397_v20 = vmul.f32 0.5, %v19739_v37 }
 0x24c   : > { %3556 = vst.msk [vmem:[#allocation2 + $0x171] sm:$0xff] %vm493_vm4, %v3523_v21  ;;  %v3493_v42 = vadd.f32 1.0, %v17051_v14  ;;  %v19864_v27 = vld [vmem:[#allocation2 + $0x138] sm:$0xff]  ;;  %v19866_v48 = vld [vmem:[#allocation2 + $0x140] sm:$0xff]  ;;  %v19870_v21 = vld [vmem:[#allocation2 + $0x130] sm:$0x3]  ;;  %v19877_v37 = vsel %vm608_vm2, %v3728_v1, %v3730_v4  ;;  %v19883_v19 = vsel %vm608_vm2, %v3732_v31, %v3733_v45 }
 0x24d   : > { %v3522_v28 = vmul.f32 %v3490_v49, %v3394_v33  ;;  %15688 = vmatprep.mubr.msk.f32.mxu0 %vm493_vm4, %v19864_v27  ;;  %25985 = vst [vmem:[#allocation29_spill] sm:$0xff] %v19877_v37  ;;  %25986 = vst [vmem:[#allocation35_spill] sm:$0xff] %v19883_v19  ;;  %v3737_v33 = vrot.slane %v19864_v27, 1  ;;  %v3738_v14 = vrot.slane %v19866_v48, 1  ;;  %v3396_v1 = vmul.f32 0.5, %v19775_v55 }
 0x24e   : > { %15630 = vmatmul.mubr.msk.f32.gmra.mxu1 %vm493_vm4, %v19854_v26  ;;  %v3525_v61 = vmul.f32 %v3493_v42, %v3397_v20  ;;  %15689 = vmatmul.mubr.msk.f32.gmra.mxu0 %vm493_vm4, %v19866_v48  ;;  %v3735_v20 = vrot.slane %v19870_v21, 1  ;;  %v19892_v42 = vld [vmem:[#allocation2 + $0x148] sm:$0x3] }
 0x24f   : > { %15632 = vmatprep.mubr.msk.f32.mxu1 %vm493_vm4, %v19858_v7  ;;  %3555 = vst.msk [vmem:[#allocation2 + $0x169] sm:$0xff] %vm493_vm4, %v3522_v28  ;;  %v3740_v26 = vrot.slane %v19892_v42, 1 }
 0x250   : > { %v17053_v49 = vpop.eup %17052  ;;  %3558 = vst.msk [vmem:[#allocation2 + $0x189] sm:$0xff] %vm493_vm4, %v3525_v61  ;;  %v19901_v7 = vsel %vm608_vm2, %v3733_v45, %v3735_v20  ;;  %v19906_v61 = vsel %vm608_vm2, %v3737_v33, %v3738_v14  ;;  %v19916_v45 = vld [vmem:[#allocation2 + $0x160] sm:$0x3] }
 0x251   : > { %v3492_v4 = vadd.f32 1.0, %v17053_v49  ;;  %25988 = vst [vmem:[#allocation34_spill] sm:$0xff] %v19901_v7  ;;  %25989 = vst [vmem:[#allocation12_spill] sm:$0xff] %v19906_v61  ;;  %v19921_v33 = vsel %vm608_vm2, %v3738_v14, %v3740_v26 }
 0x252   : > { %15633 = vmatmul.mubr.msk.f32.gmra.mxu1 %vm493_vm4, %v19877_v37  ;;  %v19894_v28 = vld [vmem:[#allocation2 + $0x150] sm:$0xff]  ;;  %v19896_v31 = vld [vmem:[#allocation2 + $0x158] sm:$0xff]  ;;  %25990 = vst [vmem:[#allocation37_spill] sm:$0xff] %v19921_v33 }
 0x253   : > { %25987 = vst [vmem:[#allocation32_spill] sm:$0xff] %v19896_v31  ;;  %15635 = vmatprep.mubr.msk.f32.mxu1 %vm493_vm4, %v19883_v19  ;;  %15691 = vmatprep.mubr.msk.f32.mxu0 %vm493_vm4, %v19894_v28  ;;  %v3524_v55 = vmul.f32 %v3492_v4, %v3396_v1  ;;  %v3742_v49 = vrot.slane %v19894_v28, 1  ;;  %v3743_v37 = vrot.slane %v19896_v31, 1  ;;  %v3745_v19 = vrot.slane %v19916_v45, 1  ;;  %v19941_v26 = vld [vmem:[#allocation2 + $0x178] sm:$0x3] }
 0x254   : > { %15692 = vmatmul.mubr.msk.f32.gmra.mxu0 %vm493_vm4, %v19896_v31 }
 0x255   : > { %3557 = vst.msk [vmem:[#allocation2 + $0x181] sm:$0xff] %vm493_vm4, %v3524_v55  ;;  %v19928_v4 = vsel %vm608_vm2, %v3742_v49, %v3743_v37  ;;  %v19946_v14 = vsel %vm608_vm2, %v3743_v37, %v3745_v19  ;;  %v17246_v49 = vld [vmem:[#allocation2] sm:$0xff]  ;;  %v17248_v19 = vld [vmem:[#allocation2 + $0x10] sm:$0x3] }
 0x256   : > { %15636 = vmatmul.mubr.msk.f32.gmra.mxu1 %vm493_vm4, %v19901_v7  ;;  %v19923_v20 = vld [vmem:[#allocation2 + $0x168] sm:$0xff]  ;;  %v19925_v1 = vld [vmem:[#allocation2 + $0x170] sm:$0xff] }
 0x257   : > { %15638 = vmatprep.mubr.msk.f32.mxu1 %vm493_vm4, %v19906_v61  ;;  %15694 = vmatprep.mubr.msk.f32.mxu0 %vm493_vm4, %v19923_v20  ;;  %v3747_v55 = vrot.slane %v19923_v20, 1  ;;  %v3748_v7 = vrot.slane %v19925_v1, 1  ;;  %v4330_v61 = vrot.slane %v17246_v49, 2 }
 0x258   : > { %15695 = vmatmul.mubr.msk.f32.gmra.mxu0 %vm493_vm4, %v19925_v1 }
 0x259   : > { %15749 = vmatprep.mubr.msk.f32.mxu0 %vm493_vm4, %v19457_v56  ;;  %v19949_v25 = vsel %vm608_vm2, %v3747_v55, %v3748_v7  ;;  %v4333_v55 = vrot.slane %v17248_v19, 2  ;;  %v4332_v49 = vsel %vm1275_vm3, %v4330_v61, %v4331_v29  ;;  %v15651_v61 = vpop.f32.mrf.mxu0  ;;  %v15601_v19 = vpop.f32.mrf.mxu1 }
 0x25a   : > { %15639 = vmatmul.mubr.msk.f32.gmra.mxu1 %vm493_vm4, %v19921_v33  ;;  %25991 = vst [vmem:[#allocation46_spill] sm:$0xff] %v19949_v25  ;;  %v3750_v33 = vrot.slane %v19941_v26, 1 }
 0x25b   : > { %15641 = vmatprep.mubr.msk.f32.mxu1 %vm493_vm4, %v19928_v4 }
 0x25c   : > { %15750 = vmatmul.mubr.msk.f32.vlgmr.msra.gmra.mxu0 %vm493_vm4, %v19464_v46  ;;  %v19961_v37 = vsel %vm608_vm2, %v3748_v7, %v3750_v33  ;;  %v4335_v7 = vrot.slane %v19457_v56, 2  ;;  %v4336_v33 = vrot.slane %v19464_v46, 2  ;;  %v19988_v56 = vld [vmem:[%s25379_s4 + $0x30] sm:$0xff] }
 0x25d   : > { %15752 = vmatprep.mubr.msk.f32.mxu0 %vm493_vm4, %v19485_v53  ;;  %15848 = vmatpush3.msra.mxu0 %v19532_v23  ;;  %v4334_v23 = vsel %vm1275_vm3, %v4331_v29, %v4333_v55  ;;  %v4341_v29 = vrot.slane %v19487_v30, 2  ;;  %v17249_v55 = vld [vmem:[%s25379_s4 + $0x20] sm:$0xff] }
 0x25e   : > { %15642 = vmatmul.mubr.msk.f32.gmra.mxu1 %vm493_vm4, %v19946_v14  ;;  %15947 = vmatprep.subr.mxu0 %v19967_v40  ;;  %v19992_v46 = vsel %vm1275_vm3, %v4335_v7, %v4336_v33 }
 0x25f   : > { %15644 = vmatprep.mubr.msk.f32.mxu1 %vm493_vm4, %v19949_v25  ;;  %v19981_v25 = vadd.f32 %v15651_v61, %v15601_v19  ;;  %v4346_v61 = vrot.slane %v19511_v17, 2  ;;  %v4351_v19 = vrot.slane %v19540_v5, 2 }
 0x260   : > { %15753 = vmatmul.mubr.msk.f32.gmra.mxu0 %vm493_vm4, %v19487_v30  ;;  %v4345_v30 = vrot.slane %v19509_v22, 2 }
 0x261   : > { %15755 = vmatprep.mubr.msk.f32.mxu0 %vm493_vm4, %v19509_v22  ;;  %25992 = vst [vmem:[#allocation38_spill] sm:$0xff] %v19981_v25  ;;  %v4405_v25 = vrot.slane %v19923_v20, 2 }
 0x262   : > { %15645 = vmatmul.mubr.msk.f32.gmra.mxu1 %vm493_vm4, %v19961_v37  ;;  %v20030_v22 = vsel %vm1275_vm3, %v4345_v30, %v4346_v61 }
 0x263   : > { %15699 = vmatprep.mubr.msk.f32.mxu1 %vm493_vm4, %v4332_v49  ;;  %v4340_v49 = vrot.slane %v19485_v53, 2 }
 0x264   : > { %15756 = vmatmul.mubr.msk.f32.gmra.mxu0 %vm493_vm4, %v19511_v17  ;;  %v4350_v17 = vrot.slane %v19538_v57, 2 }
 0x265   : > { %15758 = vmatprep.mubr.msk.f32.mxu0 %vm493_vm4, %v19538_v57  ;;  %v20013_v53 = vsel %vm1275_vm3, %v4340_v49, %v4341_v29 }
 0x266   : > { %15700 = vmatmul.mubr.msk.f32.vlgmr.msra.gmra.mxu1 %vm493_vm4, %v4334_v23  ;;  %v4338_v23 = vrot.slane %v19497_v62, 2  ;;  %v4343_v62 = vrot.slane %v19536_v38, 2  ;;  %v4348_v38 = vrot.slane %v19600_v59, 2  ;;  %v20047_v57 = vsel %vm1275_vm3, %v4350_v17, %v4351_v19 }
 0x267   : > { %15798 = vmatpush3.msra.mxu1 %v17249_v55  ;;  %15702 = vmatprep.mubr.msk.f32.mxu1 %vm493_vm4, %v19992_v46  ;;  %v4353_v59 = vrot.slane %v19639_v43, 2  ;;  %v4358_v43 = vrot.slane %v19662_v2, 2  ;;  %v4363_v2 = vrot.slane %v19722_v13, 2  ;;  %v4371_v17 = vrot.slane %v19684_v63, 2 }
 0x268   : > { %15897 = vmatprep.subr.mxu1 %v19988_v56  ;;  %v20006_v7 = vsel %vm1275_vm3, %v4336_v33, %v4338_v23  ;;  %15759 = vmatmul.mubr.msk.f32.gmra.mxu0 %vm493_vm4, %v19540_v5  ;;  %v20023_v33 = vsel %vm1275_vm3, %v4341_v29, %v4343_v62  ;;  %v20040_v49 = vsel %vm1275_vm3, %v4346_v61, %v4348_v38  ;;  %v4355_v5 = vrot.slane %v19582_v11, 2 }
 0x269   : > { %15761 = vmatprep.mubr.msk.f32.mxu0 %vm493_vm4, %v19582_v11  ;;  %v4356_v29 = vrot.slane %v19584_v6, 2  ;;  %v20057_v55 = vsel %vm1275_vm3, %v4351_v19, %v4353_v59  ;;  %v4361_v23 = vrot.slane %v19612_v41, 2  ;;  %v4366_v61 = vrot.slane %v19655_v51, 2 }
 0x26a   : > { %15703 = vmatmul.mubr.msk.f32.gmra.mxu1 %vm493_vm4, %v20006_v7  ;;  %v4368_v13 = vrot.slane %v19746_v35, 2  ;;  %v4373_v35 = vrot.slane %v19768_v58, 2  ;;  %v4378_v58 = vrot.slane %v19792_v18, 2  ;;  %v4383_v18 = vrot.slane %v19825_v0, 2 }
 0x26b   : > { %15705 = vmatprep.mubr.msk.f32.mxu1 %vm493_vm4, %v20013_v53  ;;  %v20064_v11 = vsel %vm1275_vm3, %v4355_v5, %v4356_v29  ;;  %v20074_v30 = vsel %vm1275_vm3, %v4356_v29, %v4358_v43  ;;  %v20091_v62 = vsel %vm1275_vm3, %v4361_v23, %v4363_v2  ;;  %v4375_v5 = vrot.slane %v19715_v47, 2 }
 0x26c   : > { %15762 = vmatmul.mubr.msk.f32.gmra.mxu0 %vm493_vm4, %v19584_v6  ;;  %25993 = vst [vmem:[#allocation21_spill] sm:$0xff] %v20064_v11  ;;  %v4360_v6 = vrot.slane %v19610_v50, 2  ;;  %25994 = vst [vmem:[#allocation15_spill] sm:$0xff] %v20074_v30  ;;  %v20108_v19 = vsel %vm1275_vm3, %v4366_v61, %v4368_v13  ;;  %v4376_v29 = vrot.slane %v19717_v8, 2  ;;  %v20125_v59 = vsel %vm1275_vm3, %v4371_v17, %v4373_v35 }
 0x26d   : > { %15764 = vmatprep.mubr.msk.f32.mxu0 %vm493_vm4, %v19610_v50  ;;  %25996 = vst [vmem:[#allocation30_spill] sm:$0xff] %v20091_v62  ;;  %25998 = vst [vmem:[#allocation27_spill] sm:$0xff] %v20108_v19  ;;  %v4381_v43 = vrot.slane %v19750_v54, 2  ;;  %v4385_v2 = vrot.slane %v19798_v44, 2  ;;  %v4388_v0 = vrot.slane %v19847_v24, 2  ;;  %v4393_v24 = vrot.slane %v19870_v21, 2 }
 0x26e   : > { %15706 = vmatmul.mubr.msk.f32.gmra.mxu1 %vm493_vm4, %v20023_v33  ;;  %v20081_v50 = vsel %vm1275_vm3, %v4360_v6, %v4361_v23  ;;  %26000 = vst [vmem:[#allocation33_spill] sm:$0xff] %v20125_v59  ;;  %v20132_v6 = vsel %vm1275_vm3, %v4375_v5, %v4376_v29  ;;  %v4380_v23 = vrot.slane %v19735_v15, 2  ;;  %v4390_v5 = vrot.slane %v19818_v60, 2 }
 0x26f   : > { %15708 = vmatprep.mubr.msk.f32.mxu1 %vm493_vm4, %v20030_v22  ;;  %25995 = vst [vmem:[#allocation18_spill] sm:$0xff] %v20081_v50  ;;  %26001 = vst [vmem:[#allocation36_spill] sm:$0xff] %v20132_v6  ;;  %v4398_v21 = vrot.slane %v19892_v42, 2  ;;  %v4403_v42 = vrot.slane %v19916_v45, 2  ;;  %v4408_v45 = vrot.slane %v19941_v26, 2  ;;  %v26018_v26 = vld [vmem:[#allocation11_spill] sm:$0xff] }
 0x270   : > { %15765 = vmatmul.mubr.msk.f32.gmra.mxu0 %vm493_vm4, %v19612_v41  ;;  %v4365_v41 = vrot.slane %v19653_v9, 2 }
 0x271   : > { %15767 = vmatprep.mubr.msk.f32.mxu0 %vm493_vm4, %v19653_v9 }
 0x272   : > { %15709 = vmatmul.mubr.msk.f32.gmra.mxu1 %vm493_vm4, %v20040_v49  ;;  %v20098_v9 = vsel %vm1275_vm3, %v4365_v41, %v4366_v61  ;;  %v20142_v41 = vsel %vm1275_vm3, %v4376_v29, %v4378_v58  ;;  %v20149_v61 = vsel %vm1275_vm3, %v4380_v23, %v4381_v43  ;;  %v4391_v29 = vrot.slane %v19820_v16, 2 }
 0x273   : > { %15711 = vmatprep.mubr.msk.f32.mxu1 %vm493_vm4, %v20047_v57  ;;  %25997 = vst [vmem:[#allocation24_spill] sm:$0xff] %v20098_v9  ;;  %26002 = vst [vmem:[#allocation50_spill] sm:$0xff] %v20142_v41  ;;  %v4396_v58 = vrot.slane %v19866_v48, 2 }
 0x274   : > { %15768 = vmatmul.mubr.msk.f32.gmra.mxu0 %vm493_vm4, %v19655_v51  ;;  %v4370_v51 = vrot.slane %v19671_v34, 2  ;;  %26003 = vst [vmem:[#allocation42_spill] sm:$0xff] %v20149_v61  ;;  %v20183_v23 = vsel %vm1275_vm3, %v4390_v5, %v4391_v29  ;;  %v4400_v5 = vrot.slane %v19894_v28, 2 }
 0x275   : > { %15770 = vmatprep.mubr.msk.f32.mxu0 %vm493_vm4, %v19671_v34  ;;  %26007 = vst [vmem:[#allocation56_spill] sm:$0xff] %v20183_v23 }
 0x276   : > { %15712 = vmatmul.mubr.msk.f32.gmra.mxu1 %vm493_vm4, %v20057_v55  ;;  %v20115_v38 = vsel %vm1275_vm3, %v4370_v51, %v4371_v17  ;;  %v4386_v51 = vrot.slane %v19800_v32, 2  ;;  %v20159_v17 = vsel %vm1275_vm3, %v4381_v43, %v4383_v18  ;;  %v4395_v43 = vrot.slane %v19864_v27, 2 }
 0x277   : > { %15714 = vmatprep.mubr.msk.f32.mxu1 %vm493_vm4, %v20064_v11  ;;  %25999 = vst [vmem:[#allocation39_spill] sm:$0xff] %v20115_v38  ;;  %26004 = vst [vmem:[#allocation40_spill] sm:$0xff] %v20159_v17 }
 0x278   : > { %15771 = vmatmul.mubr.msk.f32.gmra.mxu0 %vm493_vm4, %v19684_v63  ;;  %v20166_v13 = vsel %vm1275_vm3, %v4385_v2, %v4386_v51  ;;  %v20176_v35 = vsel %vm1275_vm3, %v4386_v51, %v4388_v0  ;;  %v20193_v2 = vsel %vm1275_vm3, %v4391_v29, %v4393_v24  ;;  %v20197_v51 = vld [vmem:[#allocation2 + $0x180] sm:$0xff]  ;;  %v20202_v18 = vsel %vm1275_vm3, %v4395_v43, %v4396_v58  ;;  %v20211_v29 = vld [vmem:[#allocation2 + $0x188] sm:$0xff] }
 0x279   : > { %15773 = vmatprep.mubr.msk.f32.mxu0 %vm493_vm4, %v19715_v47  ;;  %26005 = vst [vmem:[#allocation41_spill] sm:$0xff] %v20166_v13  ;;  %26006 = vst [vmem:[#allocation54_spill] sm:$0xff] %v20176_v35  ;;  %v4401_v0 = vrot.slane %v19896_v31, 2  ;;  %v20214_v24 = vsel %vm1275_vm3, %v4396_v58, %v4398_v21  ;;  %v26023_v21 = vld [vmem:[#allocation20_spill] sm:$0xff] }
 0x27a   : > { %15715 = vmatmul.mubr.msk.f32.gmra.mxu1 %vm493_vm4, %v20074_v30  ;;  %26008 = vst [vmem:[#allocation45_spill] sm:$0xff] %v20193_v2  ;;  %26009 = vst [vmem:[#allocation43_spill] sm:$0xff] %v20202_v18 }
 0x27b   : > { %15717 = vmatprep.mubr.msk.f32.mxu1 %vm493_vm4, %v20081_v50  ;;  %26010 = vst [vmem:[#allocation44_spill] sm:$0xff] %v20214_v24  ;;  %v20221_v43 = vsel %vm1275_vm3, %v4400_v5, %v4401_v0  ;;  %v20231_v58 = vsel %vm1275_vm3, %v4401_v0, %v4403_v42  ;;  %v26022_v0 = vld [vmem:[#allocation19_spill] sm:$0xff]  ;;  %v26024_v42 = vld [vmem:[#allocation22_spill] sm:$0xff] }
 0x27c   : > { %15774 = vmatmul.mubr.msk.f32.gmra.mxu0 %vm493_vm4, %v19717_v8  ;;  %26011 = vst [vmem:[#allocation58_spill] sm:$0xff] %v20221_v43  ;;  %26012 = vst [vmem:[#allocation49_spill] sm:$0xff] %v20231_v58 }
 0x27d   : > { %15776 = vmatprep.mubr.msk.f32.mxu0 %vm493_vm4, %v19735_v15 }
 0x27e   : > { %15718 = vmatmul.mubr.msk.f32.gmra.mxu1 %vm493_vm4, %v20091_v62 }
 0x27f   : > { %15720 = vmatprep.mubr.msk.f32.mxu1 %vm493_vm4, %v20098_v9 }
 0x280   : > { %15777 = vmatmul.mubr.msk.f32.gmra.mxu0 %vm493_vm4, %v19750_v54 }
 0x281   : > { %15779 = vmatprep.mubr.msk.f32.mxu0 %vm493_vm4, %v19798_v44 }
 0x282   : > { %15721 = vmatmul.mubr.msk.f32.gmra.mxu1 %vm493_vm4, %v20108_v19 }
 0x283   : > { %15723 = vmatprep.mubr.msk.f32.mxu1 %vm493_vm4, %v20115_v38 }
 0x284   : > { %15780 = vmatmul.mubr.msk.f32.gmra.mxu0 %vm493_vm4, %v19800_v32 }
 0x285   : > { %15782 = vmatprep.mubr.msk.f32.mxu0 %vm493_vm4, %v19818_v60 }
 0x286   : > { %15724 = vmatmul.mubr.msk.f32.gmra.mxu1 %vm493_vm4, %v20125_v59 }
 0x287   : > { %15726 = vmatprep.mubr.msk.f32.mxu1 %vm493_vm4, %v20132_v6 }
 0x288   : > { %15783 = vmatmul.mubr.msk.f32.gmra.mxu0 %vm493_vm4, %v19820_v16 }
 0x289   : > { %15785 = vmatprep.mubr.msk.f32.mxu0 %vm493_vm4, %v19864_v27 }
 0x28a   : > { %15727 = vmatmul.mubr.msk.f32.gmra.mxu1 %vm493_vm4, %v20142_v41 }
 0x28b   : > { %15729 = vmatprep.mubr.msk.f32.mxu1 %vm493_vm4, %v20149_v61 }
 0x28c   : > { %15786 = vmatmul.mubr.msk.f32.gmra.mxu0 %vm493_vm4, %v19866_v48 }
 0x28d   : > { %15788 = vmatprep.mubr.msk.f32.mxu0 %vm493_vm4, %v19894_v28 }
 0x28e   : > { %15730 = vmatmul.mubr.msk.f32.gmra.mxu1 %vm493_vm4, %v20159_v17 }
 0x28f   : > { %15732 = vmatprep.mubr.msk.f32.mxu1 %vm493_vm4, %v20166_v13 }
 0x290   : > { %15789 = vmatmul.mubr.msk.f32.gmra.mxu0 %vm493_vm4, %v19896_v31  ;;  %v4406_v31 = vrot.slane %v19925_v1, 2 }
 0x291   : > { %15791 = vmatprep.mubr.msk.f32.mxu0 %vm493_vm4, %v19923_v20 }
 0x292   : > { %15733 = vmatmul.mubr.msk.f32.gmra.mxu1 %vm493_vm4, %v20176_v35  ;;  %v20238_v5 = vsel %vm1275_vm3, %v4405_v25, %v4406_v31  ;;  %v20262_v25 = vld [vmem:[%s25379_s4 + $0x40] sm:$0xff] }
 0x293   : > { %15735 = vmatprep.mubr.msk.f32.mxu1 %vm493_vm4, %v20183_v23  ;;  %26013 = vst [vmem:[#allocation47_spill] sm:$0xff] %v20238_v5 }
 0x294   : > { %15792 = vmatmul.mubr.msk.f32.gmra.mxu0 %vm493_vm4, %v19925_v1 }
 0x295   : > { %15794 = vmatprep.mubr.msk.f32.mxu0 %vm493_vm4, %v20197_v51 }
 0x296   : > { %15736 = vmatmul.mubr.msk.f32.gmra.mxu1 %vm493_vm4, %v20193_v2 }
 0x297   : > { %15738 = vmatprep.mubr.msk.f32.mxu1 %vm493_vm4, %v20202_v18 }
 0x298   : > { %15795 = vmatmul.mubr.msk.f32.gmra.mxu0 %vm493_vm4, %v20211_v29 }
 0x299   : > { %15849 = vmatprep.mubr.msk.f32.mxu0 %vm493_vm4, %v19992_v46  ;;  %v20247_v46 = vsel %vm1275_vm3, %v4406_v31, %v4408_v45  ;;  %v26017_v31 = vld [vmem:[#allocation13_spill] sm:$0xff]  ;;  %v26025_v45 = vld [vmem:[#allocation26_spill] sm:$0xff] }
 0x29a   : > { %15739 = vmatmul.mubr.msk.f32.gmra.mxu1 %vm493_vm4, %v20214_v24  ;;  %26014 = vst [vmem:[#allocation48_spill] sm:$0xff] %v20247_v46 }
 0x29b   : > { %15741 = vmatprep.mubr.msk.f32.mxu1 %vm493_vm4, %v20221_v43 }
 0x29c   : > { %15850 = vmatmul.mubr.msk.f32.vlgmr.msra.gmra.mxu0 %vm493_vm4, %v20006_v7  ;;  %v26021_v7 = vld [vmem:[#allocation17_spill] sm:$0xff] }
 0x29d   : > { %15852 = vmatprep.mubr.msk.f32.mxu0 %vm493_vm4, %v20013_v53  ;;  %15948 = vmatpush3.msra.mxu0 %v19967_v40  ;;  %v26019_v40 = vld [vmem:[#allocation14_spill] sm:$0xff] }
 0x29e   : > { %15742 = vmatmul.mubr.msk.f32.gmra.mxu1 %vm493_vm4, %v20231_v58 }
 0x29f   : > { %15744 = vmatprep.mubr.msk.f32.mxu1 %vm493_vm4, %v20238_v5 }
 0x2a0   : > { %15853 = vmatmul.mubr.msk.f32.gmra.mxu0 %vm493_vm4, %v20023_v33 }
 0x2a1   : > { %15855 = vmatprep.mubr.msk.f32.mxu0 %vm493_vm4, %v20030_v22 }
 0x2a2   : > { %15745 = vmatmul.mubr.msk.f32.gmra.mxu1 %vm493_vm4, %v20247_v46 }
 0x2a3   : > { %15799 = vmatprep.mubr.msk.f32.mxu1 %vm493_vm4, %v19546_v39  ;;  %v26015_v39 = vld [vmem:[#allocation10_spill] sm:$0xff] }
 0x2a4   : > { %15856 = vmatmul.mubr.msk.f32.gmra.mxu0 %vm493_vm4, %v20040_v49 }
 0x2a5   : > { %15858 = vmatprep.mubr.msk.f32.mxu0 %vm493_vm4, %v20047_v57 }
 0x2a6   : > { %15800 = vmatmul.mubr.msk.f32.vlgmr.msra.gmra.mxu1 %vm493_vm4, %v19554_v3  ;;  %v26016_v3 = vld [vmem:[#allocation9_spill] sm:$0xff] }
 0x2a7   : > { %15898 = vmatpush3.msra.mxu1 %v19988_v56  ;;  %15802 = vmatprep.mubr.msk.f32.mxu1 %vm493_vm4, %v19572_v10  ;;  %v26020_v56 = vld [vmem:[#allocation16_spill] sm:$0xff] }
 0x2a8   : > { %15997 = vmatprep.subr.mxu1 %v20262_v25  ;;  %15859 = vmatmul.mubr.msk.f32.gmra.mxu0 %vm493_vm4, %v20057_v55 }
 0x2a9   : > { %15861 = vmatprep.mubr.msk.f32.mxu0 %vm493_vm4, %v20064_v11 }
 0x2aa   : > { %15803 = vmatmul.mubr.msk.f32.gmra.mxu1 %vm493_vm4, %v19578_v12 }
 0x2ab   : > { %15805 = vmatprep.mubr.msk.f32.mxu1 %vm493_vm4, %v19629_v52 }
 0x2ac   : > { %15862 = vmatmul.mubr.msk.f32.gmra.mxu0 %vm493_vm4, %v20074_v30 }
 0x2ad   : > { %15864 = vmatprep.mubr.msk.f32.mxu0 %vm493_vm4, %v20081_v50 }
 0x2ae   : > { %15806 = vmatmul.mubr.msk.f32.gmra.mxu1 %vm493_vm4, %v19635_v36 }
 0x2af   : > { %15808 = vmatprep.mubr.msk.f32.mxu1 %vm493_vm4, %v26015_v39 }
 0x2b0   : > { %15865 = vmatmul.mubr.msk.f32.gmra.mxu0 %vm493_vm4, %v20091_v62 }
 0x2b1   : > { %15867 = vmatprep.mubr.msk.f32.mxu0 %vm493_vm4, %v20098_v9 }
 0x2b2   : > { %15809 = vmatmul.mubr.msk.f32.gmra.mxu1 %vm493_vm4, %v26016_v3 }
 0x2b3   : > { %15811 = vmatprep.mubr.msk.f32.mxu1 %vm493_vm4, %v26017_v31 }
 0x2b4   : > { %15868 = vmatmul.mubr.msk.f32.gmra.mxu0 %vm493_vm4, %v20108_v19 }
 0x2b5   : > { %15870 = vmatprep.mubr.msk.f32.mxu0 %vm493_vm4, %v20115_v38  ;;  %v26036_v38 = vld [vmem:[#allocation37_spill] sm:$0xff] }
 0x2b6   : > { %15812 = vmatmul.mubr.msk.f32.gmra.mxu1 %vm493_vm4, %v26018_v26 }
 0x2b7   : > { %15814 = vmatprep.mubr.msk.f32.mxu1 %vm493_vm4, %v26019_v40 }
 0x2b8   : > { %15871 = vmatmul.mubr.msk.f32.gmra.mxu0 %vm493_vm4, %v20125_v59  ;;  %v20362_v59 = vpop.f32.mrf.mxu0 }
 0x2b9   : > { %15873 = vmatprep.mubr.msk.f32.mxu0 %vm493_vm4, %v20132_v6  ;;  %v26032_v6 = vld [vmem:[#allocation34_spill] sm:$0xff]  ;;  %26034 = vst [vmem:[#allocation53_spill] sm:$0xff] %v20362_v59 }
 0x2ba   : > { %15815 = vmatmul.mubr.msk.f32.gmra.mxu1 %vm493_vm4, %v26020_v56 }
 0x2bb   : > { %15817 = vmatprep.mubr.msk.f32.mxu1 %vm493_vm4, %v26021_v7 }
 0x2bc   : > { %15874 = vmatmul.mubr.msk.f32.gmra.mxu0 %vm493_vm4, %v20142_v41  ;;  %v26026_v41 = vld [vmem:[#allocation23_spill] sm:$0xff] }
 0x2bd   : > { %15876 = vmatprep.mubr.msk.f32.mxu0 %vm493_vm4, %v20149_v61  ;;  %v26027_v61 = vld [vmem:[#allocation25_spill] sm:$0xff] }
 0x2be   : > { %15818 = vmatmul.mubr.msk.f32.gmra.mxu1 %vm493_vm4, %v26022_v0 }
 0x2bf   : > { %15820 = vmatprep.mubr.msk.f32.mxu1 %vm493_vm4, %v26023_v21 }
 0x2c0   : > { %15877 = vmatmul.mubr.msk.f32.gmra.mxu0 %vm493_vm4, %v20159_v17  ;;  %v26028_v17 = vld [vmem:[#allocation31_spill] sm:$0xff] }
 0x2c1   : > { %15879 = vmatprep.mubr.msk.f32.mxu0 %vm493_vm4, %v20166_v13  ;;  %v26029_v13 = vld [vmem:[#allocation28_spill] sm:$0xff] }
 0x2c2   : > { %15821 = vmatmul.mubr.msk.f32.gmra.mxu1 %vm493_vm4, %v26024_v42 }
 0x2c3   : > { %15823 = vmatprep.mubr.msk.f32.mxu1 %vm493_vm4, %v26025_v45 }
 0x2c4   : > { %15880 = vmatmul.mubr.msk.f32.gmra.mxu0 %vm493_vm4, %v20176_v35  ;;  %v26030_v35 = vld [vmem:[#allocation29_spill] sm:$0xff] }
 0x2c5   : > { %15882 = vmatprep.mubr.msk.f32.mxu0 %vm493_vm4, %v20183_v23  ;;  %v26031_v23 = vld [vmem:[#allocation35_spill] sm:$0xff] }
 0x2c6   : > { %15824 = vmatmul.mubr.msk.f32.gmra.mxu1 %vm493_vm4, %v26026_v41 }
 0x2c7   : > { %15826 = vmatprep.mubr.msk.f32.mxu1 %vm493_vm4, %v26027_v61 }
 0x2c8   : > { %15883 = vmatmul.mubr.msk.f32.gmra.mxu0 %vm493_vm4, %v20193_v2  ;;  %v5262_v2 = vrot.slane %v20211_v29, 2 }
 0x2c9   : > { %15885 = vmatprep.mubr.msk.f32.mxu0 %vm493_vm4, %v20202_v18  ;;  %v5261_v18 = vrot.slane %v20197_v51, 2 }
 0x2ca   : > { %15827 = vmatmul.mubr.msk.f32.gmra.mxu1 %vm493_vm4, %v26028_v17 }
 0x2cb   : > { %15829 = vmatprep.mubr.msk.f32.mxu1 %vm493_vm4, %v26029_v13 }
 0x2cc   : > { %15886 = vmatmul.mubr.msk.f32.gmra.mxu0 %vm493_vm4, %v20214_v24  ;;  %v26033_v24 = vld [vmem:[#allocation12_spill] sm:$0xff] }
 0x2cd   : > { %15888 = vmatprep.mubr.msk.f32.mxu0 %vm493_vm4, %v20221_v43  ;;  %v3609_v43 = vld [vmem:[#allocation2 + $0x190] sm:$0x3] }
 0x2ce   : > { %15830 = vmatmul.mubr.msk.f32.gmra.mxu1 %vm493_vm4, %v26030_v35  ;;  %v5264_v19 = vrot.slane %v3609_v43, 2 }
 0x2cf   : > { %15832 = vmatprep.mubr.msk.f32.mxu1 %vm493_vm4, %v26031_v23 }
 0x2d0   : > { %15889 = vmatmul.mubr.msk.f32.gmra.mxu0 %vm493_vm4, %v20231_v58  ;;  %v20367_v58 = vsel %vm1275_vm3, %v5261_v18, %v5262_v2  ;;  %v20376_v9 = vsel %vm1275_vm3, %v5262_v2, %v5264_v19  ;;  %v4995_v18 = vrot.slane %v20197_v51, 1 }
 0x2d1   : > { %15891 = vmatprep.mubr.msk.f32.mxu0 %vm493_vm4, %v20238_v5  ;;  %26035 = vst [vmem:[#allocation51_spill] sm:$0xff] %v20367_v58  ;;  %26037 = vst [vmem:[#allocation52_spill] sm:$0xff] %v20376_v9 }
 0x2d2   : > { %15833 = vmatmul.mubr.msk.f32.gmra.mxu1 %vm493_vm4, %v26032_v6 }
 0x2d3   : > { %15835 = vmatprep.mubr.msk.f32.mxu1 %vm493_vm4, %v26033_v24 }
 0x2d4   : > { %15892 = vmatmul.mubr.msk.f32.gmra.mxu0 %vm493_vm4, %v20247_v46  ;;  %v4996_v46 = vrot.slane %v20211_v29, 1 }
 0x2d5   : > { %15894 = vmatprep.mubr.msk.f32.mxu0 %vm493_vm4, %v20367_v58  ;;  %v26038_v58 = vld [vmem:[#allocation46_spill] sm:$0xff] }
 0x2d6   : > { %15836 = vmatmul.mubr.msk.f32.gmra.mxu1 %vm493_vm4, %v26036_v38  ;;  %v20393_v19 = vsel %vm608_vm2, %v4995_v18, %v4996_v46  ;;  %v17250_v18 = vld [vmem:[#allocation2 + $0x30] sm:$0xff] }
 0x2d7   : > { %15838 = vmatprep.mubr.msk.f32.mxu1 %vm493_vm4, %v19928_v4  ;;  %v15654_v5 = vpop.f32.mrf.mxu0 }
 0x2d8   : > { %15895 = vmatmul.mubr.msk.f32.gmra.mxu0 %vm493_vm4, %v20376_v9 }
 0x2d9   : > { %v4181_v59 = vpop.f32.mrf.mxu0  ;;  %15949 = vmatprep.mubr.msk.f32.mxu0 %vm493_vm4, %v19572_v10  ;;  %v4998_v10 = vrot.slane %v3609_v43, 1 }
 0x2da   : > { %15839 = vmatmul.mubr.msk.f32.gmra.mxu1 %vm493_vm4, %v19946_v14 }
 0x2db   : > { %15841 = vmatprep.mubr.msk.f32.mxu1 %vm493_vm4, %v26038_v58  ;;  %v15657_v62 = vpop.f32.mrf.mxu0  ;;  %v20400_v50 = vsel %vm608_vm2, %v4996_v46, %v4998_v10 }
 0x2dc   : > { %15950 = vmatmul.mubr.msk.f32.vlgmr.msra.gmra.mxu0 %vm493_vm4, %v19578_v12  ;;  %v20406_v12 = vpop.f32.mrf.mxu1 }
 0x2dd   : > { %15952 = vmatprep.mubr.msk.f32.mxu0 %vm493_vm4, %v19629_v52  ;;  %v4191_v2 = vpop.f32.mrf.mxu0  ;;  %26039 = vst [vmem:[#allocation55_spill] sm:$0xff] %v20406_v12 }
 0x2de   : > { %15842 = vmatmul.mubr.msk.f32.gmra.mxu1 %vm493_vm4, %v19961_v37 }
 0x2df   : > { %15844 = vmatprep.mubr.msk.f32.mxu1 %vm493_vm4, %v20393_v19  ;;  %v15660_v9 = vpop.f32.mrf.mxu0 }
 0x2e0   : > { %15953 = vmatmul.mubr.msk.f32.gmra.mxu0 %vm493_vm4, %v19635_v36  ;;  %v17251_v36 = vld [vmem:[#allocation2 + $0x38] sm:$0xff] }
 0x2e1   : > { %15955 = vmatprep.mubr.msk.f32.mxu0 %vm493_vm4, %v26015_v39  ;;  %v4201_v52 = vpop.f32.mrf.mxu0  ;;  %v17252_v39 = vld [vmem:[#allocation2 + $0x48] sm:$0xff] }
 0x2e2   : > { %15845 = vmatmul.mubr.msk.f32.gmra.mxu1 %vm493_vm4, %v20400_v50 }
 0x2e3   : > { %15899 = vmatprep.mubr.msk.f32.mxu1 %vm493_vm4, %v17250_v18  ;;  %v15663_v30 = vpop.f32.mrf.mxu0 }
 0x2e4   : > { %v15604_v43 = vpop.f32.mrf.mxu1  ;;  %15956 = vmatmul.mubr.msk.f32.gmra.mxu0 %vm493_vm4, %v26016_v3  ;;  %v17253_v3 = vld [vmem:[#allocation2 + $0x50] sm:$0xff] }
 0x2e5   : > { %v20411_v11 = vadd.f32 %v15654_v5, %v15604_v43  ;;  %15958 = vmatprep.mubr.msk.f32.mxu0 %vm493_vm4, %v26017_v31  ;;  %v4211_v10 = vpop.f32.mrf.mxu0  ;;  %v17254_v31 = vld [vmem:[#allocation2 + $0x60] sm:$0xff] }
 0x2e6   : > { %15900 = vmatmul.mubr.msk.f32.vlgmr.msra.gmra.mxu1 %vm493_vm4, %v17251_v36  ;;  %v3892_v46 = vpop.f32.mrf.mxu1 }
 0x2e7   : > { %15998 = vmatpush3.msra.mxu1 %v20262_v25  ;;  %15902 = vmatprep.mubr.msk.f32.mxu1 %vm493_vm4, %v17252_v39  ;;  %v20420_v18 = vadd.f32 %v4181_v59, %v3892_v46  ;;  %v17256_v39 = vld [vmem:[#allocation2 + $0x78] sm:$0xff] }
 0x2e8   : > { %v15607_v5 = vpop.f32.mrf.mxu1  ;;  %v15666_v43 = vpop.f32.mrf.mxu0  ;;  %15959 = vmatmul.mubr.msk.f32.gmra.mxu0 %vm493_vm4, %v26018_v26 }
 0x2e9   : > { %v20422_v12 = vadd.f32 %v15657_v62, %v15607_v5  ;;  %15961 = vmatprep.mubr.msk.f32.mxu0 %vm493_vm4, %v26019_v40  ;;  %v17255_v62 = vld [vmem:[#allocation2 + $0x68] sm:$0xff] }
 0x2ea   : > { %15903 = vmatmul.mubr.msk.f32.gmra.mxu1 %vm493_vm4, %v17253_v3  ;;  %v3902_v36 = vpop.f32.mrf.mxu1  ;;  %v4221_v25 = vpop.f32.mrf.mxu0 }
 0x2eb   : > { %15905 = vmatprep.mubr.msk.f32.mxu1 %vm493_vm4, %v17254_v31  ;;  %v20430_v59 = vadd.f32 %v4191_v2, %v3902_v36  ;;  %v17257_v2 = vld [vmem:[#allocation2 + $0x80] sm:$0xff]  ;;  %v17258_v36 = vld [vmem:[#allocation2 + $0x90] sm:$0xff] }
 0x2ec   : > { %v15669_v46 = vpop.f32.mrf.mxu0  ;;  %15962 = vmatmul.mubr.msk.f32.gmra.mxu0 %vm493_vm4, %v26020_v56 }
 0x2ed   : > { %15964 = vmatprep.mubr.msk.f32.mxu0 %vm493_vm4, %v26021_v7 }
 0x2ee   : > { %15906 = vmatmul.mubr.msk.f32.gmra.mxu1 %vm493_vm4, %v17255_v62  ;;  %v4231_v26 = vpop.f32.mrf.mxu0 }
 0x2ef   : > { %15908 = vmatprep.mubr.msk.f32.mxu1 %vm493_vm4, %v17256_v39  ;;  %v15610_v40 = vpop.f32.mrf.mxu1  ;;  %v17260_v39 = vld [vmem:[#allocation2 + $0xa8] sm:$0xff] }
 0x2f0   : > { %v20438_v5 = vadd.f32 %v15660_v9, %v15610_v40  ;;  %15965 = vmatmul.mubr.msk.f32.gmra.mxu0 %vm493_vm4, %v26022_v0  ;;  %v17259_v0 = vld [vmem:[#allocation2 + $0x98] sm:$0xff] }
 0x2f1   : > { %v3912_v3 = vpop.f32.mrf.mxu1  ;;  %15967 = vmatprep.mubr.msk.f32.mxu0 %vm493_vm4, %v26023_v21  ;;  %v15672_v7 = vpop.f32.mrf.mxu0 }
 0x2f2   : > { %15909 = vmatmul.mubr.msk.f32.gmra.mxu1 %vm493_vm4, %v17257_v2  ;;  %v20443_v56 = vadd.f32 %v4201_v52, %v3912_v3 }
 0x2f3   : > { %15911 = vmatprep.mubr.msk.f32.mxu1 %vm493_vm4, %v17258_v36  ;;  %v4241_v31 = vpop.f32.mrf.mxu0 }
 0x2f4   : > { %v15613_v62 = vpop.f32.mrf.mxu1  ;;  %15968 = vmatmul.mubr.msk.f32.gmra.mxu0 %vm493_vm4, %v26024_v42  ;;  %v17261_v42 = vld [vmem:[#allocation2 + $0xb0] sm:$0xff] }
 0x2f5   : > { %v20450_v9 = vadd.f32 %v15663_v30, %v15613_v62  ;;  %15970 = vmatprep.mubr.msk.f32.mxu0 %vm493_vm4, %v26025_v45  ;;  %v15675_v52 = vpop.f32.mrf.mxu0 }
 0x2f6   : > { %15912 = vmatmul.mubr.msk.f32.gmra.mxu1 %vm493_vm4, %v17259_v0  ;;  %v3922_v21 = vpop.f32.mrf.mxu1 }
 0x2f7   : > { %15914 = vmatprep.mubr.msk.f32.mxu1 %vm493_vm4, %v17260_v39  ;;  %v20456_v40 = vadd.f32 %v4211_v10, %v3922_v21  ;;  %v20458_v3 = vpop.f32.mrf.mxu0  ;;  %v20543_v39 = vld [vmem:[#allocation2 + $0x1a8] sm:$0x3] }
 0x2f8   : > { %v15616_v2 = vpop.f32.mrf.mxu1  ;;  %15971 = vmatmul.mubr.msk.f32.gmra.mxu0 %vm493_vm4, %v26026_v41 }
 0x2f9   : > { %v20462_v30 = vadd.f32 %v15666_v43, %v15616_v2  ;;  %15973 = vmatprep.mubr.msk.f32.mxu0 %vm493_vm4, %v26027_v61  ;;  %v15678_v45 = vpop.f32.mrf.mxu0 }
 0x2fa   : > { %15915 = vmatmul.mubr.msk.f32.gmra.mxu1 %vm493_vm4, %v17261_v42  ;;  %v3932_v10 = vpop.f32.mrf.mxu1 }
 0x2fb   : > { %15917 = vmatprep.mubr.msk.f32.mxu1 %vm493_vm4, %v19671_v34  ;;  %v20469_v36 = vadd.f32 %v4221_v25, %v3932_v10  ;;  %v20471_v62 = vpop.f32.mrf.mxu0 }
 0x2fc   : > { %15974 = vmatmul.mubr.msk.f32.gmra.mxu0 %vm493_vm4, %v26028_v17 }
 0x2fd   : > { %15976 = vmatprep.mubr.msk.f32.mxu0 %vm493_vm4, %v26029_v13  ;;  %v15681_v61 = vpop.f32.mrf.mxu0 }
 0x2fe   : > { %v15619_v41 = vpop.f32.mrf.mxu1  ;;  %15918 = vmatmul.mubr.msk.f32.gmra.mxu1 %vm493_vm4, %v19684_v63 }
 0x2ff   : > { %v20479_v43 = vadd.f32 %v15669_v46, %v15619_v41  ;;  %15920 = vmatprep.mubr.msk.f32.mxu1 %vm493_vm4, %v19715_v47  ;;  %v20483_v25 = vpop.f32.mrf.mxu0 }
 0x300   : > { %v3942_v34 = vpop.f32.mrf.mxu1  ;;  %15977 = vmatmul.mubr.msk.f32.gmra.mxu0 %vm493_vm4, %v26030_v35 }
 0x301   : > { %v20485_v0 = vadd.f32 %v4231_v26, %v3942_v34  ;;  %15979 = vmatprep.mubr.msk.f32.mxu0 %vm493_vm4, %v26031_v23 }
 0x302   : > { %v15622_v17 = vpop.f32.mrf.mxu1  ;;  %15921 = vmatmul.mubr.msk.f32.gmra.mxu1 %vm493_vm4, %v19717_v8 }
 0x303   : > { %v20493_v63 = vadd.f32 %v15672_v7, %v15622_v17  ;;  %15923 = vmatprep.mubr.msk.f32.mxu1 %vm493_vm4, %v19735_v15  ;;  %v15684_v13 = vpop.f32.mrf.mxu0  ;;  %v20527_v7 = vld [vmem:[#allocation2 + $0x198] sm:$0xff] }
 0x304   : > { %v3952_v47 = vpop.f32.mrf.mxu1  ;;  %15980 = vmatmul.mubr.msk.f32.gmra.mxu0 %vm493_vm4, %v26032_v6 }
 0x305   : > { %v20497_v46 = vadd.f32 %v4241_v31, %v3952_v47  ;;  %15982 = vmatprep.mubr.msk.f32.mxu0 %vm493_vm4, %v26033_v24  ;;  %v20505_v8 = vpop.f32.mrf.mxu0  ;;  %v20529_v31 = vld [vmem:[#allocation2 + $0x1a0] sm:$0xff] }
 0x306   : > { %v15625_v35 = vpop.f32.mrf.mxu1  ;;  %15924 = vmatmul.mubr.msk.f32.gmra.mxu1 %vm493_vm4, %v19750_v54 }
 0x307   : > { %v20507_v23 = vadd.f32 %v15675_v52, %v15625_v35  ;;  %15926 = vmatprep.mubr.msk.f32.mxu1 %vm493_vm4, %v19798_v44  ;;  %v15687_v26 = vpop.f32.mrf.mxu0  ;;  %v5792_v52 = vrot.slane %v20529_v31, 1 }
 0x308   : > { %v20511_v15 = vpop.f32.mrf.mxu1  ;;  %15983 = vmatmul.mubr.msk.f32.gmra.mxu0 %vm493_vm4, %v26036_v38  ;;  %v5791_v38 = vrot.slane %v20527_v7, 1 }
 0x309   : > { %15985 = vmatprep.mubr.msk.f32.mxu0 %vm493_vm4, %v19928_v4  ;;  %v20523_v24 = vpop.f32.mrf.mxu0 }
 0x30a   : > { %v15628_v6 = vpop.f32.mrf.mxu1  ;;  %15927 = vmatmul.mubr.msk.f32.gmra.mxu1 %vm493_vm4, %v19800_v32  ;;  %v5793_v2 = vsel %vm608_vm2, %v5791_v38, %v5792_v52 }
 0x30b   : > { %v20519_v54 = vadd.f32 %v15678_v45, %v15628_v6  ;;  %15929 = vmatprep.mubr.msk.f32.mxu1 %vm493_vm4, %v19818_v60 }
 0x30c   : > { %v20525_v44 = vpop.f32.mrf.mxu1  ;;  %15986 = vmatmul.mubr.msk.f32.gmra.mxu0 %vm493_vm4, %v19946_v14 }
 0x30d   : > { %15988 = vmatprep.mubr.msk.f32.mxu0 %vm493_vm4, %v26038_v58 }
 0x30e   : > { %v15631_v32 = vpop.f32.mrf.mxu1  ;;  %15930 = vmatmul.mubr.msk.f32.gmra.mxu1 %vm493_vm4, %v19820_v16  ;;  %v15690_v60 = vpop.f32.mrf.mxu0 }
 0x30f   : > { %v20537_v4 = vadd.f32 %v15681_v61, %v15631_v32  ;;  %15932 = vmatprep.mubr.msk.f32.mxu1 %vm493_vm4, %v19864_v27  ;;  %v5794_v27 = vrot.slane %v20543_v39, 1 }
 0x310   : > { %v20545_v14 = vpop.f32.mrf.mxu1  ;;  %15989 = vmatmul.mubr.msk.f32.gmra.mxu0 %vm493_vm4, %v19961_v37  ;;  %v20549_v16 = vpop.f32.mrf.mxu0 }
 0x311   : > { %15991 = vmatprep.mubr.msk.f32.mxu0 %vm493_vm4, %v20393_v19  ;;  %v5795_v10 = vsel %vm608_vm2, %v5792_v52, %v5794_v27 }
 0x312   : > { %v15634_v58 = vpop.f32.mrf.mxu1  ;;  %15933 = vmatmul.mubr.msk.f32.gmra.mxu1 %vm493_vm4, %v19866_v48  ;;  %v26040_v48 = vld [vmem:[#allocation32_spill] sm:$0xff] }
 0x313   : > { %v20556_v21 = vadd.f32 %v15684_v13, %v15634_v58  ;;  %15935 = vmatprep.mubr.msk.f32.mxu1 %vm493_vm4, %v19894_v28  ;;  %v26041_v58 = vld [vmem:[#allocation38_spill] sm:$0xff] }
 0x314   : > { %v20561_v42 = vpop.f32.mrf.mxu1  ;;  %v15693_v37 = vpop.f32.mrf.mxu0  ;;  %15992 = vmatmul.mubr.msk.f32.gmra.mxu0 %vm493_vm4, %v20400_v50 }
 0x315   : > { %15994 = vmatprep.mubr.msk.f32.mxu0 %vm493_vm4, %v5793_v2 }
 0x316   : > { %v15637_v45 = vpop.f32.mrf.mxu1  ;;  %15936 = vmatmul.mubr.msk.f32.gmra.mxu1 %vm493_vm4, %v26040_v48  ;;  %v20567_v19 = vpop.f32.mrf.mxu0 }
 0x317   : > { %v20571_v41 = vadd.f32 %v15687_v26, %v15637_v45  ;;  %15938 = vmatprep.mubr.msk.f32.mxu1 %vm493_vm4, %v19923_v20 }
 0x318   : > { %v20575_v28 = vpop.f32.mrf.mxu1  ;;  %v15696_v61 = vpop.f32.mrf.mxu0  ;;  %15995 = vmatmul.mubr.msk.f32.gmra.mxu0 %vm493_vm4, %v5795_v10 }
 0x31a   : > { %v15640_v50 = vpop.f32.mrf.mxu1  ;;  %15939 = vmatmul.mubr.msk.f32.gmra.mxu1 %vm493_vm4, %v19925_v1  ;;  %v20584_v17 = vpop.f32.mrf.mxu0 }
 0x31b   : > { %v20580_v34 = vadd.f32 %v15690_v60, %v15640_v50  ;;  %15941 = vmatprep.mubr.msk.f32.mxu1 %vm493_vm4, %v20197_v51 }
 0x31c   : > { %v20586_v47 = vpop.f32.mrf.mxu1  ;;  %v15751_v13 = vpop.f32.mrf.mxu0 }
 0x31e   : > { %v15643_v20 = vpop.f32.mrf.mxu1  ;;  %15942 = vmatmul.mubr.msk.f32.gmra.mxu1 %vm493_vm4, %v20211_v29  ;;  %v20594_v1 = vpop.f32.mrf.mxu0 }
 0x31f   : > { %v20590_v35 = vadd.f32 %v15693_v37, %v15643_v20  ;;  %15944 = vmatprep.mubr.msk.f32.mxu1 %vm493_vm4, %v20527_v7 }
 0x320   : > { %v20596_v26 = vpop.f32.mrf.mxu1  ;;  %v15754_v6 = vpop.f32.mrf.mxu0 }
 0x322   : > { %v15646_v51 = vpop.f32.mrf.mxu1  ;;  %15945 = vmatmul.mubr.msk.f32.gmra.mxu1 %vm493_vm4, %v20529_v31  ;;  %v20604_v29 = vpop.f32.mrf.mxu0 }
 0x323   : > { %v20600_v32 = vadd.f32 %v15696_v61, %v15646_v51  ;;  %15999 = vmatprep.mubr.msk.f32.mxu1 %vm493_vm4, %v20013_v53  ;;  %v26042_v51 = vld [vmem:[#allocation21_spill] sm:$0xff] }
 0x324   : > { %v20606_v60 = vpop.f32.mrf.mxu1  ;;  %v15757_v38 = vpop.f32.mrf.mxu0 }
 0x326   : > { %v15701_v52 = vpop.f32.mrf.mxu1  ;;  %16000 = vmatmul.mubr.msk.f32.vlgmr.msra.gmra.mxu1 %vm493_vm4, %v20023_v33  ;;  %v20613_v2 = vpop.f32.mrf.mxu0 }
 0x327   : > { %v4700_v27 = vadd.f32 %v15701_v52, %v26041_v58  ;;  %16002 = vmatprep.mubr.msk.f32.mxu1 %vm493_vm4, %v20030_v22 }
 0x328   : > { %v20615_v37 = vpop.f32.mrf.mxu1  ;;  %v15760_v45 = vpop.f32.mrf.mxu0 }
 0x329   : > { %v20617_v53 = vadd.f32 %v15751_v13, %v4700_v27  ;;  %v26044_v27 = vld [vmem:[#allocation15_spill] sm:$0xff] }
 0x32a   : > { %v15704_v48 = vpop.f32.mrf.mxu1  ;;  %16003 = vmatmul.mubr.msk.f32.gmra.mxu1 %vm493_vm4, %v20040_v49  ;;  %v20624_v33 = vpop.f32.mrf.mxu0 }
 0x32b   : > { %v4702_v10 = vadd.f32 %v15704_v48, %v20411_v11  ;;  %16005 = vmatprep.mubr.msk.f32.mxu1 %vm493_vm4, %v20047_v57  ;;  %v26045_v48 = vld [vmem:[#allocation18_spill] sm:$0xff] }
 0x32c   : > { %v4550_v61 = vpop.f32.mrf.mxu1  ;;  %v15763_v50 = vpop.f32.mrf.mxu0 }
 0x32d   : > { %v20627_v22 = vadd.f32 %v4550_v61, %v20420_v18  ;;  %v20629_v20 = vadd.f32 %v15754_v6, %v4702_v10 }
 0x32e   : > { %v15707_v13 = vpop.f32.mrf.mxu1  ;;  %16006 = vmatmul.mubr.msk.f32.gmra.mxu1 %vm493_vm4, %v20057_v55  ;;  %v20636_v11 = vpop.f32.mrf.mxu0 }
 0x32f   : > { %v4704_v49 = vadd.f32 %v15707_v13, %v20422_v12  ;;  %16008 = vmatprep.mubr.msk.f32.mxu1 %vm493_vm4, %v26042_v51  ;;  %26043 = vst [vmem:[#allocation66_spill] sm:$0xff] %v20636_v11  ;;  %v26079_v11 = vld [vmem:[#allocation52_spill] sm:$0xff] }
 0x330   : > { %v4560_v57 = vpop.f32.mrf.mxu1  ;;  %v15766_v18 = vpop.f32.mrf.mxu0 }
 0x331   : > { %v20639_v52 = vadd.f32 %v4560_v57, %v20430_v59  ;;  %v20641_v58 = vadd.f32 %v15757_v38, %v4704_v49  ;;  %v26047_v49 = vld [vmem:[#allocation30_spill] sm:$0xff]  ;;  %v26048_v57 = vld [vmem:[#allocation24_spill] sm:$0xff] }
 0x332   : > { %v15710_v6 = vpop.f32.mrf.mxu1  ;;  %16009 = vmatmul.mubr.msk.f32.gmra.mxu1 %vm493_vm4, %v26044_v27  ;;  %v20648_v12 = vpop.f32.mrf.mxu0 }
 0x333   : > { %v4706_v55 = vadd.f32 %v15710_v6, %v20438_v5  ;;  %16011 = vmatprep.mubr.msk.f32.mxu1 %vm493_vm4, %v26045_v48  ;;  %26046 = vst [vmem:[#allocation68_spill] sm:$0xff] %v20648_v12  ;;  %v26074_v12 = vld [vmem:[#allocation49_spill] sm:$0xff] }
 0x334   : > { %v4570_v10 = vpop.f32.mrf.mxu1  ;;  %v15769_v59 = vpop.f32.mrf.mxu0 }
 0x335   : > { %v20651_v61 = vadd.f32 %v4570_v10, %v20443_v56  ;;  %v20653_v13 = vadd.f32 %v15760_v45, %v4706_v55  ;;  %v26050_v55 = vld [vmem:[#allocation27_spill] sm:$0xff] }
 0x336   : > { %v15713_v38 = vpop.f32.mrf.mxu1  ;;  %16012 = vmatmul.mubr.msk.f32.gmra.mxu1 %vm493_vm4, %v26047_v49  ;;  %v20660_v5 = vpop.f32.mrf.mxu0  ;;  %v26051_v49 = vld [vmem:[#allocation39_spill] sm:$0xff] }
 0x337   : > { %v4708_v51 = vadd.f32 %v15713_v38, %v20450_v9  ;;  %16014 = vmatprep.mubr.msk.f32.mxu1 %vm493_vm4, %v26048_v57  ;;  %26049 = vst [vmem:[#allocation57_spill] sm:$0xff] %v20660_v5  ;;  %v26055_v5 = vld [vmem:[#allocation36_spill] sm:$0xff] }
 0x338   : > { %v4580_v6 = vpop.f32.mrf.mxu1  ;;  %v15772_v56 = vpop.f32.mrf.mxu0 }
 0x339   : > { %v20663_v27 = vadd.f32 %v4580_v6, %v20456_v40  ;;  %v20665_v48 = vadd.f32 %v15763_v50, %v4708_v51  ;;  %v26054_v51 = vld [vmem:[#allocation33_spill] sm:$0xff] }
 0x33a   : > { %v15716_v45 = vpop.f32.mrf.mxu1  ;;  %16015 = vmatmul.mubr.msk.f32.gmra.mxu1 %vm493_vm4, %v26050_v55  ;;  %v20672_v9 = vpop.f32.mrf.mxu0 }
 0x33b   : > { %v4710_v10 = vadd.f32 %v15716_v45, %v20462_v30  ;;  %16017 = vmatprep.mubr.msk.f32.mxu1 %vm493_vm4, %v26051_v49  ;;  %26052 = vst [vmem:[#allocation70_spill] sm:$0xff] %v20672_v9  ;;  %v26059_v9 = vld [vmem:[#allocation42_spill] sm:$0xff] }
 0x33c   : > { %v4590_v38 = vpop.f32.mrf.mxu1  ;;  %v15775_v40 = vpop.f32.mrf.mxu0 }
 0x33d   : > { %v20675_v57 = vadd.f32 %v4590_v38, %v20469_v36  ;;  %v20677_v6 = vadd.f32 %v15766_v18, %v4710_v10  ;;  %v26058_v10 = vld [vmem:[#allocation50_spill] sm:$0xff] }
 0x33e   : > { %v15719_v50 = vpop.f32.mrf.mxu1  ;;  %16018 = vmatmul.mubr.msk.f32.gmra.mxu1 %vm493_vm4, %v26054_v51  ;;  %v20684_v30 = vpop.f32.mrf.mxu0 }
 0x33f   : > { %26053 = vst [vmem:[#allocation72_spill] sm:$0xff] %v20675_v57  ;;  %v4712_v55 = vadd.f32 %v15719_v50, %v20479_v43  ;;  %16020 = vmatprep.mubr.msk.f32.mxu1 %vm493_vm4, %v26055_v5  ;;  %26056 = vst [vmem:[#allocation63_spill] sm:$0xff] %v20684_v30  ;;  %v26063_v30 = vld [vmem:[#allocation41_spill] sm:$0xff]  ;;  %v26077_v57 = vld [vmem:[#allocation48_spill] sm:$0xff] }
 0x340   : > { %v4600_v45 = vpop.f32.mrf.mxu1  ;;  %v15778_v36 = vpop.f32.mrf.mxu0 }
 0x341   : > { %v20687_v49 = vadd.f32 %v4600_v45, %v20485_v0  ;;  %v20689_v38 = vadd.f32 %v15769_v59, %v4712_v55  ;;  %v26062_v55 = vld [vmem:[#allocation40_spill] sm:$0xff] }
 0x342   : > { %v15722_v18 = vpop.f32.mrf.mxu1  ;;  %16021 = vmatmul.mubr.msk.f32.gmra.mxu1 %vm493_vm4, %v26058_v10  ;;  %v20696_v43 = vpop.f32.mrf.mxu0 }
 0x343   : > { %26057 = vst [vmem:[#allocation59_spill] sm:$0xff] %v20687_v49  ;;  %v4714_v51 = vadd.f32 %v15722_v18, %v20493_v63  ;;  %16023 = vmatprep.mubr.msk.f32.mxu1 %vm493_vm4, %v26059_v9  ;;  %26060 = vst [vmem:[#allocation60_spill] sm:$0xff] %v20696_v43 }
 0x344   : > { %v4610_v5 = vpop.f32.mrf.mxu1  ;;  %v15781_v0 = vpop.f32.mrf.mxu0 }
 0x345   : > { %v20699_v50 = vadd.f32 %v4610_v5, %v20497_v46  ;;  %v20701_v45 = vadd.f32 %v15772_v56, %v4714_v51  ;;  %v26065_v5 = vld [vmem:[#allocation54_spill] sm:$0xff]  ;;  %v26066_v51 = vld [vmem:[#allocation56_spill] sm:$0xff] }
 0x346   : > { %v15725_v59 = vpop.f32.mrf.mxu1  ;;  %16024 = vmatmul.mubr.msk.f32.gmra.mxu1 %vm493_vm4, %v26062_v55  ;;  %v20708_v63 = vpop.f32.mrf.mxu0 }
 0x347   : > { %26061 = vst [vmem:[#allocation61_spill] sm:$0xff] %v20699_v50  ;;  %v4716_v10 = vadd.f32 %v15725_v59, %v20507_v23  ;;  %16026 = vmatprep.mubr.msk.f32.mxu1 %vm493_vm4, %v26063_v30  ;;  %26064 = vst [vmem:[#allocation74_spill] sm:$0xff] %v20708_v63  ;;  %v6646_v30 = vld [vmem:[%s25382_s7 + $0x8] sm:$0xff] }
 0x348   : > { %v20710_v9 = vpop.f32.mrf.mxu1  ;;  %v15784_v18 = vpop.f32.mrf.mxu0  ;;  %16047 = vmatprep.subr.mxu0 %v6646_v30 }
 0x349   : > { %v20712_v43 = vadd.f32 %v15775_v40, %v4716_v10  ;;  %16048 = vmatpush3.msra.mxu0 %v6646_v30  ;;  %v26072_v30 = vld [vmem:[#allocation58_spill] sm:$0xff] }
 0x34a   : > { %v15728_v46 = vpop.f32.mrf.mxu1  ;;  %16027 = vmatmul.mubr.msk.f32.gmra.mxu1 %vm493_vm4, %v26065_v5  ;;  %v20719_v23 = vpop.f32.mrf.mxu0  ;;  %v26068_v5 = vld [vmem:[#allocation45_spill] sm:$0xff] }
 0x34b   : > { %v4718_v56 = vadd.f32 %v15728_v46, %v20519_v54  ;;  %16029 = vmatprep.mubr.msk.f32.mxu1 %vm493_vm4, %v26066_v51  ;;  %26067 = vst [vmem:[#allocation62_spill] sm:$0xff] %v20719_v23  ;;  %v26069_v46 = vld [vmem:[#allocation43_spill] sm:$0xff] }
 0x34c   : > { %v20724_v59 = vpop.f32.mrf.mxu1  ;;  %v15787_v40 = vpop.f32.mrf.mxu0 }
 0x34d   : > { %v20726_v55 = vadd.f32 %v15778_v36, %v4718_v56  ;;  %v26071_v36 = vld [vmem:[#allocation44_spill] sm:$0xff] }
 0x34e   : > { %v15731_v10 = vpop.f32.mrf.mxu1  ;;  %16030 = vmatmul.mubr.msk.f32.gmra.mxu1 %vm493_vm4, %v26068_v5  ;;  %v20733_v51 = vpop.f32.mrf.mxu0 }
 0x34f   : > { %v4720_v54 = vadd.f32 %v15731_v10, %v20537_v4  ;;  %16032 = vmatprep.mubr.msk.f32.mxu1 %vm493_vm4, %v26069_v46  ;;  %26070 = vst [vmem:[#allocation64_spill] sm:$0xff] %v20733_v51 }
 0x350   : > { %v20735_v23 = vpop.f32.mrf.mxu1  ;;  %v15790_v63 = vpop.f32.mrf.mxu0 }
 0x351   : > { %v20737_v50 = vadd.f32 %v15781_v0, %v4720_v54  ;;  %v26075_v54 = vld [vmem:[#allocation47_spill] sm:$0xff] }
 0x352   : > { %v15734_v49 = vpop.f32.mrf.mxu1  ;;  %16033 = vmatmul.mubr.msk.f32.gmra.mxu1 %vm493_vm4, %v26071_v36  ;;  %v20744_v4 = vpop.f32.mrf.mxu0 }
 0x353   : > { %v4722_v56 = vadd.f32 %v15734_v49, %v20556_v21  ;;  %16035 = vmatprep.mubr.msk.f32.mxu1 %vm493_vm4, %v26072_v30  ;;  %26073 = vst [vmem:[#allocation76_spill] sm:$0xff] %v20744_v4  ;;  %v6057_v49 = vrot.slane %v20527_v7, 2  ;;  %v6058_v30 = vrot.slane %v20529_v31, 2  ;;  %v6060_v7 = vrot.slane %v20543_v39, 2 }
 0x354   : > { %v20746_v10 = vpop.f32.mrf.mxu1  ;;  %v15793_v5 = vpop.f32.mrf.mxu0 }
 0x355   : > { %v20748_v46 = vadd.f32 %v15784_v18, %v4722_v56  ;;  %v6059_v31 = vsel %vm1275_vm3, %v6057_v49, %v6058_v30 }
 0x356   : > { %v15737_v51 = vpop.f32.mrf.mxu1  ;;  %16036 = vmatmul.mubr.msk.f32.gmra.mxu1 %vm493_vm4, %v26074_v12  ;;  %v20755_v21 = vpop.f32.mrf.mxu0  ;;  %v26078_v12 = vld [vmem:[#allocation51_spill] sm:$0xff] }
 0x357   : > { %v4724_v0 = vadd.f32 %v15737_v51, %v20571_v41  ;;  %16038 = vmatprep.mubr.msk.f32.mxu1 %vm493_vm4, %v26075_v54  ;;  %26076 = vst [vmem:[#allocation78_spill] sm:$0xff] %v20755_v21 }
 0x358   : > { %v20758_v36 = vpop.f32.mrf.mxu1  ;;  %v15796_v4 = vpop.f32.mrf.mxu0 }
 0x359   : > { %v20761_v18 = vadd.f32 %v15787_v40, %v4724_v0 }
 0x35a   : > { %v15740_v56 = vpop.f32.mrf.mxu1  ;;  %16039 = vmatmul.mubr.msk.f32.gmra.mxu1 %vm493_vm4, %v26077_v57  ;;  %v20768_v51 = vpop.f32.mrf.mxu0  ;;  %v6061_v57 = vsel %vm1275_vm3, %v6058_v30, %v6060_v7 }
 0x35b   : > { %v4726_v41 = vadd.f32 %v15740_v56, %v20580_v34  ;;  %16041 = vmatprep.mubr.msk.f32.mxu1 %vm493_vm4, %v26078_v12 }
 0x35c   : > { %v20771_v54 = vpop.f32.mrf.mxu1  ;;  %v20774_v21 = vpop.f32.mrf.mxu0 }
 0x35d   : > { %v20776_v40 = vadd.f32 %v15790_v63, %v4726_v41 }
 0x35e   : > { %v15743_v0 = vpop.f32.mrf.mxu1  ;;  %16042 = vmatmul.mubr.msk.f32.gmra.mxu1 %vm493_vm4, %v26079_v11  ;;  %v20783_v56 = vpop.f32.mrf.mxu0 }
 0x35f   : > { %v4728_v34 = vadd.f32 %v15743_v0, %v20590_v35  ;;  %16044 = vmatprep.mubr.msk.f32.mxu1 %vm493_vm4, %v6059_v31 }
 0x360   : > { %v20785_v39 = vpop.f32.mrf.mxu1  ;;  %v20787_v12 = vpop.f32.mrf.mxu0 }
 0x361   : > { %26080 = vst [vmem:[#allocation65_spill] sm:$0xff] %v20787_v12  ;;  %v20789_v49 = vadd.f32 %v15793_v5, %v4728_v34 }
 0x362   : > { %v15746_v63 = vpop.f32.mrf.mxu1  ;;  %16045 = vmatmul.mubr.msk.f32.gmra.mxu1 %vm493_vm4, %v6061_v57  ;;  %v20793_v11 = vpop.f32.mrf.mxu0 }
 0x363   : > { %v4730_v41 = vadd.f32 %v15746_v63, %v20600_v32  ;;  %26081 = vst [vmem:[#allocation67_spill] sm:$0xff] %v20793_v11 }
 0x364   : > { %v20795_v35 = vpop.f32.mrf.mxu1  ;;  %v20797_v31 = vpop.f32.mrf.mxu0 }
 0x365   : > { %26082 = vst [vmem:[#allocation80_spill] sm:$0xff] %v20797_v31  ;;  %v20799_v30 = vadd.f32 %v15796_v4, %v4730_v41 }
 0x366   : > { %v15801_v7 = vpop.f32.mrf.mxu1  ;;  %v20804_v12 = vpop.f32.mrf.mxu0 }
 0x367   : > { %v20802_v0 = vadd.f32 %v15801_v7, %v20617_v53  ;;  %26083 = vst [vmem:[#allocation82_spill] sm:$0xff] %v20804_v12 }
 0x368   : > { %v20806_v5 = vpop.f32.mrf.mxu1  ;;  %v20808_v34 = vpop.f32.mrf.mxu0 }
 0x369   : > { %26084 = vst [vmem:[#allocation69_spill] sm:$0xff] %v20808_v34 }
 0x36a   : > { %v15804_v57 = vpop.f32.mrf.mxu1  ;;  %v20813_v63 = vpop.f32.mrf.mxu0 }
 0x36b   : > { %v20811_v32 = vadd.f32 %v15804_v57, %v20629_v20  ;;  %26086 = vst [vmem:[#allocation84_spill] sm:$0xff] %v20813_v63 }
 0x36c   : > { %v20815_v11 = vpop.f32.mrf.mxu1  ;;  %v20817_v4 = vpop.f32.mrf.mxu0 }
 0x36d   : > { %26085 = vst [vmem:[#allocation71_spill] sm:$0xff] %v20811_v32  ;;  %26087 = vst [vmem:[#allocation73_spill] sm:$0xff] %v20817_v4 }
 0x36e   : > { %v15807_v41 = vpop.f32.mrf.mxu1  ;;  %v20822_v7 = vpop.f32.mrf.mxu0 }
 0x36f   : > { %v20820_v53 = vadd.f32 %v15807_v41, %v20641_v58  ;;  %26089 = vst [vmem:[#allocation88_spill] sm:$0xff] %v20822_v7 }
 0x370   : > { %v20824_v12 = vpop.f32.mrf.mxu1  ;;  %v20826_v31 = vpop.f32.mrf.mxu0 }
 0x371   : > { %26088 = vst [vmem:[#allocation86_spill] sm:$0xff] %v20820_v53  ;;  %26090 = vst [vmem:[#allocation90_spill] sm:$0xff] %v20826_v31 }
 0x372   : > { %v15810_v34 = vpop.f32.mrf.mxu1  ;;  %v20831_v57 = vpop.f32.mrf.mxu0 }
 0x373   : > { %v20829_v20 = vadd.f32 %v15810_v34, %v20653_v13  ;;  %26092 = vst [vmem:[#allocation77_spill] sm:$0xff] %v20831_v57 }
 0x374   : > { %v20833_v63 = vpop.f32.mrf.mxu1  ;;  %v20835_v32 = vpop.f32.mrf.mxu0 }
 0x375   : > { %26091 = vst [vmem:[#allocation75_spill] sm:$0xff] %v20829_v20  ;;  %26093 = vst [vmem:[#allocation79_spill] sm:$0xff] %v20835_v32 }
 0x376   : > { %v15813_v4 = vpop.f32.mrf.mxu1  ;;  %v20840_v41 = vpop.f32.mrf.mxu0 }
 0x377   : > { %v20838_v58 = vadd.f32 %v15813_v4, %v20665_v48  ;;  %26095 = vst [vmem:[#allocation83_spill] sm:$0xff] %v20840_v41 }
 0x378   : > { %v20842_v7 = vpop.f32.mrf.mxu1  ;;  %v20844_v53 = vpop.f32.mrf.mxu0 }
 0x379   : > { %26094 = vst [vmem:[#allocation81_spill] sm:$0xff] %v20838_v58  ;;  %26096 = vst [vmem:[#allocation85_spill] sm:$0xff] %v20844_v53 }
 0x37a   : > { %v15816_v31 = vpop.f32.mrf.mxu1  ;;  %v20849_v34 = vpop.f32.mrf.mxu0 }
 0x37b   : > { %v20847_v13 = vadd.f32 %v15816_v31, %v20677_v6  ;;  %26098 = vst [vmem:[#allocation89_spill] sm:$0xff] %v20849_v34 }
 0x37c   : > { %v20851_v57 = vpop.f32.mrf.mxu1  ;;  %v20853_v20 = vpop.f32.mrf.mxu0 }
 0x37d   : > { %26097 = vst [vmem:[#allocation87_spill] sm:$0xff] %v20847_v13  ;;  %26099 = vst [vmem:[#allocation95_spill] sm:$0xff] %v20853_v20 }
 0x37e   : > { %v15819_v32 = vpop.f32.mrf.mxu1  ;;  %v20858_v4 = vpop.f32.mrf.mxu0 }
 0x37f   : > { %v20856_v48 = vadd.f32 %v15819_v32, %v20689_v38  ;;  %26101 = vst [vmem:[#allocation92_spill] sm:$0xff] %v20858_v4 }
 0x380   : > { %v20860_v41 = vpop.f32.mrf.mxu1  ;;  %v20862_v58 = vpop.f32.mrf.mxu0 }
 0x381   : > { %26100 = vst [vmem:[#allocation91_spill] sm:$0xff] %v20856_v48  ;;  %26102 = vst [vmem:[#allocation96_spill] sm:$0xff] %v20860_v41 }
 0x382   : > { %26103 = vst [vmem:[#allocation98_spill] sm:$0xff] %v20862_v58  ;;  %v15822_v53 = vpop.f32.mrf.mxu1  ;;  %v20867_v31 = vpop.f32.mrf.mxu0 }
 0x383   : > { %v20865_v6 = vadd.f32 %v15822_v53, %v20701_v45  ;;  %26105 = vst [vmem:[#allocation94_spill] sm:$0xff] %v20867_v31 }
 0x384   : > { %v20869_v34 = vpop.f32.mrf.mxu1  ;;  %v20871_v13 = vpop.f32.mrf.mxu0 }
 0x385   : > { %26104 = vst [vmem:[#allocation93_spill] sm:$0xff] %v20865_v6  ;;  %26106 = vst [vmem:[#allocation97_spill] sm:$0xff] %v20869_v34 }
 0x386   : > { %26107 = vst [vmem:[#allocation7_spill] sm:$0xff] %v20871_v13  ;;  %v15825_v20 = vpop.f32.mrf.mxu1  ;;  %v20876_v32 = vpop.f32.mrf.mxu0 }
 0x387   : > { %v20874_v38 = vadd.f32 %v15825_v20, %v20712_v43  ;;  %26109 = vst [vmem:[#allocation10_spill] sm:$0xff] %v20876_v32 }
 0x388   : > { %v20878_v4 = vpop.f32.mrf.mxu1  ;;  %v15884_v48 = vpop.f32.mrf.mxu0 }
 0x389   : > { %26108 = vst [vmem:[#allocation8_spill] sm:$0xff] %v20874_v38  ;;  %26110 = vst [vmem:[#allocation9_spill] sm:$0xff] %v20878_v4 }
 0x38a   : > { %v15828_v58 = vpop.f32.mrf.mxu1  ;;  %v20883_v45 = vpop.f32.mrf.mxu0 }
 0x38b   : > { %v20881_v41 = vadd.f32 %v15828_v58, %v20726_v55  ;;  %26112 = vst [vmem:[#allocation11_spill] sm:$0xff] %v20883_v45 }
 0x38c   : > { %v20885_v53 = vpop.f32.mrf.mxu1  ;;  %v15887_v31 = vpop.f32.mrf.mxu0 }
 0x38d   : > { %26111 = vst [vmem:[#allocation13_spill] sm:$0xff] %v20881_v41  ;;  %26113 = vst [vmem:[#allocation14_spill] sm:$0xff] %v20885_v53 }
 0x38e   : > { %v15831_v6 = vpop.f32.mrf.mxu1  ;;  %v20890_v43 = vpop.f32.mrf.mxu0 }
 0x38f   : > { %v20888_v13 = vadd.f32 %v15831_v6, %v20737_v50  ;;  %26115 = vst [vmem:[#allocation17_spill] sm:$0xff] %v20890_v43 }
 0x390   : > { %v20892_v20 = vpop.f32.mrf.mxu1  ;;  %v15890_v32 = vpop.f32.mrf.mxu0 }
 0x391   : > { %26114 = vst [vmem:[#allocation16_spill] sm:$0xff] %v20888_v13  ;;  %26116 = vst [vmem:[#allocation19_spill] sm:$0xff] %v20892_v20 }
 0x392   : > { %v15834_v38 = vpop.f32.mrf.mxu1  ;;  %v20895_v34 = vpop.f32.mrf.mxu0 }
 0x393   : > { %v5252_v4 = vadd.f32 %v15834_v38, %v20748_v46  ;;  %26117 = vst [vmem:[#allocation20_spill] sm:$0xff] %v20895_v34 }
 0x394   : > { %v20897_v55 = vpop.f32.mrf.mxu1  ;;  %v15893_v58 = vpop.f32.mrf.mxu0 }
 0x395   : > { %26118 = vst [vmem:[#allocation22_spill] sm:$0xff] %v20897_v55  ;;  %v20899_v45 = vadd.f32 %v15884_v48, %v5252_v4 }
 0x396   : > { %v15837_v41 = vpop.f32.mrf.mxu1  ;;  %v20902_v50 = vpop.f32.mrf.mxu0 }
 0x397   : > { %v5254_v53 = vadd.f32 %v15837_v41, %v20761_v18  ;;  %26119 = vst [vmem:[#allocation26_spill] sm:$0xff] %v20902_v50 }
 0x398   : > { %v20904_v6 = vpop.f32.mrf.mxu1  ;;  %v15896_v43 = vpop.f32.mrf.mxu0 }
 0x399   : > { %v20906_v13 = vadd.f32 %v15887_v31, %v5254_v53 }
 0x39a   : > { %v15840_v20 = vpop.f32.mrf.mxu1  ;;  %v20909_v38 = vpop.f32.mrf.mxu0 }
 0x39b   : > { %v5256_v46 = vadd.f32 %v15840_v20, %v20776_v40  ;;  %26120 = vst [vmem:[#allocation23_spill] sm:$0xff] %v20909_v38 }
 0x39c   : > { %v20911_v34 = vpop.f32.mrf.mxu1  ;;  %v20913_v55 = vpop.f32.mrf.mxu0 }
 0x39d   : > { %26121 = vst [vmem:[#allocation25_spill] sm:$0xff] %v20913_v55  ;;  %v20915_v48 = vadd.f32 %v15890_v32, %v5256_v46  ;;  %v6645_v32 = vld [vmem:[%s25382_s7] sm:$0xff] }
 0x39e   : > { %v15843_v4 = vpop.f32.mrf.mxu1  ;;  %v20918_v41 = vpop.f32.mrf.mxu0  ;;  %v20932_v46 = vld [vmem:[#allocation2] sm:$0xff]  ;;  %16097 = vmatprep.subr.mxu1 %v6645_v32 }
 0x39f   : > { %v5258_v18 = vadd.f32 %v15843_v4, %v20789_v49  ;;  %26122 = vst [vmem:[#allocation31_spill] sm:$0xff] %v20918_v41  ;;  %v6704_v4 = vrot.slane %v20932_v46, 1  ;;  %16099 = vmatprep.mubr.msk.f32.mxu1 %vm493_vm4, %v20932_v46  ;;  %16098 = vmatpush3.msra.mxu1 %v6645_v32 }
 0x3a0   : > { %v20920_v50 = vpop.f32.mrf.mxu1  ;;  %v20922_v31 = vpop.f32.mrf.mxu0 }
 0x3a1   : > { %26123 = vst [vmem:[#allocation28_spill] sm:$0xff] %v20920_v50  ;;  %26124 = vst [vmem:[#allocation29_spill] sm:$0xff] %v20922_v31  ;;  %v20924_v53 = vadd.f32 %v15893_v58, %v5258_v18 }
 0x3a2   : > { %v15846_v40 = vpop.f32.mrf.mxu1  ;;  %v20927_v38 = vpop.f32.mrf.mxu0 }
 0x3a3   : > { %v5260_v20 = vadd.f32 %v15846_v40, %v20799_v30  ;;  %26125 = vst [vmem:[#allocation35_spill] sm:$0xff] %v20927_v38  ;;  %v20943_v30 = vld [vmem:[#allocation2 + $0x8] sm:$0xff]  ;;  %v20945_v40 = vld [vmem:[#allocation2 + $0x10] sm:$0x3] }
 0x3a4   : > { %v20934_v49 = vpop.f32.mrf.mxu1  ;;  %v20939_v58 = vpop.f32.mrf.mxu0  ;;  %v6705_v31 = vrot.slane %v20943_v30, 1  ;;  %16100 = vmatmul.mubr.msk.f32.vlgmr.msra.gmra.mxu1 %vm493_vm4, %v20943_v30  ;;  %v6707_v41 = vrot.slane %v20945_v40, 1 }
 0x3a5   : > { %26126 = vst [vmem:[#allocation34_spill] sm:$0xff] %v20934_v49  ;;  %26127 = vst [vmem:[#allocation12_spill] sm:$0xff] %v20939_v58  ;;  %v20941_v18 = vadd.f32 %v15896_v43, %v5260_v20  ;;  %v6647_v58 = vld [vmem:[%s25382_s7 + $0x10] sm:$0xff] }
 0x3a6   : > { %v20947_v38 = vpop.f32.mrf.mxu1  ;;  %v20956_v43 = vpop.f32.mrf.mxu0  ;;  %16147 = vmatprep.subr.mxu0 %v6647_v58  ;;  %v6706_v32 = vsel %vm608_vm2, %v6704_v4, %v6705_v31  ;;  %v6708_v55 = vsel %vm608_vm2, %v6705_v31, %v6707_v41 }
 0x3a7   : > { %26128 = vst [vmem:[#allocation37_spill] sm:$0xff] %v20941_v18  ;;  %26129 = vst [vmem:[#allocation46_spill] sm:$0xff] %v20947_v38  ;;  %16049 = vmatprep.mubr.msk.f32.mxu0 %vm493_vm4, %v6706_v32 }
 0x3a8   : > { %26130 = vst [vmem:[#allocation32_spill] sm:$0xff] %v20956_v43  ;;  %v20958_v20 = vpop.f32.mrf.mxu1  ;;  %v20962_v18 = vpop.f32.mrf.mxu0  ;;  %16050 = vmatmul.mubr.msk.f32.vlgmr.msra.gmra.mxu0 %vm493_vm4, %v6708_v55 }
 0x3a9   : > { %26131 = vst [vmem:[#allocation38_spill] sm:$0xff] %v20958_v20  ;;  %26132 = vst [vmem:[#allocation21_spill] sm:$0xff] %v20962_v18  ;;  %16148 = vmatpush3.msra.mxu0 %v6647_v58 }
 0x3aa   : > { %v20965_v38 = vpop.f32.mrf.mxu1  ;;  %v20968_v49 = vpop.f32.mrf.mxu0 }
 0x3ab   : > { %26133 = vst [vmem:[#allocation15_spill] sm:$0xff] %v20965_v38  ;;  %26134 = vst [vmem:[#allocation18_spill] sm:$0xff] %v20968_v49 }
 0x3ac   : > { %v20970_v50 = vpop.f32.mrf.mxu1  ;;  %v20972_v43 = vpop.f32.mrf.mxu0 }
 0x3ad   : > { %26135 = vst [vmem:[#allocation30_spill] sm:$0xff] %v20970_v50  ;;  %26136 = vst [vmem:[#allocation24_spill] sm:$0xff] %v20972_v43 }
 0x3ae   : > { %v20974_v20 = vpop.f32.mrf.mxu1  ;;  %v20976_v4 = vpop.f32.mrf.mxu0 }
 0x3af   : > { %26137 = vst [vmem:[#allocation27_spill] sm:$0xff] %v20974_v20  ;;  %26138 = vst [vmem:[#allocation39_spill] sm:$0xff] %v20976_v4 }
 0x3b0   : > { %v20978_v41 = vpop.f32.mrf.mxu1  ;;  %v20980_v31 = vpop.f32.mrf.mxu0 }
 0x3b1   : > { %26139 = vst [vmem:[#allocation33_spill] sm:$0xff] %v20978_v41  ;;  %26140 = vst [vmem:[#allocation36_spill] sm:$0xff] %v20980_v31 }
 0x3b2   : > { %v20982_v32 = vpop.f32.mrf.mxu1  ;;  %v20984_v18 = vpop.f32.mrf.mxu0 }
 0x3b3   : > { %26141 = vst [vmem:[#allocation50_spill] sm:$0xff] %v20982_v32  ;;  %26142 = vst [vmem:[#allocation42_spill] sm:$0xff] %v20984_v18 }
 0x3b4   : > { %v20986_v55 = vpop.f32.mrf.mxu1  ;;  %v20988_v49 = vpop.f32.mrf.mxu0 }
 0x3b5   : > { %26143 = vst [vmem:[#allocation40_spill] sm:$0xff] %v20986_v55  ;;  %26144 = vst [vmem:[#allocation41_spill] sm:$0xff] %v20988_v49 }
 0x3b6   : > { %v20990_v58 = vpop.f32.mrf.mxu1  ;;  %v20992_v50 = vpop.f32.mrf.mxu0 }
 0x3b7   : > { %26145 = vst [vmem:[#allocation54_spill] sm:$0xff] %v20990_v58  ;;  %26146 = vst [vmem:[#allocation56_spill] sm:$0xff] %v20992_v50 }
 0x3b8   : > { %v20994_v43 = vpop.f32.mrf.mxu1  ;;  %v20998_v4 = vpop.f32.mrf.mxu0 }
 0x3b9   : > { %26147 = vst [vmem:[#allocation45_spill] sm:$0xff] %v20994_v43  ;;  %26149 = vst [vmem:[#allocation44_spill] sm:$0xff] %v20998_v4  ;;  %v26158_v4 = vld [vmem:[#allocation55_spill] sm:$0xff] }
 0x3ba   : > { %v20996_v20 = vpop.f32.mrf.mxu1  ;;  %v21004_v32 = vpop.f32.mrf.mxu0 }
 0x3bb   : > { %26148 = vst [vmem:[#allocation43_spill] sm:$0xff] %v20996_v20  ;;  %26152 = vst [vmem:[#allocation47_spill] sm:$0xff] %v21004_v32 }
 0x3bc   : > { %v21000_v41 = vpop.f32.mrf.mxu1  ;;  %v21010_v49 = vpop.f32.mrf.mxu0 }
 0x3bd   : > { %26150 = vst [vmem:[#allocation58_spill] sm:$0xff] %v21000_v41  ;;  %26155 = vst [vmem:[#allocation52_spill] sm:$0xff] %v21010_v49  ;;  %v26159_v41 = vld [vmem:[#allocation53_spill] sm:$0xff]  ;;  %v4252_v49 = vadd.f32 %v20458_v3, %v20511_v15  ;;  %v4312_v3 = vadd.f32 %v20567_v19, %v20596_v26  ;;  %v4968_v26 = vadd.f32 %v20624_v33, %v20651_v61  ;;  %v26168_v61 = vld [vmem:[#allocation63_spill] sm:$0xff] }
 0x3be   : > { %v21002_v31 = vpop.f32.mrf.mxu1  ;;  %v21016_v43 = vpop.f32.mrf.mxu0  ;;  %v4172_v38 = vadd.f32 %v26159_v41, %v26158_v4  ;;  %v4282_v4 = vadd.f32 %v20505_v8, %v20561_v42 }
 0x3bf   : > { %26151 = vst [vmem:[#allocation49_spill] sm:$0xff] %v21002_v31  ;;  %26157 = vst [vmem:[#allocation100_spill] sm:$0xff] %v21016_v43  ;;  %v4272_v43 = vadd.f32 %v20483_v25, %v20545_v14  ;;  %v4715_v25 = vadd.f32 %v20710_v9, %v4252_v49  ;;  %v26162_v9 = vld [vmem:[#allocation72_spill] sm:$0xff] }
 0x3c0   : > { %v21006_v18 = vpop.f32.mrf.mxu1  ;;  %v21024_v32 = vpop.f32.mrf.mxu0  ;;  %v4721_v42 = vadd.f32 %v20746_v10, %v4282_v4  ;;  %v26164_v10 = vld [vmem:[#allocation59_spill] sm:$0xff]  ;;  %v26169_v49 = vld [vmem:[#allocation60_spill] sm:$0xff] }
 0x3c1   : > { %26153 = vst [vmem:[#allocation48_spill] sm:$0xff] %v21006_v18  ;;  %26160 = vst [vmem:[#allocation55_spill] sm:$0xff] %v21024_v32  ;;  %v4699_v18 = vadd.f32 %v20615_v37, %v4172_v38  ;;  %v4292_v32 = vadd.f32 %v20523_v24, %v20575_v28  ;;  %v4302_v37 = vadd.f32 %v20549_v16, %v20586_v47 }
 0x3c2   : > { %v21008_v55 = vpop.f32.mrf.mxu1  ;;  %v21047_v15 = vpop.f32.mrf.mxu0  ;;  %v4964_v24 = vadd.f32 %v20604_v29, %v20627_v22  ;;  %v4719_v16 = vadd.f32 %v20735_v23, %v4272_v43  ;;  %v4966_v28 = vadd.f32 %v20613_v2, %v20639_v52  ;;  %v4727_v47 = vadd.f32 %v20785_v39, %v4312_v3  ;;  %v26163_v23 = vld [vmem:[#allocation68_spill] sm:$0xff]  ;;  %v26166_v39 = vld [vmem:[#allocation61_spill] sm:$0xff] }
 0x3c3   : > { %26154 = vst [vmem:[#allocation51_spill] sm:$0xff] %v21008_v55  ;;  %v4723_v19 = vadd.f32 %v20758_v36, %v4292_v32  ;;  %v26165_v36 = vld [vmem:[#allocation57_spill] sm:$0xff]  ;;  %v4978_v38 = vadd.f32 %v26168_v61, %v4715_v25  ;;  %v6648_v43 = vld [vmem:[%s25382_s7 + $0x18] sm:$0xff]  ;;  %v26170_v32 = vld [vmem:[#allocation74_spill] sm:$0xff] }
 0x3c4   : > { %v21012_v58 = vpop.f32.mrf.mxu1  ;;  %v21072_v2 = vpop.f32.mrf.mxu0  ;;  %v4982_v4 = vadd.f32 %v26170_v32, %v4719_v16  ;;  %v26172_v3 = vld [vmem:[#allocation64_spill] sm:$0xff]  ;;  %16197 = vmatprep.subr.mxu1 %v6648_v43  ;;  %v5496_v16 = vadd.f32 %v20774_v21, %v20802_v0  ;;  %v7365_v21 = vrot.slane %v20945_v40, 2 }
 0x3c5   : > { %v26173_v25 = vld [vmem:[#allocation76_spill] sm:$0xff]  ;;  %16198 = vmatpush3.msra.mxu1 %v6648_v43  ;;  %v26187_v43 = vld [vmem:[#allocation69_spill] sm:$0xff] }
 0x3c6   : > { %v21014_v50 = vpop.f32.mrf.mxu1 }
 0x3c7   : > { %26156 = vst [vmem:[#allocation99_spill] sm:$0xff] %v21014_v50  ;;  %v4262_v50 = vadd.f32 %v20471_v62, %v20525_v44  ;;  %v4322_v62 = vadd.f32 %v20584_v17, %v20606_v60  ;;  %v4962_v44 = vadd.f32 %v20594_v1, %v4699_v18  ;;  %v4725_v17 = vadd.f32 %v20771_v54, %v4302_v37  ;;  %v26161_v60 = vld [vmem:[#allocation66_spill] sm:$0xff] }
 0x3c8   : > { %v21018_v20 = vpop.f32.mrf.mxu1  ;;  %v4970_v22 = vadd.f32 %v26161_v60, %v20663_v27  ;;  %v26171_v37 = vld [vmem:[#allocation62_spill] sm:$0xff] }
 0x3c9   : > { %v4717_v8 = vadd.f32 %v20724_v59, %v4262_v50  ;;  %v4729_v1 = vadd.f32 %v20795_v35, %v4322_v62  ;;  %v4972_v59 = vadd.f32 %v26163_v23, %v26162_v9  ;;  %v4974_v50 = vadd.f32 %v26165_v36, %v26164_v10  ;;  %v26167_v35 = vld [vmem:[#allocation70_spill] sm:$0xff] }
 0x3ca   : > { %v21022_v31 = vpop.f32.mrf.mxu1  ;;  %v5229_v54 = vadd.f32 %v20806_v5, %v4962_v44  ;;  %v4976_v33 = vadd.f32 %v26167_v35, %v26166_v39  ;;  %v4986_v62 = vadd.f32 %v26172_v3, %v4723_v19  ;;  %v7362_v5 = vrot.slane %v20932_v46, 2  ;;  %v26181_v36 = vld [vmem:[#allocation86_spill] sm:$0xff]  ;;  %v26189_v3 = vld [vmem:[#allocation84_spill] sm:$0xff] }
 0x3cb   : > { %v4980_v27 = vadd.f32 %v26169_v49, %v4717_v8  ;;  %v5231_v44 = vadd.f32 %v20815_v11, %v4964_v24  ;;  %v26174_v8 = vld [vmem:[#allocation78_spill] sm:$0xff]  ;;  %v4992_v9 = vadd.f32 %v20768_v51, %v4729_v1  ;;  %v5233_v10 = vadd.f32 %v20824_v12, %v4966_v28  ;;  %v6649_v12 = vld [vmem:[%s25382_s7 + $0x20] sm:$0xff]  ;;  %v26186_v49 = vld [vmem:[#allocation75_spill] sm:$0xff] }
 0x3cc   : > { %v21027_v55 = vpop.f32.mrf.mxu1  ;;  %v4990_v60 = vadd.f32 %v26174_v8, %v4727_v47  ;;  %v7363_v11 = vrot.slane %v20943_v30, 2  ;;  %v5235_v24 = vadd.f32 %v20833_v63, %v4968_v26  ;;  %v5237_v19 = vadd.f32 %v20842_v7, %v4970_v22  ;;  %v26176_v47 = vld [vmem:[#allocation71_spill] sm:$0xff]  ;;  %v26177_v30 = vld [vmem:[#allocation65_spill] sm:$0xff]  ;;  %16247 = vmatprep.subr.mxu0 %v6649_v12 }
 0x3cd   : > { %v5495_v51 = vadd.f32 %v20783_v56, %v5229_v54  ;;  %v5239_v0 = vadd.f32 %v20851_v57, %v4972_v59  ;;  %v5498_v1 = vadd.f32 %v26177_v30, %v26176_v47  ;;  %v26179_v56 = vld [vmem:[#allocation97_spill] sm:$0xff]  ;;  %v26180_v26 = vld [vmem:[#allocation67_spill] sm:$0xff]  ;;  %v26182_v54 = vld [vmem:[#allocation80_spill] sm:$0xff]  ;;  %v5502_v32 = vadd.f32 %v26187_v43, %v26186_v49 }
 0x3ce   : > { %v21037_v41 = vpop.f32.mrf.mxu1  ;;  %v21118_v63 = vsel %vm1275_vm3, %v7362_v5, %v7363_v11  ;;  %v5243_v7 = vadd.f32 %v26179_v56, %v4976_v33  ;;  %v5497_v22 = vadd.f32 %v26180_v26, %v5231_v44  ;;  %v5500_v39 = vadd.f32 %v26182_v54, %v26181_v36  ;;  %v26184_v57 = vld [vmem:[#allocation9_spill] sm:$0xff]  ;;  %v26193_v12 = vld [vmem:[#allocation87_spill] sm:$0xff] }
 0x3cf   : > { %26178 = vst [vmem:[#allocation53_spill] sm:$0xff] %v21118_v63  ;;  %v21125_v40 = vsel %vm1275_vm3, %v7363_v11, %v7365_v21  ;;  %v5245_v59 = vadd.f32 %v26184_v57, %v4978_v38  ;;  %v5501_v5 = vadd.f32 %v26189_v3, %v5235_v24  ;;  %v26190_v44 = vld [vmem:[#allocation81_spill] sm:$0xff]  ;;  %v26194_v21 = vld [vmem:[#allocation90_spill] sm:$0xff]  ;;  %v26197_v26 = vld [vmem:[#allocation91_spill] sm:$0xff] }
 0x3d0   : > { %v21054_v14 = vpop.f32.mrf.mxu1  ;;  %26183 = vst [vmem:[#allocation66_spill] sm:$0xff] %v21125_v40  ;;  %v5506_v38 = vadd.f32 %v26194_v21, %v26193_v12  ;;  %v26196_v30 = vld [vmem:[#allocation77_spill] sm:$0xff]  ;;  %v26198_v36 = vld [vmem:[#allocation79_spill] sm:$0xff]  ;;  %v5253_v12 = vadd.f32 %v20904_v6, %v4986_v62  ;;  %v26213_v62 = vld [vmem:[#allocation46_spill] sm:$0xff] }
 0x3d1   : > { %v5505_v56 = vadd.f32 %v26196_v30, %v5239_v0  ;;  %v26199_v54 = vld [vmem:[#allocation83_spill] sm:$0xff]  ;;  %v26202_v43 = vld [vmem:[#allocation93_spill] sm:$0xff] }
 0x3d2   : > { %v15934_v29 = vpop.f32.mrf.mxu1  ;;  %v26200_v24 = vld [vmem:[#allocation19_spill] sm:$0xff]  ;;  %v26235_v63 = vld [vmem:[#allocation25_spill] sm:$0xff] }
 0x3d3   : > { %v21075_v52 = vadd.f32 %v15934_v29, %v20899_v45  ;;  %v4984_v45 = vadd.f32 %v26171_v37, %v4721_v42  ;;  %v4988_v29 = vadd.f32 %v26173_v25, %v4725_v17  ;;  %v21098_v42 = vpop.f32.mrf.mxu0  ;;  %v26191_v25 = vld [vmem:[#allocation73_spill] sm:$0xff]  ;;  %v5249_v57 = vadd.f32 %v26200_v24, %v4982_v4  ;;  %v26206_v21 = vld [vmem:[#allocation95_spill] sm:$0xff] }
 0x3d4   : > { %v21082_v18 = vpop.f32.mrf.mxu1  ;;  %v5504_v8 = vadd.f32 %v26191_v25, %v26190_v44  ;;  %v26204_v44 = vld [vmem:[#allocation89_spill] sm:$0xff] }
 0x3d5   : > { %v21131_v37 = vpop.f32.mrf.mxu0  ;;  %v5509_v25 = vadd.f32 %v26204_v44, %v5243_v7  ;;  %v5255_v4 = vadd.f32 %v20911_v34, %v4988_v29  ;;  %v26211_v7 = vld [vmem:[#allocation13_spill] sm:$0xff]  ;;  %v26214_v44 = vld [vmem:[#allocation38_spill] sm:$0xff]  ;;  %v26218_v34 = vld [vmem:[#allocation15_spill] sm:$0xff] }
 0x3d6   : > { %v15937_v23 = vpop.f32.mrf.mxu1  ;;  %v5761_v29 = vadd.f32 %v26218_v34, %v5498_v1 }
 0x3d7   : > { %v21101_v46 = vadd.f32 %v15937_v23, %v20906_v13  ;;  %v26175_v13 = vld [vmem:[#allocation96_spill] sm:$0xff] }
 0x3d8   : > { %v21107_v17 = vpop.f32.mrf.mxu1  ;;  %v5241_v28 = vadd.f32 %v26175_v13, %v4974_v50  ;;  %v26185_v50 = vld [vmem:[#allocation82_spill] sm:$0xff]  ;;  %v26192_v23 = vld [vmem:[#allocation88_spill] sm:$0xff] }
 0x3d9   : > { %v5499_v61 = vadd.f32 %v26185_v50, %v5233_v10  ;;  %v5503_v11 = vadd.f32 %v26192_v23, %v5237_v19  ;;  %v26195_v10 = vld [vmem:[#allocation14_spill] sm:$0xff]  ;;  %v26203_v19 = vld [vmem:[#allocation85_spill] sm:$0xff] }
 0x3da   : > { %v15940_v35 = vpop.f32.mrf.mxu1  ;;  %v5247_v47 = vadd.f32 %v26195_v10, %v4980_v27  ;;  %v26201_v50 = vld [vmem:[#allocation22_spill] sm:$0xff]  ;;  %v5510_v3 = vadd.f32 %v26203_v19, %v26202_v43  ;;  %v26205_v27 = vld [vmem:[#allocation8_spill] sm:$0xff]  ;;  %v5759_v19 = vadd.f32 %v26213_v62, %v5496_v16  ;;  %v26222_v16 = vld [vmem:[#allocation27_spill] sm:$0xff] }
 0x3db   : > { %v21134_v33 = vadd.f32 %v15940_v35, %v20915_v48  ;;  %v5508_v48 = vadd.f32 %v26198_v36, %v26197_v26  ;;  %v5507_v35 = vadd.f32 %v26199_v54, %v5241_v28  ;;  %v5251_v49 = vadd.f32 %v26201_v50, %v4984_v45  ;;  %v26207_v10 = vld [vmem:[#allocation92_spill] sm:$0xff]  ;;  %v21158_v26 = vpop.f32.mrf.mxu0  ;;  %v26210_v54 = vld [vmem:[#allocation34_spill] sm:$0xff] }
 0x3dc   : > { %v21142_v13 = vpop.f32.mrf.mxu1  ;;  %v5512_v0 = vadd.f32 %v26206_v21, %v26205_v27  ;;  %v5511_v30 = vadd.f32 %v26207_v10, %v5245_v59  ;;  %v26209_v45 = vld [vmem:[#allocation28_spill] sm:$0xff]  ;;  %v5259_v24 = vadd.f32 %v26210_v54, %v4992_v9  ;;  %v26212_v50 = vld [vmem:[#allocation98_spill] sm:$0xff]  ;;  %v5758_v59 = vadd.f32 %v26214_v44, %v5495_v51  ;;  %v26223_v51 = vld [vmem:[#allocation33_spill] sm:$0xff] }
 0x3dd   : > { %26188 = vst [vmem:[#allocation72_spill] sm:$0xff] %v21134_v33  ;;  %v5257_v36 = vadd.f32 %v26209_v45, %v4990_v60  ;;  %v5514_v43 = vadd.f32 %v26212_v50, %v26211_v7  ;;  %v26215_v27 = vld [vmem:[#allocation94_spill] sm:$0xff]  ;;  %v26216_v10 = vld [vmem:[#allocation16_spill] sm:$0xff]  ;;  %v26221_v7 = vld [vmem:[#allocation11_spill] sm:$0xff]  ;;  %v5763_v62 = vadd.f32 %v26222_v16, %v5500_v39  ;;  %v5762_v44 = vadd.f32 %v26223_v51, %v5499_v61 }
 0x3de   : > { %v15943_v23 = vpop.f32.mrf.mxu1  ;;  %v5513_v21 = vadd.f32 %v26215_v27, %v5247_v47  ;;  %v26219_v60 = vld [vmem:[#allocation30_spill] sm:$0xff]  ;;  %v21183_v50 = vadd.f32 %v26221_v7, %v5251_v49  ;;  %v21187_v47 = vpop.f32.mrf.mxu0  ;;  %v26224_v27 = vld [vmem:[#allocation17_spill] sm:$0xff]  ;;  %v26230_v7 = vld [vmem:[#allocation23_spill] sm:$0xff] }
 0x3df   : > { %v21161_v28 = vadd.f32 %v15943_v23, %v20924_v53  ;;  %v26217_v53 = vld [vmem:[#allocation7_spill] sm:$0xff]  ;;  %v5760_v45 = vadd.f32 %v26219_v60, %v5497_v22  ;;  %v26220_v9 = vld [vmem:[#allocation10_spill] sm:$0xff]  ;;  %v21203_v39 = vadd.f32 %v26230_v7, %v5259_v24  ;;  %v26233_v16 = vld [vmem:[#allocation40_spill] sm:$0xff] }
 0x3e0   : > { %v21168_v6 = vpop.f32.mrf.mxu1  ;;  %v21175_v23 = vadd.f32 %v26217_v53, %v26216_v10  ;;  %v21180_v54 = vadd.f32 %v26220_v9, %v5249_v57  ;;  %v21190_v10 = vadd.f32 %v26224_v27, %v5253_v12  ;;  %v26225_v53 = vld [vmem:[#allocation37_spill] sm:$0xff]  ;;  %v26227_v22 = vld [vmem:[#allocation50_spill] sm:$0xff]  ;;  %v26228_v57 = vld [vmem:[#allocation20_spill] sm:$0xff]  ;;  %v5764_v51 = vadd.f32 %v26233_v16, %v5501_v5 }
 0x3e1   : > { %26208 = vst [vmem:[#allocation68_spill] sm:$0xff] %v21161_v28  ;;  %v5765_v34 = vadd.f32 %v26227_v22, %v5502_v32  ;;  %v21197_v60 = vadd.f32 %v26228_v57, %v5255_v4  ;;  %v26229_v49 = vld [vmem:[#allocation26_spill] sm:$0xff]  ;;  %26231 = vst [vmem:[#allocation57_spill] sm:$0xff] %v21203_v39  ;;  %v26237_v32 = vld [vmem:[#allocation45_spill] sm:$0xff] }
 0x3e2   : > { %v15946_v40 = vpop.f32.mrf.mxu1  ;;  %v21200_v9 = vadd.f32 %v26229_v49, %v5257_v36  ;;  %v26234_v12 = vld [vmem:[#allocation54_spill] sm:$0xff]  ;;  %v5766_v22 = vadd.f32 %v26237_v32, %v5503_v11  ;;  %v26238_v4 = vld [vmem:[#allocation43_spill] sm:$0xff]  ;;  %v21216_v36 = vld [vmem:[%s25380_s5] ss:$0 sm:$0xff] }
 0x3e3   : > { %v21193_v1 = vadd.f32 %v15946_v40, %v26225_v53  ;;  %v5767_v27 = vadd.f32 %v26234_v12, %v5504_v8  ;;  %v6026_v40 = vadd.f32 %v26235_v63, %v5759_v19  ;;  %v26236_v53 = vld [vmem:[#allocation31_spill] sm:$0xff]  ;;  %v5769_v57 = vadd.f32 %v26238_v4, %v5506_v38  ;;  %v26239_v49 = vld [vmem:[#allocation29_spill] sm:$0xff]  ;;  %v26241_v16 = vld [vmem:[#allocation58_spill] sm:$0xff]  ;;  %v21221_v12 = vpop.f32.mrf.mxu0 }
 0x3e4   : > { %v21205_v61 = vpop.f32.mrf.mxu1  ;;  %v6028_v7 = vadd.f32 %v26239_v49, %v5761_v29  ;;  %v5768_v8 = vadd.f32 %v26241_v16, %v5505_v56  ;;  %v26242_v19 = vld [vmem:[#allocation12_spill] sm:$0xff]  ;;  %v26244_v38 = vld [vmem:[#allocation49_spill] sm:$0xff]  ;;  %v26246_v28 = vld [vmem:[#allocation51_spill] sm:$0xff] }
 0x3e5   : > { %26226 = vst [vmem:[#allocation59_spill] sm:$0xff] %v21193_v1  ;;  %26232 = vst [vmem:[#allocation61_spill] sm:$0xff] %v21205_v61  ;;  %v6025_v1 = vadd.f32 %v26236_v53, %v5758_v59  ;;  %v26240_v61 = vld [vmem:[#allocation35_spill] sm:$0xff]  ;;  %v6030_v59 = vadd.f32 %v26242_v19, %v5763_v62  ;;  %v26243_v11 = vld [vmem:[#allocation32_spill] sm:$0xff]  ;;  %v5771_v32 = vadd.f32 %v26244_v38, %v5508_v48 }
 0x3e6   : > { %v16001_v24 = vpop.f32.mrf.mxu1  ;;  %v6027_v5 = vadd.f32 %v26240_v61, %v5760_v45  ;;  %v6029_v53 = vadd.f32 %v26243_v11, %v5762_v44  ;;  %v26245_v4 = vld [vmem:[#allocation48_spill] sm:$0xff]  ;;  %v5773_v33 = vadd.f32 %v26246_v28, %v5510_v3  ;;  %v21231_v29 = vld [vmem:[%s25381_s6] ss:$0 sm:$0xff]  ;;  %v26248_v62 = vld [vmem:[#allocation18_spill] sm:$0xff]  ;;  %v5772_v48 = vadd.f32 %v21012_v58, %v5509_v25 }
 0x3e7   : > { %v6292_v63 = vadd.f32 %v16001_v24, %v6026_v40  ;;  %v5770_v39 = vadd.f32 %v26245_v4, %v5507_v35  ;;  %v26247_v56 = vld [vmem:[#allocation21_spill] sm:$0xff]  ;;  %v6031_v49 = vadd.f32 %v26248_v62, %v5764_v51  ;;  %v26249_v44 = vld [vmem:[#allocation24_spill] sm:$0xff]  ;;  %v26250_v35 = vld [vmem:[#allocation99_spill] sm:$0xff]  ;;  %v5774_v58 = vadd.f32 %v21018_v20, %v5511_v30 }
 0x3e8   : > { %v6132_v45 = vpop.f32.mrf.mxu1  ;;  %v6032_v61 = vadd.f32 %v26247_v56, %v5765_v34  ;;  %v21237_v16 = vadd.f32 %v26249_v44, %v5767_v27  ;;  %v5775_v3 = vadd.f32 %v26250_v35, %v5512_v0  ;;  %v26251_v19 = vld [vmem:[#allocation39_spill] sm:$0xff]  ;;  %v26252_v38 = vld [vmem:[#allocation36_spill] sm:$0xff]  ;;  %v21247_v34 = vpop.f32.mrf.mxu0  ;;  %v26254_v0 = vld [vmem:[#allocation41_spill] sm:$0xff]  ;;  %v5776_v20 = vadd.f32 %v21027_v55, %v5513_v21 }
 0x3e9   : > { %v6330_v40 = vmul.f32 %v21216_v36, %v6292_v63  ;;  %v6291_v24 = vadd.f32 %v6132_v45, %v6025_v1  ;;  %v21242_v11 = vadd.f32 %v26251_v19, %v5766_v22  ;;  %v21245_v4 = vadd.f32 %v26252_v38, %v5769_v57  ;;  %v26253_v63 = vld [vmem:[#allocation42_spill] sm:$0xff]  ;;  %v26255_v56 = vld [vmem:[#allocation56_spill] sm:$0xff]  ;;  %v26257_v35 = vld [vmem:[#allocation47_spill] sm:$0xff] }
 0x3ea   : > { %v16004_v28 = vpop.f32.mrf.mxu1  ;;  %v21254_v45 = vadd.f32 %v26253_v63, %v5768_v8  ;;  %v21258_v22 = vadd.f32 %v26254_v0, %v5771_v32  ;;  %v21261_v57 = vadd.f32 %v26255_v56, %v5770_v39  ;;  %v26256_v62 = vld [vmem:[#allocation44_spill] sm:$0xff]  ;;  %v5778_v55 = vadd.f32 %v21054_v14, %v21180_v54 }
 0x3eb   : > { %v21250_v1 = vadd.f32 %v21231_v29, %v6330_v40  ;;  %v6329_v51 = vmul.f32 %v21216_v36, %v6291_v24  ;;  %v6294_v27 = vadd.f32 %v16004_v28, %v6028_v7  ;;  %v21264_v44 = vadd.f32 %v26256_v62, %v5773_v33  ;;  %v26258_v39 = vld [vmem:[#allocation52_spill] sm:$0xff]  ;;  %v5996_v33 = vpop.f32.mrf.mxu0 }
 0x3ec   : > { %v6142_v25 = vpop.f32.mrf.mxu1  ;;  %v5777_v40 = vadd.f32 %v21022_v31, %v5514_v43  ;;  %v21274_v28 = vadd.f32 %v26257_v35, %v5772_v48  ;;  %v21277_v19 = vadd.f32 %v26258_v39, %v5775_v3  ;;  %v5779_v31 = vadd.f32 %v21037_v41, %v21175_v23 }
 0x3ed   : > { %v6432_v24 = vmul.f32 0.70710677, %v21250_v1  ;;  %v21269_v7 = vadd.f32 %v21231_v29, %v6329_v51  ;;  %v6332_v8 = vmul.f32 %v21216_v36, %v6294_v27  ;;  %v6293_v30 = vadd.f32 %v6142_v25, %v6027_v5  ;;  %v26259_v51 = vld [vmem:[#allocation100_spill] sm:$0xff]  ;;  %v26260_v27 = vld [vmem:[#allocation55_spill] sm:$0xff] }
 0x3ee   : > { %v16007_v32 = vpop.f32.mrf.mxu1  ;;  %v21289_v3 = vadd.f32 %v26259_v51, %v5774_v58  ;;  %v21293_v63 = vadd.f32 %v26260_v27, %v5777_v40  ;;  %v5780_v25 = vadd.f32 %v21082_v18, %v21183_v50  ;;  %v15993_v58 = vpop.f32.mrf.mxu0  ;;  %v21306_v62 = vadd.f32 %v21072_v2, %v5779_v31  ;;  %v26264_v27 = vld [vmem:[#allocation61_spill] sm:$0xff] }
 0x3ef   : > { %17054 = verf.f32 %v6432_v24  ;;  %v6431_v43 = vmul.f32 0.70710677, %v21269_v7  ;;  %v21283_v38 = vadd.f32 %v21231_v29, %v6332_v8  ;;  %v6331_v21 = vmul.f32 %v21216_v36, %v6293_v30 }
 0x3f0   : > { %v6296_v5 = vadd.f32 %v16007_v32, %v6030_v59  ;;  %v6152_v48 = vpop.f32.mrf.mxu1  ;;  %v21302_v59 = vadd.f32 %v21047_v15, %v5776_v20  ;;  %v5782_v18 = vadd.f32 %v21107_v17, %v21190_v10  ;;  %v21315_v15 = vadd.f32 %v21098_v42, %v5778_v55  ;;  %v6006_v32 = vpop.f32.mrf.mxu0 }
 0x3f1   : > { %17056 = verf.f32 %v6431_v43  ;;  %v6434_v41 = vmul.f32 0.70710677, %v21283_v38  ;;  %v6295_v23 = vadd.f32 %v6152_v48, %v6029_v53  ;;  %v21298_v0 = vadd.f32 %v21231_v29, %v6331_v21  ;;  %v26261_v43 = vld [vmem:[#allocation72_spill] sm:$0xff] }
 0x3f2   : > { %v6334_v14 = vmul.f32 %v21216_v36, %v6296_v5  ;;  %v16010_v54 = vpop.f32.mrf.mxu1  ;;  %v21323_v2 = vadd.f32 %v21131_v37, %v21075_v52  ;;  %v5784_v17 = vadd.f32 %v21142_v13, %v21197_v60  ;;  %v21329_v42 = vadd.f32 %v21158_v26, %v5780_v25  ;;  %v15996_v31 = vpop.f32.mrf.mxu0 }
 0x3f3   : > { %17058 = verf.f32 %v6434_v41  ;;  %v6333_v56 = vmul.f32 %v21216_v36, %v6295_v23  ;;  %v6298_v53 = vadd.f32 %v16010_v54, %v6032_v61  ;;  %v6433_v50 = vmul.f32 0.70710677, %v21298_v0 }
 0x3f4   : > { %v21312_v40 = vadd.f32 %v21231_v29, %v6334_v14  ;;  %v6162_v24 = vpop.f32.mrf.mxu1  ;;  %v5786_v35 = vadd.f32 %v21168_v6, %v21200_v9  ;;  %v21341_v60 = vadd.f32 %v21187_v47, %v21101_v46  ;;  %v21344_v26 = vadd.f32 %v21221_v12, %v5782_v18  ;;  %v26262_v12 = vld [vmem:[#allocation68_spill] sm:$0xff] }
 0x3f5   : > { %v21318_v8 = vadd.f32 %v21231_v29, %v6333_v56  ;;  %v6336_v61 = vmul.f32 %v21216_v36, %v6298_v53  ;;  %v6297_v20 = vadd.f32 %v6162_v24, %v6031_v49  ;;  %17060 = verf.f32 %v6433_v50  ;;  %v26265_v50 = vld [vmem:[#allocation59_spill] sm:$0xff] }
 0x3f6   : > { %v6436_v10 = vmul.f32 0.70710677, %v21312_v40  ;;  %v16013_v30 = vpop.f32.mrf.mxu1  ;;  %v21352_v55 = vadd.f32 %v21247_v34, %v26261_v43  ;;  %v21356_v47 = vadd.f32 %v5996_v33, %v5784_v17  ;;  %v21359_v5 = vadd.f32 %v15993_v58, %v26262_v12  ;;  %v26263_v34 = vld [vmem:[#allocation57_spill] sm:$0xff]  ;;  %v6016_v58 = vpop.f32.mrf.mxu0 }
 0x3f7   : > { %v6435_v49 = vmul.f32 0.70710677, %v21318_v8  ;;  %v21335_v39 = vadd.f32 %v21231_v29, %v6336_v61  ;;  %v6335_v52 = vmul.f32 %v21216_v36, %v6297_v20  ;;  %v6300_v37 = vadd.f32 %v16013_v30, %v21237_v16 }
 0x3f8   : > { %17062 = verf.f32 %v6436_v10  ;;  %v6172_v13 = vpop.f32.mrf.mxu1  ;;  %v21363_v41 = vadd.f32 %v6006_v32, %v5786_v35  ;;  %v5788_v25 = vadd.f32 %v26264_v27, %v26263_v34  ;;  %v6400_v14 = vmul.f32 0.5, %v21250_v1 }
 0x3f9   : > { %17064 = verf.f32 %v6435_v49  ;;  %v6438_v6 = vmul.f32 0.70710677, %v21335_v39  ;;  %v21348_v9 = vadd.f32 %v21231_v29, %v6335_v52  ;;  %v6338_v16 = vmul.f32 %v21216_v36, %v6300_v37 }
 0x3fa   : > { %v6299_v21 = vadd.f32 %v6172_v13, %v21242_v11  ;;  %v16016_v46 = vpop.f32.mrf.mxu1  ;;  %v21375_v24 = vadd.f32 %v15996_v31, %v26265_v50  ;;  %v6399_v61 = vmul.f32 0.5, %v21269_v7  ;;  %v6402_v31 = vmul.f32 0.5, %v21283_v38 }
 0x3fb   : > { %17066 = verf.f32 %v6438_v6  ;;  %v6437_v48 = vmul.f32 0.70710677, %v21348_v9  ;;  %v6302_v51 = vadd.f32 %v16016_v46, %v21245_v4  ;;  %v21369_v11 = vadd.f32 %v21231_v29, %v6338_v16 }
 0x3fc   : > { %v17055_v23 = vpop.eup %17054  ;;  %v6337_v33 = vmul.f32 %v21216_v36, %v6299_v21  ;;  %v6182_v54 = vpop.f32.mrf.mxu1  ;;  %v6404_v34 = vmul.f32 0.5, %v21312_v40 }
 0x3fd   : > { %v6496_v56 = vadd.f32 1.0, %v17055_v23  ;;  %17068 = verf.f32 %v6437_v48  ;;  %v6340_v53 = vmul.f32 %v21216_v36, %v6302_v51  ;;  %v6301_v4 = vadd.f32 %v6182_v54, %v21254_v45 }
 0x3fe   : > { %v17057_v18 = vpop.eup %17056  ;;  %v6440_v1 = vmul.f32 0.70710677, %v21369_v11  ;;  %v6375_v20 = vadd.f32 %v21231_v29, %v6337_v33  ;;  %v16019_v17 = vpop.f32.mrf.mxu1  ;;  %v21384_v45 = vadd.f32 %v6016_v58, %v5788_v25  ;;  %v6401_v51 = vmul.f32 0.5, %v21298_v0 }
 0x3ff   : > { %v6528_v10 = vmul.f32 %v6496_v56, %v6400_v14  ;;  %v6495_v30 = vadd.f32 1.0, %v17057_v18  ;;  %v21381_v32 = vadd.f32 %v21231_v29, %v6340_v53  ;;  %v6339_v35 = vmul.f32 %v21216_v36, %v6301_v4 }
 0x400   : > { %v17059_v49 = vpop.eup %17058  ;;  %17070 = verf.f32 %v6440_v1  ;;  %v6439_v52 = vmul.f32 0.70710677, %v6375_v20  ;;  %v6304_v37 = vadd.f32 %v16019_v17, %v21258_v22  ;;  %v6192_v7 = vpop.f32.mrf.mxu1  ;;  %v6403_v33 = vmul.f32 0.5, %v21318_v8 }
 0x401   : > { %6560 = vst.msk [vmem:[#allocation2 + $0x21] sm:$0xff] %vm493_vm4, %v6528_v10  ;;  %v6527_v13 = vmul.f32 %v6495_v30, %v6399_v61  ;;  %v6498_v6 = vadd.f32 1.0, %v17059_v49  ;;  %v6442_v43 = vmul.f32 0.70710677, %v21381_v32  ;;  %v21391_v16 = vadd.f32 %v21231_v29, %v6339_v35 }
 0x402   : > { %17072 = verf.f32 %v6439_v52  ;;  %v6342_v21 = vmul.f32 %v21216_v36, %v6304_v37  ;;  %v6303_v46 = vadd.f32 %v6192_v7, %v21261_v57  ;;  %v16022_v12 = vpop.f32.mrf.mxu1  ;;  %v17061_v48 = vpop.eup %17060  ;;  %v6406_v53 = vmul.f32 0.5, %v21335_v39 }
 0x403   : > { %6559 = vst.msk [vmem:[#allocation2 + $0x19] sm:$0xff] %vm493_vm4, %v6527_v13  ;;  %v6530_v22 = vmul.f32 %v6498_v6, %v6402_v31  ;;  %17074 = verf.f32 %v6442_v43  ;;  %v6306_v38 = vadd.f32 %v16022_v12, %v21264_v44  ;;  %v6497_v23 = vadd.f32 1.0, %v17061_v48 }
 0x404   : > { %v6441_v27 = vmul.f32 0.70710677, %v21391_v16  ;;  %v21401_v25 = vadd.f32 %v21231_v29, %v6342_v21  ;;  %v6202_v14 = vpop.f32.mrf.mxu1  ;;  %v6341_v54 = vmul.f32 %v21216_v36, %v6303_v46  ;;  %v6405_v17 = vmul.f32 0.5, %v21348_v9 }
 0x405   : > { %v17063_v57 = vpop.eup %17062  ;;  %6562 = vst.msk [vmem:[#allocation2 + $0x39] sm:$0xff] %vm493_vm4, %v6530_v22  ;;  %v6344_v0 = vmul.f32 %v21216_v36, %v6306_v38  ;;  %v6305_v44 = vadd.f32 %v6202_v14, %v21274_v28  ;;  %v6529_v56 = vmul.f32 %v6497_v23, %v6401_v51  ;;  %v6408_v52 = vmul.f32 0.5, %v21369_v11 }
 0x406   : > { %v17065_v58 = vpop.eup %17064  ;;  %v6500_v40 = vadd.f32 1.0, %v17063_v57  ;;  %17076 = verf.f32 %v6441_v27  ;;  %v16025_v4 = vpop.f32.mrf.mxu1  ;;  %v6444_v50 = vmul.f32 0.70710677, %v21401_v25  ;;  %v21411_v61 = vadd.f32 %v21231_v29, %v6341_v54 }
 0x407   : > { %v6499_v18 = vadd.f32 1.0, %v17065_v58  ;;  %v21414_v8 = vadd.f32 %v21231_v29, %v6344_v0  ;;  %6561 = vst.msk [vmem:[#allocation2 + $0x31] sm:$0xff] %vm493_vm4, %v6529_v56  ;;  %v6343_v10 = vmul.f32 %v21216_v36, %v6305_v44  ;;  %v6308_v39 = vadd.f32 %v16025_v4, %v21277_v19 }
 0x408   : > { %v17067_v1 = vpop.eup %17066  ;;  %v6532_v28 = vmul.f32 %v6500_v40, %v6404_v34  ;;  %v6212_v30 = vpop.f32.mrf.mxu1  ;;  %17078 = verf.f32 %v6444_v50  ;;  %v6407_v7 = vmul.f32 0.5, %v6375_v20  ;;  %v6443_v13 = vmul.f32 0.70710677, %v21411_v61 }
 0x409   : > { %v6531_v35 = vmul.f32 %v6499_v18, %v6403_v33  ;;  %v6502_v49 = vadd.f32 1.0, %v17067_v1  ;;  %v6446_v31 = vmul.f32 0.70710677, %v21414_v8  ;;  %v21425_v9 = vadd.f32 %v21231_v29, %v6343_v10 }
 0x40a   : > { %v17069_v37 = vpop.eup %17068  ;;  %6564 = vst.msk [vmem:[#allocation2 + $0x51] sm:$0xff] %vm493_vm4, %v6532_v28  ;;  %v16028_v6 = vpop.f32.mrf.mxu1  ;;  %v21427_v43 = vld [vmem:[#allocation2 + $0x18] sm:$0xff]  ;;  %v6346_v11 = vmul.f32 %v21216_v36, %v6308_v39  ;;  %v6307_v46 = vadd.f32 %v6212_v30, %v21289_v3  ;;  %v21434_v20 = vld [vmem:[#allocation2 + $0x20] sm:$0xff]  ;;  %v6410_v12 = vmul.f32 0.5, %v21381_v32  ;;  %17080 = verf.f32 %v6443_v13  ;;  %v21467_v28 = vld [vmem:[#allocation2 + $0x28] sm:$0x3] }
 0x40b   : > { %6563 = vst.msk [vmem:[#allocation2 + $0x49] sm:$0xff] %vm493_vm4, %v6531_v35  ;;  %v6534_v19 = vmul.f32 %v6502_v49, %v6406_v53  ;;  %v6501_v21 = vadd.f32 1.0, %v17069_v37  ;;  %16102 = vmatprep.mubr.msk.f32.mxu1 %vm493_vm4, %v21427_v43  ;;  %v6445_v48 = vmul.f32 0.70710677, %v21425_v9  ;;  %v6310_v22 = vadd.f32 %v16028_v6, %v21293_v63 }
 0x40c   : > { %v6222_v51 = vpop.f32.mrf.mxu1  ;;  %16103 = vmatmul.mubr.msk.f32.gmra.mxu1 %vm493_vm4, %v21434_v20  ;;  %17082 = verf.f32 %v6446_v31  ;;  %v21443_v23 = vadd.f32 %v21231_v29, %v6346_v11  ;;  %v6345_v34 = vmul.f32 %v21216_v36, %v6307_v46  ;;  %v6409_v33 = vmul.f32 0.5, %v21391_v16 }
 0x40d   : > { %v17071_v38 = vpop.eup %17070  ;;  %6566 = vst.msk [vmem:[#allocation2 + $0x69] sm:$0xff] %vm493_vm4, %v6534_v19  ;;  %v6533_v3 = vmul.f32 %v6501_v21, %v6405_v17  ;;  %17084 = verf.f32 %v6445_v48  ;;  %v6348_v27 = vmul.f32 %v21216_v36, %v6310_v22  ;;  %v6309_v63 = vadd.f32 %v6222_v51, %v21302_v59 }
 0x40e   : > { %v6504_v32 = vadd.f32 1.0, %v17071_v38  ;;  %v16031_v14 = vpop.f32.mrf.mxu1  ;;  %v6448_v54 = vmul.f32 0.70710677, %v21443_v23  ;;  %v21452_v0 = vadd.f32 %v21231_v29, %v6345_v34  ;;  %v21455_v58 = vld [vmem:[#allocation2 + $0x30] sm:$0xff]  ;;  %v21457_v56 = vld [vmem:[#allocation2 + $0x38] sm:$0xff]  ;;  %v6412_v1 = vmul.f32 0.5, %v21401_v25 }
 0x40f   : > { %v17073_v57 = vpop.eup %17072  ;;  %6565 = vst.msk [vmem:[#allocation2 + $0x61] sm:$0xff] %vm493_vm4, %v6533_v3  ;;  %v6312_v44 = vadd.f32 %v16031_v14, %v21306_v62  ;;  %v21460_v4 = vadd.f32 %v21231_v29, %v6348_v27  ;;  %v6347_v18 = vmul.f32 %v21216_v36, %v6309_v63  ;;  %16105 = vmatprep.mubr.msk.f32.mxu1 %vm493_vm4, %v21455_v58  ;;  %v21473_v10 = vmul.f32 0.5, %v21411_v61  ;;  %v21506_v3 = vld [vmem:[#allocation2 + $0x40] sm:$0x3] }
 0x410   : > { %v17075_v40 = vpop.eup %17074  ;;  %v6536_v53 = vmul.f32 %v6504_v32, %v6408_v52  ;;  %v6503_v59 = vadd.f32 1.0, %v17073_v57  ;;  %v6232_v16 = vpop.f32.mrf.mxu1  ;;  %17086 = verf.f32 %v6448_v54  ;;  %v6447_v62 = vmul.f32 0.70710677, %v21452_v0  ;;  %16106 = vmatmul.mubr.msk.f32.gmra.mxu1 %vm493_vm4, %v21457_v56 }
 0x411   : > { %v6506_v50 = vadd.f32 1.0, %v17075_v40  ;;  %v6450_v39 = vmul.f32 0.70710677, %v21460_v4  ;;  %v21477_v30 = vadd.f32 %v21231_v29, %v6347_v18  ;;  %v6350_v13 = vmul.f32 %v21216_v36, %v6312_v44 }
 0x412   : > { %6568 = vst.msk [vmem:[#allocation2 + $0x81] sm:$0xff] %vm493_vm4, %v6536_v53  ;;  %v6535_v17 = vmul.f32 %v6503_v59, %v6407_v7  ;;  %v16034_v25 = vpop.f32.mrf.mxu1  ;;  %v21479_v35 = vld [vmem:[#allocation2 + $0x48] sm:$0xff]  ;;  %v21481_v49 = vld [vmem:[#allocation2 + $0x50] sm:$0xff]  ;;  %17088 = verf.f32 %v6447_v62  ;;  %v6709_v7 = vrot.slane %v21427_v43, 1  ;;  %v6414_v31 = vmul.f32 0.5, %v21414_v8 }
 0x413   : > { %v17077_v52 = vpop.eup %17076  ;;  %v6538_v37 = vmul.f32 %v6506_v50, %v6410_v12  ;;  %16108 = vmatprep.mubr.msk.f32.mxu1 %vm493_vm4, %v21479_v35  ;;  %17090 = verf.f32 %v6450_v39  ;;  %v6449_v6 = vmul.f32 0.70710677, %v21477_v30  ;;  %v21492_v21 = vadd.f32 %v21231_v29, %v6350_v13  ;;  %v21502_v8 = vld [vmem:[%s25382_s7 + $0x28] sm:$0xff] }
 0x414   : > { %6567 = vst.msk [vmem:[#allocation2 + $0x79] sm:$0xff] %vm493_vm4, %v6535_v17  ;;  %v6505_v61 = vadd.f32 1.0, %v17077_v52  ;;  %v6242_v19 = vpop.f32.mrf.mxu1  ;;  %v6710_v11 = vrot.slane %v21434_v20, 1  ;;  %v6712_v46 = vrot.slane %v21467_v28, 1  ;;  %v6311_v12 = vadd.f32 %v6232_v16, %v21315_v15  ;;  %16109 = vmatmul.mubr.msk.f32.gmra.mxu1 %vm493_vm4, %v21481_v49  ;;  %16297 = vmatprep.subr.mxu1 %v21502_v8 }
 0x415   : > { %6570 = vst.msk [vmem:[#allocation2 + $0x99] sm:$0xff] %vm493_vm4, %v6538_v37  ;;  %v17079_v48 = vpop.eup %17078  ;;  %17092 = verf.f32 %v6449_v6  ;;  %v6314_v51 = vadd.f32 %v16034_v25, %v21323_v2  ;;  %v6714_v38 = vrot.slane %v21455_v58, 1  ;;  %v6413_v63 = vmul.f32 0.5, %v21425_v9 }
 0x416   : > { %v6537_v22 = vmul.f32 %v6505_v61, %v6409_v33  ;;  %v16037_v34 = vpop.f32.mrf.mxu1  ;;  %v21508_v32 = vld [vmem:[#allocation2 + $0x60] sm:$0xff]  ;;  %v21510_v15 = vld [vmem:[#allocation2 + $0x68] sm:$0xff]  ;;  %v6508_v27 = vadd.f32 1.0, %v17079_v48  ;;  %v6452_v14 = vmul.f32 0.70710677, %v21492_v21  ;;  %v21516_v57 = vsel %vm608_vm2, %v6709_v7, %v6710_v11 }
 0x417   : > { %16111 = vmatprep.mubr.msk.f32.mxu1 %vm493_vm4, %v21508_v32  ;;  %16052 = vmatprep.mubr.msk.f32.mxu0 %vm493_vm4, %v21516_v57  ;;  %v21524_v2 = vsel %vm608_vm2, %v6710_v11, %v6712_v46  ;;  %v6349_v33 = vmul.f32 %v21216_v36, %v6311_v12  ;;  %v6352_v9 = vmul.f32 %v21216_v36, %v6314_v51  ;;  %v6715_v54 = vrot.slane %v21457_v56, 1  ;;  %v17081_v40 = vpop.eup %17080  ;;  %v21570_v51 = vld [vmem:[#allocation2 + $0x58] sm:$0x3] }
 0x418   : > { %6569 = vst.msk [vmem:[#allocation2 + $0x91] sm:$0xff] %vm493_vm4, %v6537_v22  ;;  %v6252_v44 = vpop.f32.mrf.mxu1  ;;  %v6540_v53 = vmul.f32 %v6508_v27, %v6412_v1  ;;  %17094 = verf.f32 %v6452_v14  ;;  %16053 = vmatmul.mubr.msk.f32.gmra.mxu0 %vm493_vm4, %v21524_v2  ;;  %v6717_v59 = vrot.slane %v21506_v3, 1  ;;  %v6313_v18 = vadd.f32 %v6242_v19, %v21329_v42  ;;  %16112 = vmatmul.mubr.msk.f32.gmra.mxu1 %vm493_vm4, %v21510_v15 }
 0x419   : > { %v17083_v16 = vpop.eup %17082  ;;  %v6507_v50 = vadd.f32 1.0, %v17081_v40  ;;  %v21536_v62 = vadd.f32 %v21231_v29, %v6349_v33  ;;  %v21539_v17 = vadd.f32 %v21231_v29, %v6352_v9  ;;  %v21542_v1 = vsel %vm608_vm2, %v6714_v38, %v6715_v54 }
 0x41a   : > { %v16040_v39 = vpop.f32.mrf.mxu1  ;;  %v17085_v25 = vpop.eup %17084  ;;  %6572 = vst.msk [vmem:[#allocation2 + $0xb1] sm:$0xff] %vm493_vm4, %v6540_v53  ;;  %v6510_v52 = vadd.f32 1.0, %v17083_v16  ;;  %16055 = vmatprep.mubr.msk.f32.mxu0 %vm493_vm4, %v21542_v1  ;;  %v21548_v42 = vsel %vm608_vm2, %v6715_v54, %v6717_v59  ;;  %v6351_v37 = vmul.f32 %v21216_v36, %v6313_v18  ;;  %v6316_v13 = vadd.f32 %v16037_v34, %v21341_v60 }
 0x41b   : > { %v21552_v7 = vld [vmem:[#allocation2 + $0x78] sm:$0xff]  ;;  %v21554_v61 = vld [vmem:[#allocation2 + $0x80] sm:$0xff]  ;;  %v6539_v6 = vmul.f32 %v6507_v50, %v21473_v10  ;;  %v6509_v19 = vadd.f32 1.0, %v17085_v25  ;;  %v6416_v11 = vmul.f32 0.5, %v21443_v23  ;;  %v6451_v46 = vmul.f32 0.70710677, %v21536_v62 }
 0x41c   : > { %16114 = vmatprep.mubr.msk.f32.mxu1 %vm493_vm4, %v21552_v7  ;;  %v21561_v12 = vpop.f32.mrf.mxu1  ;;  %v6542_v48 = vmul.f32 %v6510_v52, %v6414_v31  ;;  %v6415_v22 = vmul.f32 0.5, %v21452_v0  ;;  %v6454_v60 = vmul.f32 0.70710677, %v21539_v17  ;;  %16056 = vmatmul.mubr.msk.f32.gmra.mxu0 %vm493_vm4, %v21548_v42  ;;  %v21568_v10 = vadd.f32 %v21231_v29, %v6351_v37 }
 0x41d   : > { %16115 = vmatmul.mubr.msk.f32.gmra.mxu1 %vm493_vm4, %v21554_v61  ;;  %v17087_v23 = vpop.eup %17086  ;;  %6571 = vst.msk [vmem:[#allocation2 + $0xa9] sm:$0xff] %vm493_vm4, %v6539_v6  ;;  %v6541_v38 = vmul.f32 %v6509_v19, %v6413_v63  ;;  %17096 = verf.f32 %v6451_v46  ;;  %v6354_v0 = vmul.f32 %v21216_v36, %v6316_v13  ;;  %v6719_v31 = vrot.slane %v21479_v35, 1 }
 0x41e   : > { %6574 = vst.msk [vmem:[#allocation2 + $0xc9] sm:$0xff] %vm493_vm4, %v6542_v48  ;;  %v6512_v34 = vadd.f32 1.0, %v17087_v23  ;;  %v6418_v27 = vmul.f32 0.5, %v21460_v4  ;;  %17098 = verf.f32 %v6454_v60  ;;  %v6453_v14 = vmul.f32 0.70710677, %v21568_v10  ;;  %v16043_v4 = vpop.f32.mrf.mxu1 }
 0x41f   : > { %v21580_v33 = vld [vmem:[#allocation2 + $0x90] sm:$0xff]  ;;  %v21582_v9 = vld [vmem:[#allocation2 + $0x98] sm:$0xff]  ;;  %v17089_v54 = vpop.eup %17088  ;;  %6573 = vst.msk [vmem:[#allocation2 + $0xc1] sm:$0xff] %vm493_vm4, %v6541_v38  ;;  %v21586_v63 = vadd.f32 %v21231_v29, %v6354_v0  ;;  %v6720_v40 = vrot.slane %v21481_v49, 1  ;;  %v6722_v53 = vrot.slane %v21570_v51, 1  ;;  %v6315_v59 = vadd.f32 %v6252_v44, %v21344_v26 }
 0x420   : > { %16117 = vmatprep.mubr.msk.f32.mxu1 %vm493_vm4, %v21580_v33  ;;  %v17091_v18 = vpop.eup %17090  ;;  %v6544_v16 = vmul.f32 %v6512_v34, %v6416_v11  ;;  %v6511_v50 = vadd.f32 1.0, %v17089_v54  ;;  %17100 = verf.f32 %v6453_v14  ;;  %v6318_v25 = vadd.f32 %v16040_v39, %v21352_v55 }
 0x421   : > { %16118 = vmatmul.mubr.msk.f32.gmra.mxu1 %vm493_vm4, %v21582_v9  ;;  %v6514_v52 = vadd.f32 1.0, %v17091_v18  ;;  %v6417_v37 = vmul.f32 0.5, %v21477_v30  ;;  %v6456_v13 = vmul.f32 0.70710677, %v21586_v63  ;;  %v21599_v26 = vsel %vm608_vm2, %v6719_v31, %v6720_v40  ;;  %v21609_v30 = vld [vmem:[#allocation2 + $0x70] sm:$0x3] }
 0x422   : > { %v17093_v44 = vpop.eup %17092  ;;  %6576 = vst.msk [vmem:[#allocation2 + $0xe1] sm:$0xff] %vm493_vm4, %v6544_v16  ;;  %v6543_v6 = vmul.f32 %v6511_v50, %v6415_v22  ;;  %16058 = vmatprep.mubr.msk.f32.mxu0 %vm493_vm4, %v21599_v26  ;;  %v21605_v55 = vsel %vm608_vm2, %v6720_v40, %v6722_v53  ;;  %v6353_v39 = vmul.f32 %v21216_v36, %v6315_v59  ;;  %v6724_v48 = vrot.slane %v21508_v32, 1  ;;  %v6272_v22 = vpop.f32.mrf.mxu1  ;;  %v21632_v53 = vld [vmem:[#allocation2 + $0x88] sm:$0x3] }
 0x423   : > { %v6356_v19 = vmul.f32 %v21216_v36, %v6318_v25  ;;  %v6546_v11 = vmul.f32 %v6514_v52, %v6418_v27  ;;  %v6513_v46 = vadd.f32 1.0, %v17093_v44  ;;  %17102 = verf.f32 %v6456_v13  ;;  %16059 = vmatmul.mubr.msk.f32.gmra.mxu0 %vm493_vm4, %v21605_v55 }
 0x424   : > { %6575 = vst.msk [vmem:[#allocation2 + $0xd9] sm:$0xff] %vm493_vm4, %v6543_v6  ;;  %v6420_v60 = vmul.f32 0.5, %v21492_v21  ;;  %v21617_v23 = vadd.f32 %v21231_v29, %v6353_v39  ;;  %v6725_v0 = vrot.slane %v21510_v15, 1  ;;  %v21623_v31 = vld [vmem:[#allocation2 + $0xa8] sm:$0xff]  ;;  %v21625_v34 = vld [vmem:[#allocation2 + $0xb0] sm:$0xff]  ;;  %v6727_v54 = vrot.slane %v21609_v30, 1 }
 0x425   : > { %v21620_v38 = vadd.f32 %v21231_v29, %v6356_v19  ;;  %v17095_v27 = vpop.eup %17094  ;;  %6578 = vst.msk [vmem:[#allocation2 + $0xf9] sm:$0xff] %vm493_vm4, %v6546_v11  ;;  %v6545_v14 = vmul.f32 %v6513_v46, %v6417_v37  ;;  %v6317_v21 = vadd.f32 %v21561_v12, %v21356_v47  ;;  %v6320_v40 = vadd.f32 %v16043_v4, %v21359_v5  ;;  %v16046_v4 = vpop.f32.mrf.mxu1 }
 0x426   : > { %16120 = vmatprep.mubr.msk.f32.mxu1 %vm493_vm4, %v21623_v31  ;;  %v6516_v59 = vadd.f32 1.0, %v17095_v27  ;;  %v6419_v18 = vmul.f32 0.5, %v21536_v62  ;;  %v6455_v16 = vmul.f32 0.70710677, %v21617_v23  ;;  %v6729_v50 = vrot.slane %v21552_v7, 1  ;;  %v21641_v25 = vld [vmem:[#allocation2 + $0xc0] sm:$0xff] }
 0x427   : > { %16121 = vmatmul.mubr.msk.f32.gmra.mxu1 %vm493_vm4, %v21625_v34  ;;  %6577 = vst.msk [vmem:[#allocation2 + $0xf1] sm:$0xff] %vm493_vm4, %v6545_v14  ;;  %v6458_v47 = vmul.f32 0.70710677, %v21620_v38  ;;  %v21646_v5 = vsel %vm608_vm2, %v6724_v48, %v6725_v0  ;;  %v21649_v12 = vsel %vm608_vm2, %v6725_v0, %v6727_v54  ;;  %v6355_v62 = vmul.f32 %v21216_v36, %v6317_v21  ;;  %v21654_v52 = vld [vmem:[#allocation2 + $0xc8] sm:$0xff] }
 0x428   : > { %16123 = vmatprep.mubr.msk.f32.mxu1 %vm493_vm4, %v21641_v25  ;;  %v6548_v37 = vmul.f32 %v6516_v59, %v6420_v60  ;;  %17104 = verf.f32 %v6455_v16  ;;  %16061 = vmatprep.mubr.msk.f32.mxu0 %vm493_vm4, %v21646_v5  ;;  %v6358_v13 = vmul.f32 %v21216_v36, %v6320_v40  ;;  %v6730_v44 = vrot.slane %v21554_v61, 1 }
 0x429   : > { %17106 = verf.f32 %v6458_v47  ;;  %16062 = vmatmul.mubr.msk.f32.gmra.mxu0 %vm493_vm4, %v21649_v12  ;;  %v21663_v6 = vadd.f32 %v21231_v29, %v6355_v62  ;;  %v6732_v39 = vrot.slane %v21632_v53, 1  ;;  %v6319_v19 = vadd.f32 %v6272_v22, %v21363_v41  ;;  %v6282_v47 = vpop.f32.mrf.mxu1 }
 0x42a   : > { %v17097_v11 = vpop.eup %17096  ;;  %6580 = vst.msk [vmem:[#allocation2 + $0x111] sm:$0xff] %vm493_vm4, %v6548_v37  ;;  %v6422_v46 = vmul.f32 0.5, %v21539_v17  ;;  %v21670_v48 = vadd.f32 %v21231_v29, %v6358_v13  ;;  %v21673_v60 = vsel %vm608_vm2, %v6729_v50, %v6730_v44  ;;  %v6322_v0 = vadd.f32 %v16046_v4, %v21375_v24  ;;  %v21692_v50 = vld [vmem:[#allocation2 + $0xa0] sm:$0x3] }
 0x42b   : > { %26266 = vst [vmem:[#allocation70_spill] sm:$0xff] %v21673_v60  ;;  %16124 = vmatmul.mubr.msk.f32.gmra.mxu1 %vm493_vm4, %v21654_v52  ;;  %v17099_v27 = vpop.eup %17098  ;;  %v6515_v14 = vadd.f32 1.0, %v17097_v11  ;;  %v6457_v41 = vmul.f32 0.70710677, %v21663_v6  ;;  %16064 = vmatprep.mubr.msk.f32.mxu0 %vm493_vm4, %v21673_v60  ;;  %v21682_v17 = vsel %vm608_vm2, %v6730_v44, %v6732_v39  ;;  %v6734_v22 = vrot.slane %v21580_v33, 1  ;;  %v21685_v54 = vld [vmem:[#allocation2 + $0xd8] sm:$0xff] }
 0x42c   : > { %26267 = vst [vmem:[#allocation63_spill] sm:$0xff] %v21682_v17  ;;  %v21687_v21 = vld [vmem:[#allocation2 + $0xe0] sm:$0xff]  ;;  %v6518_v24 = vadd.f32 1.0, %v17099_v27  ;;  %v6421_v40 = vmul.f32 0.5, %v21568_v10  ;;  %v6460_v59 = vmul.f32 0.70710677, %v21670_v48  ;;  %v6357_v16 = vmul.f32 %v21216_v36, %v6319_v19  ;;  %16126 = vmatprep.mubr.msk.f32.mxu1 %vm493_vm4, %v21685_v54 }
 0x42d   : > { %v17101_v62 = vpop.eup %17100  ;;  %v6547_v4 = vmul.f32 %v6515_v14, %v6419_v18  ;;  %17108 = verf.f32 %v6457_v41  ;;  %16065 = vmatmul.mubr.msk.f32.gmra.mxu0 %vm493_vm4, %v21682_v17  ;;  %v6360_v37 = vmul.f32 %v21216_v36, %v6322_v0  ;;  %v6735_v10 = vrot.slane %v21582_v9, 1  ;;  %v21716_v27 = vld [vmem:[#allocation2 + $0xb8] sm:$0x3] }
 0x42e   : > { %v6550_v13 = vmul.f32 %v6518_v24, %v6422_v46  ;;  %v6517_v44 = vadd.f32 1.0, %v17101_v62  ;;  %17110 = verf.f32 %v6460_v59  ;;  %v21701_v39 = vadd.f32 %v21231_v29, %v6357_v16  ;;  %v21705_v19 = vld [vmem:[#allocation2 + $0xf0] sm:$0xff]  ;;  %v21720_v14 = vld [vmem:[#allocation2 + $0xf8] sm:$0xff] }
 0x42f   : > { %16127 = vmatmul.mubr.msk.f32.gmra.mxu1 %vm493_vm4, %v21687_v21  ;;  %6579 = vst.msk [vmem:[#allocation2 + $0x109] sm:$0xff] %vm493_vm4, %v6547_v4  ;;  %v21709_v18 = vadd.f32 %v21231_v29, %v6360_v37  ;;  %v21712_v11 = vsel %vm608_vm2, %v6734_v22, %v6735_v10  ;;  %v6737_v46 = vrot.slane %v21692_v50, 1  ;;  %v6321_v0 = vadd.f32 %v6282_v47, %v21384_v45 }
 0x430   : > { %26268 = vst [vmem:[#allocation60_spill] sm:$0xff] %v21712_v11  ;;  %16129 = vmatprep.mubr.msk.f32.mxu1 %vm493_vm4, %v21705_v19  ;;  %v17103_v41 = vpop.eup %17102  ;;  %6582 = vst.msk [vmem:[#allocation2 + $0x129] sm:$0xff] %vm493_vm4, %v6550_v13  ;;  %v6549_v24 = vmul.f32 %v6517_v44, %v6421_v40  ;;  %v6459_v59 = vmul.f32 0.70710677, %v21701_v39  ;;  %16067 = vmatprep.mubr.msk.f32.mxu0 %vm493_vm4, %v21712_v11  ;;  %v6739_v22 = vrot.slane %v21623_v31, 1  ;;  %v6424_v45 = vmul.f32 0.5, %v21586_v63 }
 0x431   : > { %v6520_v16 = vadd.f32 1.0, %v17103_v41  ;;  %v6462_v47 = vmul.f32 0.70710677, %v21709_v18  ;;  %v21730_v62 = vsel %vm608_vm2, %v6735_v10, %v6737_v46  ;;  %v6359_v40 = vmul.f32 %v21216_v36, %v6321_v0  ;;  %v21738_v13 = vld [vmem:[#allocation2 + $0xd0] sm:$0x3] }
 0x432   : > { %26269 = vst [vmem:[#allocation74_spill] sm:$0xff] %v21730_v62  ;;  %6581 = vst.msk [vmem:[#allocation2 + $0x121] sm:$0xff] %vm493_vm4, %v6549_v24  ;;  %17112 = verf.f32 %v6459_v59  ;;  %16068 = vmatmul.mubr.msk.f32.gmra.mxu0 %vm493_vm4, %v21730_v62  ;;  %v6740_v4 = vrot.slane %v21625_v34, 1  ;;  %v6742_v37 = vrot.slane %v21716_v27, 1  ;;  %v6744_v10 = vrot.slane %v21641_v25, 1 }
 0x433   : > { %16130 = vmatmul.mubr.msk.f32.gmra.mxu1 %vm493_vm4, %v21720_v14  ;;  %v6552_v63 = vmul.f32 %v6520_v16, %v6424_v45  ;;  %17114 = verf.f32 %v6462_v47  ;;  %v6745_v44 = vrot.slane %v21654_v52, 1  ;;  %v21745_v46 = vadd.f32 %v21231_v29, %v6359_v40 }
 0x434   : > { %v21748_v36 = vsel %vm608_vm2, %v6739_v22, %v6740_v4  ;;  %v21751_v0 = vsel %vm608_vm2, %v6740_v4, %v6742_v37  ;;  %v6747_v59 = vrot.slane %v21738_v13, 1  ;;  %v6749_v29 = vrot.slane %v21685_v54, 1  ;;  %v21762_v22 = vld [vmem:[#allocation2 + $0xe8] sm:$0x3] }
 0x435   : > { %26270 = vst [vmem:[#allocation62_spill] sm:$0xff] %v21748_v36  ;;  %26271 = vst [vmem:[#allocation64_spill] sm:$0xff] %v21751_v0  ;;  %v17105_v41 = vpop.eup %17104  ;;  %16070 = vmatprep.mubr.msk.f32.mxu0 %vm493_vm4, %v21748_v36  ;;  %v21757_v24 = vsel %vm608_vm2, %v6744_v10, %v6745_v44  ;;  %v6750_v45 = vrot.slane %v21687_v21, 1  ;;  %v6423_v47 = vmul.f32 0.5, %v21617_v23  ;;  %v6461_v4 = vmul.f32 0.70710677, %v21745_v46 }
 0x436   : > { %6584 = vst.msk [vmem:[#allocation2 + $0x141] sm:$0xff] %vm493_vm4, %v6552_v63  ;;  %26272 = vst [vmem:[#allocation76_spill] sm:$0xff] %v21757_v24  ;;  %v17107_v16 = vpop.eup %17106  ;;  %v6519_v40 = vadd.f32 1.0, %v17105_v41  ;;  %16071 = vmatmul.mubr.msk.f32.gmra.mxu0 %vm493_vm4, %v21751_v0  ;;  %v21768_v37 = vld [vmem:[#allocation2 + $0x108] sm:$0xff]  ;;  %v21770_v63 = vld [vmem:[#allocation2 + $0x110] sm:$0xff]  ;;  %v6426_v10 = vmul.f32 0.5, %v21620_v38  ;;  %v21776_v62 = vsel %vm608_vm2, %v6745_v44, %v6747_v59 }
 0x437   : > { %v6522_v36 = vadd.f32 1.0, %v17107_v16  ;;  %16073 = vmatprep.mubr.msk.f32.mxu0 %vm493_vm4, %v21757_v24  ;;  %26273 = vst [vmem:[#allocation78_spill] sm:$0xff] %v21776_v62  ;;  %v21779_v23 = vsel %vm608_vm2, %v6749_v29, %v6750_v45  ;;  %16132 = vmatprep.mubr.msk.f32.mxu1 %vm493_vm4, %v21768_v37  ;;  %17116 = verf.f32 %v6461_v4  ;;  %v6754_v0 = vrot.slane %v21705_v19, 1 }
 0x438   : > { %v6551_v41 = vmul.f32 %v6519_v40, %v6423_v47  ;;  %v6755_v11 = vrot.slane %v21720_v14, 1  ;;  %16133 = vmatmul.mubr.msk.f32.gmra.mxu1 %vm493_vm4, %v21770_v63  ;;  %v6752_v16 = vrot.slane %v21762_v22, 1  ;;  %v21795_v47 = vld [vmem:[#allocation2 + $0x100] sm:$0x3]  ;;  %v6759_v17 = vrot.slane %v21768_v37, 1 }
 0x439   : > { %v6554_v38 = vmul.f32 %v6522_v36, %v6426_v10  ;;  %v21788_v44 = vld [vmem:[#allocation2 + $0x120] sm:$0xff]  ;;  %v21790_v59 = vld [vmem:[#allocation2 + $0x128] sm:$0xff]  ;;  %v6425_v36 = vmul.f32 0.5, %v21663_v6  ;;  %v6428_v10 = vmul.f32 0.5, %v21670_v48  ;;  %v6760_v60 = vrot.slane %v21770_v63, 1 }
 0x43a   : > { %26274 = vst [vmem:[#allocation96_spill] sm:$0xff] %v21790_v59  ;;  %v17109_v29 = vpop.eup %17108  ;;  %6583 = vst.msk [vmem:[#allocation2 + $0x139] sm:$0xff] %vm493_vm4, %v6551_v41  ;;  %16074 = vmatmul.mubr.msk.f32.gmra.mxu0 %vm493_vm4, %v21776_v62  ;;  %16135 = vmatprep.mubr.msk.f32.mxu1 %vm493_vm4, %v21788_v44  ;;  %v21805_v41 = vsel %vm608_vm2, %v6750_v45, %v6752_v16  ;;  %v21808_v24 = vsel %vm608_vm2, %v6754_v0, %v6755_v11  ;;  %v6757_v48 = vrot.slane %v21795_v47, 1  ;;  %v21817_v45 = vld [vmem:[#allocation2 + $0x118] sm:$0x3] }
 0x43b   : > { %v17111_v40 = vpop.eup %17110  ;;  %6586 = vst.msk [vmem:[#allocation2 + $0x159] sm:$0xff] %vm493_vm4, %v6554_v38  ;;  %v6521_v4 = vadd.f32 1.0, %v17109_v29  ;;  %16076 = vmatprep.mubr.msk.f32.mxu0 %vm493_vm4, %v21779_v23  ;;  %26275 = vst [vmem:[#allocation71_spill] sm:$0xff] %v21805_v41  ;;  %v6427_v0 = vmul.f32 0.5, %v21701_v39 }
 0x43c   : > { %v6524_v62 = vadd.f32 1.0, %v17111_v40  ;;  %26276 = vst [vmem:[#allocation65_spill] sm:$0xff] %v21808_v24  ;;  %16136 = vmatmul.mubr.msk.f32.gmra.mxu1 %vm493_vm4, %v21790_v59  ;;  %v21824_v29 = vsel %vm608_vm2, %v6755_v11, %v6757_v48 }
 0x43d   : > { %v6553_v6 = vmul.f32 %v6521_v4, %v6425_v36  ;;  %26277 = vst [vmem:[#allocation97_spill] sm:$0xff] %v21824_v29  ;;  %v21828_v36 = vsel %vm608_vm2, %v6759_v17, %v6760_v60  ;;  %v6764_v4 = vrot.slane %v21788_v44, 1 }
 0x43e   : > { %v6556_v38 = vmul.f32 %v6524_v62, %v6428_v10  ;;  %16077 = vmatmul.mubr.msk.f32.gmra.mxu0 %vm493_vm4, %v21805_v41  ;;  %26278 = vst [vmem:[#allocation67_spill] sm:$0xff] %v21828_v36  ;;  %v6765_v10 = vrot.slane %v21790_v59, 1  ;;  %v6762_v41 = vrot.slane %v21817_v45, 1 }
 0x43f   : > { %v17113_v16 = vpop.eup %17112  ;;  %6585 = vst.msk [vmem:[#allocation2 + $0x151] sm:$0xff] %vm493_vm4, %v6553_v6  ;;  %16079 = vmatprep.mubr.msk.f32.mxu0 %vm493_vm4, %v21808_v24  ;;  %v6430_v6 = vmul.f32 0.5, %v21709_v18 }
 0x440   : > { %v17115_v40 = vpop.eup %17114  ;;  %6588 = vst.msk [vmem:[#allocation2 + $0x171] sm:$0xff] %vm493_vm4, %v6556_v38  ;;  %v6523_v62 = vadd.f32 1.0, %v17113_v16  ;;  %v21840_v38 = vld [vmem:[#allocation2 + $0x130] sm:$0x3]  ;;  %v21847_v18 = vsel %vm608_vm2, %v6760_v60, %v6762_v41  ;;  %v21853_v16 = vsel %vm608_vm2, %v6764_v4, %v6765_v10  ;;  %v6429_v60 = vmul.f32 0.5, %v21745_v46 }
 0x441   : > { %v6526_v39 = vadd.f32 1.0, %v17115_v40  ;;  %v21834_v24 = vld [vmem:[#allocation2 + $0x138] sm:$0xff]  ;;  %v21836_v11 = vld [vmem:[#allocation2 + $0x140] sm:$0xff]  ;;  %26281 = vst [vmem:[#allocation9_spill] sm:$0xff] %v21847_v18  ;;  %26282 = vst [vmem:[#allocation82_spill] sm:$0xff] %v21853_v16 }
 0x442   : > { %26279 = vst [vmem:[#allocation86_spill] sm:$0xff] %v21834_v24  ;;  %26280 = vst [vmem:[#allocation80_spill] sm:$0xff] %v21836_v11  ;;  %v6555_v48 = vmul.f32 %v6523_v62, %v6427_v0  ;;  %16080 = vmatmul.mubr.msk.f32.gmra.mxu0 %vm493_vm4, %v21824_v29  ;;  %16138 = vmatprep.mubr.msk.f32.mxu1 %vm493_vm4, %v21834_v24  ;;  %v6769_v0 = vrot.slane %v21834_v24, 1  ;;  %v6770_v40 = vrot.slane %v21836_v11, 1 }
 0x443   : > { %v6558_v17 = vmul.f32 %v6526_v39, %v6430_v6  ;;  %16082 = vmatprep.mubr.msk.f32.mxu0 %vm493_vm4, %v21828_v36  ;;  %16139 = vmatmul.mubr.msk.f32.gmra.mxu1 %vm493_vm4, %v21836_v11  ;;  %v6767_v6 = vrot.slane %v21840_v38, 1  ;;  %v21862_v39 = vld [vmem:[#allocation2 + $0x148] sm:$0x3] }
 0x444   : > { %6587 = vst.msk [vmem:[#allocation2 + $0x169] sm:$0xff] %vm493_vm4, %v6555_v48  ;;  %v17117_v62 = vpop.eup %17116  ;;  %v6772_v29 = vrot.slane %v21862_v39, 1 }
 0x445   : > { %6590 = vst.msk [vmem:[#allocation2 + $0x189] sm:$0xff] %vm493_vm4, %v6558_v17  ;;  %v6525_v41 = vadd.f32 1.0, %v17117_v62  ;;  %v21871_v36 = vsel %vm608_vm2, %v6765_v10, %v6767_v6  ;;  %v21876_v17 = vsel %vm608_vm2, %v6769_v0, %v6770_v40  ;;  %v21886_v10 = vld [vmem:[#allocation2 + $0x160] sm:$0x3] }
 0x446   : > { %16083 = vmatmul.mubr.msk.f32.gmra.mxu0 %vm493_vm4, %v21847_v18  ;;  %v21864_v48 = vld [vmem:[#allocation2 + $0x150] sm:$0xff]  ;;  %v21866_v4 = vld [vmem:[#allocation2 + $0x158] sm:$0xff]  ;;  %26285 = vst [vmem:[#allocation84_spill] sm:$0xff] %v21871_v36  ;;  %26286 = vst [vmem:[#allocation81_spill] sm:$0xff] %v21876_v17  ;;  %v21891_v0 = vsel %vm608_vm2, %v6770_v40, %v6772_v29 }
 0x447   : > { %26283 = vst [vmem:[#allocation75_spill] sm:$0xff] %v21864_v48  ;;  %26284 = vst [vmem:[#allocation69_spill] sm:$0xff] %v21866_v4  ;;  %16085 = vmatprep.mubr.msk.f32.mxu0 %vm493_vm4, %v21853_v16  ;;  %16141 = vmatprep.mubr.msk.f32.mxu1 %vm493_vm4, %v21864_v48  ;;  %v6557_v46 = vmul.f32 %v6525_v41, %v6429_v60  ;;  %v6774_v62 = vrot.slane %v21864_v48, 1  ;;  %v6775_v18 = vrot.slane %v21866_v4, 1  ;;  %v6777_v16 = vrot.slane %v21886_v10, 1 }
 0x448   : > { %16142 = vmatmul.mubr.msk.f32.gmra.mxu1 %vm493_vm4, %v21866_v4  ;;  %v21911_v29 = vld [vmem:[#allocation2 + $0x178] sm:$0x3] }
 0x449   : > { %6589 = vst.msk [vmem:[#allocation2 + $0x181] sm:$0xff] %vm493_vm4, %v6557_v46  ;;  %v21898_v41 = vsel %vm608_vm2, %v6774_v62, %v6775_v18  ;;  %v21916_v40 = vsel %vm608_vm2, %v6775_v18, %v6777_v16  ;;  %v21937_v16 = vld [vmem:[%s25382_s7 + $0x38] sm:$0xff] }
 0x44a   : > { %16086 = vmatmul.mubr.msk.f32.gmra.mxu0 %vm493_vm4, %v21871_v36 }
 0x44b   : > { %16088 = vmatprep.mubr.msk.f32.mxu0 %vm493_vm4, %v21876_v17  ;;  %v21893_v6 = vld [vmem:[#allocation2 + $0x168] sm:$0xff]  ;;  %v21895_v60 = vld [vmem:[#allocation2 + $0x170] sm:$0xff]  ;;  %v6782_v17 = vrot.slane %v21911_v29, 1 }
 0x44c   : > { %16144 = vmatprep.mubr.msk.f32.mxu1 %vm493_vm4, %v21893_v6  ;;  %v6779_v46 = vrot.slane %v21893_v6, 1  ;;  %v6780_v36 = vrot.slane %v21895_v60, 1 }
 0x44d   : > { %16145 = vmatmul.mubr.msk.f32.gmra.mxu1 %vm493_vm4, %v21895_v60 }
 0x44e   : > { %16089 = vmatmul.mubr.msk.f32.gmra.mxu0 %vm493_vm4, %v21891_v0  ;;  %16199 = vmatprep.mubr.msk.f32.mxu1 %vm493_vm4, %v21427_v43  ;;  %v21919_v62 = vsel %vm608_vm2, %v6779_v46, %v6780_v36  ;;  %v21931_v18 = vsel %vm608_vm2, %v6780_v36, %v6782_v17  ;;  %v7367_v46 = vrot.slane %v21427_v43, 2  ;;  %v7368_v36 = vrot.slane %v21434_v20, 2  ;;  %v21955_v17 = vld [vmem:[%s25382_s7 + $0x30] sm:$0xff] }
 0x44f   : > { %16091 = vmatprep.mubr.msk.f32.mxu0 %vm493_vm4, %v21898_v41  ;;  %26287 = vst [vmem:[#allocation73_spill] sm:$0xff] %v21919_v62  ;;  %26288 = vst [vmem:[#allocation88_spill] sm:$0xff] %v21931_v18 }
 0x450   : > { %v21960_v43 = vsel %vm1275_vm3, %v7367_v46, %v7368_v36 }
 0x451   : > { %16200 = vmatmul.mubr.msk.f32.vlgmr.msra.gmra.mxu1 %vm493_vm4, %v21434_v20  ;;  %v7372_v20 = vrot.slane %v21455_v58, 2 }
 0x452   : > { %16092 = vmatmul.mubr.msk.f32.gmra.mxu0 %vm493_vm4, %v21916_v40  ;;  %16202 = vmatprep.mubr.msk.f32.mxu1 %vm493_vm4, %v21455_v58 }
 0x453   : > { %16094 = vmatprep.mubr.msk.f32.mxu0 %vm493_vm4, %v21919_v62  ;;  %16298 = vmatpush3.msra.mxu1 %v21502_v8  ;;  %v26289_v8 = vld [vmem:[#allocation53_spill] sm:$0xff]  ;;  %v26290_v62 = vld [vmem:[#allocation66_spill] sm:$0xff] }
 0x454   : > { %16397 = vmatprep.subr.mxu1 %v21937_v16 }
 0x455   : > { %16203 = vmatmul.mubr.msk.f32.gmra.mxu1 %vm493_vm4, %v21457_v56 }
 0x456   : > { %16095 = vmatmul.mubr.msk.f32.gmra.mxu0 %vm493_vm4, %v21931_v18  ;;  %16205 = vmatprep.mubr.msk.f32.mxu1 %vm493_vm4, %v21479_v35  ;;  %v7373_v18 = vrot.slane %v21457_v56, 2  ;;  %v7377_v56 = vrot.slane %v21479_v35, 2 }
 0x457   : > { %16149 = vmatprep.mubr.msk.f32.mxu0 %vm493_vm4, %v26289_v8  ;;  %v17262_v8 = vld [vmem:[%s25382_s7 + $0x20] sm:$0xff] }
 0x458   : > { %v21981_v58 = vsel %vm1275_vm3, %v7372_v20, %v7373_v18  ;;  %v7383_v20 = vrot.slane %v21510_v15, 2 }
 0x459   : > { %16206 = vmatmul.mubr.msk.f32.gmra.mxu1 %vm493_vm4, %v21481_v49 }
 0x45a   : > { %16150 = vmatmul.mubr.msk.f32.vlgmr.msra.gmra.mxu0 %vm493_vm4, %v26290_v62  ;;  %16208 = vmatprep.mubr.msk.f32.mxu1 %vm493_vm4, %v21508_v32  ;;  %v7370_v62 = vrot.slane %v21467_v28, 2  ;;  %v7375_v28 = vrot.slane %v21506_v3, 2  ;;  %v7380_v3 = vrot.slane %v21570_v51, 2  ;;  %v7385_v51 = vrot.slane %v21609_v30, 2 }
 0x45b   : > { %16248 = vmatpush3.msra.mxu0 %v17262_v8  ;;  %16152 = vmatprep.mubr.msk.f32.mxu0 %vm493_vm4, %v21960_v43  ;;  %v7378_v8 = vrot.slane %v21481_v49, 2  ;;  %v7382_v49 = vrot.slane %v21508_v32, 2 }
 0x45c   : > { %16347 = vmatprep.subr.mxu0 %v21955_v17  ;;  %v21974_v46 = vsel %vm1275_vm3, %v7368_v36, %v7370_v62  ;;  %v21991_v36 = vsel %vm1275_vm3, %v7373_v18, %v7375_v28  ;;  %v7388_v62 = vrot.slane %v21554_v61, 2 }
 0x45d   : > { %16209 = vmatmul.mubr.msk.f32.gmra.mxu1 %vm493_vm4, %v21510_v15  ;;  %v21998_v35 = vsel %vm1275_vm3, %v7377_v56, %v7378_v8  ;;  %v22008_v18 = vsel %vm1275_vm3, %v7378_v8, %v7380_v3  ;;  %v22015_v32 = vsel %vm1275_vm3, %v7382_v49, %v7383_v20  ;;  %v7387_v15 = vrot.slane %v21552_v7, 2 }
 0x45e   : > { %16153 = vmatmul.mubr.msk.f32.gmra.mxu0 %vm493_vm4, %v21974_v46  ;;  %16211 = vmatprep.mubr.msk.f32.mxu1 %vm493_vm4, %v21552_v7  ;;  %v22025_v56 = vsel %vm1275_vm3, %v7383_v20, %v7385_v51  ;;  %v7393_v49 = vrot.slane %v21582_v9, 2  ;;  %v7390_v20 = vrot.slane %v21632_v53, 2  ;;  %v7395_v53 = vrot.slane %v21692_v50, 2 }
 0x45f   : > { %16155 = vmatprep.mubr.msk.f32.mxu0 %vm493_vm4, %v21981_v58  ;;  %v22032_v7 = vsel %vm1275_vm3, %v7387_v15, %v7388_v62  ;;  %v7398_v15 = vrot.slane %v21625_v34, 2  ;;  %v7400_v50 = vrot.slane %v21716_v27, 2  ;;  %v7405_v27 = vrot.slane %v21738_v13, 2 }
 0x460   : > { %v22044_v3 = vsel %vm1275_vm3, %v7388_v62, %v7390_v20  ;;  %v22061_v62 = vsel %vm1275_vm3, %v7393_v49, %v7395_v53  ;;  %v7408_v20 = vrot.slane %v21687_v21, 2  ;;  %v7412_v53 = vrot.slane %v21705_v19, 2 }
 0x461   : > { %16212 = vmatmul.mubr.msk.f32.gmra.mxu1 %vm493_vm4, %v21554_v61  ;;  %v7392_v61 = vrot.slane %v21580_v33, 2  ;;  %26292 = vst [vmem:[#allocation90_spill] sm:$0xff] %v22061_v62  ;;  %v7410_v13 = vrot.slane %v21762_v22, 2  ;;  %v7415_v22 = vrot.slane %v21795_v47, 2  ;;  %v7420_v47 = vrot.slane %v21817_v45, 2 }
 0x462   : > { %16156 = vmatmul.mubr.msk.f32.gmra.mxu0 %vm493_vm4, %v21991_v36  ;;  %16214 = vmatprep.mubr.msk.f32.mxu1 %vm493_vm4, %v21580_v33  ;;  %v7425_v45 = vrot.slane %v21840_v38, 2  ;;  %v7430_v38 = vrot.slane %v21862_v39, 2 }
 0x463   : > { %16158 = vmatprep.mubr.msk.f32.mxu0 %vm493_vm4, %v21998_v35  ;;  %v22051_v33 = vsel %vm1275_vm3, %v7392_v61, %v7393_v49  ;;  %v7407_v49 = vrot.slane %v21685_v54, 2 }
 0x464   : > { %v16101_v8 = vpop.f32.mrf.mxu1 }
 0x465   : > { %16215 = vmatmul.mubr.msk.f32.gmra.mxu1 %vm493_vm4, %v21582_v9  ;;  %v7397_v9 = vrot.slane %v21623_v31, 2 }
 0x466   : > { %16159 = vmatmul.mubr.msk.f32.gmra.mxu0 %vm493_vm4, %v22008_v18  ;;  %16217 = vmatprep.mubr.msk.f32.mxu1 %vm493_vm4, %v21623_v31 }
 0x467   : > { %16161 = vmatprep.mubr.msk.f32.mxu0 %vm493_vm4, %v22015_v32  ;;  %v22068_v51 = vsel %vm1275_vm3, %v7397_v9, %v7398_v15 }
 0x468   : > { %v16051_v28 = vpop.f32.mrf.mxu0  ;;  %26293 = vst [vmem:[#allocation14_spill] sm:$0xff] %v22068_v51 }
 0x469   : > { %16218 = vmatmul.mubr.msk.f32.gmra.mxu1 %vm493_vm4, %v21625_v34  ;;  %v22038_v30 = vadd.f32 %v16101_v8, %v16051_v28  ;;  %v7402_v34 = vrot.slane %v21641_v25, 2  ;;  %v7403_v8 = vrot.slane %v21654_v52, 2  ;;  %v22078_v28 = vsel %vm1275_vm3, %v7398_v15, %v7400_v50 }
 0x46a   : > { %16162 = vmatmul.mubr.msk.f32.gmra.mxu0 %vm493_vm4, %v22025_v56  ;;  %16220 = vmatprep.mubr.msk.f32.mxu1 %vm493_vm4, %v21641_v25  ;;  %26294 = vst [vmem:[#allocation77_spill] sm:$0xff] %v22078_v28  ;;  %v22102_v15 = vsel %vm1275_vm3, %v7407_v49, %v7408_v20  ;;  %v7417_v49 = vrot.slane %v21768_v37, 2 }
 0x46b   : > { %26291 = vst [vmem:[#allocation87_spill] sm:$0xff] %v22038_v30  ;;  %16164 = vmatprep.mubr.msk.f32.mxu0 %vm493_vm4, %v22032_v7  ;;  %v22085_v61 = vsel %vm1275_vm3, %v7402_v34, %v7403_v8  ;;  %v22095_v9 = vsel %vm1275_vm3, %v7403_v8, %v7405_v27  ;;  %26297 = vst [vmem:[#allocation83_spill] sm:$0xff] %v22102_v15  ;;  %v7413_v34 = vrot.slane %v21720_v14, 2  ;;  %v7418_v27 = vrot.slane %v21770_v63, 2 }
 0x46c   : > { %26295 = vst [vmem:[#allocation91_spill] sm:$0xff] %v22085_v61  ;;  %26296 = vst [vmem:[#allocation79_spill] sm:$0xff] %v22095_v9  ;;  %v22112_v8 = vsel %vm1275_vm3, %v7408_v20, %v7410_v13  ;;  %v7422_v13 = vrot.slane %v21788_v44, 2  ;;  %v7423_v30 = vrot.slane %v21790_v59, 2 }
 0x46d   : > { %16221 = vmatmul.mubr.msk.f32.gmra.mxu1 %vm493_vm4, %v21654_v52  ;;  %26298 = vst [vmem:[#allocation19_spill] sm:$0xff] %v22112_v8  ;;  %v22119_v50 = vsel %vm1275_vm3, %v7412_v53, %v7413_v34  ;;  %v22129_v20 = vsel %vm1275_vm3, %v7413_v34, %v7415_v22  ;;  %v22136_v53 = vsel %vm1275_vm3, %v7417_v49, %v7418_v27  ;;  %v7427_v22 = vrot.slane %v21834_v24, 2 }
 0x46e   : > { %16165 = vmatmul.mubr.msk.f32.gmra.mxu0 %vm493_vm4, %v22044_v3  ;;  %16223 = vmatprep.mubr.msk.f32.mxu1 %vm493_vm4, %v21685_v54  ;;  %26299 = vst [vmem:[#allocation22_spill] sm:$0xff] %v22119_v50  ;;  %26300 = vst [vmem:[#allocation93_spill] sm:$0xff] %v22129_v20  ;;  %v22146_v34 = vsel %vm1275_vm3, %v7418_v27, %v7420_v47  ;;  %v22153_v49 = vsel %vm1275_vm3, %v7422_v13, %v7423_v30  ;;  %v22167_v13 = vld [vmem:[#allocation2 + $0x180] sm:$0xff] }
 0x46f   : > { %16167 = vmatprep.mubr.msk.f32.mxu0 %vm493_vm4, %v22051_v33  ;;  %26301 = vst [vmem:[#allocation85_spill] sm:$0xff] %v22136_v53  ;;  %26302 = vst [vmem:[#allocation89_spill] sm:$0xff] %v22146_v34  ;;  %v22163_v27 = vsel %vm1275_vm3, %v7423_v30, %v7425_v45  ;;  %v22181_v30 = vld [vmem:[#allocation2 + $0x188] sm:$0xff] }
 0x470   : > { %26303 = vst [vmem:[#allocation8_spill] sm:$0xff] %v22153_v49  ;;  %26304 = vst [vmem:[#allocation95_spill] sm:$0xff] %v22163_v27 }
 0x471   : > { %16224 = vmatmul.mubr.msk.f32.gmra.mxu1 %vm493_vm4, %v21687_v21 }
 0x472   : > { %16168 = vmatmul.mubr.msk.f32.gmra.mxu0 %vm493_vm4, %v22061_v62  ;;  %16226 = vmatprep.mubr.msk.f32.mxu1 %vm493_vm4, %v21705_v19 }
 0x473   : > { %16170 = vmatprep.mubr.msk.f32.mxu0 %vm493_vm4, %v22068_v51 }
 0x475   : > { %16227 = vmatmul.mubr.msk.f32.gmra.mxu1 %vm493_vm4, %v21720_v14 }
 0x476   : > { %16171 = vmatmul.mubr.msk.f32.gmra.mxu0 %vm493_vm4, %v22078_v28  ;;  %16229 = vmatprep.mubr.msk.f32.mxu1 %vm493_vm4, %v21768_v37 }
 0x477   : > { %16173 = vmatprep.mubr.msk.f32.mxu0 %vm493_vm4, %v22085_v61 }
 0x479   : > { %16230 = vmatmul.mubr.msk.f32.gmra.mxu1 %vm493_vm4, %v21770_v63 }
 0x47a   : > { %16174 = vmatmul.mubr.msk.f32.gmra.mxu0 %vm493_vm4, %v22095_v9  ;;  %16232 = vmatprep.mubr.msk.f32.mxu1 %vm493_vm4, %v21788_v44 }
 0x47b   : > { %16176 = vmatprep.mubr.msk.f32.mxu0 %vm493_vm4, %v22102_v15 }
 0x47d   : > { %16233 = vmatmul.mubr.msk.f32.gmra.mxu1 %vm493_vm4, %v21790_v59  ;;  %v7428_v59 = vrot.slane %v21836_v11, 2 }
 0x47e   : > { %16177 = vmatmul.mubr.msk.f32.gmra.mxu0 %vm493_vm4, %v22112_v8  ;;  %16235 = vmatprep.mubr.msk.f32.mxu1 %vm493_vm4, %v21834_v24  ;;  %v7433_v24 = vrot.slane %v21866_v4, 2 }
 0x47f   : > { %16179 = vmatprep.mubr.msk.f32.mxu0 %vm493_vm4, %v22119_v50  ;;  %v22172_v47 = vsel %vm1275_vm3, %v7427_v22, %v7428_v59  ;;  %v22184_v45 = vsel %vm1275_vm3, %v7428_v59, %v7430_v38  ;;  %v7435_v59 = vrot.slane %v21886_v10, 2  ;;  %v7440_v10 = vrot.slane %v21911_v29, 2  ;;  %v26314_v29 = vld [vmem:[#allocation74_spill] sm:$0xff]  ;;  %v26319_v38 = vld [vmem:[#allocation71_spill] sm:$0xff] }
 0x480   : > { %26305 = vst [vmem:[#allocation92_spill] sm:$0xff] %v22172_v47  ;;  %26306 = vst [vmem:[#allocation28_spill] sm:$0xff] %v22184_v45 }
 0x481   : > { %16236 = vmatmul.mubr.msk.f32.gmra.mxu1 %vm493_vm4, %v21836_v11  ;;  %v7432_v11 = vrot.slane %v21864_v48, 2  ;;  %v22201_v39 = vsel %vm1275_vm3, %v7433_v24, %v7435_v59  ;;  %v26320_v59 = vld [vmem:[#allocation65_spill] sm:$0xff] }
 0x482   : > { %16180 = vmatmul.mubr.msk.f32.gmra.mxu0 %vm493_vm4, %v22129_v20  ;;  %16238 = vmatprep.mubr.msk.f32.mxu1 %vm493_vm4, %v21864_v48  ;;  %v7438_v48 = vrot.slane %v21895_v60, 2  ;;  %26308 = vst [vmem:[#allocation13_spill] sm:$0xff] %v22201_v39 }
 0x483   : > { %16182 = vmatprep.mubr.msk.f32.mxu0 %vm493_vm4, %v22136_v53  ;;  %v22191_v22 = vsel %vm1275_vm3, %v7432_v11, %v7433_v24 }
 0x484   : > { %26307 = vst [vmem:[#allocation34_spill] sm:$0xff] %v22191_v22  ;;  %v22217_v24 = vsel %vm1275_vm3, %v7438_v48, %v7440_v10  ;;  %v26321_v10 = vld [vmem:[#allocation97_spill] sm:$0xff] }
 0x485   : > { %16239 = vmatmul.mubr.msk.f32.gmra.mxu1 %vm493_vm4, %v21866_v4  ;;  %v7437_v4 = vrot.slane %v21893_v6, 2  ;;  %26310 = vst [vmem:[#allocation46_spill] sm:$0xff] %v22217_v24 }
 0x486   : > { %16183 = vmatmul.mubr.msk.f32.gmra.mxu0 %vm493_vm4, %v22146_v34  ;;  %16241 = vmatprep.mubr.msk.f32.mxu1 %vm493_vm4, %v21893_v6 }
 0x487   : > { %16185 = vmatprep.mubr.msk.f32.mxu0 %vm493_vm4, %v22153_v49  ;;  %v22208_v11 = vsel %vm1275_vm3, %v7437_v4, %v7438_v48  ;;  %v22232_v48 = vld [vmem:[%s25382_s7 + $0x40] sm:$0xff]  ;;  %v26313_v4 = vld [vmem:[#allocation60_spill] sm:$0xff] }
 0x488   : > { %26309 = vst [vmem:[#allocation98_spill] sm:$0xff] %v22208_v11 }
 0x489   : > { %16242 = vmatmul.mubr.msk.f32.gmra.mxu1 %vm493_vm4, %v21895_v60 }
 0x48a   : > { %16186 = vmatmul.mubr.msk.f32.gmra.mxu0 %vm493_vm4, %v22163_v27  ;;  %16244 = vmatprep.mubr.msk.f32.mxu1 %vm493_vm4, %v22167_v13 }
 0x48b   : > { %16188 = vmatprep.mubr.msk.f32.mxu0 %vm493_vm4, %v22172_v47 }
 0x48d   : > { %16245 = vmatmul.mubr.msk.f32.gmra.mxu1 %vm493_vm4, %v22181_v30 }
 0x48e   : > { %16189 = vmatmul.mubr.msk.f32.gmra.mxu0 %vm493_vm4, %v22184_v45  ;;  %16299 = vmatprep.mubr.msk.f32.mxu1 %vm493_vm4, %v21960_v43  ;;  %v26317_v43 = vld [vmem:[#allocation76_spill] sm:$0xff] }
 0x48f   : > { %16191 = vmatprep.mubr.msk.f32.mxu0 %vm493_vm4, %v22191_v22 }
 0x491   : > { %16300 = vmatmul.mubr.msk.f32.vlgmr.msra.gmra.mxu1 %vm493_vm4, %v21974_v46  ;;  %v26318_v46 = vld [vmem:[#allocation78_spill] sm:$0xff] }
 0x492   : > { %16192 = vmatmul.mubr.msk.f32.gmra.mxu0 %vm493_vm4, %v22201_v39  ;;  %16302 = vmatprep.mubr.msk.f32.mxu1 %vm493_vm4, %v21981_v58 }
 0x493   : > { %16194 = vmatprep.mubr.msk.f32.mxu0 %vm493_vm4, %v22208_v11  ;;  %16398 = vmatpush3.msra.mxu1 %v21937_v16  ;;  %v26315_v16 = vld [vmem:[#allocation62_spill] sm:$0xff] }
 0x495   : > { %16303 = vmatmul.mubr.msk.f32.gmra.mxu1 %vm493_vm4, %v21991_v36 }
 0x496   : > { %16195 = vmatmul.mubr.msk.f32.gmra.mxu0 %vm493_vm4, %v22217_v24  ;;  %16305 = vmatprep.mubr.msk.f32.mxu1 %vm493_vm4, %v21998_v35 }
 0x497   : > { %16249 = vmatprep.mubr.msk.f32.mxu0 %vm493_vm4, %v21516_v57  ;;  %v26311_v57 = vld [vmem:[#allocation70_spill] sm:$0xff] }
 0x499   : > { %16306 = vmatmul.mubr.msk.f32.gmra.mxu1 %vm493_vm4, %v22008_v18 }
 0x49a   : > { %16250 = vmatmul.mubr.msk.f32.vlgmr.msra.gmra.mxu0 %vm493_vm4, %v21524_v2  ;;  %16308 = vmatprep.mubr.msk.f32.mxu1 %vm493_vm4, %v22015_v32  ;;  %v26312_v2 = vld [vmem:[#allocation63_spill] sm:$0xff] }
 0x49b   : > { %16348 = vmatpush3.msra.mxu0 %v21955_v17  ;;  %16252 = vmatprep.mubr.msk.f32.mxu0 %vm493_vm4, %v21542_v1  ;;  %v26316_v17 = vld [vmem:[#allocation64_spill] sm:$0xff] }
 0x49c   : > { %16447 = vmatprep.subr.mxu0 %v22232_v48 }
 0x49d   : > { %16309 = vmatmul.mubr.msk.f32.gmra.mxu1 %vm493_vm4, %v22025_v56 }
 0x49e   : > { %16253 = vmatmul.mubr.msk.f32.gmra.mxu0 %vm493_vm4, %v21548_v42  ;;  %16311 = vmatprep.mubr.msk.f32.mxu1 %vm493_vm4, %v22032_v7 }
 0x49f   : > { %16255 = vmatprep.mubr.msk.f32.mxu0 %vm493_vm4, %v21599_v26 }
 0x4a1   : > { %16312 = vmatmul.mubr.msk.f32.gmra.mxu1 %vm493_vm4, %v22044_v3 }
 0x4a2   : > { %16256 = vmatmul.mubr.msk.f32.gmra.mxu0 %vm493_vm4, %v21605_v55  ;;  %16314 = vmatprep.mubr.msk.f32.mxu1 %vm493_vm4, %v22051_v33 }
 0x4a3   : > { %16258 = vmatprep.mubr.msk.f32.mxu0 %vm493_vm4, %v21646_v5 }
 0x4a5   : > { %16315 = vmatmul.mubr.msk.f32.gmra.mxu1 %vm493_vm4, %v22061_v62 }
 0x4a6   : > { %16259 = vmatmul.mubr.msk.f32.gmra.mxu0 %vm493_vm4, %v21649_v12  ;;  %16317 = vmatprep.mubr.msk.f32.mxu1 %vm493_vm4, %v22068_v51 }
 0x4a7   : > { %16261 = vmatprep.mubr.msk.f32.mxu0 %vm493_vm4, %v26311_v57 }
 0x4a9   : > { %16318 = vmatmul.mubr.msk.f32.gmra.mxu1 %vm493_vm4, %v22078_v28 }
 0x4aa   : > { %16262 = vmatmul.mubr.msk.f32.gmra.mxu0 %vm493_vm4, %v26312_v2  ;;  %16320 = vmatprep.mubr.msk.f32.mxu1 %vm493_vm4, %v22085_v61 }
 0x4ab   : > { %16264 = vmatprep.mubr.msk.f32.mxu0 %vm493_vm4, %v26313_v4 }
 0x4ad   : > { %16321 = vmatmul.mubr.msk.f32.gmra.mxu1 %vm493_vm4, %v22095_v9 }
 0x4ae   : > { %16265 = vmatmul.mubr.msk.f32.gmra.mxu0 %vm493_vm4, %v26314_v29  ;;  %16323 = vmatprep.mubr.msk.f32.mxu1 %vm493_vm4, %v22102_v15 }
 0x4af   : > { %16267 = vmatprep.mubr.msk.f32.mxu0 %vm493_vm4, %v26315_v16 }
 0x4b1   : > { %16324 = vmatmul.mubr.msk.f32.gmra.mxu1 %vm493_vm4, %v22112_v8 }
 0x4b2   : > { %16268 = vmatmul.mubr.msk.f32.gmra.mxu0 %vm493_vm4, %v26316_v17  ;;  %16326 = vmatprep.mubr.msk.f32.mxu1 %vm493_vm4, %v22119_v50  ;;  %v22332_v50 = vpop.f32.mrf.mxu1 }
 0x4b3   : > { %16270 = vmatprep.mubr.msk.f32.mxu0 %vm493_vm4, %v26317_v43  ;;  %26327 = vst [vmem:[#allocation38_spill] sm:$0xff] %v22332_v50 }
 0x4b5   : > { %16327 = vmatmul.mubr.msk.f32.gmra.mxu1 %vm493_vm4, %v22129_v20  ;;  %v26325_v20 = vld [vmem:[#allocation84_spill] sm:$0xff] }
 0x4b6   : > { %16271 = vmatmul.mubr.msk.f32.gmra.mxu0 %vm493_vm4, %v26318_v46  ;;  %16329 = vmatprep.mubr.msk.f32.mxu1 %vm493_vm4, %v22136_v53  ;;  %v26322_v53 = vld [vmem:[#allocation67_spill] sm:$0xff] }
 0x4b7   : > { %16273 = vmatprep.mubr.msk.f32.mxu0 %vm493_vm4, %v21779_v23 }
 0x4b9   : > { %16330 = vmatmul.mubr.msk.f32.gmra.mxu1 %vm493_vm4, %v22146_v34  ;;  %v26323_v34 = vld [vmem:[#allocation9_spill] sm:$0xff] }
 0x4ba   : > { %16274 = vmatmul.mubr.msk.f32.gmra.mxu0 %vm493_vm4, %v26319_v38  ;;  %16332 = vmatprep.mubr.msk.f32.mxu1 %vm493_vm4, %v22153_v49  ;;  %v26324_v49 = vld [vmem:[#allocation82_spill] sm:$0xff] }
 0x4bb   : > { %16276 = vmatprep.mubr.msk.f32.mxu0 %vm493_vm4, %v26320_v59 }
 0x4bd   : > { %16333 = vmatmul.mubr.msk.f32.gmra.mxu1 %vm493_vm4, %v22163_v27  ;;  %v8294_v27 = vrot.slane %v22181_v30, 2 }
 0x4be   : > { %16277 = vmatmul.mubr.msk.f32.gmra.mxu0 %vm493_vm4, %v26321_v10  ;;  %16335 = vmatprep.mubr.msk.f32.mxu1 %vm493_vm4, %v22172_v47  ;;  %v8293_v47 = vrot.slane %v22167_v13, 2 }
 0x4bf   : > { %16279 = vmatprep.mubr.msk.f32.mxu0 %vm493_vm4, %v26322_v53 }
 0x4c1   : > { %16336 = vmatmul.mubr.msk.f32.gmra.mxu1 %vm493_vm4, %v22184_v45  ;;  %v26326_v45 = vld [vmem:[#allocation81_spill] sm:$0xff] }
 0x4c2   : > { %16280 = vmatmul.mubr.msk.f32.gmra.mxu0 %vm493_vm4, %v26323_v34  ;;  %16338 = vmatprep.mubr.msk.f32.mxu1 %vm493_vm4, %v22191_v22  ;;  %v6641_v22 = vld [vmem:[#allocation2 + $0x190] sm:$0x3] }
 0x4c3   : > { %16282 = vmatprep.mubr.msk.f32.mxu0 %vm493_vm4, %v26324_v49  ;;  %v8296_v8 = vrot.slane %v6641_v22, 2 }
 0x4c5   : > { %16339 = vmatmul.mubr.msk.f32.gmra.mxu1 %vm493_vm4, %v22201_v39  ;;  %v22337_v39 = vsel %vm1275_vm3, %v8293_v47, %v8294_v27  ;;  %v22346_v15 = vsel %vm1275_vm3, %v8294_v27, %v8296_v8  ;;  %v8027_v47 = vrot.slane %v22167_v13, 1  ;;  %v26331_v8 = vld [vmem:[#allocation88_spill] sm:$0xff] }
 0x4c6   : > { %16283 = vmatmul.mubr.msk.f32.gmra.mxu0 %vm493_vm4, %v26325_v20  ;;  %16341 = vmatprep.mubr.msk.f32.mxu1 %vm493_vm4, %v22208_v11  ;;  %26328 = vst [vmem:[#allocation94_spill] sm:$0xff] %v22337_v39  ;;  %26329 = vst [vmem:[#allocation16_spill] sm:$0xff] %v22346_v15 }
 0x4c7   : > { %16285 = vmatprep.mubr.msk.f32.mxu0 %vm493_vm4, %v26326_v45 }
 0x4c9   : > { %16342 = vmatmul.mubr.msk.f32.gmra.mxu1 %vm493_vm4, %v22217_v24  ;;  %v8028_v24 = vrot.slane %v22181_v30, 1 }
 0x4ca   : > { %16286 = vmatmul.mubr.msk.f32.gmra.mxu0 %vm493_vm4, %v21891_v0  ;;  %16344 = vmatprep.mubr.msk.f32.mxu1 %vm493_vm4, %v22337_v39  ;;  %v26330_v39 = vld [vmem:[#allocation73_spill] sm:$0xff] }
 0x4cb   : > { %16288 = vmatprep.mubr.msk.f32.mxu0 %vm493_vm4, %v21898_v41  ;;  %v22363_v27 = vsel %vm608_vm2, %v8027_v47, %v8028_v24  ;;  %v17263_v47 = vld [vmem:[#allocation2 + $0x30] sm:$0xff] }
 0x4cc   : > { %v16104_v11 = vpop.f32.mrf.mxu1 }
 0x4cd   : > { %16345 = vmatmul.mubr.msk.f32.gmra.mxu1 %vm493_vm4, %v22346_v15 }
 0x4ce   : > { %v7213_v50 = vpop.f32.mrf.mxu1  ;;  %16289 = vmatmul.mubr.msk.f32.gmra.mxu0 %vm493_vm4, %v21916_v40  ;;  %16399 = vmatprep.mubr.msk.f32.mxu1 %vm493_vm4, %v21542_v1  ;;  %v8030_v1 = vrot.slane %v6641_v22, 1 }
 0x4cf   : > { %16291 = vmatprep.mubr.msk.f32.mxu0 %vm493_vm4, %v26330_v39 }
 0x4d0   : > { %v16107_v9 = vpop.f32.mrf.mxu1  ;;  %v22370_v28 = vsel %vm608_vm2, %v8028_v24, %v8030_v1 }
 0x4d1   : > { %16400 = vmatmul.mubr.msk.f32.vlgmr.msra.gmra.mxu1 %vm493_vm4, %v21548_v42  ;;  %v22376_v42 = vpop.f32.mrf.mxu0 }
 0x4d2   : > { %16292 = vmatmul.mubr.msk.f32.gmra.mxu0 %vm493_vm4, %v26331_v8  ;;  %16402 = vmatprep.mubr.msk.f32.mxu1 %vm493_vm4, %v21599_v26  ;;  %v7223_v15 = vpop.f32.mrf.mxu1  ;;  %26332 = vst [vmem:[#allocation7_spill] sm:$0xff] %v22376_v42 }
 0x4d3   : > { %16294 = vmatprep.mubr.msk.f32.mxu0 %vm493_vm4, %v22363_v27 }
 0x4d4   : > { %v16110_v61 = vpop.f32.mrf.mxu1 }
 0x4d5   : > { %16403 = vmatmul.mubr.msk.f32.gmra.mxu1 %vm493_vm4, %v21605_v55  ;;  %v17264_v55 = vld [vmem:[#allocation2 + $0x38] sm:$0xff] }
 0x4d6   : > { %16295 = vmatmul.mubr.msk.f32.gmra.mxu0 %vm493_vm4, %v22370_v28  ;;  %16405 = vmatprep.mubr.msk.f32.mxu1 %vm493_vm4, %v21646_v5  ;;  %v7233_v26 = vpop.f32.mrf.mxu1  ;;  %v17265_v5 = vld [vmem:[#allocation2 + $0x48] sm:$0xff] }
 0x4d7   : > { %16349 = vmatprep.mubr.msk.f32.mxu0 %vm493_vm4, %v17263_v47 }
 0x4d8   : > { %v16054_v22 = vpop.f32.mrf.mxu0  ;;  %v16113_v51 = vpop.f32.mrf.mxu1 }
 0x4d9   : > { %v22381_v62 = vadd.f32 %v16104_v11, %v16054_v22  ;;  %16406 = vmatmul.mubr.msk.f32.gmra.mxu1 %vm493_vm4, %v21649_v12  ;;  %v17266_v12 = vld [vmem:[#allocation2 + $0x50] sm:$0xff] }
 0x4da   : > { %16350 = vmatmul.mubr.msk.f32.vlgmr.msra.gmra.mxu0 %vm493_vm4, %v17264_v55  ;;  %v6924_v24 = vpop.f32.mrf.mxu0  ;;  %16408 = vmatprep.mubr.msk.f32.mxu1 %vm493_vm4, %v26311_v57  ;;  %v7243_v1 = vpop.f32.mrf.mxu1  ;;  %v17267_v57 = vld [vmem:[#allocation2 + $0x60] sm:$0xff] }
 0x4db   : > { %16448 = vmatpush3.msra.mxu0 %v22232_v48  ;;  %16352 = vmatprep.mubr.msk.f32.mxu0 %vm493_vm4, %v17265_v5  ;;  %v22390_v47 = vadd.f32 %v7213_v50, %v6924_v24  ;;  %v17269_v5 = vld [vmem:[#allocation2 + $0x78] sm:$0xff] }
 0x4dc   : > { %v16057_v11 = vpop.f32.mrf.mxu0 }
 0x4dd   : > { %v16116_v22 = vpop.f32.mrf.mxu1  ;;  %v22392_v42 = vadd.f32 %v16107_v9, %v16057_v11  ;;  %16409 = vmatmul.mubr.msk.f32.gmra.mxu1 %vm493_vm4, %v26312_v2  ;;  %v17268_v9 = vld [vmem:[#allocation2 + $0x68] sm:$0xff] }
 0x4de   : > { %16353 = vmatmul.mubr.msk.f32.gmra.mxu0 %vm493_vm4, %v17266_v12  ;;  %v6934_v55 = vpop.f32.mrf.mxu0  ;;  %16411 = vmatprep.mubr.msk.f32.mxu1 %vm493_vm4, %v26313_v4 }
 0x4df   : > { %v7253_v48 = vpop.f32.mrf.mxu1  ;;  %16355 = vmatprep.mubr.msk.f32.mxu0 %vm493_vm4, %v17267_v57  ;;  %v22400_v50 = vadd.f32 %v7223_v15, %v6934_v55  ;;  %v17270_v15 = vld [vmem:[#allocation2 + $0x80] sm:$0xff]  ;;  %v17271_v55 = vld [vmem:[#allocation2 + $0x90] sm:$0xff] }
 0x4e1   : > { %v16119_v24 = vpop.f32.mrf.mxu1  ;;  %16412 = vmatmul.mubr.msk.f32.gmra.mxu1 %vm493_vm4, %v26314_v29 }
 0x4e2   : > { %16356 = vmatmul.mubr.msk.f32.gmra.mxu0 %vm493_vm4, %v17268_v9  ;;  %16414 = vmatprep.mubr.msk.f32.mxu1 %vm493_vm4, %v26315_v16 }
 0x4e3   : > { %v7263_v2 = vpop.f32.mrf.mxu1  ;;  %16358 = vmatprep.mubr.msk.f32.mxu0 %vm493_vm4, %v17269_v5  ;;  %v16060_v4 = vpop.f32.mrf.mxu0 }
 0x4e4   : > { %v22408_v11 = vadd.f32 %v16110_v61, %v16060_v4 }
 0x4e5   : > { %v6944_v12 = vpop.f32.mrf.mxu0  ;;  %16415 = vmatmul.mubr.msk.f32.gmra.mxu1 %vm493_vm4, %v26316_v17  ;;  %v17272_v17 = vld [vmem:[#allocation2 + $0x98] sm:$0xff] }
 0x4e6   : > { %16359 = vmatmul.mubr.msk.f32.gmra.mxu0 %vm493_vm4, %v17270_v15  ;;  %v22413_v29 = vadd.f32 %v7233_v26, %v6944_v12  ;;  %16417 = vmatprep.mubr.msk.f32.mxu1 %vm493_vm4, %v26317_v43 }
 0x4e7   : > { %v16122_v16 = vpop.f32.mrf.mxu1  ;;  %16361 = vmatprep.mubr.msk.f32.mxu0 %vm493_vm4, %v17271_v55 }
 0x4e9   : > { %v7273_v57 = vpop.f32.mrf.mxu1  ;;  %v16063_v9 = vpop.f32.mrf.mxu0  ;;  %16418 = vmatmul.mubr.msk.f32.gmra.mxu1 %vm493_vm4, %v26318_v46  ;;  %v17273_v46 = vld [vmem:[#allocation2 + $0xb0] sm:$0xff] }
 0x4ea   : > { %v22420_v61 = vadd.f32 %v16113_v51, %v16063_v9  ;;  %16362 = vmatmul.mubr.msk.f32.gmra.mxu0 %vm493_vm4, %v17272_v17  ;;  %16420 = vmatprep.mubr.msk.f32.mxu1 %vm493_vm4, %v21779_v23 }
 0x4eb   : > { %v16125_v26 = vpop.f32.mrf.mxu1  ;;  %16364 = vmatprep.mubr.msk.f32.mxu0 %vm493_vm4, %v21623_v31  ;;  %v6954_v43 = vpop.f32.mrf.mxu0 }
 0x4ec   : > { %v22427_v5 = vadd.f32 %v7243_v1, %v6954_v43  ;;  %v22514_v43 = vld [vmem:[#allocation2 + $0x1a8] sm:$0x3] }
 0x4ed   : > { %v22429_v4 = vpop.f32.mrf.mxu1  ;;  %v16066_v12 = vpop.f32.mrf.mxu0  ;;  %16421 = vmatmul.mubr.msk.f32.gmra.mxu1 %vm493_vm4, %v26319_v38 }
 0x4ee   : > { %v22433_v51 = vadd.f32 %v16116_v22, %v16066_v12  ;;  %16365 = vmatmul.mubr.msk.f32.gmra.mxu0 %vm493_vm4, %v17273_v46  ;;  %16423 = vmatprep.mubr.msk.f32.mxu1 %vm493_vm4, %v26320_v59  ;;  %v26335_v46 = vld [vmem:[#allocation80_spill] sm:$0xff] }
 0x4ef   : > { %v16128_v23 = vpop.f32.mrf.mxu1  ;;  %16367 = vmatprep.mubr.msk.f32.mxu0 %vm493_vm4, %v21641_v25  ;;  %v6964_v31 = vpop.f32.mrf.mxu0 }
 0x4f0   : > { %v22440_v1 = vadd.f32 %v7253_v48, %v6964_v31 }
 0x4f1   : > { %v22442_v15 = vpop.f32.mrf.mxu1  ;;  %16424 = vmatmul.mubr.msk.f32.gmra.mxu1 %vm493_vm4, %v26321_v10 }
 0x4f2   : > { %v16069_v38 = vpop.f32.mrf.mxu0  ;;  %16368 = vmatmul.mubr.msk.f32.gmra.mxu0 %vm493_vm4, %v21654_v52  ;;  %16426 = vmatprep.mubr.msk.f32.mxu1 %vm493_vm4, %v26322_v53 }
 0x4f3   : > { %v16131_v59 = vpop.f32.mrf.mxu1  ;;  %v22450_v22 = vadd.f32 %v16119_v24, %v16069_v38  ;;  %16370 = vmatprep.mubr.msk.f32.mxu0 %vm493_vm4, %v21685_v54  ;;  %v26336_v38 = vld [vmem:[#allocation75_spill] sm:$0xff] }
 0x4f4   : > { %v6974_v25 = vpop.f32.mrf.mxu0 }
 0x4f5   : > { %v22454_v48 = vpop.f32.mrf.mxu1  ;;  %v22456_v55 = vadd.f32 %v7263_v2, %v6974_v25  ;;  %16427 = vmatmul.mubr.msk.f32.gmra.mxu1 %vm493_vm4, %v26323_v34 }
 0x4f6   : > { %v16072_v10 = vpop.f32.mrf.mxu0  ;;  %16371 = vmatmul.mubr.msk.f32.gmra.mxu0 %vm493_vm4, %v21687_v21  ;;  %16429 = vmatprep.mubr.msk.f32.mxu1 %vm493_vm4, %v26324_v49 }
 0x4f7   : > { %v22464_v52 = vadd.f32 %v16122_v16, %v16072_v10  ;;  %16373 = vmatprep.mubr.msk.f32.mxu0 %vm493_vm4, %v21705_v19  ;;  %v22498_v16 = vld [vmem:[#allocation2 + $0x198] sm:$0xff] }
 0x4f8   : > { %v6984_v54 = vpop.f32.mrf.mxu0  ;;  %v16134_v53 = vpop.f32.mrf.mxu1  ;;  %v8823_v17 = vrot.slane %v22498_v16, 1 }
 0x4f9   : > { %v22468_v24 = vadd.f32 %v7273_v57, %v6984_v54  ;;  %16430 = vmatmul.mubr.msk.f32.gmra.mxu1 %vm493_vm4, %v26325_v20  ;;  %v22500_v57 = vld [vmem:[#allocation2 + $0x1a0] sm:$0xff] }
 0x4fa   : > { %v16075_v34 = vpop.f32.mrf.mxu0  ;;  %16374 = vmatmul.mubr.msk.f32.gmra.mxu0 %vm493_vm4, %v21720_v14  ;;  %16432 = vmatprep.mubr.msk.f32.mxu1 %vm493_vm4, %v26326_v45  ;;  %v22476_v21 = vpop.f32.mrf.mxu1  ;;  %v26337_v54 = vld [vmem:[#allocation69_spill] sm:$0xff] }
 0x4fb   : > { %v22478_v49 = vadd.f32 %v16125_v26, %v16075_v34  ;;  %16376 = vmatprep.mubr.msk.f32.mxu0 %vm493_vm4, %v21768_v37  ;;  %v8824_v26 = vrot.slane %v22500_v57, 1 }
 0x4fc   : > { %v22482_v19 = vpop.f32.mrf.mxu0  ;;  %v16137_v2 = vpop.f32.mrf.mxu1 }
 0x4fd   : > { %16433 = vmatmul.mubr.msk.f32.gmra.mxu1 %vm493_vm4, %v21891_v0  ;;  %v26333_v0 = vld [vmem:[#allocation96_spill] sm:$0xff] }
 0x4fe   : > { %v16078_v20 = vpop.f32.mrf.mxu0  ;;  %16377 = vmatmul.mubr.msk.f32.gmra.mxu0 %vm493_vm4, %v21770_v63  ;;  %16435 = vmatprep.mubr.msk.f32.mxu1 %vm493_vm4, %v21898_v41  ;;  %v22494_v45 = vpop.f32.mrf.mxu1 }
 0x4ff   : > { %v22490_v14 = vadd.f32 %v16128_v23, %v16078_v20  ;;  %16379 = vmatprep.mubr.msk.f32.mxu0 %vm493_vm4, %v21788_v44  ;;  %v26334_v44 = vld [vmem:[#allocation86_spill] sm:$0xff]  ;;  %v8826_v23 = vrot.slane %v22514_v43, 1 }
 0x500   : > { %v22496_v37 = vpop.f32.mrf.mxu0 }
 0x501   : > { %16436 = vmatmul.mubr.msk.f32.gmra.mxu1 %vm493_vm4, %v21916_v40 }
 0x502   : > { %v16081_v63 = vpop.f32.mrf.mxu0  ;;  %16380 = vmatmul.mubr.msk.f32.gmra.mxu0 %vm493_vm4, %v26333_v0  ;;  %16438 = vmatprep.mubr.msk.f32.mxu1 %vm493_vm4, %v26330_v39 }
 0x503   : > { %v22508_v41 = vadd.f32 %v16131_v59, %v16081_v63  ;;  %16382 = vmatprep.mubr.msk.f32.mxu0 %vm493_vm4, %v26334_v44  ;;  %v16140_v9 = vpop.f32.mrf.mxu1  ;;  %v8825_v59 = vsel %vm608_vm2, %v8823_v17, %v8824_v26 }
 0x504   : > { %v22516_v40 = vpop.f32.mrf.mxu0 }
 0x505   : > { %16439 = vmatmul.mubr.msk.f32.gmra.mxu1 %vm493_vm4, %v26331_v8  ;;  %v22520_v12 = vpop.f32.mrf.mxu1 }
 0x506   : > { %v16084_v39 = vpop.f32.mrf.mxu0  ;;  %16383 = vmatmul.mubr.msk.f32.gmra.mxu0 %vm493_vm4, %v26335_v46  ;;  %16441 = vmatprep.mubr.msk.f32.mxu1 %vm493_vm4, %v22363_v27 }
 0x507   : > { %v22527_v31 = vadd.f32 %v16134_v53, %v16084_v39  ;;  %16385 = vmatprep.mubr.msk.f32.mxu0 %vm493_vm4, %v26336_v38  ;;  %v8827_v53 = vsel %vm608_vm2, %v8824_v26, %v8826_v23 }
 0x508   : > { %v22532_v25 = vpop.f32.mrf.mxu0  ;;  %v16143_v8 = vpop.f32.mrf.mxu1 }
 0x509   : > { %16442 = vmatmul.mubr.msk.f32.gmra.mxu1 %vm493_vm4, %v22370_v28 }
 0x50a   : > { %v16087_v10 = vpop.f32.mrf.mxu0  ;;  %16386 = vmatmul.mubr.msk.f32.gmra.mxu0 %vm493_vm4, %v26337_v54  ;;  %v22538_v27 = vpop.f32.mrf.mxu1  ;;  %16444 = vmatprep.mubr.msk.f32.mxu1 %vm493_vm4, %v8825_v59 }
 0x50b   : > { %v22542_v34 = vadd.f32 %v16137_v2, %v16087_v10  ;;  %16388 = vmatprep.mubr.msk.f32.mxu0 %vm493_vm4, %v21893_v6 }
 0x50c   : > { %v22546_v20 = vpop.f32.mrf.mxu0 }
 0x50d   : > { %v16146_v63 = vpop.f32.mrf.mxu1  ;;  %16445 = vmatmul.mubr.msk.f32.gmra.mxu1 %vm493_vm4, %v8827_v53 }
 0x50e   : > { %v16090_v28 = vpop.f32.mrf.mxu0  ;;  %16389 = vmatmul.mubr.msk.f32.gmra.mxu0 %vm493_vm4, %v21895_v60 }
 0x50f   : > { %v22551_v0 = vadd.f32 %v16140_v9, %v16090_v28  ;;  %16391 = vmatprep.mubr.msk.f32.mxu0 %vm493_vm4, %v22167_v13  ;;  %v22555_v44 = vpop.f32.mrf.mxu1 }
 0x510   : > { %v22557_v2 = vpop.f32.mrf.mxu0 }
 0x511   : > { %v16201_v17 = vpop.f32.mrf.mxu1 }
 0x512   : > { %v16093_v6 = vpop.f32.mrf.mxu0  ;;  %16392 = vmatmul.mubr.msk.f32.gmra.mxu0 %vm493_vm4, %v22181_v30 }
 0x513   : > { %v22561_v26 = vadd.f32 %v16143_v8, %v16093_v6  ;;  %16394 = vmatprep.mubr.msk.f32.mxu0 %vm493_vm4, %v22498_v16  ;;  %v22565_v60 = vpop.f32.mrf.mxu1  ;;  %v26338_v8 = vld [vmem:[#allocation87_spill] sm:$0xff] }
 0x514   : > { %v22567_v9 = vpop.f32.mrf.mxu0 }
 0x515   : > { %v16204_v39 = vpop.f32.mrf.mxu1 }
 0x516   : > { %v16096_v13 = vpop.f32.mrf.mxu0  ;;  %16395 = vmatmul.mubr.msk.f32.gmra.mxu0 %vm493_vm4, %v22500_v57 }
 0x517   : > { %v22571_v46 = vadd.f32 %v16146_v63, %v16096_v13  ;;  %16449 = vmatprep.mubr.msk.f32.mxu0 %vm493_vm4, %v21981_v58  ;;  %v22575_v30 = vpop.f32.mrf.mxu1 }
 0x518   : > { %v22577_v23 = vpop.f32.mrf.mxu0 }
 0x519   : > { %v16207_v38 = vpop.f32.mrf.mxu1 }
 0x51a   : > { %v16151_v59 = vpop.f32.mrf.mxu0  ;;  %16450 = vmatmul.mubr.msk.f32.vlgmr.msra.gmra.mxu0 %vm493_vm4, %v21991_v36 }
 0x51b   : > { %v7732_v10 = vadd.f32 %v16151_v59, %v26338_v8  ;;  %16452 = vmatprep.mubr.msk.f32.mxu0 %vm493_vm4, %v21998_v35  ;;  %v22584_v54 = vpop.f32.mrf.mxu1 }
 0x51c   : > { %v22586_v53 = vpop.f32.mrf.mxu0 }
 0x51d   : > { %v16210_v63 = vpop.f32.mrf.mxu1  ;;  %v22588_v58 = vadd.f32 %v16201_v17, %v7732_v10 }
 0x51e   : > { %v16154_v28 = vpop.f32.mrf.mxu0  ;;  %16453 = vmatmul.mubr.msk.f32.gmra.mxu0 %vm493_vm4, %v22008_v18 }
 0x51f   : > { %v7734_v6 = vadd.f32 %v16154_v28, %v22381_v62  ;;  %16455 = vmatprep.mubr.msk.f32.mxu0 %vm493_vm4, %v22015_v32  ;;  %v22595_v36 = vpop.f32.mrf.mxu1 }
 0x520   : > { %v7582_v13 = vpop.f32.mrf.mxu0 }
 0x521   : > { %v22598_v35 = vadd.f32 %v7582_v13, %v22390_v47  ;;  %v16213_v59 = vpop.f32.mrf.mxu1  ;;  %v22600_v8 = vadd.f32 %v16204_v39, %v7734_v6 }
 0x522   : > { %v16157_v17 = vpop.f32.mrf.mxu0  ;;  %16456 = vmatmul.mubr.msk.f32.gmra.mxu0 %vm493_vm4, %v22025_v56 }
 0x523   : > { %v7736_v18 = vadd.f32 %v16157_v17, %v22392_v42  ;;  %16458 = vmatprep.mubr.msk.f32.mxu0 %vm493_vm4, %v22032_v7  ;;  %v22607_v62 = vpop.f32.mrf.mxu1  ;;  %v26341_v17 = vld [vmem:[#allocation90_spill] sm:$0xff] }
 0x524   : > { %26339 = vst [vmem:[#allocation15_spill] sm:$0xff] %v22607_v62  ;;  %v7592_v32 = vpop.f32.mrf.mxu0  ;;  %v26373_v62 = vld [vmem:[#allocation16_spill] sm:$0xff] }
 0x525   : > { %v22610_v10 = vadd.f32 %v7592_v32, %v22400_v50  ;;  %v16216_v47 = vpop.f32.mrf.mxu1  ;;  %v22612_v28 = vadd.f32 %v16207_v38, %v7736_v18  ;;  %v26342_v18 = vld [vmem:[#allocation14_spill] sm:$0xff] }
 0x526   : > { %v16160_v39 = vpop.f32.mrf.mxu0  ;;  %16459 = vmatmul.mubr.msk.f32.gmra.mxu0 %vm493_vm4, %v22044_v3 }
 0x527   : > { %v7738_v56 = vadd.f32 %v16160_v39, %v22408_v11  ;;  %16461 = vmatprep.mubr.msk.f32.mxu0 %vm493_vm4, %v22051_v33  ;;  %v22619_v42 = vpop.f32.mrf.mxu1 }
 0x528   : > { %26340 = vst [vmem:[#allocation30_spill] sm:$0xff] %v22619_v42  ;;  %v7602_v7 = vpop.f32.mrf.mxu0  ;;  %v26368_v42 = vld [vmem:[#allocation13_spill] sm:$0xff] }
 0x529   : > { %v22622_v6 = vadd.f32 %v7602_v7, %v22413_v29  ;;  %v16219_v50 = vpop.f32.mrf.mxu1  ;;  %v22624_v13 = vadd.f32 %v16210_v63, %v7738_v56  ;;  %v26344_v56 = vld [vmem:[#allocation77_spill] sm:$0xff] }
 0x52a   : > { %v16163_v38 = vpop.f32.mrf.mxu0  ;;  %16462 = vmatmul.mubr.msk.f32.gmra.mxu0 %vm493_vm4, %v26341_v17  ;;  %v26345_v17 = vld [vmem:[#allocation91_spill] sm:$0xff] }
 0x52b   : > { %v7740_v3 = vadd.f32 %v16163_v38, %v22420_v61  ;;  %16464 = vmatprep.mubr.msk.f32.mxu0 %vm493_vm4, %v26342_v18  ;;  %v22631_v11 = vpop.f32.mrf.mxu1 }
 0x52c   : > { %26343 = vst [vmem:[#allocation10_spill] sm:$0xff] %v22631_v11  ;;  %v7612_v33 = vpop.f32.mrf.mxu0  ;;  %v26349_v11 = vld [vmem:[#allocation83_spill] sm:$0xff] }
 0x52d   : > { %v22634_v32 = vadd.f32 %v7612_v33, %v22427_v5  ;;  %v16222_v29 = vpop.f32.mrf.mxu1  ;;  %v22636_v39 = vadd.f32 %v16213_v59, %v7740_v3  ;;  %v26348_v3 = vld [vmem:[#allocation79_spill] sm:$0xff] }
 0x52e   : > { %v16166_v63 = vpop.f32.mrf.mxu0  ;;  %16465 = vmatmul.mubr.msk.f32.gmra.mxu0 %vm493_vm4, %v26344_v56 }
 0x52f   : > { %v7742_v7 = vadd.f32 %v16166_v63, %v22433_v51  ;;  %16467 = vmatprep.mubr.msk.f32.mxu0 %vm493_vm4, %v26345_v17  ;;  %v22643_v61 = vpop.f32.mrf.mxu1 }
 0x530   : > { %26346 = vst [vmem:[#allocation11_spill] sm:$0xff] %v22643_v61  ;;  %v7622_v38 = vpop.f32.mrf.mxu0  ;;  %v26353_v61 = vld [vmem:[#allocation22_spill] sm:$0xff] }
 0x531   : > { %v22646_v18 = vadd.f32 %v7622_v38, %v22440_v1  ;;  %v16225_v5 = vpop.f32.mrf.mxu1  ;;  %v22648_v33 = vadd.f32 %v16216_v47, %v7742_v7  ;;  %v26352_v7 = vld [vmem:[#allocation19_spill] sm:$0xff] }
 0x532   : > { %v16169_v59 = vpop.f32.mrf.mxu0  ;;  %16468 = vmatmul.mubr.msk.f32.gmra.mxu0 %vm493_vm4, %v26348_v3 }
 0x533   : > { %26347 = vst [vmem:[#allocation27_spill] sm:$0xff] %v22646_v18  ;;  %v7744_v56 = vadd.f32 %v16169_v59, %v22450_v22  ;;  %16470 = vmatprep.mubr.msk.f32.mxu0 %vm493_vm4, %v26349_v11  ;;  %v22655_v51 = vpop.f32.mrf.mxu1  ;;  %v26371_v18 = vld [vmem:[#allocation46_spill] sm:$0xff] }
 0x534   : > { %26350 = vst [vmem:[#allocation33_spill] sm:$0xff] %v22655_v51  ;;  %v7632_v63 = vpop.f32.mrf.mxu0  ;;  %v26357_v51 = vld [vmem:[#allocation85_spill] sm:$0xff] }
 0x535   : > { %v22658_v17 = vadd.f32 %v7632_v63, %v22456_v55  ;;  %v16228_v1 = vpop.f32.mrf.mxu1  ;;  %v22660_v38 = vadd.f32 %v16219_v50, %v7744_v56  ;;  %v26356_v56 = vld [vmem:[#allocation93_spill] sm:$0xff] }
 0x536   : > { %v16172_v47 = vpop.f32.mrf.mxu0  ;;  %16471 = vmatmul.mubr.msk.f32.gmra.mxu0 %vm493_vm4, %v26352_v7 }
 0x537   : > { %26351 = vst [vmem:[#allocation17_spill] sm:$0xff] %v22658_v17  ;;  %v7746_v3 = vadd.f32 %v16172_v47, %v22464_v52  ;;  %16473 = vmatprep.mubr.msk.f32.mxu0 %vm493_vm4, %v26353_v61  ;;  %v22667_v22 = vpop.f32.mrf.mxu1 }
 0x538   : > { %26354 = vst [vmem:[#allocation37_spill] sm:$0xff] %v22667_v22  ;;  %v7642_v11 = vpop.f32.mrf.mxu0 }
 0x539   : > { %v22670_v59 = vadd.f32 %v7642_v11, %v22468_v24  ;;  %v16231_v55 = vpop.f32.mrf.mxu1  ;;  %v22672_v63 = vadd.f32 %v16222_v29, %v7746_v3  ;;  %v26359_v11 = vld [vmem:[#allocation89_spill] sm:$0xff]  ;;  %v26360_v3 = vld [vmem:[#allocation8_spill] sm:$0xff] }
 0x53a   : > { %v16175_v50 = vpop.f32.mrf.mxu0  ;;  %16474 = vmatmul.mubr.msk.f32.gmra.mxu0 %vm493_vm4, %v26356_v56 }
 0x53b   : > { %26355 = vst [vmem:[#allocation50_spill] sm:$0xff] %v22670_v59  ;;  %v7748_v7 = vadd.f32 %v16175_v50, %v22478_v49  ;;  %16476 = vmatprep.mubr.msk.f32.mxu0 %vm493_vm4, %v26357_v51  ;;  %v22679_v52 = vpop.f32.mrf.mxu1  ;;  %v9678_v51 = vld [vmem:[%s25385_s10 + $0x8] sm:$0xff] }
 0x53c   : > { %26358 = vst [vmem:[#allocation20_spill] sm:$0xff] %v22679_v52  ;;  %v22681_v61 = vpop.f32.mrf.mxu0  ;;  %16497 = vmatprep.subr.mxu1 %v9678_v51 }
 0x53d   : > { %v16234_v47 = vpop.f32.mrf.mxu1  ;;  %v22683_v22 = vadd.f32 %v16225_v5, %v7748_v7  ;;  %16498 = vmatpush3.msra.mxu1 %v9678_v51  ;;  %v26366_v51 = vld [vmem:[#allocation34_spill] sm:$0xff] }
 0x53e   : > { %v16178_v24 = vpop.f32.mrf.mxu0  ;;  %16477 = vmatmul.mubr.msk.f32.gmra.mxu0 %vm493_vm4, %v26359_v11  ;;  %v26362_v11 = vld [vmem:[#allocation95_spill] sm:$0xff] }
 0x53f   : > { %v7750_v29 = vadd.f32 %v16178_v24, %v22490_v14  ;;  %16479 = vmatprep.mubr.msk.f32.mxu0 %vm493_vm4, %v26360_v3  ;;  %v22690_v49 = vpop.f32.mrf.mxu1  ;;  %v26363_v24 = vld [vmem:[#allocation92_spill] sm:$0xff] }
 0x540   : > { %26361 = vst [vmem:[#allocation26_spill] sm:$0xff] %v22690_v49  ;;  %v22695_v50 = vpop.f32.mrf.mxu0 }
 0x541   : > { %v16237_v5 = vpop.f32.mrf.mxu1  ;;  %v22697_v56 = vadd.f32 %v16228_v1, %v7750_v29  ;;  %v26365_v1 = vld [vmem:[#allocation28_spill] sm:$0xff] }
 0x542   : > { %v16181_v7 = vpop.f32.mrf.mxu0  ;;  %16480 = vmatmul.mubr.msk.f32.gmra.mxu0 %vm493_vm4, %v26362_v11 }
 0x543   : > { %v7752_v14 = vadd.f32 %v16181_v7, %v22508_v41  ;;  %16482 = vmatprep.mubr.msk.f32.mxu0 %vm493_vm4, %v26363_v24  ;;  %v22704_v3 = vpop.f32.mrf.mxu1 }
 0x544   : > { %26364 = vst [vmem:[#allocation23_spill] sm:$0xff] %v22704_v3  ;;  %v22706_v49 = vpop.f32.mrf.mxu0 }
 0x545   : > { %v16240_v52 = vpop.f32.mrf.mxu1  ;;  %v22708_v59 = vadd.f32 %v16231_v55, %v7752_v14  ;;  %v26369_v14 = vld [vmem:[#allocation98_spill] sm:$0xff] }
 0x546   : > { %v16184_v17 = vpop.f32.mrf.mxu0  ;;  %16483 = vmatmul.mubr.msk.f32.gmra.mxu0 %vm493_vm4, %v26365_v1 }
 0x547   : > { %v7754_v29 = vadd.f32 %v16184_v17, %v22527_v31  ;;  %16485 = vmatprep.mubr.msk.f32.mxu0 %vm493_vm4, %v26366_v51  ;;  %v22715_v41 = vpop.f32.mrf.mxu1  ;;  %v9089_v17 = vrot.slane %v22498_v16, 2  ;;  %v9090_v51 = vrot.slane %v22500_v57, 2  ;;  %v9092_v16 = vrot.slane %v22514_v43, 2 }
 0x548   : > { %26367 = vst [vmem:[#allocation40_spill] sm:$0xff] %v22715_v41  ;;  %v22717_v7 = vpop.f32.mrf.mxu0 }
 0x549   : > { %v16243_v11 = vpop.f32.mrf.mxu1  ;;  %v22719_v24 = vadd.f32 %v16234_v47, %v7754_v29  ;;  %v9091_v57 = vsel %vm1275_vm3, %v9089_v17, %v9090_v51 }
 0x54a   : > { %v16187_v3 = vpop.f32.mrf.mxu0  ;;  %16486 = vmatmul.mubr.msk.f32.gmra.mxu0 %vm493_vm4, %v26368_v42  ;;  %v26372_v42 = vld [vmem:[#allocation94_spill] sm:$0xff] }
 0x54b   : > { %v7756_v55 = vadd.f32 %v16187_v3, %v22542_v34  ;;  %16488 = vmatprep.mubr.msk.f32.mxu0 %vm493_vm4, %v26369_v14  ;;  %v22726_v31 = vpop.f32.mrf.mxu1 }
 0x54c   : > { %26370 = vst [vmem:[#allocation54_spill] sm:$0xff] %v22726_v31  ;;  %v22729_v1 = vpop.f32.mrf.mxu0 }
 0x54d   : > { %v16246_v41 = vpop.f32.mrf.mxu1  ;;  %v22732_v47 = vadd.f32 %v16237_v5, %v7756_v55 }
 0x54e   : > { %v16190_v29 = vpop.f32.mrf.mxu0  ;;  %16489 = vmatmul.mubr.msk.f32.gmra.mxu0 %vm493_vm4, %v26371_v18  ;;  %v9093_v18 = vsel %vm1275_vm3, %v9090_v51, %v9092_v16 }
 0x54f   : > { %v7758_v34 = vadd.f32 %v16190_v29, %v22551_v0  ;;  %16491 = vmatprep.mubr.msk.f32.mxu0 %vm493_vm4, %v26372_v42  ;;  %v22739_v3 = vpop.f32.mrf.mxu1 }
 0x550   : > { %v22742_v14 = vpop.f32.mrf.mxu0 }
 0x551   : > { %v22745_v31 = vpop.f32.mrf.mxu1  ;;  %v22747_v5 = vadd.f32 %v16240_v52, %v7758_v34 }
 0x552   : > { %v16193_v55 = vpop.f32.mrf.mxu0  ;;  %16492 = vmatmul.mubr.msk.f32.gmra.mxu0 %vm493_vm4, %v26373_v62 }
 0x553   : > { %v7760_v0 = vadd.f32 %v16193_v55, %v22561_v26  ;;  %16494 = vmatprep.mubr.msk.f32.mxu0 %vm493_vm4, %v9091_v57  ;;  %v22754_v29 = vpop.f32.mrf.mxu1 }
 0x554   : > { %v22756_v43 = vpop.f32.mrf.mxu0 }
 0x555   : > { %v22758_v42 = vpop.f32.mrf.mxu1  ;;  %v22760_v17 = vadd.f32 %v16243_v11, %v7760_v0 }
 0x556   : > { %26374 = vst [vmem:[#allocation25_spill] sm:$0xff] %v22758_v42  ;;  %v16196_v52 = vpop.f32.mrf.mxu0  ;;  %16495 = vmatmul.mubr.msk.f32.gmra.mxu0 %vm493_vm4, %v9093_v18 }
 0x557   : > { %v7762_v34 = vadd.f32 %v16196_v52, %v22571_v46  ;;  %v22764_v62 = vpop.f32.mrf.mxu1 }
 0x558   : > { %26375 = vst [vmem:[#allocation31_spill] sm:$0xff] %v22764_v62  ;;  %v22766_v26 = vpop.f32.mrf.mxu0 }
 0x559   : > { %v22768_v57 = vpop.f32.mrf.mxu1  ;;  %v22770_v51 = vadd.f32 %v16246_v41, %v7762_v34 }
 0x55a   : > { %26376 = vst [vmem:[#allocation45_spill] sm:$0xff] %v22768_v57  ;;  %v16251_v16 = vpop.f32.mrf.mxu0 }
 0x55b   : > { %v22773_v55 = vadd.f32 %v16251_v16, %v22588_v58  ;;  %v22775_v42 = vpop.f32.mrf.mxu1 }
 0x55c   : > { %26377 = vst [vmem:[#allocation43_spill] sm:$0xff] %v22775_v42  ;;  %v22777_v11 = vpop.f32.mrf.mxu0 }
 0x55d   : > { %v22779_v0 = vpop.f32.mrf.mxu1 }
 0x55e   : > { %26378 = vst [vmem:[#allocation29_spill] sm:$0xff] %v22779_v0  ;;  %v16254_v18 = vpop.f32.mrf.mxu0 }
 0x55f   : > { %v22782_v46 = vadd.f32 %v16254_v18, %v22600_v8  ;;  %v22784_v52 = vpop.f32.mrf.mxu1 }
 0x560   : > { %26380 = vst [vmem:[#allocation58_spill] sm:$0xff] %v22784_v52  ;;  %v22786_v62 = vpop.f32.mrf.mxu0 }
 0x561   : > { %26379 = vst [vmem:[#allocation35_spill] sm:$0xff] %v22782_v46  ;;  %v22788_v41 = vpop.f32.mrf.mxu1 }
 0x562   : > { %26381 = vst [vmem:[#allocation12_spill] sm:$0xff] %v22788_v41  ;;  %v16257_v34 = vpop.f32.mrf.mxu0 }
 0x563   : > { %v22791_v58 = vadd.f32 %v16257_v34, %v22612_v28  ;;  %v22793_v16 = vpop.f32.mrf.mxu1 }
 0x564   : > { %26383 = vst [vmem:[#allocation49_spill] sm:$0xff] %v22793_v16  ;;  %v22795_v42 = vpop.f32.mrf.mxu0 }
 0x565   : > { %26382 = vst [vmem:[#allocation32_spill] sm:$0xff] %v22791_v58  ;;  %v22797_v57 = vpop.f32.mrf.mxu1 }
 0x566   : > { %26384 = vst [vmem:[#allocation48_spill] sm:$0xff] %v22797_v57  ;;  %v16260_v0 = vpop.f32.mrf.mxu0 }
 0x567   : > { %v22800_v8 = vadd.f32 %v16260_v0, %v22624_v13  ;;  %v22802_v18 = vpop.f32.mrf.mxu1 }
 0x568   : > { %26386 = vst [vmem:[#allocation21_spill] sm:$0xff] %v22802_v18  ;;  %v22804_v52 = vpop.f32.mrf.mxu0 }
 0x569   : > { %26385 = vst [vmem:[#allocation51_spill] sm:$0xff] %v22800_v8  ;;  %v22806_v46 = vpop.f32.mrf.mxu1 }
 0x56a   : > { %26387 = vst [vmem:[#allocation18_spill] sm:$0xff] %v22806_v46  ;;  %v16263_v41 = vpop.f32.mrf.mxu0 }
 0x56b   : > { %v22809_v28 = vadd.f32 %v16263_v41, %v22636_v39  ;;  %v22811_v34 = vpop.f32.mrf.mxu1 }
 0x56c   : > { %26389 = vst [vmem:[#allocation99_spill] sm:$0xff] %v22811_v34  ;;  %v22813_v16 = vpop.f32.mrf.mxu0 }
 0x56d   : > { %26388 = vst [vmem:[#allocation24_spill] sm:$0xff] %v22809_v28  ;;  %v22815_v58 = vpop.f32.mrf.mxu1 }
 0x56e   : > { %26390 = vst [vmem:[#allocation39_spill] sm:$0xff] %v22815_v58  ;;  %v16266_v57 = vpop.f32.mrf.mxu0 }
 0x56f   : > { %v22818_v13 = vadd.f32 %v16266_v57, %v22648_v33  ;;  %v22820_v0 = vpop.f32.mrf.mxu1 }
 0x570   : > { %26392 = vst [vmem:[#allocation42_spill] sm:$0xff] %v22820_v0  ;;  %v22822_v18 = vpop.f32.mrf.mxu0 }
 0x571   : > { %26391 = vst [vmem:[#allocation36_spill] sm:$0xff] %v22818_v13  ;;  %26393 = vst [vmem:[#allocation41_spill] sm:$0xff] %v22822_v18  ;;  %v22824_v8 = vpop.f32.mrf.mxu1 }
 0x572   : > { %26394 = vst [vmem:[#allocation56_spill] sm:$0xff] %v22824_v8  ;;  %v16269_v46 = vpop.f32.mrf.mxu0 }
 0x573   : > { %v22827_v39 = vadd.f32 %v16269_v46, %v22660_v38  ;;  %v22829_v41 = vpop.f32.mrf.mxu1 }
 0x574   : > { %26396 = vst [vmem:[#allocation47_spill] sm:$0xff] %v22829_v41  ;;  %v22831_v34 = vpop.f32.mrf.mxu0 }
 0x575   : > { %26395 = vst [vmem:[#allocation44_spill] sm:$0xff] %v22827_v39  ;;  %v22833_v28 = vpop.f32.mrf.mxu1 }
 0x576   : > { %26397 = vst [vmem:[#allocation52_spill] sm:$0xff] %v22833_v28  ;;  %v16272_v58 = vpop.f32.mrf.mxu0 }
 0x577   : > { %v22836_v33 = vadd.f32 %v16272_v58, %v22672_v63  ;;  %v22838_v57 = vpop.f32.mrf.mxu1 }
 0x578   : > { %26399 = vst [vmem:[#allocation55_spill] sm:$0xff] %v22838_v57  ;;  %v22840_v0 = vpop.f32.mrf.mxu0 }
 0x579   : > { %26398 = vst [vmem:[#allocation100_spill] sm:$0xff] %v22836_v33  ;;  %26400 = vst [vmem:[#allocation72_spill] sm:$0xff] %v22840_v0  ;;  %v16331_v13 = vpop.f32.mrf.mxu1 }
 0x57a   : > { %v16275_v8 = vpop.f32.mrf.mxu0 }
 0x57b   : > { %v22843_v18 = vadd.f32 %v16275_v8, %v22683_v22  ;;  %v22845_v38 = vpop.f32.mrf.mxu1 }
 0x57c   : > { %26402 = vst [vmem:[#allocation57_spill] sm:$0xff] %v22845_v38  ;;  %v22847_v46 = vpop.f32.mrf.mxu0 }
 0x57d   : > { %26401 = vst [vmem:[#allocation68_spill] sm:$0xff] %v22843_v18  ;;  %26403 = vst [vmem:[#allocation61_spill] sm:$0xff] %v22847_v46  ;;  %v22849_v41 = vpop.f32.mrf.mxu1 }
 0x57e   : > { %26404 = vst [vmem:[#allocation59_spill] sm:$0xff] %v22849_v41  ;;  %v16278_v28 = vpop.f32.mrf.mxu0 }
 0x57f   : > { %v22852_v39 = vadd.f32 %v16278_v28, %v22697_v56  ;;  %v22854_v63 = vpop.f32.mrf.mxu1 }
 0x580   : > { %26406 = vst [vmem:[#allocation66_spill] sm:$0xff] %v22854_v63  ;;  %v22856_v58 = vpop.f32.mrf.mxu0 }
 0x581   : > { %26405 = vst [vmem:[#allocation53_spill] sm:$0xff] %v22852_v39  ;;  %26407 = vst [vmem:[#allocation70_spill] sm:$0xff] %v22856_v58  ;;  %v16337_v57 = vpop.f32.mrf.mxu1 }
 0x582   : > { %v16281_v33 = vpop.f32.mrf.mxu0 }
 0x583   : > { %v8282_v0 = vadd.f32 %v16281_v33, %v22708_v59  ;;  %v22859_v22 = vpop.f32.mrf.mxu1 }
 0x584   : > { %26408 = vst [vmem:[#allocation63_spill] sm:$0xff] %v22859_v22  ;;  %v22861_v8 = vpop.f32.mrf.mxu0 }
 0x585   : > { %26409 = vst [vmem:[#allocation60_spill] sm:$0xff] %v22861_v8  ;;  %v16340_v38 = vpop.f32.mrf.mxu1  ;;  %v22863_v18 = vadd.f32 %v16331_v13, %v8282_v0 }
 0x586   : > { %v16284_v41 = vpop.f32.mrf.mxu0 }
 0x587   : > { %v22866_v46 = vadd.f32 %v16284_v41, %v22719_v24  ;;  %v22868_v56 = vpop.f32.mrf.mxu1 }
 0x588   : > { %26411 = vst [vmem:[#allocation62_spill] sm:$0xff] %v22868_v56  ;;  %v22870_v28 = vpop.f32.mrf.mxu0 }
 0x589   : > { %26410 = vst [vmem:[#allocation74_spill] sm:$0xff] %v22866_v46  ;;  %26412 = vst [vmem:[#allocation64_spill] sm:$0xff] %v22870_v28  ;;  %v16343_v63 = vpop.f32.mrf.mxu1 }
 0x58a   : > { %v16287_v39 = vpop.f32.mrf.mxu0 }
 0x58b   : > { %v8286_v58 = vadd.f32 %v16287_v39, %v22732_v47  ;;  %v22873_v59 = vpop.f32.mrf.mxu1 }
 0x58c   : > { %26413 = vst [vmem:[#allocation76_spill] sm:$0xff] %v22873_v59  ;;  %v22875_v33 = vpop.f32.mrf.mxu0 }
 0x58d   : > { %v16346_v22 = vpop.f32.mrf.mxu1  ;;  %v22877_v8 = vadd.f32 %v16337_v57, %v8286_v58 }
 0x58e   : > { %v16290_v13 = vpop.f32.mrf.mxu0 }
 0x58f   : > { %v8288_v0 = vadd.f32 %v16290_v13, %v22747_v5  ;;  %v22880_v24 = vpop.f32.mrf.mxu1 }
 0x590   : > { %26414 = vst [vmem:[#allocation78_spill] sm:$0xff] %v22880_v24  ;;  %v22882_v41 = vpop.f32.mrf.mxu0 }
 0x591   : > { %v22884_v56 = vpop.f32.mrf.mxu1  ;;  %v22886_v46 = vadd.f32 %v16340_v38, %v8288_v0  ;;  %v9677_v38 = vld [vmem:[%s25385_s10] sm:$0xff] }
 0x592   : > { %26415 = vst [vmem:[#allocation71_spill] sm:$0xff] %v22884_v56  ;;  %v16293_v28 = vpop.f32.mrf.mxu0  ;;  %v22903_v0 = vld [vmem:[#allocation2] sm:$0xff]  ;;  %16547 = vmatprep.subr.mxu0 %v9677_v38 }
 0x593   : > { %v8290_v47 = vadd.f32 %v16293_v28, %v22760_v17  ;;  %v22889_v39 = vpop.f32.mrf.mxu1  ;;  %v9736_v28 = vrot.slane %v22903_v0, 1  ;;  %16549 = vmatprep.mubr.msk.f32.mxu0 %vm493_vm4, %v22903_v0  ;;  %16548 = vmatpush3.msra.mxu0 %v9677_v38 }
 0x594   : > { %26416 = vst [vmem:[#allocation65_spill] sm:$0xff] %v22889_v39  ;;  %v22891_v59 = vpop.f32.mrf.mxu0 }
 0x595   : > { %26417 = vst [vmem:[#allocation97_spill] sm:$0xff] %v22891_v59  ;;  %v22893_v57 = vpop.f32.mrf.mxu1  ;;  %v22895_v58 = vadd.f32 %v16343_v63, %v8290_v47 }
 0x596   : > { %26418 = vst [vmem:[#allocation67_spill] sm:$0xff] %v22893_v57  ;;  %v16296_v5 = vpop.f32.mrf.mxu0 }
 0x597   : > { %v8292_v13 = vadd.f32 %v16296_v5, %v22770_v51  ;;  %v22898_v24 = vpop.f32.mrf.mxu1  ;;  %v22914_v51 = vld [vmem:[#allocation2 + $0x8] sm:$0xff]  ;;  %v22916_v5 = vld [vmem:[#allocation2 + $0x10] sm:$0x3] }
 0x598   : > { %26419 = vst [vmem:[#allocation9_spill] sm:$0xff] %v22898_v24  ;;  %v22905_v17 = vpop.f32.mrf.mxu0  ;;  %v9737_v57 = vrot.slane %v22914_v51, 1  ;;  %16550 = vmatmul.mubr.msk.f32.vlgmr.msra.gmra.mxu0 %vm493_vm4, %v22914_v51  ;;  %v9739_v39 = vrot.slane %v22916_v5, 1 }
 0x599   : > { %26420 = vst [vmem:[#allocation82_spill] sm:$0xff] %v22905_v17  ;;  %v22910_v63 = vpop.f32.mrf.mxu1  ;;  %v22912_v47 = vadd.f32 %v16346_v22, %v8292_v13 }
 0x59a   : > { %26421 = vst [vmem:[#allocation84_spill] sm:$0xff] %v22910_v63  ;;  %v22918_v24 = vpop.f32.mrf.mxu0  ;;  %v9679_v63 = vld [vmem:[%s25385_s10 + $0x10] sm:$0xff]  ;;  %v9738_v38 = vsel %vm608_vm2, %v9736_v28, %v9737_v57  ;;  %v9740_v56 = vsel %vm608_vm2, %v9737_v57, %v9739_v39 }
 0x59b   : > { %26422 = vst [vmem:[#allocation81_spill] sm:$0xff] %v22912_v47  ;;  %26423 = vst [vmem:[#allocation73_spill] sm:$0xff] %v22918_v24  ;;  %v22927_v22 = vpop.f32.mrf.mxu1  ;;  %16597 = vmatprep.subr.mxu1 %v9679_v63  ;;  %16499 = vmatprep.mubr.msk.f32.mxu1 %vm493_vm4, %v9738_v38 }
 0x59c   : > { %26424 = vst [vmem:[#allocation88_spill] sm:$0xff] %v22927_v22  ;;  %v22929_v13 = vpop.f32.mrf.mxu0  ;;  %16500 = vmatmul.mubr.msk.f32.vlgmr.msra.gmra.mxu1 %vm493_vm4, %v9740_v56 }
 0x59d   : > { %26425 = vst [vmem:[#allocation96_spill] sm:$0xff] %v22929_v13  ;;  %v22933_v47 = vpop.f32.mrf.mxu1  ;;  %16598 = vmatpush3.msra.mxu1 %v9679_v63 }
 0x59e   : > { %26426 = vst [vmem:[#allocation86_spill] sm:$0xff] %v22933_v47  ;;  %v22936_v17 = vpop.f32.mrf.mxu0 }
 0x59f   : > { %26427 = vst [vmem:[#allocation80_spill] sm:$0xff] %v22936_v17  ;;  %v22939_v24 = vpop.f32.mrf.mxu1 }
 0x5a0   : > { %26428 = vst [vmem:[#allocation75_spill] sm:$0xff] %v22939_v24  ;;  %v22941_v59 = vpop.f32.mrf.mxu0 }
 0x5a1   : > { %26429 = vst [vmem:[#allocation69_spill] sm:$0xff] %v22941_v59  ;;  %v22943_v22 = vpop.f32.mrf.mxu1 }
 0x5a2   : > { %26430 = vst [vmem:[#allocation87_spill] sm:$0xff] %v22943_v22  ;;  %v22945_v13 = vpop.f32.mrf.mxu0 }
 0x5a3   : > { %26431 = vst [vmem:[#allocation90_spill] sm:$0xff] %v22945_v13  ;;  %v22947_v28 = vpop.f32.mrf.mxu1 }
 0x5a4   : > { %26432 = vst [vmem:[#allocation14_spill] sm:$0xff] %v22947_v28  ;;  %v22949_v39 = vpop.f32.mrf.mxu0 }
 0x5a5   : > { %26433 = vst [vmem:[#allocation77_spill] sm:$0xff] %v22949_v39  ;;  %v22951_v57 = vpop.f32.mrf.mxu1 }
 0x5a6   : > { %26434 = vst [vmem:[#allocation91_spill] sm:$0xff] %v22951_v57  ;;  %v22953_v38 = vpop.f32.mrf.mxu0 }
 0x5a7   : > { %26435 = vst [vmem:[#allocation79_spill] sm:$0xff] %v22953_v38  ;;  %v22957_v56 = vpop.f32.mrf.mxu1 }
 0x5a8   : > { %v22955_v47 = vpop.f32.mrf.mxu0  ;;  %26437 = vst [vmem:[#allocation19_spill] sm:$0xff] %v22957_v56 }
 0x5a9   : > { %26436 = vst [vmem:[#allocation83_spill] sm:$0xff] %v22955_v47  ;;  %v22963_v59 = vpop.f32.mrf.mxu1 }
 0x5aa   : > { %v22959_v24 = vpop.f32.mrf.mxu0  ;;  %26440 = vst [vmem:[#allocation85_spill] sm:$0xff] %v22963_v59 }
 0x5ab   : > { %26438 = vst [vmem:[#allocation22_spill] sm:$0xff] %v22959_v24  ;;  %v22969_v28 = vpop.f32.mrf.mxu1 }
 0x5ac   : > { %v22961_v63 = vpop.f32.mrf.mxu0  ;;  %26443 = vst [vmem:[#allocation95_spill] sm:$0xff] %v22969_v28  ;;  %v26453_v28 = vld [vmem:[#allocation38_spill] sm:$0xff] }
 0x5ad   : > { %26439 = vst [vmem:[#allocation93_spill] sm:$0xff] %v22961_v63  ;;  %v22975_v38 = vpop.f32.mrf.mxu1 }
 0x5ae   : > { %v22965_v22 = vpop.f32.mrf.mxu0  ;;  %26446 = vst [vmem:[#allocation34_spill] sm:$0xff] %v22975_v38 }
 0x5af   : > { %26441 = vst [vmem:[#allocation89_spill] sm:$0xff] %v22965_v22  ;;  %v22981_v24 = vpop.f32.mrf.mxu1 }
 0x5b0   : > { %v22967_v13 = vpop.f32.mrf.mxu0  ;;  %26448 = vst [vmem:[#allocation98_spill] sm:$0xff] %v22981_v24  ;;  %v7284_v24 = vadd.f32 %v22429_v4, %v22482_v19  ;;  %v7344_v4 = vadd.f32 %v22538_v27, %v22567_v9 }
 0x5b1   : > { %26442 = vst [vmem:[#allocation8_spill] sm:$0xff] %v22967_v13  ;;  %v22987_v22 = vpop.f32.mrf.mxu1  ;;  %v26452_v13 = vld [vmem:[#allocation7_spill] sm:$0xff] }
 0x5b2   : > { %v22971_v39 = vpop.f32.mrf.mxu0  ;;  %26451 = vst [vmem:[#allocation16_spill] sm:$0xff] %v22987_v22  ;;  %v7204_v17 = vadd.f32 %v26453_v28, %v26452_v13  ;;  %v7304_v22 = vadd.f32 %v22454_v48, %v22516_v40  ;;  %v7314_v13 = vadd.f32 %v22476_v21, %v22532_v25  ;;  %v7334_v28 = vadd.f32 %v22520_v12, %v22557_v2 }
 0x5b3   : > { %26444 = vst [vmem:[#allocation92_spill] sm:$0xff] %v22971_v39  ;;  %v7747_v21 = vadd.f32 %v22681_v61, %v7284_v24  ;;  %v7996_v40 = vadd.f32 %v22575_v30, %v22598_v35  ;;  %v8000_v30 = vadd.f32 %v22595_v36, %v22622_v6  ;;  %v26461_v24 = vld [vmem:[#allocation33_spill] sm:$0xff] }
 0x5b4   : > { %v22973_v57 = vpop.f32.mrf.mxu0  ;;  %v7753_v25 = vadd.f32 %v22717_v7, %v7314_v13  ;;  %v26462_v6 = vld [vmem:[#allocation37_spill] sm:$0xff]  ;;  %v26464_v13 = vld [vmem:[#allocation26_spill] sm:$0xff] }
 0x5b5   : > { %26445 = vst [vmem:[#allocation28_spill] sm:$0xff] %v22973_v57  ;;  %v7731_v57 = vadd.f32 %v22586_v53, %v7204_v17  ;;  %v7324_v53 = vadd.f32 %v22494_v45, %v22546_v20  ;;  %v7757_v20 = vadd.f32 %v22742_v14, %v7334_v28  ;;  %v26458_v14 = vld [vmem:[#allocation10_spill] sm:$0xff]  ;;  %v8010_v36 = vadd.f32 %v26461_v24, %v7747_v21  ;;  %v26465_v28 = vld [vmem:[#allocation23_spill] sm:$0xff] }
 0x5b6   : > { %v22977_v47 = vpop.f32.mrf.mxu0 }
 0x5b7   : > { %26447 = vst [vmem:[#allocation13_spill] sm:$0xff] %v22977_v47  ;;  %v22996_v47 = vpop.f32.mrf.mxu1  ;;  %v7994_v48 = vadd.f32 %v22565_v60, %v7731_v57  ;;  %v7755_v27 = vadd.f32 %v22729_v1, %v7324_v53  ;;  %v7759_v60 = vadd.f32 %v22756_v43, %v7344_v4  ;;  %v26457_v1 = vld [vmem:[#allocation17_spill] sm:$0xff]  ;;  %v8016_v53 = vadd.f32 %v26464_v13, %v7753_v25  ;;  %v26482_v13 = vld [vmem:[#allocation58_spill] sm:$0xff] }
 0x5b8   : > { %v22979_v56 = vpop.f32.mrf.mxu0  ;;  %v8267_v25 = vadd.f32 %v22804_v52, %v8000_v30  ;;  %v9681_v52 = vld [vmem:[%s25385_s10 + $0x20] sm:$0xff] }
 0x5b9   : > { %v23025_v12 = vpop.f32.mrf.mxu1  ;;  %v8261_v61 = vadd.f32 %v22777_v11, %v7994_v48  ;;  %v8018_v4 = vadd.f32 %v26465_v28, %v7755_v27  ;;  %v8528_v27 = vadd.f32 %v22745_v31, %v22773_v55  ;;  %v10397_v31 = vrot.slane %v22916_v5, 2  ;;  %16697 = vmatprep.subr.mxu1 %v9681_v52  ;;  %v26489_v52 = vld [vmem:[#allocation48_spill] sm:$0xff] }
 0x5ba   : > { %v22983_v63 = vpop.f32.mrf.mxu0  ;;  %v8533_v28 = vadd.f32 %v26482_v13, %v8267_v25  ;;  %v26492_v25 = vld [vmem:[#allocation18_spill] sm:$0xff]  ;;  %v26496_v13 = vld [vmem:[#allocation64_spill] sm:$0xff] }
 0x5bb   : > { %26449 = vst [vmem:[#allocation46_spill] sm:$0xff] %v22983_v63  ;;  %v7294_v63 = vadd.f32 %v22442_v15, %v22496_v37  ;;  %v7354_v15 = vadd.f32 %v22555_v44, %v22577_v23  ;;  %v7751_v37 = vadd.f32 %v22706_v49, %v7304_v22  ;;  %v7998_v44 = vadd.f32 %v22584_v54, %v22610_v10  ;;  %v26454_v23 = vld [vmem:[#allocation15_spill] sm:$0xff]  ;;  %v26459_v10 = vld [vmem:[#allocation50_spill] sm:$0xff]  ;;  %v23053_v11 = vpop.f32.mrf.mxu1 }
 0x5bc   : > { %v22985_v59 = vpop.f32.mrf.mxu0  ;;  %v8002_v35 = vadd.f32 %v26454_v23, %v22634_v32  ;;  %v26455_v49 = vld [vmem:[#allocation27_spill] sm:$0xff]  ;;  %v8006_v54 = vadd.f32 %v26458_v14, %v26457_v1  ;;  %v26463_v32 = vld [vmem:[#allocation20_spill] sm:$0xff] }
 0x5bd   : > { %26450 = vst [vmem:[#allocation94_spill] sm:$0xff] %v22985_v59  ;;  %v7749_v45 = vadd.f32 %v22695_v50, %v7294_v63  ;;  %v7761_v9 = vadd.f32 %v22766_v26, %v7354_v15  ;;  %v26456_v50 = vld [vmem:[#allocation30_spill] sm:$0xff]  ;;  %v8263_v26 = vadd.f32 %v22786_v62, %v7996_v40  ;;  %v8014_v57 = vadd.f32 %v26463_v32, %v7751_v37  ;;  %v9680_v63 = vld [vmem:[%s25385_s10 + $0x18] sm:$0xff]  ;;  %v23079_v1 = vpop.f32.mrf.mxu1  ;;  %v26481_v32 = vld [vmem:[#allocation29_spill] sm:$0xff] }
 0x5be   : > { %v22991_v39 = vpop.f32.mrf.mxu0  ;;  %v8004_v7 = vadd.f32 %v26456_v50, %v26455_v49  ;;  %v26466_v15 = vld [vmem:[#allocation40_spill] sm:$0xff]  ;;  %v10394_v62 = vrot.slane %v22903_v0, 2  ;;  %16647 = vmatprep.subr.mxu0 %v9680_v63  ;;  %v8265_v21 = vadd.f32 %v22795_v42, %v7998_v44  ;;  %v10395_v0 = vrot.slane %v22914_v51, 2  ;;  %v26468_v44 = vld [vmem:[#allocation35_spill] sm:$0xff] }
 0x5bf   : > { %v8012_v22 = vadd.f32 %v26462_v6, %v7749_v45  ;;  %v8020_v48 = vadd.f32 %v26466_v15, %v7757_v20  ;;  %v26467_v45 = vld [vmem:[#allocation54_spill] sm:$0xff]  ;;  %v8024_v40 = vadd.f32 %v22739_v3, %v7761_v9  ;;  %16648 = vmatpush3.msra.mxu0 %v9680_v63  ;;  %v8527_v20 = vadd.f32 %v22754_v29, %v8261_v61  ;;  %v26470_v9 = vld [vmem:[#allocation31_spill] sm:$0xff]  ;;  %v26471_v29 = vld [vmem:[#allocation41_spill] sm:$0xff] }
 0x5c0   : > { %v22994_v38 = vpop.f32.mrf.mxu0  ;;  %v8022_v37 = vadd.f32 %v26467_v45, %v7759_v60  ;;  %v8269_v42 = vadd.f32 %v22813_v16, %v8002_v35  ;;  %v26469_v60 = vld [vmem:[#allocation25_spill] sm:$0xff]  ;;  %v8271_v55 = vadd.f32 %v26471_v29, %v8004_v7  ;;  %v8273_v30 = vadd.f32 %v22831_v34, %v8006_v54  ;;  %v26472_v51 = vld [vmem:[#allocation32_spill] sm:$0xff]  ;;  %v26480_v54 = vld [vmem:[#allocation51_spill] sm:$0xff] }
 0x5c1   : > { %v8530_v3 = vadd.f32 %v26469_v60, %v26468_v44  ;;  %v26473_v61 = vld [vmem:[#allocation45_spill] sm:$0xff]  ;;  %v23090_v14 = vsel %vm1275_vm3, %v10394_v62, %v10395_v0  ;;  %v23098_v5 = vsel %vm1275_vm3, %v10395_v0, %v10397_v31  ;;  %v8534_v63 = vadd.f32 %v26481_v32, %v26480_v54  ;;  %v26483_v15 = vld [vmem:[#allocation24_spill] sm:$0xff]  ;;  %v26495_v54 = vld [vmem:[#allocation39_spill] sm:$0xff] }
 0x5c2   : > { %v16381_v59 = vpop.f32.mrf.mxu0  ;;  %v8532_v16 = vadd.f32 %v26473_v61, %v26472_v51  ;;  %26474 = vst [vmem:[#allocation7_spill] sm:$0xff] %v23090_v14  ;;  %26478 = vst [vmem:[#allocation15_spill] sm:$0xff] %v23098_v5  ;;  %v26479_v7 = vld [vmem:[#allocation61_spill] sm:$0xff]  ;;  %v26486_v44 = vld [vmem:[#allocation60_spill] sm:$0xff] }
 0x5c3   : > { %v23009_v17 = vadd.f32 %v16381_v59, %v22863_v18  ;;  %v26460_v18 = vld [vmem:[#allocation11_spill] sm:$0xff]  ;;  %v8277_v34 = vadd.f32 %v26479_v7, %v8010_v36  ;;  %v26487_v60 = vld [vmem:[#allocation49_spill] sm:$0xff]  ;;  %v26488_v0 = vld [vmem:[#allocation36_spill] sm:$0xff]  ;;  %v23113_v36 = vpop.f32.mrf.mxu1 }
 0x5c4   : > { %v23018_v19 = vpop.f32.mrf.mxu0  ;;  %v8008_v59 = vadd.f32 %v26460_v18, %v26459_v10  ;;  %v26475_v10 = vld [vmem:[#allocation72_spill] sm:$0xff]  ;;  %v8538_v31 = vadd.f32 %v26489_v52, %v26488_v0  ;;  %v26490_v29 = vld [vmem:[#allocation21_spill] sm:$0xff]  ;;  %v8287_v0 = vadd.f32 %v22882_v41, %v8020_v48  ;;  %v26501_v52 = vld [vmem:[#allocation47_spill] sm:$0xff] }
 0x5c5   : > { %v8537_v51 = vadd.f32 %v26490_v29, %v8271_v55  ;;  %v26491_v61 = vld [vmem:[#allocation44_spill] sm:$0xff]  ;;  %v8285_v55 = vadd.f32 %v22875_v33, %v8018_v4  ;;  %v26502_v29 = vld [vmem:[#allocation53_spill] sm:$0xff]  ;;  %v26508_v41 = vld [vmem:[#allocation82_spill] sm:$0xff] }
 0x5c6   : > { %v23032_v2 = vpop.f32.mrf.mxu0  ;;  %v8275_v18 = vadd.f32 %v26475_v10, %v8008_v59  ;;  %v26485_v59 = vld [vmem:[#allocation70_spill] sm:$0xff]  ;;  %v26493_v10 = vld [vmem:[#allocation99_spill] sm:$0xff]  ;;  %v26494_v7 = vld [vmem:[#allocation100_spill] sm:$0xff]  ;;  %v8291_v4 = vadd.f32 %v26508_v41, %v8024_v40 }
 0x5c7   : > { %v8542_v32 = vadd.f32 %v26495_v54, %v26494_v7  ;;  %v26509_v48 = vld [vmem:[#allocation96_spill] sm:$0xff]  ;;  %v26518_v40 = vld [vmem:[#allocation77_spill] sm:$0xff] }
 0x5c8   : > { %v23047_v43 = vpop.f32.mrf.mxu0 }
 0x5ca   : > { %v16387_v23 = vpop.f32.mrf.mxu0 }
 0x5cb   : > { %v23066_v49 = vadd.f32 %v16387_v23, %v22877_v8  ;;  %v8529_v8 = vadd.f32 %v26470_v9, %v8263_v26  ;;  %v26476_v26 = vld [vmem:[#allocation43_spill] sm:$0xff]  ;;  %v26484_v23 = vld [vmem:[#allocation12_spill] sm:$0xff]  ;;  %v8535_v9 = vadd.f32 %v26487_v60, %v8269_v42 }
 0x5cc   : > { %v23072_v50 = vpop.f32.mrf.mxu0  ;;  %v8531_v24 = vadd.f32 %v26476_v26, %v8265_v21  ;;  %v8536_v62 = vadd.f32 %v26484_v23, %v26483_v15  ;;  %v8279_v21 = vadd.f32 %v26485_v59, %v8012_v22  ;;  %v8539_v26 = vadd.f32 %v26493_v10, %v8273_v30  ;;  %v26497_v15 = vld [vmem:[#allocation42_spill] sm:$0xff]  ;;  %v26498_v23 = vld [vmem:[#allocation68_spill] sm:$0xff] }
 0x5cd   : > { %v8541_v42 = vadd.f32 %v26497_v15, %v8275_v18  ;;  %v26499_v59 = vld [vmem:[#allocation56_spill] sm:$0xff]  ;;  %v8543_v30 = vadd.f32 %v26501_v52, %v8277_v34  ;;  %v26505_v18 = vld [vmem:[#allocation73_spill] sm:$0xff]  ;;  %v8790_v34 = vadd.f32 %v26509_v48, %v8527_v20  ;;  %v26511_v52 = vld [vmem:[#allocation74_spill] sm:$0xff] }
 0x5ce   : > { %v16390_v35 = vpop.f32.mrf.mxu0  ;;  %v8791_v54 = vadd.f32 %v26505_v18, %v8528_v27  ;;  %v26513_v27 = vld [vmem:[#allocation69_spill] sm:$0xff]  ;;  %v8794_v41 = vadd.f32 %v26518_v40, %v8531_v24  ;;  %v26519_v20 = vld [vmem:[#allocation79_spill] sm:$0xff] }
 0x5cf   : > { %v23095_v6 = vadd.f32 %v16390_v35, %v22886_v46  ;;  %v8281_v46 = vadd.f32 %v26486_v44, %v8014_v57  ;;  %v8540_v35 = vadd.f32 %v26492_v25, %v26491_v61  ;;  %v8283_v57 = vadd.f32 %v26496_v13, %v8016_v53  ;;  %v26503_v61 = vld [vmem:[#allocation52_spill] sm:$0xff]  ;;  %v26504_v53 = vld [vmem:[#allocation97_spill] sm:$0xff]  ;;  %v26506_v13 = vld [vmem:[#allocation55_spill] sm:$0xff] }
 0x5d0   : > { %v23106_v45 = vpop.f32.mrf.mxu0  ;;  %v8544_v44 = vadd.f32 %v26499_v59, %v26498_v23  ;;  %v8546_v25 = vadd.f32 %v26503_v61, %v26502_v29  ;;  %v8289_v7 = vadd.f32 %v26504_v53, %v8022_v37  ;;  %v23138_v15 = vadd.f32 %v26506_v13, %v8279_v21  ;;  %v26510_v23 = vld [vmem:[#allocation80_spill] sm:$0xff]  ;;  %v26512_v29 = vld [vmem:[#allocation59_spill] sm:$0xff]  ;;  %v26514_v21 = vld [vmem:[#allocation90_spill] sm:$0xff] }
 0x5d1   : > { %26477 = vst [vmem:[#allocation38_spill] sm:$0xff] %v23095_v6  ;;  %v8793_v59 = vadd.f32 %v26510_v23, %v8530_v3  ;;  %v23150_v61 = vadd.f32 %v26512_v29, %v26511_v52  ;;  %v8792_v53 = vadd.f32 %v26513_v27, %v8529_v8  ;;  %v8795_v18 = vadd.f32 %v26514_v21, %v8532_v16  ;;  %v26515_v13 = vld [vmem:[#allocation66_spill] sm:$0xff]  ;;  %v26520_v3 = vld [vmem:[#allocation63_spill] sm:$0xff] }
 0x5d2   : > { %v16393_v22 = vpop.f32.mrf.mxu0  ;;  %v23155_v5 = vadd.f32 %v26515_v13, %v8283_v57  ;;  %v8797_v48 = vadd.f32 %v26519_v20, %v8534_v63  ;;  %v23163_v23 = vadd.f32 %v26520_v3, %v8285_v55  ;;  %v26521_v52 = vld [vmem:[#allocation62_spill] sm:$0xff]  ;;  %v26523_v8 = vld [vmem:[#allocation83_spill] sm:$0xff]  ;;  %v26527_v63 = vld [vmem:[#allocation93_spill] sm:$0xff] }
 0x5d3   : > { %v23126_v60 = vadd.f32 %v16393_v22, %v22895_v58  ;;  %v23140_v58 = vpop.f32.mrf.mxu1  ;;  %v26507_v22 = vld [vmem:[#allocation57_spill] sm:$0xff]  ;;  %v23166_v29 = vadd.f32 %v26521_v52, %v8287_v0  ;;  %v8796_v16 = vadd.f32 %v26523_v8, %v8533_v28  ;;  %v26524_v27 = vld [vmem:[#allocation22_spill] sm:$0xff]  ;;  %v26526_v24 = vld [vmem:[#allocation71_spill] sm:$0xff]  ;;  %v8798_v40 = vadd.f32 %v26527_v63, %v8535_v9 }
 0x5d4   : > { %v23133_v10 = vpop.f32.mrf.mxu0  ;;  %v23143_v33 = vadd.f32 %v26507_v22, %v8281_v46  ;;  %v26516_v46 = vld [vmem:[#allocation81_spill] sm:$0xff]  ;;  %v8799_v57 = vadd.f32 %v26524_v27, %v8536_v62  ;;  %v26528_v55 = vld [vmem:[#allocation78_spill] sm:$0xff]  ;;  %v26531_v52 = vld [vmem:[#allocation67_spill] sm:$0xff] }
 0x5d5   : > { %26500 = vst [vmem:[#allocation27_spill] sm:$0xff] %v23126_v60  ;;  %v23172_v21 = vpop.f32.mrf.mxu1  ;;  %v23180_v20 = vadd.f32 %v26528_v55, %v8291_v4  ;;  %v23185_v0 = vld [vmem:[%s25383_s8] ss:$0 sm:$0xff]  ;;  %v9060_v8 = vadd.f32 %v26531_v52, %v8793_v59  ;;  %v26535_v63 = vld [vmem:[#allocation8_spill] sm:$0xff]  ;;  %v26538_v59 = vld [vmem:[#allocation86_spill] sm:$0xff] }
 0x5d6   : > { %v16396_v37 = vpop.f32.mrf.mxu0  ;;  %v26530_v3 = vld [vmem:[#allocation65_spill] sm:$0xff]  ;;  %v8800_v4 = vadd.f32 %v26535_v63, %v8537_v51  ;;  %v26536_v55 = vld [vmem:[#allocation92_spill] sm:$0xff]  ;;  %v9064_v52 = vadd.f32 %v26538_v59, %v8797_v48  ;;  %v26540_v51 = vld [vmem:[#allocation87_spill] sm:$0xff] }
 0x5d7   : > { %v23158_v22 = vadd.f32 %v16396_v37, %v26516_v46  ;;  %v26525_v37 = vld [vmem:[#allocation76_spill] sm:$0xff]  ;;  %v9058_v46 = vadd.f32 %v26526_v24, %v8791_v54  ;;  %26529 = vst [vmem:[#allocation10_spill] sm:$0xff] %v23180_v20  ;;  %v9057_v62 = vadd.f32 %v26530_v3, %v8790_v34  ;;  %v26532_v27 = vld [vmem:[#allocation89_spill] sm:$0xff] }
 0x5d8   : > { %v23168_v14 = vpop.f32.mrf.mxu0  ;;  %v23175_v13 = vadd.f32 %v26525_v37, %v8289_v7  ;;  %v8801_v7 = vadd.f32 %v26532_v27, %v8538_v31  ;;  %v26534_v24 = vld [vmem:[#allocation84_spill] sm:$0xff]  ;;  %v23197_v20 = vld [vmem:[%s25384_s9] ss:$0 sm:$0xff]  ;;  %v23201_v31 = vpop.f32.mrf.mxu1 }
 0x5d9   : > { %26517 = vst [vmem:[#allocation30_spill] sm:$0xff] %v23158_v22  ;;  %26522 = vst [vmem:[#allocation17_spill] sm:$0xff] %v23168_v14  ;;  %v26533_v22 = vld [vmem:[#allocation9_spill] sm:$0xff]  ;;  %v9062_v9 = vadd.f32 %v26534_v24, %v8795_v18  ;;  %v8803_v14 = vadd.f32 %v26536_v55, %v8540_v35  ;;  %v26537_v34 = vld [vmem:[#allocation88_spill] sm:$0xff]  ;;  %v8804_v55 = vadd.f32 %v22979_v56, %v8541_v42 }
 0x5da   : > { %v16451_v28 = vpop.f32.mrf.mxu0  ;;  %v9059_v54 = vadd.f32 %v26533_v22, %v8792_v53  ;;  %v9061_v3 = vadd.f32 %v26537_v34, %v8794_v41  ;;  %v26539_v18 = vld [vmem:[#allocation75_spill] sm:$0xff]  ;;  %v26541_v35 = vld [vmem:[#allocation28_spill] sm:$0xff]  ;;  %v26542_v24 = vld [vmem:[#allocation13_spill] sm:$0xff] }
 0x5db   : > { %v9324_v37 = vadd.f32 %v16451_v28, %v9058_v46  ;;  %v9063_v46 = vadd.f32 %v26539_v18, %v8796_v16  ;;  %v23206_v28 = vadd.f32 %v26540_v51, %v8799_v57  ;;  %v8802_v27 = vadd.f32 %v26541_v35, %v8539_v26  ;;  %v26543_v41 = vld [vmem:[#allocation14_spill] sm:$0xff]  ;;  %v26544_v16 = vld [vmem:[#allocation91_spill] sm:$0xff]  ;;  %v26548_v42 = vld [vmem:[#allocation85_spill] sm:$0xff]  ;;  %v9018_v35 = vpop.f32.mrf.mxu1 }
 0x5dc   : > { %v9164_v60 = vpop.f32.mrf.mxu0  ;;  %v8805_v63 = vadd.f32 %v26542_v24, %v8542_v32  ;;  %v23212_v34 = vadd.f32 %v26543_v41, %v8798_v40  ;;  %v26545_v57 = vld [vmem:[#allocation46_spill] sm:$0xff]  ;;  %v26547_v51 = vld [vmem:[#allocation19_spill] sm:$0xff]  ;;  %v23227_v40 = vadd.f32 %v26548_v42, %v8803_v14 }
 0x5dd   : > { %v9362_v53 = vmul.f32 %v23185_v0, %v9324_v37  ;;  %v9323_v22 = vadd.f32 %v9164_v60, %v9057_v62  ;;  %v23219_v37 = vadd.f32 %v26544_v16, %v8801_v7  ;;  %v8807_v59 = vadd.f32 %v26545_v57, %v8544_v44  ;;  %v26546_v26 = vld [vmem:[#allocation94_spill] sm:$0xff]  ;;  %v26552_v57 = vld [vmem:[#allocation16_spill] sm:$0xff] }
 0x5de   : > { %v16454_v6 = vpop.f32.mrf.mxu0  ;;  %v8806_v18 = vadd.f32 %v26546_v26, %v8543_v30  ;;  %v23224_v56 = vadd.f32 %v26547_v51, %v8800_v4  ;;  %v26549_v30 = vld [vmem:[#allocation95_spill] sm:$0xff]  ;;  %v26550_v4 = vld [vmem:[#allocation34_spill] sm:$0xff]  ;;  %v8810_v51 = vadd.f32 %v23018_v19, %v23143_v33 }
 0x5df   : > { %v23215_v48 = vadd.f32 %v23197_v20, %v9362_v53  ;;  %v9361_v60 = vmul.f32 %v23185_v0, %v9323_v22  ;;  %v9326_v62 = vadd.f32 %v16454_v6, %v9060_v8  ;;  %v8809_v53 = vadd.f32 %v22991_v39, %v8546_v25  ;;  %v26551_v14 = vld [vmem:[#allocation98_spill] sm:$0xff] }
 0x5e0   : > { %v9174_v32 = vpop.f32.mrf.mxu0  ;;  %v23236_v24 = vadd.f32 %v26549_v30, %v8802_v27  ;;  %v23239_v41 = vadd.f32 %v26550_v4, %v8805_v63  ;;  %v23242_v16 = vadd.f32 %v26551_v14, %v8804_v55  ;;  %v8808_v39 = vadd.f32 %v22994_v38, %v23138_v15  ;;  %v16440_v55 = vpop.f32.mrf.mxu1 }
 0x5e1   : > { %v9464_v22 = vmul.f32 0.70710677, %v23215_v48  ;;  %v23232_v6 = vadd.f32 %v23197_v20, %v9361_v60  ;;  %v9364_v8 = vmul.f32 %v23185_v0, %v9326_v62  ;;  %v9325_v44 = vadd.f32 %v9174_v32, %v9059_v54 }
 0x5e2   : > { %v16457_v7 = vpop.f32.mrf.mxu0  ;;  %v23252_v26 = vadd.f32 %v26552_v57, %v8807_v59  ;;  %v23255_v63 = vadd.f32 %v22996_v47, %v8806_v18  ;;  %v23259_v32 = vadd.f32 %v23025_v12, %v8809_v53  ;;  %v8812_v12 = vadd.f32 %v23047_v43, %v23155_v5 }
 0x5e3   : > { %17118 = verf.f32 %v9464_v22  ;;  %v9463_v25 = vmul.f32 0.70710677, %v23232_v6  ;;  %v23248_v60 = vadd.f32 %v23197_v20, %v9364_v8  ;;  %v9363_v54 = vmul.f32 %v23185_v0, %v9325_v44 }
 0x5e4   : > { %v9328_v62 = vadd.f32 %v16457_v7, %v9062_v9  ;;  %v9184_v27 = vpop.f32.mrf.mxu0  ;;  %v8813_v9 = vadd.f32 %v23032_v2, %v23150_v61  ;;  %v23281_v61 = vadd.f32 %v23079_v1, %v23009_v17  ;;  %v8814_v53 = vadd.f32 %v23072_v50, %v23163_v23 }
 0x5e5   : > { %17120 = verf.f32 %v9463_v25  ;;  %v9466_v38 = vmul.f32 0.70710677, %v23248_v60  ;;  %v9327_v15 = vadd.f32 %v9184_v27, %v9061_v3  ;;  %v23266_v59 = vadd.f32 %v23197_v20, %v9363_v54 }
 0x5e6   : > { %v9366_v47 = vmul.f32 %v23185_v0, %v9328_v62  ;;  %v16460_v18 = vpop.f32.mrf.mxu0  ;;  %v23271_v3 = vadd.f32 %v23053_v11, %v8808_v39  ;;  %v23291_v7 = vadd.f32 %v23113_v36, %v8810_v51  ;;  %v23294_v17 = vadd.f32 %v23140_v58, %v8813_v9  ;;  %v26553_v62 = vld [vmem:[#allocation38_spill] sm:$0xff] }
 0x5e7   : > { %17122 = verf.f32 %v9466_v38  ;;  %v9365_v42 = vmul.f32 %v23185_v0, %v9327_v15  ;;  %v9330_v22 = vadd.f32 %v16460_v18, %v9064_v52  ;;  %v9465_v19 = vmul.f32 0.70710677, %v23266_v59  ;;  %v9028_v52 = vpop.f32.mrf.mxu1  ;;  %v26554_v15 = vld [vmem:[#allocation27_spill] sm:$0xff] }
 0x5e8   : > { %v23277_v2 = vadd.f32 %v23197_v20, %v9366_v47  ;;  %v9194_v33 = vpop.f32.mrf.mxu0  ;;  %v8816_v50 = vadd.f32 %v23106_v45, %v23166_v29  ;;  %v23305_v36 = vadd.f32 %v23172_v21, %v8812_v12  ;;  %v23309_v58 = vadd.f32 %v23201_v31, %v23066_v49 }
 0x5e9   : > { %v23286_v11 = vadd.f32 %v23197_v20, %v9365_v42  ;;  %v9368_v8 = vmul.f32 %v23185_v0, %v9330_v22  ;;  %v9329_v43 = vadd.f32 %v9194_v33, %v9063_v46  ;;  %17124 = verf.f32 %v9465_v19  ;;  %v16443_v14 = vpop.f32.mrf.mxu1 }
 0x5ea   : > { %v9468_v5 = vmul.f32 0.70710677, %v23277_v2  ;;  %v16463_v44 = vpop.f32.mrf.mxu0  ;;  %v23315_v39 = vadd.f32 %v9018_v35, %v8814_v53  ;;  %v23322_v49 = vadd.f32 %v16440_v55, %v26553_v62  ;;  %v23326_v57 = vadd.f32 %v9028_v52, %v8816_v50 }
 0x5eb   : > { %v9467_v1 = vmul.f32 0.70710677, %v23286_v11  ;;  %v23300_v23 = vadd.f32 %v23197_v20, %v9368_v8  ;;  %v9367_v46 = vmul.f32 %v23185_v0, %v9329_v43  ;;  %v9332_v30 = vadd.f32 %v16463_v44, %v23206_v28  ;;  %v9038_v55 = vpop.f32.mrf.mxu1 }
 0x5ec   : > { %17126 = verf.f32 %v9468_v5  ;;  %v9204_v4 = vpop.f32.mrf.mxu0  ;;  %v8818_v28 = vadd.f32 %v23133_v10, %v23175_v13  ;;  %v9432_v38 = vmul.f32 0.5, %v23215_v48  ;;  %v23334_v51 = vadd.f32 %v16443_v14, %v26554_v15  ;;  %v26556_v5 = vld [vmem:[#allocation17_spill] sm:$0xff] }
 0x5ed   : > { %17128 = verf.f32 %v9467_v1  ;;  %v9470_v45 = vmul.f32 0.70710677, %v23300_v23  ;;  %v23313_v29 = vadd.f32 %v23197_v20, %v9367_v46  ;;  %v9370_v25 = vmul.f32 %v23185_v0, %v9332_v30 }
 0x5ee   : > { %v9331_v21 = vadd.f32 %v9204_v4, %v23212_v34  ;;  %v16466_v54 = vpop.f32.mrf.mxu0  ;;  %v9431_v42 = vmul.f32 0.5, %v23232_v6  ;;  %v23343_v19 = vadd.f32 %v9038_v55, %v8818_v28  ;;  %v16446_v6 = vpop.f32.mrf.mxu1  ;;  %v9434_v4 = vmul.f32 0.5, %v23248_v60 }
 0x5ef   : > { %17130 = verf.f32 %v9470_v45  ;;  %v9469_v31 = vmul.f32 0.70710677, %v23313_v29  ;;  %v9334_v27 = vadd.f32 %v16466_v54, %v23219_v37  ;;  %v23330_v10 = vadd.f32 %v23197_v20, %v9370_v25 }
 0x5f0   : > { %v17119_v35 = vpop.eup %17118  ;;  %v9369_v13 = vmul.f32 %v23185_v0, %v9331_v21  ;;  %v9214_v34 = vpop.f32.mrf.mxu0  ;;  %v9436_v55 = vmul.f32 0.5, %v23277_v2 }
 0x5f1   : > { %v9528_v9 = vadd.f32 1.0, %v17119_v35  ;;  %17132 = verf.f32 %v9469_v31  ;;  %v9372_v47 = vmul.f32 %v23185_v0, %v9334_v27  ;;  %v9333_v37 = vadd.f32 %v9214_v34, %v23224_v56  ;;  %v26555_v56 = vld [vmem:[#allocation10_spill] sm:$0xff] }
 0x5f2   : > { %v17121_v18 = vpop.eup %17120  ;;  %v9472_v48 = vmul.f32 0.70710677, %v23330_v10  ;;  %v23341_v22 = vadd.f32 %v23197_v20, %v9369_v13  ;;  %v16469_v12 = vpop.f32.mrf.mxu0  ;;  %v23351_v44 = vadd.f32 %v26556_v5, %v26555_v56  ;;  %v9433_v35 = vmul.f32 0.5, %v23266_v59 }
 0x5f3   : > { %v9560_v33 = vmul.f32 %v9528_v9, %v9432_v38  ;;  %v9527_v53 = vadd.f32 1.0, %v17121_v18  ;;  %v23346_v52 = vadd.f32 %v23197_v20, %v9372_v47  ;;  %v9371_v8 = vmul.f32 %v23185_v0, %v9333_v37 }
 0x5f4   : > { %v17123_v43 = vpop.eup %17122  ;;  %17134 = verf.f32 %v9472_v48  ;;  %v9471_v50 = vmul.f32 0.70710677, %v23341_v22  ;;  %v9336_v1 = vadd.f32 %v16469_v12, %v23227_v40  ;;  %v9224_v46 = vpop.f32.mrf.mxu0  ;;  %v26557_v40 = vld [vmem:[#allocation30_spill] sm:$0xff] }
 0x5f5   : > { %9592 = vst.msk [vmem:[#allocation2 + $0x21] sm:$0xff] %vm493_vm4, %v9560_v33  ;;  %v9559_v30 = vmul.f32 %v9527_v53, %v9431_v42  ;;  %v9530_v14 = vadd.f32 1.0, %v17123_v43  ;;  %v9474_v45 = vmul.f32 0.70710677, %v23346_v52  ;;  %v23359_v28 = vadd.f32 %v23197_v20, %v9371_v8 }
 0x5f6   : > { %17136 = verf.f32 %v9471_v50  ;;  %v9374_v25 = vmul.f32 %v23185_v0, %v9336_v1  ;;  %v9335_v21 = vadd.f32 %v9224_v46, %v23236_v24  ;;  %v16472_v54 = vpop.f32.mrf.mxu0  ;;  %v17125_v62 = vpop.eup %17124  ;;  %v23364_v31 = vadd.f32 %v16446_v6, %v26557_v40 }
 0x5f7   : > { %9591 = vst.msk [vmem:[#allocation2 + $0x19] sm:$0xff] %vm493_vm4, %v9559_v30  ;;  %v9562_v27 = vmul.f32 %v9530_v14, %v9434_v4  ;;  %17138 = verf.f32 %v9474_v45  ;;  %v9338_v60 = vadd.f32 %v16472_v54, %v23239_v41  ;;  %v9529_v38 = vadd.f32 1.0, %v17125_v62 }
 0x5f8   : > { %v9473_v13 = vmul.f32 0.70710677, %v23359_v28  ;;  %v23371_v34 = vadd.f32 %v23197_v20, %v9374_v25  ;;  %v9234_v24 = vpop.f32.mrf.mxu0  ;;  %v9373_v9 = vmul.f32 %v23185_v0, %v9335_v21  ;;  %v9435_v42 = vmul.f32 0.5, %v23286_v11 }
 0x5f9   : > { %v17127_v15 = vpop.eup %17126  ;;  %9594 = vst.msk [vmem:[#allocation2 + $0x39] sm:$0xff] %vm493_vm4, %v9562_v27  ;;  %v9376_v47 = vmul.f32 %v23185_v0, %v9338_v60  ;;  %v9337_v41 = vadd.f32 %v9234_v24, %v23242_v16  ;;  %v9561_v59 = vmul.f32 %v9529_v38, %v9433_v35  ;;  %v9438_v43 = vmul.f32 0.5, %v23300_v23 }
 0x5fa   : > { %v17129_v37 = vpop.eup %17128  ;;  %v9532_v18 = vadd.f32 1.0, %v17127_v15  ;;  %17140 = verf.f32 %v9473_v13  ;;  %v16475_v48 = vpop.f32.mrf.mxu0  ;;  %v9476_v33 = vmul.f32 0.70710677, %v23371_v34  ;;  %v23381_v53 = vadd.f32 %v23197_v20, %v9373_v9 }
 0x5fb   : > { %v9531_v12 = vadd.f32 1.0, %v17129_v37  ;;  %v23384_v2 = vadd.f32 %v23197_v20, %v9376_v47  ;;  %9593 = vst.msk [vmem:[#allocation2 + $0x31] sm:$0xff] %vm493_vm4, %v9561_v59  ;;  %v9375_v56 = vmul.f32 %v23185_v0, %v9337_v41  ;;  %v9340_v11 = vadd.f32 %v16475_v48, %v23252_v26 }
 0x5fc   : > { %v17131_v8 = vpop.eup %17130  ;;  %v9564_v16 = vmul.f32 %v9532_v18, %v9436_v55  ;;  %v9244_v5 = vpop.f32.mrf.mxu0  ;;  %v9437_v1 = vmul.f32 0.5, %v23313_v29  ;;  %17142 = verf.f32 %v9476_v33  ;;  %v9440_v30 = vmul.f32 0.5, %v23330_v10 }
 0x5fd   : > { %v9563_v6 = vmul.f32 %v9531_v12, %v9435_v42  ;;  %v9534_v50 = vadd.f32 1.0, %v17131_v8  ;;  %v9475_v4 = vmul.f32 0.70710677, %v23381_v53  ;;  %v9478_v14 = vmul.f32 0.70710677, %v23384_v2 }
 0x5fe   : > { %v17133_v46 = vpop.eup %17132  ;;  %9596 = vst.msk [vmem:[#allocation2 + $0x51] sm:$0xff] %vm493_vm4, %v9564_v16  ;;  %v23396_v23 = vadd.f32 %v23197_v20, %v9375_v56  ;;  %v16478_v45 = vpop.f32.mrf.mxu0  ;;  %v23398_v26 = vld [vmem:[#allocation2 + $0x18] sm:$0xff]  ;;  %v9378_v21 = vmul.f32 %v23185_v0, %v9340_v11  ;;  %v9339_v54 = vadd.f32 %v9244_v5, %v23255_v63  ;;  %v23405_v10 = vld [vmem:[#allocation2 + $0x20] sm:$0xff]  ;;  %v9439_v62 = vmul.f32 0.5, %v23341_v22 }
 0x5ff   : > { %9595 = vst.msk [vmem:[#allocation2 + $0x49] sm:$0xff] %vm493_vm4, %v9563_v6  ;;  %v9566_v25 = vmul.f32 %v9534_v50, %v9438_v43  ;;  %v9533_v29 = vadd.f32 1.0, %v17133_v46  ;;  %16552 = vmatprep.mubr.msk.f32.mxu0 %vm493_vm4, %v23398_v26  ;;  %17144 = verf.f32 %v9475_v4  ;;  %v9342_v27 = vadd.f32 %v16478_v45, %v23259_v32  ;;  %v23440_v43 = vld [vmem:[#allocation2 + $0x28] sm:$0x3] }
 0x600   : > { %v9477_v40 = vmul.f32 0.70710677, %v23396_v23  ;;  %v9254_v60 = vpop.f32.mrf.mxu0  ;;  %16553 = vmatmul.mubr.msk.f32.gmra.mxu0 %vm493_vm4, %v23405_v10  ;;  %17146 = verf.f32 %v9478_v14  ;;  %v23414_v38 = vadd.f32 %v23197_v20, %v9378_v21  ;;  %v9377_v13 = vmul.f32 %v23185_v0, %v9339_v54 }
 0x601   : > { %v17135_v35 = vpop.eup %17134  ;;  %9598 = vst.msk [vmem:[#allocation2 + $0x69] sm:$0xff] %vm493_vm4, %v9566_v25  ;;  %v9565_v63 = vmul.f32 %v9533_v29, %v9437_v1  ;;  %v9442_v24 = vmul.f32 0.5, %v23346_v52  ;;  %v9380_v32 = vmul.f32 %v23185_v0, %v9342_v27  ;;  %v9441_v9 = vmul.f32 0.5, %v23359_v28  ;;  %v23477_v27 = vld [vmem:[%s25385_s10 + $0x28] sm:$0xff] }
 0x602   : > { %v9536_v22 = vadd.f32 1.0, %v17135_v35  ;;  %17148 = verf.f32 %v9477_v40  ;;  %v16481_v15 = vpop.f32.mrf.mxu0  ;;  %v23422_v47 = vmul.f32 0.5, %v23371_v34  ;;  %v9480_v41 = vmul.f32 0.70710677, %v23414_v38  ;;  %v23428_v59 = vld [vmem:[#allocation2 + $0x30] sm:$0xff]  ;;  %v23430_v52 = vld [vmem:[#allocation2 + $0x38] sm:$0xff]  ;;  %16747 = vmatprep.subr.mxu0 %v23477_v27 }
 0x603   : > { %v17137_v55 = vpop.eup %17136  ;;  %9597 = vst.msk [vmem:[#allocation2 + $0x61] sm:$0xff] %vm493_vm4, %v9565_v63  ;;  %v23426_v37 = vadd.f32 %v23197_v20, %v9377_v13  ;;  %v23433_v12 = vadd.f32 %v23197_v20, %v9380_v32  ;;  %v9341_v28 = vadd.f32 %v9254_v60, %v23271_v3  ;;  %16555 = vmatprep.mubr.msk.f32.mxu0 %vm493_vm4, %v23428_v59  ;;  %v9741_v16 = vrot.slane %v23398_v26, 1  ;;  %v23470_v40 = vld [vmem:[#allocation2 + $0x40] sm:$0x3] }
 0x604   : > { %v17139_v18 = vpop.eup %17138  ;;  %v9568_v42 = vmul.f32 %v9536_v22, %v9440_v30  ;;  %v9535_v48 = vadd.f32 1.0, %v17137_v55  ;;  %v9264_v34 = vpop.f32.mrf.mxu0  ;;  %17150 = verf.f32 %v9480_v41  ;;  %16556 = vmatmul.mubr.msk.f32.gmra.mxu0 %vm493_vm4, %v23430_v52  ;;  %v23446_v3 = vmul.f32 0.5, %v23381_v53 }
 0x605   : > { %v9538_v33 = vadd.f32 1.0, %v17139_v18  ;;  %v9479_v8 = vmul.f32 0.70710677, %v23426_v37  ;;  %v9482_v11 = vmul.f32 0.70710677, %v23433_v12  ;;  %v9379_v5 = vmul.f32 %v23185_v0, %v9341_v28 }
 0x606   : > { %9600 = vst.msk [vmem:[#allocation2 + $0x81] sm:$0xff] %vm493_vm4, %v9568_v42  ;;  %v9567_v56 = vmul.f32 %v9535_v48, %v9439_v62  ;;  %v16484_v6 = vpop.f32.mrf.mxu0  ;;  %v23450_v50 = vld [vmem:[#allocation2 + $0x48] sm:$0xff]  ;;  %v23452_v1 = vld [vmem:[#allocation2 + $0x50] sm:$0xff]  ;;  %v9344_v4 = vadd.f32 %v16481_v15, %v23281_v61  ;;  %v9742_v14 = vrot.slane %v23405_v10, 1  ;;  %v9744_v25 = vrot.slane %v23440_v43, 1 }
 0x607   : > { %v17141_v46 = vpop.eup %17140  ;;  %v9570_v30 = vmul.f32 %v9538_v33, %v9442_v24  ;;  %17152 = verf.f32 %v9479_v8  ;;  %16558 = vmatprep.mubr.msk.f32.mxu0 %vm493_vm4, %v23450_v50  ;;  %v23460_v45 = vadd.f32 %v23197_v20, %v9379_v5  ;;  %v9343_v54 = vadd.f32 %v9264_v34, %v23291_v7 }
 0x608   : > { %9599 = vst.msk [vmem:[#allocation2 + $0x79] sm:$0xff] %vm493_vm4, %v9567_v56  ;;  %v9537_v53 = vadd.f32 1.0, %v17141_v46  ;;  %17154 = verf.f32 %v9482_v11  ;;  %v9274_v29 = vpop.f32.mrf.mxu0  ;;  %v9382_v21 = vmul.f32 %v23185_v0, %v9344_v4  ;;  %v23466_v61 = vsel %vm608_vm2, %v9741_v16, %v9742_v14  ;;  %16559 = vmatmul.mubr.msk.f32.gmra.mxu0 %vm493_vm4, %v23452_v1 }
 0x609   : > { %9602 = vst.msk [vmem:[#allocation2 + $0x99] sm:$0xff] %vm493_vm4, %v9570_v30  ;;  %v9346_v62 = vadd.f32 %v16484_v6, %v23294_v17  ;;  %v17143_v60 = vpop.eup %17142  ;;  %v9446_v63 = vmul.f32 0.5, %v23384_v2  ;;  %v9481_v13 = vmul.f32 0.70710677, %v23460_v45  ;;  %16502 = vmatprep.mubr.msk.f32.mxu1 %vm493_vm4, %v23466_v61  ;;  %v23484_v7 = vsel %vm608_vm2, %v9742_v14, %v9744_v25 }
 0x60a   : > { %v9569_v35 = vmul.f32 %v9537_v53, %v9441_v9  ;;  %v16487_v17 = vpop.f32.mrf.mxu0  ;;  %v23486_v22 = vld [vmem:[#allocation2 + $0x60] sm:$0xff]  ;;  %v23488_v24 = vld [vmem:[#allocation2 + $0x68] sm:$0xff]  ;;  %v9540_v32 = vadd.f32 1.0, %v17143_v60  ;;  %v23492_v15 = vadd.f32 %v23197_v20, %v9382_v21  ;;  %16503 = vmatmul.mubr.msk.f32.gmra.mxu1 %vm493_vm4, %v23484_v7  ;;  %v9381_v2 = vmul.f32 %v23185_v0, %v9343_v54 }
 0x60b   : > { %v9384_v55 = vmul.f32 %v23185_v0, %v9346_v62  ;;  %16561 = vmatprep.mubr.msk.f32.mxu0 %vm493_vm4, %v23486_v22  ;;  %17156 = verf.f32 %v9481_v13  ;;  %v9746_v9 = vrot.slane %v23428_v59, 1  ;;  %v9747_v41 = vrot.slane %v23430_v52, 1 }
 0x60c   : > { %9601 = vst.msk [vmem:[#allocation2 + $0x91] sm:$0xff] %vm493_vm4, %v9569_v35  ;;  %v9749_v18 = vrot.slane %v23470_v40, 1  ;;  %v9284_v42 = vpop.f32.mrf.mxu0  ;;  %v17145_v48 = vpop.eup %17144  ;;  %v9572_v28 = vmul.f32 %v9540_v32, %v23422_v47  ;;  %v9445_v34 = vmul.f32 0.5, %v23396_v23  ;;  %v9484_v33 = vmul.f32 0.70710677, %v23492_v15  ;;  %16562 = vmatmul.mubr.msk.f32.gmra.mxu0 %vm493_vm4, %v23488_v24 }
 0x60d   : > { %v23508_v8 = vadd.f32 %v23197_v20, %v9381_v2  ;;  %v17147_v16 = vpop.eup %17146  ;;  %v9539_v56 = vadd.f32 1.0, %v17145_v48  ;;  %v23513_v11 = vadd.f32 %v23197_v20, %v9384_v55  ;;  %v23516_v5 = vsel %vm608_vm2, %v9746_v9, %v9747_v41  ;;  %v23539_v32 = vld [vmem:[#allocation2 + $0x58] sm:$0x3] }
 0x60e   : > { %v23519_v47 = vsel %vm608_vm2, %v9747_v41, %v9749_v18  ;;  %v16490_v23 = vpop.f32.mrf.mxu0  ;;  %9604 = vst.msk [vmem:[#allocation2 + $0xb1] sm:$0xff] %vm493_vm4, %v9572_v28  ;;  %v9542_v46 = vadd.f32 1.0, %v17147_v16  ;;  %v9448_v30 = vmul.f32 0.5, %v23414_v38  ;;  %17158 = verf.f32 %v9484_v33  ;;  %16505 = vmatprep.mubr.msk.f32.mxu1 %vm493_vm4, %v23516_v5 }
 0x60f   : > { %v17149_v6 = vpop.eup %17148  ;;  %v9483_v4 = vmul.f32 0.70710677, %v23508_v8  ;;  %v23526_v14 = vld [vmem:[#allocation2 + $0x78] sm:$0xff]  ;;  %v23528_v53 = vld [vmem:[#allocation2 + $0x80] sm:$0xff]  ;;  %v9571_v25 = vmul.f32 %v9539_v56, %v23446_v3  ;;  %v9447_v54 = vmul.f32 0.5, %v23426_v37  ;;  %16506 = vmatmul.mubr.msk.f32.gmra.mxu1 %vm493_vm4, %v23519_v47  ;;  %v9345_v35 = vadd.f32 %v9274_v29, %v23305_v36 }
 0x610   : > { %v9541_v21 = vadd.f32 1.0, %v17149_v6  ;;  %v9486_v62 = vmul.f32 0.70710677, %v23513_v11  ;;  %16564 = vmatprep.mubr.msk.f32.mxu0 %vm493_vm4, %v23526_v14  ;;  %v9294_v38 = vpop.f32.mrf.mxu0  ;;  %v9574_v60 = vmul.f32 %v9542_v46, %v9446_v63  ;;  %v9348_v13 = vadd.f32 %v16487_v17, %v23309_v58 }
 0x611   : > { %17160 = verf.f32 %v9483_v4  ;;  %16565 = vmatmul.mubr.msk.f32.gmra.mxu0 %vm493_vm4, %v23528_v53  ;;  %v17151_v37 = vpop.eup %17150  ;;  %9603 = vst.msk [vmem:[#allocation2 + $0xa9] sm:$0xff] %vm493_vm4, %v9571_v25  ;;  %v9751_v2 = vrot.slane %v23450_v50, 1  ;;  %v9752_v55 = vrot.slane %v23452_v1, 1  ;;  %v9450_v36 = vmul.f32 0.5, %v23433_v12 }
 0x612   : > { %v9573_v3 = vmul.f32 %v9541_v21, %v9445_v34  ;;  %17162 = verf.f32 %v9486_v62  ;;  %9606 = vst.msk [vmem:[#allocation2 + $0xc9] sm:$0xff] %vm493_vm4, %v9574_v60  ;;  %v9544_v63 = vadd.f32 1.0, %v17151_v37  ;;  %v9383_v58 = vmul.f32 %v23185_v0, %v9345_v35  ;;  %v16493_v34 = vpop.f32.mrf.mxu0 }
 0x613   : > { %v9386_v29 = vmul.f32 %v23185_v0, %v9348_v13  ;;  %v23550_v17 = vld [vmem:[#allocation2 + $0x90] sm:$0xff]  ;;  %v23552_v9 = vld [vmem:[#allocation2 + $0x98] sm:$0xff]  ;;  %v23556_v18 = vsel %vm608_vm2, %v9751_v2, %v9752_v55  ;;  %v9754_v48 = vrot.slane %v23539_v32, 1  ;;  %v9347_v28 = vadd.f32 %v9284_v42, %v23315_v39 }
 0x614   : > { %v17153_v41 = vpop.eup %17152  ;;  %9605 = vst.msk [vmem:[#allocation2 + $0xc1] sm:$0xff] %vm493_vm4, %v9573_v3  ;;  %v9350_v12 = vadd.f32 %v16490_v23, %v23322_v49  ;;  %16567 = vmatprep.mubr.msk.f32.mxu0 %vm493_vm4, %v23550_v17  ;;  %v9576_v16 = vmul.f32 %v9544_v63, %v9448_v30  ;;  %v23564_v6 = vadd.f32 %v23197_v20, %v9383_v58  ;;  %v23578_v30 = vld [vmem:[#allocation2 + $0x70] sm:$0x3]  ;;  %v9449_v25 = vmul.f32 0.5, %v23460_v45  ;;  %v9304_v3 = vpop.f32.mrf.mxu0 }
 0x615   : > { %v17155_v33 = vpop.eup %17154  ;;  %v9543_v56 = vadd.f32 1.0, %v17153_v41  ;;  %v23567_v46 = vadd.f32 %v23197_v20, %v9386_v29  ;;  %16508 = vmatprep.mubr.msk.f32.mxu1 %vm493_vm4, %v23556_v18  ;;  %16568 = vmatmul.mubr.msk.f32.gmra.mxu0 %vm493_vm4, %v23552_v9  ;;  %v23574_v49 = vsel %vm608_vm2, %v9752_v55, %v9754_v48  ;;  %v9385_v42 = vmul.f32 %v23185_v0, %v9347_v28 }
 0x616   : > { %v9546_v39 = vadd.f32 1.0, %v17155_v33  ;;  %v9388_v23 = vmul.f32 %v23185_v0, %v9350_v12  ;;  %9608 = vst.msk [vmem:[#allocation2 + $0xe1] sm:$0xff] %vm493_vm4, %v9576_v16  ;;  %v9485_v21 = vmul.f32 0.70710677, %v23564_v6  ;;  %16509 = vmatmul.mubr.msk.f32.gmra.mxu1 %vm493_vm4, %v23574_v49  ;;  %v9756_v62 = vrot.slane %v23486_v22, 1 }
 0x617   : > { %v9575_v4 = vmul.f32 %v9543_v56, %v9447_v54  ;;  %v9488_v35 = vmul.f32 0.70710677, %v23567_v46  ;;  %v23588_v13 = vadd.f32 %v23197_v20, %v9385_v42  ;;  %v9757_v45 = vrot.slane %v23488_v24, 1  ;;  %v23614_v12 = vld [vmem:[#allocation2 + $0x88] sm:$0x3] }
 0x618   : > { %v9578_v60 = vmul.f32 %v9546_v39, %v9450_v36  ;;  %v23591_v37 = vadd.f32 %v23197_v20, %v9388_v23  ;;  %v17157_v54 = vpop.eup %17156  ;;  %17164 = verf.f32 %v9485_v21  ;;  %v9759_v2 = vrot.slane %v23578_v30, 1  ;;  %v23597_v63 = vld [vmem:[#allocation2 + $0xa8] sm:$0xff]  ;;  %v23599_v36 = vld [vmem:[#allocation2 + $0xb0] sm:$0xff]  ;;  %v16496_v39 = vpop.f32.mrf.mxu0 }
 0x619   : > { %9607 = vst.msk [vmem:[#allocation2 + $0xd9] sm:$0xff] %vm493_vm4, %v9575_v4  ;;  %v9349_v55 = vadd.f32 %v9294_v38, %v23326_v57  ;;  %v9545_v58 = vadd.f32 1.0, %v17157_v54  ;;  %v9452_v29 = vmul.f32 0.5, %v23492_v15  ;;  %17166 = verf.f32 %v9488_v35  ;;  %16570 = vmatprep.mubr.msk.f32.mxu0 %vm493_vm4, %v23597_v63  ;;  %v9048_v54 = vpop.f32.mrf.mxu1 }
 0x61a   : > { %9610 = vst.msk [vmem:[#allocation2 + $0xf9] sm:$0xff] %vm493_vm4, %v9578_v60  ;;  %v9487_v41 = vmul.f32 0.70710677, %v23588_v13  ;;  %v9451_v48 = vmul.f32 0.5, %v23508_v8  ;;  %v9490_v28 = vmul.f32 0.70710677, %v23591_v37  ;;  %v23609_v57 = vsel %vm608_vm2, %v9756_v62, %v9757_v45  ;;  %16571 = vmatmul.mubr.msk.f32.gmra.mxu0 %vm493_vm4, %v23599_v36 }
 0x61b   : > { %v23612_v38 = vsel %vm608_vm2, %v9757_v45, %v9759_v2  ;;  %v23618_v15 = vld [vmem:[#allocation2 + $0xc0] sm:$0xff]  ;;  %v17159_v33 = vpop.eup %17158  ;;  %v9577_v16 = vmul.f32 %v9545_v58, %v9449_v25  ;;  %16511 = vmatprep.mubr.msk.f32.mxu1 %vm493_vm4, %v23609_v57  ;;  %v9387_v8 = vmul.f32 %v23185_v0, %v9349_v55  ;;  %v9352_v56 = vadd.f32 %v16493_v34, %v23334_v51  ;;  %v23626_v42 = vld [vmem:[#allocation2 + $0xc8] sm:$0xff] }
 0x61c   : > { %17168 = verf.f32 %v9487_v41  ;;  %16573 = vmatprep.mubr.msk.f32.mxu0 %vm493_vm4, %v23618_v15  ;;  %v9548_v23 = vadd.f32 1.0, %v17159_v33  ;;  %16512 = vmatmul.mubr.msk.f32.gmra.mxu1 %vm493_vm4, %v23612_v38  ;;  %v9761_v4 = vrot.slane %v23526_v14, 1  ;;  %v9762_v25 = vrot.slane %v23528_v53, 1 }
 0x61d   : > { %17170 = verf.f32 %v9490_v28  ;;  %9609 = vst.msk [vmem:[#allocation2 + $0xf1] sm:$0xff] %vm493_vm4, %v9577_v16  ;;  %v23634_v51 = vadd.f32 %v23197_v20, %v9387_v8  ;;  %v9390_v34 = vmul.f32 %v23185_v0, %v9352_v56  ;;  %v9764_v62 = vrot.slane %v23614_v12, 1  ;;  %v23662_v56 = vld [vmem:[#allocation2 + $0xa0] sm:$0x3] }
 0x61e   : > { %v17161_v21 = vpop.eup %17160  ;;  %v9351_v60 = vadd.f32 %v9304_v3, %v23343_v19  ;;  %v9580_v45 = vmul.f32 %v9548_v23, %v9452_v29  ;;  %v23640_v55 = vsel %vm608_vm2, %v9761_v4, %v9762_v25  ;;  %v9354_v58 = vadd.f32 %v16496_v39, %v23364_v31  ;;  %16574 = vmatmul.mubr.msk.f32.gmra.mxu0 %vm493_vm4, %v23626_v42  ;;  %v9314_v39 = vpop.f32.mrf.mxu0 }
 0x61f   : > { %v17163_v35 = vpop.eup %17162  ;;  %v9547_v2 = vadd.f32 1.0, %v17161_v21  ;;  %v9454_v41 = vmul.f32 0.5, %v23513_v11  ;;  %v9489_v33 = vmul.f32 0.70710677, %v23634_v51  ;;  %v23648_v16 = vadd.f32 %v23197_v20, %v9390_v34  ;;  %16514 = vmatprep.mubr.msk.f32.mxu1 %vm493_vm4, %v23640_v55 }
 0x620   : > { %v9550_v28 = vadd.f32 1.0, %v17163_v35  ;;  %v23652_v19 = vld [vmem:[#allocation2 + $0xd8] sm:$0xff]  ;;  %v23654_v3 = vld [vmem:[#allocation2 + $0xe0] sm:$0xff]  ;;  %9612 = vst.msk [vmem:[#allocation2 + $0x111] sm:$0xff] %vm493_vm4, %v9580_v45  ;;  %v23658_v29 = vsel %vm608_vm2, %v9762_v25, %v9764_v62  ;;  %v9389_v11 = vmul.f32 %v23185_v0, %v9351_v60  ;;  %v9392_v8 = vmul.f32 %v23185_v0, %v9354_v58 }
 0x621   : > { %v9579_v31 = vmul.f32 %v9547_v2, %v9451_v48  ;;  %26558 = vst [vmem:[#allocation50_spill] sm:$0xff] %v23658_v29  ;;  %16576 = vmatprep.mubr.msk.f32.mxu0 %vm493_vm4, %v23652_v19  ;;  %v9087_v23 = vadd.f32 %v9048_v54, %v23351_v44  ;;  %17172 = verf.f32 %v9489_v33  ;;  %v9492_v21 = vmul.f32 0.70710677, %v23648_v16  ;;  %16515 = vmatmul.mubr.msk.f32.gmra.mxu1 %vm493_vm4, %v23658_v29  ;;  %v23684_v54 = vld [vmem:[#allocation2 + $0xb8] sm:$0x3] }
 0x622   : > { %v9582_v4 = vmul.f32 %v9550_v28, %v9454_v41  ;;  %v23672_v48 = vadd.f32 %v23197_v20, %v9389_v11  ;;  %v23675_v25 = vadd.f32 %v23197_v20, %v9392_v8  ;;  %v9766_v34 = vrot.slane %v23550_v17, 1  ;;  %16577 = vmatmul.mubr.msk.f32.gmra.mxu0 %vm493_vm4, %v23654_v3 }
 0x623   : > { %9611 = vst.msk [vmem:[#allocation2 + $0x109] sm:$0xff] %vm493_vm4, %v9579_v31  ;;  %v9767_v62 = vrot.slane %v23552_v9, 1  ;;  %17174 = verf.f32 %v9492_v21  ;;  %v9769_v44 = vrot.slane %v23662_v56, 1  ;;  %v9353_v60 = vadd.f32 %v9314_v39, %v9087_v23 }
 0x624   : > { %9614 = vst.msk [vmem:[#allocation2 + $0x129] sm:$0xff] %vm493_vm4, %v9582_v4  ;;  %v9771_v35 = vrot.slane %v23597_v63, 1  ;;  %v9453_v45 = vmul.f32 0.5, %v23564_v6  ;;  %v9456_v2 = vmul.f32 0.5, %v23567_v46  ;;  %v9491_v58 = vmul.f32 0.70710677, %v23672_v48 }
 0x625   : > { %v9494_v41 = vmul.f32 0.70710677, %v23675_v25  ;;  %v17165_v28 = vpop.eup %17164  ;;  %v23691_v33 = vsel %vm608_vm2, %v9766_v34, %v9767_v62  ;;  %v23694_v31 = vsel %vm608_vm2, %v9767_v62, %v9769_v44  ;;  %v9391_v11 = vmul.f32 %v23185_v0, %v9353_v60  ;;  %v23698_v39 = vld [vmem:[#allocation2 + $0xf0] sm:$0xff]  ;;  %v23700_v6 = vld [vmem:[#allocation2 + $0xf8] sm:$0xff] }
 0x626   : > { %26559 = vst [vmem:[#allocation11_spill] sm:$0xff] %v23691_v33  ;;  %26560 = vst [vmem:[#allocation33_spill] sm:$0xff] %v23694_v31  ;;  %v9772_v8 = vrot.slane %v23599_v36, 1  ;;  %v17167_v46 = vpop.eup %17166  ;;  %v9549_v23 = vadd.f32 1.0, %v17165_v28  ;;  %17176 = verf.f32 %v9491_v58  ;;  %16517 = vmatprep.mubr.msk.f32.mxu1 %vm493_vm4, %v23691_v33  ;;  %v9774_v4 = vrot.slane %v23684_v54, 1  ;;  %16579 = vmatprep.mubr.msk.f32.mxu0 %vm493_vm4, %v23698_v39 }
 0x627   : > { %v9776_v21 = vrot.slane %v23618_v15, 1  ;;  %v9552_v0 = vadd.f32 1.0, %v17167_v46  ;;  %17178 = verf.f32 %v9494_v41  ;;  %16518 = vmatmul.mubr.msk.f32.gmra.mxu1 %vm493_vm4, %v23694_v31  ;;  %v23711_v34 = vadd.f32 %v23197_v20, %v9391_v11  ;;  %v23716_v44 = vld [vmem:[#allocation2 + $0xd0] sm:$0x3]  ;;  %16580 = vmatmul.mubr.msk.f32.gmra.mxu0 %vm493_vm4, %v23700_v6 }
 0x628   : > { %v23714_v62 = vsel %vm608_vm2, %v9771_v35, %v9772_v8  ;;  %v9581_v58 = vmul.f32 %v9549_v23, %v9453_v45  ;;  %v9455_v28 = vmul.f32 0.5, %v23588_v13  ;;  %v23724_v41 = vsel %vm608_vm2, %v9772_v8, %v9774_v4 }
 0x629   : > { %26561 = vst [vmem:[#allocation37_spill] sm:$0xff] %v23714_v62  ;;  %v17169_v60 = vpop.eup %17168  ;;  %16520 = vmatprep.mubr.msk.f32.mxu1 %vm493_vm4, %v23714_v62  ;;  %26562 = vst [vmem:[#allocation20_spill] sm:$0xff] %v23724_v41  ;;  %v9777_v20 = vrot.slane %v23626_v42, 1  ;;  %v9584_v35 = vmul.f32 %v9552_v0, %v9456_v2  ;;  %v9458_v31 = vmul.f32 0.5, %v23591_v37  ;;  %v9493_v33 = vmul.f32 0.70710677, %v23711_v34 }
 0x62a   : > { %v17171_v11 = vpop.eup %17170  ;;  %v9551_v46 = vadd.f32 1.0, %v17169_v60  ;;  %v23729_v29 = vld [vmem:[#allocation2 + $0x108] sm:$0xff]  ;;  %v23731_v45 = vld [vmem:[#allocation2 + $0x110] sm:$0xff]  ;;  %9613 = vst.msk [vmem:[#allocation2 + $0x121] sm:$0xff] %vm493_vm4, %v9581_v58  ;;  %v9779_v8 = vrot.slane %v23716_v44, 1  ;;  %v9781_v4 = vrot.slane %v23652_v19, 1 }
 0x62b   : > { %v9554_v13 = vadd.f32 1.0, %v17171_v11  ;;  %v23735_v23 = vsel %vm608_vm2, %v9776_v21, %v9777_v20  ;;  %16582 = vmatprep.mubr.msk.f32.mxu0 %vm493_vm4, %v23729_v29  ;;  %9616 = vst.msk [vmem:[#allocation2 + $0x141] sm:$0xff] %vm493_vm4, %v9584_v35  ;;  %17180 = verf.f32 %v9493_v33  ;;  %16521 = vmatmul.mubr.msk.f32.gmra.mxu1 %vm493_vm4, %v23724_v41  ;;  %v9782_v2 = vrot.slane %v23654_v3, 1  ;;  %v23745_v0 = vld [vmem:[#allocation2 + $0xe8] sm:$0x3] }
 0x62c   : > { %26563 = vst [vmem:[#allocation26_spill] sm:$0xff] %v23735_v23  ;;  %v9583_v37 = vmul.f32 %v9551_v46, %v9455_v28  ;;  %16583 = vmatmul.mubr.msk.f32.gmra.mxu0 %vm493_vm4, %v23731_v45  ;;  %16523 = vmatprep.mubr.msk.f32.mxu1 %vm493_vm4, %v23735_v23  ;;  %v23752_v60 = vsel %vm608_vm2, %v9777_v20, %v9779_v8  ;;  %v9786_v58 = vrot.slane %v23698_v39, 1  ;;  %v9787_v28 = vrot.slane %v23700_v6, 1  ;;  %v23765_v20 = vld [vmem:[#allocation2 + $0x100] sm:$0x3] }
 0x62d   : > { %v9586_v21 = vmul.f32 %v9554_v13, %v9458_v31  ;;  %26564 = vst [vmem:[#allocation23_spill] sm:$0xff] %v23752_v60  ;;  %v23756_v33 = vsel %vm608_vm2, %v9781_v4, %v9782_v2  ;;  %v9784_v31 = vrot.slane %v23745_v0, 1  ;;  %v9457_v35 = vmul.f32 0.5, %v23634_v51 }
 0x62e   : > { %9615 = vst.msk [vmem:[#allocation2 + $0x139] sm:$0xff] %vm493_vm4, %v9583_v37  ;;  %26565 = vst [vmem:[#allocation40_spill] sm:$0xff] %v23756_v33  ;;  %v17173_v11 = vpop.eup %17172  ;;  %v9460_v8 = vmul.f32 0.5, %v23648_v16  ;;  %v9791_v37 = vrot.slane %v23729_v29, 1  ;;  %v23775_v51 = vsel %vm608_vm2, %v9786_v58, %v9787_v28  ;;  %v9789_v16 = vrot.slane %v23765_v20, 1 }
 0x62f   : > { %9618 = vst.msk [vmem:[#allocation2 + $0x159] sm:$0xff] %vm493_vm4, %v9586_v21  ;;  %v9553_v46 = vadd.f32 1.0, %v17173_v11  ;;  %16524 = vmatmul.mubr.msk.f32.gmra.mxu1 %vm493_vm4, %v23752_v60  ;;  %v23771_v4 = vsel %vm608_vm2, %v9782_v2, %v9784_v31  ;;  %26567 = vst [vmem:[#allocation35_spill] sm:$0xff] %v23775_v51  ;;  %v9792_v11 = vrot.slane %v23731_v45, 1  ;;  %v23788_v58 = vld [vmem:[#allocation2 + $0x118] sm:$0x3] }
 0x630   : > { %v17175_v13 = vpop.eup %17174  ;;  %16526 = vmatprep.mubr.msk.f32.mxu1 %vm493_vm4, %v23756_v33  ;;  %26566 = vst [vmem:[#allocation54_spill] sm:$0xff] %v23771_v4  ;;  %v9462_v33 = vmul.f32 0.5, %v23675_v25 }
 0x631   : > { %v9585_v21 = vmul.f32 %v9553_v46, %v9457_v35  ;;  %v9556_v23 = vadd.f32 1.0, %v17175_v13  ;;  %v23778_v60 = vld [vmem:[#allocation2 + $0x120] sm:$0xff]  ;;  %v23780_v41 = vld [vmem:[#allocation2 + $0x128] sm:$0xff]  ;;  %v9459_v46 = vmul.f32 0.5, %v23672_v48  ;;  %v23805_v62 = vsel %vm608_vm2, %v9791_v37, %v9792_v11 }
 0x632   : > { %16585 = vmatprep.mubr.msk.f32.mxu0 %vm493_vm4, %v23778_v60  ;;  %26570 = vst [vmem:[#allocation41_spill] sm:$0xff] %v23805_v62  ;;  %v9796_v48 = vrot.slane %v23778_v60, 1  ;;  %v9797_v25 = vrot.slane %v23780_v41, 1 }
 0x633   : > { %v17177_v2 = vpop.eup %17176  ;;  %9617 = vst.msk [vmem:[#allocation2 + $0x151] sm:$0xff] %vm493_vm4, %v9585_v21  ;;  %v9588_v31 = vmul.f32 %v9556_v23, %v9460_v8  ;;  %16527 = vmatmul.mubr.msk.f32.gmra.mxu1 %vm493_vm4, %v23771_v4  ;;  %16586 = vmatmul.mubr.msk.f32.gmra.mxu0 %vm493_vm4, %v23780_v41  ;;  %v23797_v21 = vsel %vm608_vm2, %v9787_v28, %v9789_v16  ;;  %v9794_v28 = vrot.slane %v23788_v58, 1 }
 0x634   : > { %v17179_v35 = vpop.eup %17178  ;;  %v9555_v13 = vadd.f32 1.0, %v17177_v2  ;;  %16529 = vmatprep.mubr.msk.f32.mxu1 %vm493_vm4, %v23775_v51  ;;  %26568 = vst [vmem:[#allocation25_spill] sm:$0xff] %v23797_v21  ;;  %v23814_v51 = vld [vmem:[#allocation2 + $0x130] sm:$0x3] }
 0x635   : > { %v23799_v23 = vld [vmem:[#allocation2 + $0x138] sm:$0xff]  ;;  %v23801_v8 = vld [vmem:[#allocation2 + $0x140] sm:$0xff]  ;;  %9620 = vst.msk [vmem:[#allocation2 + $0x171] sm:$0xff] %vm493_vm4, %v9588_v31  ;;  %v9558_v4 = vadd.f32 1.0, %v17179_v35  ;;  %v9461_v31 = vmul.f32 0.5, %v23711_v34  ;;  %v23823_v35 = vsel %vm608_vm2, %v9792_v11, %v9794_v28 }
 0x636   : > { %26569 = vst [vmem:[#allocation31_spill] sm:$0xff] %v23801_v8  ;;  %16588 = vmatprep.mubr.msk.f32.mxu0 %vm493_vm4, %v23799_v23  ;;  %v9587_v2 = vmul.f32 %v9555_v13, %v9459_v46  ;;  %26571 = vst [vmem:[#allocation32_spill] sm:$0xff] %v23823_v35  ;;  %v9801_v46 = vrot.slane %v23799_v23, 1  ;;  %v9802_v13 = vrot.slane %v23801_v8, 1  ;;  %v23838_v11 = vld [vmem:[#allocation2 + $0x148] sm:$0x3] }
 0x637   : > { %v9590_v16 = vmul.f32 %v9558_v4, %v9462_v33  ;;  %16530 = vmatmul.mubr.msk.f32.gmra.mxu1 %vm493_vm4, %v23797_v21  ;;  %16589 = vmatmul.mubr.msk.f32.gmra.mxu0 %vm493_vm4, %v23801_v8  ;;  %v23827_v4 = vsel %vm608_vm2, %v9796_v48, %v9797_v25 }
 0x638   : > { %v17181_v37 = vpop.eup %17180  ;;  %9619 = vst.msk [vmem:[#allocation2 + $0x169] sm:$0xff] %vm493_vm4, %v9587_v2  ;;  %16532 = vmatprep.mubr.msk.f32.mxu1 %vm493_vm4, %v23805_v62  ;;  %26572 = vst [vmem:[#allocation45_spill] sm:$0xff] %v23827_v4  ;;  %v9799_v2 = vrot.slane %v23814_v51, 1  ;;  %v23851_v28 = vsel %vm608_vm2, %v9801_v46, %v9802_v13 }
 0x639   : > { %9622 = vst.msk [vmem:[#allocation2 + $0x189] sm:$0xff] %vm493_vm4, %v9590_v16  ;;  %v9557_v33 = vadd.f32 1.0, %v17181_v37  ;;  %26576 = vst [vmem:[#allocation51_spill] sm:$0xff] %v23851_v28 }
 0x63a   : > { %v23832_v21 = vld [vmem:[#allocation2 + $0x150] sm:$0xff]  ;;  %v23834_v34 = vld [vmem:[#allocation2 + $0x158] sm:$0xff]  ;;  %v23845_v48 = vsel %vm608_vm2, %v9797_v25, %v9799_v2 }
 0x63b   : > { %26573 = vst [vmem:[#allocation72_spill] sm:$0xff] %v23832_v21  ;;  %26574 = vst [vmem:[#allocation43_spill] sm:$0xff] %v23834_v34  ;;  %v9589_v62 = vmul.f32 %v9557_v33, %v9461_v31  ;;  %16533 = vmatmul.mubr.msk.f32.gmra.mxu1 %vm493_vm4, %v23823_v35  ;;  %16591 = vmatprep.mubr.msk.f32.mxu0 %vm493_vm4, %v23832_v21  ;;  %v9806_v16 = vrot.slane %v23832_v21, 1  ;;  %v9807_v37 = vrot.slane %v23834_v34, 1  ;;  %v9804_v31 = vrot.slane %v23838_v11, 1 }
 0x63c   : > { %16535 = vmatprep.mubr.msk.f32.mxu1 %vm493_vm4, %v23827_v4  ;;  %26575 = vst [vmem:[#allocation61_spill] sm:$0xff] %v23845_v48  ;;  %16592 = vmatmul.mubr.msk.f32.gmra.mxu0 %vm493_vm4, %v23834_v34  ;;  %v23858_v33 = vld [vmem:[#allocation2 + $0x160] sm:$0x3] }
 0x63d   : > { %9621 = vst.msk [vmem:[#allocation2 + $0x181] sm:$0xff] %vm493_vm4, %v9589_v62  ;;  %v23867_v62 = vsel %vm608_vm2, %v9802_v13, %v9804_v31  ;;  %v23872_v46 = vsel %vm608_vm2, %v9806_v16, %v9807_v37  ;;  %v9809_v35 = vrot.slane %v23858_v33, 1  ;;  %v23883_v13 = vld [vmem:[#allocation2 + $0x178] sm:$0x3] }
 0x63f   : > { %16536 = vmatmul.mubr.msk.f32.gmra.mxu1 %vm493_vm4, %v23845_v48  ;;  %v23860_v25 = vld [vmem:[#allocation2 + $0x168] sm:$0xff]  ;;  %v23862_v2 = vld [vmem:[#allocation2 + $0x170] sm:$0xff]  ;;  %v23888_v16 = vsel %vm608_vm2, %v9807_v37, %v9809_v35 }
 0x640   : > { %16538 = vmatprep.mubr.msk.f32.mxu1 %vm493_vm4, %v23851_v28  ;;  %16594 = vmatprep.mubr.msk.f32.mxu0 %vm493_vm4, %v23860_v25  ;;  %v9811_v48 = vrot.slane %v23860_v25, 1  ;;  %v9812_v4 = vrot.slane %v23862_v2, 1  ;;  %26577 = vst [vmem:[#allocation29_spill] sm:$0xff] %v23888_v16  ;;  %v9814_v28 = vrot.slane %v23883_v13, 1  ;;  %v23929_v37 = vld [vmem:[%s25385_s10 + $0x30] sm:$0xff] }
 0x641   : > { %16595 = vmatmul.mubr.msk.f32.gmra.mxu0 %vm493_vm4, %v23862_v2 }
 0x642   : > { %16649 = vmatprep.mubr.msk.f32.mxu0 %vm493_vm4, %v23398_v26  ;;  %v23891_v31 = vsel %vm608_vm2, %v9811_v48, %v9812_v4  ;;  %v23904_v35 = vsel %vm608_vm2, %v9812_v4, %v9814_v28  ;;  %v23909_v48 = vld [vmem:[%s25385_s10 + $0x38] sm:$0xff]  ;;  %v10400_v4 = vrot.slane %v23405_v10, 2  ;;  %v26580_v28 = vld [vmem:[#allocation7_spill] sm:$0xff] }
 0x643   : > { %16539 = vmatmul.mubr.msk.f32.gmra.mxu1 %vm493_vm4, %v23867_v62  ;;  %26578 = vst [vmem:[#allocation58_spill] sm:$0xff] %v23891_v31  ;;  %26579 = vst [vmem:[#allocation24_spill] sm:$0xff] %v23904_v35 }
 0x644   : > { %16541 = vmatprep.mubr.msk.f32.mxu1 %vm493_vm4, %v23872_v46 }
 0x645   : > { %16650 = vmatmul.mubr.msk.f32.vlgmr.msra.gmra.mxu0 %vm493_vm4, %v23405_v10  ;;  %v10404_v10 = vrot.slane %v23428_v59, 2 }
 0x646   : > { %16652 = vmatprep.mubr.msk.f32.mxu0 %vm493_vm4, %v23428_v59  ;;  %16748 = vmatpush3.msra.mxu0 %v23477_v27  ;;  %v10399_v27 = vrot.slane %v23398_v26, 2  ;;  %v26581_v26 = vld [vmem:[#allocation15_spill] sm:$0xff] }
 0x647   : > { %16542 = vmatmul.mubr.msk.f32.gmra.mxu1 %vm493_vm4, %v23888_v16  ;;  %16847 = vmatprep.subr.mxu0 %v23909_v48  ;;  %v10402_v16 = vrot.slane %v23440_v43, 2  ;;  %v10410_v43 = vrot.slane %v23452_v1, 2 }
 0x648   : > { %16544 = vmatprep.mubr.msk.f32.mxu1 %vm493_vm4, %v23891_v31  ;;  %v17274_v31 = vld [vmem:[%s25385_s10 + $0x20] sm:$0xff] }
 0x649   : > { %16653 = vmatmul.mubr.msk.f32.gmra.mxu0 %vm493_vm4, %v23430_v52 }
 0x64a   : > { %16655 = vmatprep.mubr.msk.f32.mxu0 %vm493_vm4, %v23450_v50 }
 0x64b   : > { %16545 = vmatmul.mubr.msk.f32.gmra.mxu1 %vm493_vm4, %v23904_v35  ;;  %v23934_v35 = vsel %vm1275_vm3, %v10399_v27, %v10400_v4  ;;  %v23948_v27 = vsel %vm1275_vm3, %v10400_v4, %v10402_v16  ;;  %v10415_v4 = vrot.slane %v23488_v24, 2 }
 0x64c   : > { %16599 = vmatprep.mubr.msk.f32.mxu1 %vm493_vm4, %v26580_v28  ;;  %v10405_v28 = vrot.slane %v23430_v52, 2  ;;  %v10409_v52 = vrot.slane %v23450_v50, 2 }
 0x64d   : > { %16656 = vmatmul.mubr.msk.f32.gmra.mxu0 %vm493_vm4, %v23452_v1  ;;  %v10414_v1 = vrot.slane %v23486_v22, 2 }
 0x64e   : > { %16658 = vmatprep.mubr.msk.f32.mxu0 %vm493_vm4, %v23486_v22  ;;  %v23955_v59 = vsel %vm1275_vm3, %v10404_v10, %v10405_v28  ;;  %v23972_v50 = vsel %vm1275_vm3, %v10409_v52, %v10410_v43  ;;  %v10420_v10 = vrot.slane %v23528_v53, 2 }
 0x64f   : > { %16600 = vmatmul.mubr.msk.f32.vlgmr.msra.gmra.mxu1 %vm493_vm4, %v26581_v26  ;;  %v23989_v22 = vsel %vm1275_vm3, %v10414_v1, %v10415_v4  ;;  %v10422_v1 = vrot.slane %v23614_v12, 2  ;;  %v10427_v12 = vrot.slane %v23662_v56, 2  ;;  %v10432_v56 = vrot.slane %v23684_v54, 2 }
 0x650   : > { %16698 = vmatpush3.msra.mxu1 %v17274_v31  ;;  %16602 = vmatprep.mubr.msk.f32.mxu1 %vm493_vm4, %v23934_v35  ;;  %v10407_v31 = vrot.slane %v23470_v40, 2  ;;  %v10412_v40 = vrot.slane %v23539_v32, 2  ;;  %v10417_v32 = vrot.slane %v23578_v30, 2  ;;  %v10425_v30 = vrot.slane %v23552_v9, 2 }
 0x651   : > { %16659 = vmatmul.mubr.msk.f32.gmra.mxu0 %vm493_vm4, %v23488_v24  ;;  %16797 = vmatprep.subr.mxu1 %v23929_v37  ;;  %v10419_v24 = vrot.slane %v23526_v14, 2  ;;  %v10437_v54 = vrot.slane %v23716_v44, 2  ;;  %v10442_v44 = vrot.slane %v23745_v0, 2  ;;  %v10447_v0 = vrot.slane %v23765_v20, 2 }
 0x652   : > { %16661 = vmatprep.mubr.msk.f32.mxu0 %vm493_vm4, %v23526_v14  ;;  %v23965_v16 = vsel %vm1275_vm3, %v10405_v28, %v10407_v31  ;;  %v23982_v26 = vsel %vm1275_vm3, %v10410_v43, %v10412_v40  ;;  %v23999_v43 = vsel %vm1275_vm3, %v10415_v4, %v10417_v32  ;;  %v24018_v4 = vsel %vm1275_vm3, %v10420_v10, %v10422_v1 }
 0x653   : > { %16603 = vmatmul.mubr.msk.f32.gmra.mxu1 %vm493_vm4, %v23948_v27  ;;  %v24008_v14 = vsel %vm1275_vm3, %v10419_v24, %v10420_v10  ;;  %26584 = vst [vmem:[#allocation60_spill] sm:$0xff] %v24018_v4  ;;  %v10430_v40 = vrot.slane %v23599_v36, 2  ;;  %v24035_v24 = vsel %vm1275_vm3, %v10425_v30, %v10427_v12  ;;  %v10435_v10 = vrot.slane %v23626_v42, 2 }
 0x654   : > { %16605 = vmatprep.mubr.msk.f32.mxu1 %vm493_vm4, %v23955_v59  ;;  %26583 = vst [vmem:[#allocation70_spill] sm:$0xff] %v24008_v14  ;;  %26586 = vst [vmem:[#allocation36_spill] sm:$0xff] %v24035_v24  ;;  %v10452_v20 = vrot.slane %v23788_v58, 2  ;;  %v10457_v58 = vrot.slane %v23814_v51, 2  ;;  %v10465_v51 = vrot.slane %v23834_v34, 2 }
 0x655   : > { %16662 = vmatmul.mubr.msk.f32.gmra.mxu0 %vm493_vm4, %v23528_v53  ;;  %v10424_v53 = vrot.slane %v23550_v17, 2  ;;  %v24052_v32 = vsel %vm1275_vm3, %v10430_v40, %v10432_v56  ;;  %v10450_v56 = vrot.slane %v23731_v45, 2 }
 0x656   : > { %16664 = vmatprep.mubr.msk.f32.mxu0 %vm493_vm4, %v23550_v17  ;;  %26588 = vst [vmem:[#allocation21_spill] sm:$0xff] %v24052_v32 }
 0x657   : > { %16606 = vmatmul.mubr.msk.f32.gmra.mxu1 %vm493_vm4, %v23965_v16  ;;  %v24025_v17 = vsel %vm1275_vm3, %v10424_v53, %v10425_v30  ;;  %v10440_v53 = vrot.slane %v23654_v3, 2  ;;  %v24069_v30 = vsel %vm1275_vm3, %v10435_v10, %v10437_v54  ;;  %v10454_v54 = vrot.slane %v23778_v60, 2 }
 0x658   : > { %16608 = vmatprep.mubr.msk.f32.mxu1 %vm493_vm4, %v23972_v50  ;;  %v16551_v28 = vpop.f32.mrf.mxu0  ;;  %26585 = vst [vmem:[#allocation49_spill] sm:$0xff] %v24025_v17  ;;  %26590 = vst [vmem:[#allocation18_spill] sm:$0xff] %v24069_v30 }
 0x659   : > { %16665 = vmatmul.mubr.msk.f32.gmra.mxu0 %vm493_vm4, %v23552_v9  ;;  %v10429_v9 = vrot.slane %v23597_v63, 2  ;;  %v24086_v12 = vsel %vm1275_vm3, %v10440_v53, %v10442_v44 }
 0x65a   : > { %16667 = vmatprep.mubr.msk.f32.mxu0 %vm493_vm4, %v23597_v63  ;;  %26592 = vst [vmem:[#allocation100_spill] sm:$0xff] %v24086_v12 }
 0x65b   : > { %16609 = vmatmul.mubr.msk.f32.gmra.mxu1 %vm493_vm4, %v23982_v26  ;;  %v24042_v63 = vsel %vm1275_vm3, %v10429_v9, %v10430_v40  ;;  %v10444_v9 = vrot.slane %v23698_v39, 2  ;;  %v10445_v40 = vrot.slane %v23700_v6, 2 }
 0x65c   : > { %16611 = vmatprep.mubr.msk.f32.mxu1 %vm493_vm4, %v23989_v22  ;;  %v16501_v52 = vpop.f32.mrf.mxu1  ;;  %26587 = vst [vmem:[#allocation48_spill] sm:$0xff] %v24042_v63 }
 0x65d   : > { %16668 = vmatmul.mubr.msk.f32.gmra.mxu0 %vm493_vm4, %v23599_v36  ;;  %v24003_v31 = vadd.f32 %v16551_v28, %v16501_v52  ;;  %v10434_v36 = vrot.slane %v23618_v15, 2  ;;  %v10439_v52 = vrot.slane %v23652_v19, 2 }
 0x65e   : > { %16670 = vmatprep.mubr.msk.f32.mxu0 %vm493_vm4, %v23618_v15 }
 0x65f   : > { %26582 = vst [vmem:[#allocation12_spill] sm:$0xff] %v24003_v31  ;;  %16612 = vmatmul.mubr.msk.f32.gmra.mxu1 %vm493_vm4, %v23999_v43  ;;  %v24059_v28 = vsel %vm1275_vm3, %v10434_v36, %v10435_v10  ;;  %v24076_v1 = vsel %vm1275_vm3, %v10439_v52, %v10440_v53  ;;  %v24093_v36 = vsel %vm1275_vm3, %v10444_v9, %v10445_v40  ;;  %v10449_v10 = vrot.slane %v23729_v29, 2 }
 0x660   : > { %16614 = vmatprep.mubr.msk.f32.mxu1 %vm493_vm4, %v24008_v14  ;;  %26589 = vst [vmem:[#allocation44_spill] sm:$0xff] %v24059_v28  ;;  %26591 = vst [vmem:[#allocation99_spill] sm:$0xff] %v24076_v1  ;;  %v24103_v52 = vsel %vm1275_vm3, %v10445_v40, %v10447_v0  ;;  %v10455_v9 = vrot.slane %v23780_v41, 2  ;;  %v24120_v40 = vsel %vm1275_vm3, %v10450_v56, %v10452_v20  ;;  %v10460_v0 = vrot.slane %v23801_v8, 2 }
 0x661   : > { %16671 = vmatmul.mubr.msk.f32.gmra.mxu0 %vm493_vm4, %v23626_v42  ;;  %26593 = vst [vmem:[#allocation39_spill] sm:$0xff] %v24093_v36  ;;  %26594 = vst [vmem:[#allocation64_spill] sm:$0xff] %v24103_v52  ;;  %v24110_v53 = vsel %vm1275_vm3, %v10449_v10, %v10450_v56  ;;  %v10459_v10 = vrot.slane %v23799_v23, 2  ;;  %v24136_v56 = vld [vmem:[#allocation2 + $0x180] sm:$0xff]  ;;  %v10464_v31 = vrot.slane %v23832_v21, 2 }
 0x662   : > { %16673 = vmatprep.mubr.msk.f32.mxu0 %vm493_vm4, %v23652_v19  ;;  %26595 = vst [vmem:[#allocation42_spill] sm:$0xff] %v24110_v53  ;;  %26596 = vst [vmem:[#allocation68_spill] sm:$0xff] %v24120_v40  ;;  %v24127_v44 = vsel %vm1275_vm3, %v10454_v54, %v10455_v9  ;;  %v24139_v20 = vsel %vm1275_vm3, %v10455_v9, %v10457_v58  ;;  %v24153_v9 = vld [vmem:[#allocation2 + $0x188] sm:$0xff] }
 0x663   : > { %16615 = vmatmul.mubr.msk.f32.gmra.mxu1 %vm493_vm4, %v24018_v4  ;;  %26597 = vst [vmem:[#allocation56_spill] sm:$0xff] %v24127_v44  ;;  %26598 = vst [vmem:[#allocation47_spill] sm:$0xff] %v24139_v20  ;;  %v24146_v54 = vsel %vm1275_vm3, %v10459_v10, %v10460_v0  ;;  %v24165_v10 = vsel %vm1275_vm3, %v10464_v31, %v10465_v51  ;;  %v26611_v31 = vld [vmem:[#allocation23_spill] sm:$0xff] }
 0x664   : > { %16617 = vmatprep.mubr.msk.f32.mxu1 %vm493_vm4, %v24025_v17  ;;  %26599 = vst [vmem:[#allocation53_spill] sm:$0xff] %v24146_v54  ;;  %26601 = vst [vmem:[#allocation97_spill] sm:$0xff] %v24165_v10 }
 0x665   : > { %16674 = vmatmul.mubr.msk.f32.gmra.mxu0 %vm493_vm4, %v23654_v3 }
 0x666   : > { %16676 = vmatprep.mubr.msk.f32.mxu0 %vm493_vm4, %v23698_v39 }
 0x667   : > { %16618 = vmatmul.mubr.msk.f32.gmra.mxu1 %vm493_vm4, %v24035_v24 }
 0x668   : > { %16620 = vmatprep.mubr.msk.f32.mxu1 %vm493_vm4, %v24042_v63 }
 0x669   : > { %16677 = vmatmul.mubr.msk.f32.gmra.mxu0 %vm493_vm4, %v23700_v6 }
 0x66a   : > { %16679 = vmatprep.mubr.msk.f32.mxu0 %vm493_vm4, %v23729_v29 }
 0x66b   : > { %16621 = vmatmul.mubr.msk.f32.gmra.mxu1 %vm493_vm4, %v24052_v32 }
 0x66c   : > { %16623 = vmatprep.mubr.msk.f32.mxu1 %vm493_vm4, %v24059_v28 }
 0x66d   : > { %16680 = vmatmul.mubr.msk.f32.gmra.mxu0 %vm493_vm4, %v23731_v45 }
 0x66e   : > { %16682 = vmatprep.mubr.msk.f32.mxu0 %vm493_vm4, %v23778_v60 }
 0x66f   : > { %16624 = vmatmul.mubr.msk.f32.gmra.mxu1 %vm493_vm4, %v24069_v30 }
 0x670   : > { %16626 = vmatprep.mubr.msk.f32.mxu1 %vm493_vm4, %v24076_v1 }
 0x671   : > { %16683 = vmatmul.mubr.msk.f32.gmra.mxu0 %vm493_vm4, %v23780_v41 }
 0x672   : > { %16685 = vmatprep.mubr.msk.f32.mxu0 %vm493_vm4, %v23799_v23 }
 0x673   : > { %16627 = vmatmul.mubr.msk.f32.gmra.mxu1 %vm493_vm4, %v24086_v12 }
 0x674   : > { %16629 = vmatprep.mubr.msk.f32.mxu1 %vm493_vm4, %v24093_v36 }
 0x675   : > { %16686 = vmatmul.mubr.msk.f32.gmra.mxu0 %vm493_vm4, %v23801_v8  ;;  %v10462_v8 = vrot.slane %v23838_v11, 2  ;;  %v10470_v11 = vrot.slane %v23862_v2, 2 }
 0x676   : > { %16688 = vmatprep.mubr.msk.f32.mxu0 %vm493_vm4, %v23832_v21  ;;  %v10467_v21 = vrot.slane %v23858_v33, 2  ;;  %v10472_v33 = vrot.slane %v23883_v13, 2  ;;  %v26607_v13 = vld [vmem:[#allocation33_spill] sm:$0xff] }
 0x677   : > { %16630 = vmatmul.mubr.msk.f32.gmra.mxu1 %vm493_vm4, %v24103_v52  ;;  %v24158_v58 = vsel %vm1275_vm3, %v10460_v0, %v10462_v8  ;;  %v26612_v0 = vld [vmem:[#allocation40_spill] sm:$0xff] }
 0x678   : > { %16632 = vmatprep.mubr.msk.f32.mxu1 %vm493_vm4, %v24110_v53  ;;  %26600 = vst [vmem:[#allocation52_spill] sm:$0xff] %v24158_v58  ;;  %v24175_v8 = vsel %vm1275_vm3, %v10465_v51, %v10467_v21  ;;  %v24191_v21 = vsel %vm1275_vm3, %v10470_v11, %v10472_v33  ;;  %v26613_v51 = vld [vmem:[#allocation54_spill] sm:$0xff]  ;;  %v26615_v33 = vld [vmem:[#allocation25_spill] sm:$0xff] }
 0x679   : > { %16689 = vmatmul.mubr.msk.f32.gmra.mxu0 %vm493_vm4, %v23834_v34  ;;  %v10469_v34 = vrot.slane %v23860_v25, 2  ;;  %26602 = vst [vmem:[#allocation73_spill] sm:$0xff] %v24175_v8  ;;  %26604 = vst [vmem:[#allocation57_spill] sm:$0xff] %v24191_v21 }
 0x67a   : > { %16691 = vmatprep.mubr.msk.f32.mxu0 %vm493_vm4, %v23860_v25 }
 0x67b   : > { %16633 = vmatmul.mubr.msk.f32.gmra.mxu1 %vm493_vm4, %v24120_v40 }
 0x67c   : > { %16635 = vmatprep.mubr.msk.f32.mxu1 %vm493_vm4, %v24127_v44 }
 0x67d   : > { %16692 = vmatmul.mubr.msk.f32.gmra.mxu0 %vm493_vm4, %v23862_v2 }
 0x67e   : > { %16694 = vmatprep.mubr.msk.f32.mxu0 %vm493_vm4, %v24136_v56 }
 0x67f   : > { %16636 = vmatmul.mubr.msk.f32.gmra.mxu1 %vm493_vm4, %v24139_v20 }
 0x680   : > { %16638 = vmatprep.mubr.msk.f32.mxu1 %vm493_vm4, %v24146_v54 }
 0x681   : > { %16695 = vmatmul.mubr.msk.f32.gmra.mxu0 %vm493_vm4, %v24153_v9 }
 0x682   : > { %16749 = vmatprep.mubr.msk.f32.mxu0 %vm493_vm4, %v23934_v35  ;;  %v24183_v35 = vsel %vm1275_vm3, %v10469_v34, %v10470_v11  ;;  %v24206_v34 = vld [vmem:[%s25385_s10 + $0x40] sm:$0xff]  ;;  %v26614_v11 = vld [vmem:[#allocation35_spill] sm:$0xff] }
 0x683   : > { %16639 = vmatmul.mubr.msk.f32.gmra.mxu1 %vm493_vm4, %v24158_v58  ;;  %26603 = vst [vmem:[#allocation55_spill] sm:$0xff] %v24183_v35 }
 0x684   : > { %16641 = vmatprep.mubr.msk.f32.mxu1 %vm493_vm4, %v24165_v10 }
 0x685   : > { %16750 = vmatmul.mubr.msk.f32.vlgmr.msra.gmra.mxu0 %vm493_vm4, %v23948_v27  ;;  %v26610_v27 = vld [vmem:[#allocation26_spill] sm:$0xff] }
 0x686   : > { %16752 = vmatprep.mubr.msk.f32.mxu0 %vm493_vm4, %v23955_v59  ;;  %16848 = vmatpush3.msra.mxu0 %v23909_v48  ;;  %v26608_v48 = vld [vmem:[#allocation37_spill] sm:$0xff] }
 0x687   : > { %16642 = vmatmul.mubr.msk.f32.gmra.mxu1 %vm493_vm4, %v24175_v8 }
 0x688   : > { %16644 = vmatprep.mubr.msk.f32.mxu1 %vm493_vm4, %v24183_v35 }
 0x689   : > { %16753 = vmatmul.mubr.msk.f32.gmra.mxu0 %vm493_vm4, %v23965_v16 }
 0x68a   : > { %16755 = vmatprep.mubr.msk.f32.mxu0 %vm493_vm4, %v23972_v50 }
 0x68b   : > { %16645 = vmatmul.mubr.msk.f32.gmra.mxu1 %vm493_vm4, %v24191_v21 }
 0x68c   : > { %16699 = vmatprep.mubr.msk.f32.mxu1 %vm493_vm4, %v23466_v61  ;;  %v26605_v61 = vld [vmem:[#allocation50_spill] sm:$0xff] }
 0x68d   : > { %16756 = vmatmul.mubr.msk.f32.gmra.mxu0 %vm493_vm4, %v23982_v26 }
 0x68e   : > { %16758 = vmatprep.mubr.msk.f32.mxu0 %vm493_vm4, %v23989_v22 }
 0x68f   : > { %16700 = vmatmul.mubr.msk.f32.vlgmr.msra.gmra.mxu1 %vm493_vm4, %v23484_v7  ;;  %v26606_v7 = vld [vmem:[#allocation11_spill] sm:$0xff] }
 0x690   : > { %16798 = vmatpush3.msra.mxu1 %v23929_v37  ;;  %16702 = vmatprep.mubr.msk.f32.mxu1 %vm493_vm4, %v23516_v5  ;;  %v26609_v37 = vld [vmem:[#allocation20_spill] sm:$0xff] }
 0x691   : > { %16759 = vmatmul.mubr.msk.f32.gmra.mxu0 %vm493_vm4, %v23999_v43  ;;  %16897 = vmatprep.subr.mxu1 %v24206_v34 }
 0x692   : > { %16761 = vmatprep.mubr.msk.f32.mxu0 %vm493_vm4, %v24008_v14 }
 0x693   : > { %16703 = vmatmul.mubr.msk.f32.gmra.mxu1 %vm493_vm4, %v23519_v47 }
 0x694   : > { %16705 = vmatprep.mubr.msk.f32.mxu1 %vm493_vm4, %v23556_v18 }
 0x695   : > { %16762 = vmatmul.mubr.msk.f32.gmra.mxu0 %vm493_vm4, %v24018_v4 }
 0x696   : > { %16764 = vmatprep.mubr.msk.f32.mxu0 %vm493_vm4, %v24025_v17 }
 0x697   : > { %16706 = vmatmul.mubr.msk.f32.gmra.mxu1 %vm493_vm4, %v23574_v49 }
 0x698   : > { %16708 = vmatprep.mubr.msk.f32.mxu1 %vm493_vm4, %v23609_v57 }
 0x699   : > { %16765 = vmatmul.mubr.msk.f32.gmra.mxu0 %vm493_vm4, %v24035_v24 }
 0x69a   : > { %16767 = vmatprep.mubr.msk.f32.mxu0 %vm493_vm4, %v24042_v63  ;;  %v24341_v63 = vpop.f32.mrf.mxu1 }
 0x69b   : > { %16709 = vmatmul.mubr.msk.f32.gmra.mxu1 %vm493_vm4, %v23612_v38 }
 0x69c   : > { %16711 = vmatprep.mubr.msk.f32.mxu1 %vm493_vm4, %v23640_v55 }
 0x69d   : > { %16768 = vmatmul.mubr.msk.f32.gmra.mxu0 %vm493_vm4, %v24052_v32 }
 0x69e   : > { %16770 = vmatprep.mubr.msk.f32.mxu0 %vm493_vm4, %v24059_v28  ;;  %v26624_v28 = vld [vmem:[#allocation58_spill] sm:$0xff] }
 0x69f   : > { %16712 = vmatmul.mubr.msk.f32.gmra.mxu1 %vm493_vm4, %v26605_v61 }
 0x6a0   : > { %16714 = vmatprep.mubr.msk.f32.mxu1 %vm493_vm4, %v26606_v7 }
 0x6a1   : > { %16771 = vmatmul.mubr.msk.f32.gmra.mxu0 %vm493_vm4, %v24069_v30  ;;  %v11060_v30 = vrot.slane %v24153_v9, 1 }
 0x6a2   : > { %16773 = vmatprep.mubr.msk.f32.mxu0 %vm493_vm4, %v24076_v1 }
 0x6a3   : > { %16715 = vmatmul.mubr.msk.f32.gmra.mxu1 %vm493_vm4, %v26607_v13 }
 0x6a4   : > { %16717 = vmatprep.mubr.msk.f32.mxu1 %vm493_vm4, %v26608_v48 }
 0x6a5   : > { %16774 = vmatmul.mubr.msk.f32.gmra.mxu0 %vm493_vm4, %v24086_v12 }
 0x6a6   : > { %16776 = vmatprep.mubr.msk.f32.mxu0 %vm493_vm4, %v24093_v36  ;;  %v26620_v36 = vld [vmem:[#allocation51_spill] sm:$0xff] }
 0x6a7   : > { %16718 = vmatmul.mubr.msk.f32.gmra.mxu1 %vm493_vm4, %v26609_v37 }
 0x6a8   : > { %16720 = vmatprep.mubr.msk.f32.mxu1 %vm493_vm4, %v26610_v27 }
 0x6a9   : > { %16777 = vmatmul.mubr.msk.f32.gmra.mxu0 %vm493_vm4, %v24103_v52  ;;  %v24302_v52 = vpop.f32.mrf.mxu0 }
 0x6aa   : > { %16779 = vmatprep.mubr.msk.f32.mxu0 %vm493_vm4, %v24110_v53  ;;  %v26616_v53 = vld [vmem:[#allocation41_spill] sm:$0xff] }
 0x6ab   : > { %16721 = vmatmul.mubr.msk.f32.gmra.mxu1 %vm493_vm4, %v26611_v31 }
 0x6ac   : > { %16723 = vmatprep.mubr.msk.f32.mxu1 %vm493_vm4, %v26612_v0 }
 0x6ad   : > { %16780 = vmatmul.mubr.msk.f32.gmra.mxu0 %vm493_vm4, %v24120_v40  ;;  %v26618_v40 = vld [vmem:[#allocation45_spill] sm:$0xff] }
 0x6ae   : > { %16782 = vmatprep.mubr.msk.f32.mxu0 %vm493_vm4, %v24127_v44  ;;  %v26617_v44 = vld [vmem:[#allocation32_spill] sm:$0xff] }
 0x6af   : > { %16724 = vmatmul.mubr.msk.f32.gmra.mxu1 %vm493_vm4, %v26613_v51 }
 0x6b0   : > { %16726 = vmatprep.mubr.msk.f32.mxu1 %vm493_vm4, %v26614_v11 }
 0x6b1   : > { %16783 = vmatmul.mubr.msk.f32.gmra.mxu0 %vm493_vm4, %v24139_v20  ;;  %v11326_v20 = vrot.slane %v24153_v9, 2 }
 0x6b2   : > { %16785 = vmatprep.mubr.msk.f32.mxu0 %vm493_vm4, %v24146_v54  ;;  %v11325_v54 = vrot.slane %v24136_v56, 2 }
 0x6b3   : > { %16727 = vmatmul.mubr.msk.f32.gmra.mxu1 %vm493_vm4, %v26615_v33 }
 0x6b4   : > { %16729 = vmatprep.mubr.msk.f32.mxu1 %vm493_vm4, %v26616_v53  ;;  %v24309_v12 = vsel %vm1275_vm3, %v11325_v54, %v11326_v20  ;;  %v11059_v54 = vrot.slane %v24136_v56, 1 }
 0x6b5   : > { %16786 = vmatmul.mubr.msk.f32.gmra.mxu0 %vm493_vm4, %v24158_v58  ;;  %v26619_v58 = vld [vmem:[#allocation61_spill] sm:$0xff]  ;;  %26621 = vst [vmem:[#allocation82_spill] sm:$0xff] %v24309_v12 }
 0x6b6   : > { %16788 = vmatprep.mubr.msk.f32.mxu0 %vm493_vm4, %v24165_v10  ;;  %v9673_v10 = vld [vmem:[#allocation2 + $0x190] sm:$0x3] }
 0x6b7   : > { %16730 = vmatmul.mubr.msk.f32.gmra.mxu1 %vm493_vm4, %v26617_v44 }
 0x6b8   : > { %16732 = vmatprep.mubr.msk.f32.mxu1 %vm493_vm4, %v26618_v40 }
 0x6b9   : > { %16789 = vmatmul.mubr.msk.f32.gmra.mxu0 %vm493_vm4, %v24175_v8  ;;  %v11328_v8 = vrot.slane %v9673_v10, 2 }
 0x6ba   : > { %16791 = vmatprep.mubr.msk.f32.mxu0 %vm493_vm4, %v24183_v35 }
 0x6bb   : > { %16733 = vmatmul.mubr.msk.f32.gmra.mxu1 %vm493_vm4, %v26619_v58  ;;  %v24318_v1 = vsel %vm1275_vm3, %v11326_v20, %v11328_v8  ;;  %v26625_v8 = vld [vmem:[#allocation24_spill] sm:$0xff] }
 0x6bc   : > { %16735 = vmatprep.mubr.msk.f32.mxu1 %vm493_vm4, %v26620_v36  ;;  %26622 = vst [vmem:[#allocation96_spill] sm:$0xff] %v24318_v1 }
 0x6bd   : > { %16792 = vmatmul.mubr.msk.f32.gmra.mxu0 %vm493_vm4, %v24191_v21 }
 0x6be   : > { %16794 = vmatprep.mubr.msk.f32.mxu0 %vm493_vm4, %v24309_v12  ;;  %v26623_v12 = vld [vmem:[#allocation29_spill] sm:$0xff] }
 0x6bf   : > { %16736 = vmatmul.mubr.msk.f32.gmra.mxu1 %vm493_vm4, %v23867_v62 }
 0x6c0   : > { %v16554_v35 = vpop.f32.mrf.mxu0  ;;  %16738 = vmatprep.mubr.msk.f32.mxu1 %vm493_vm4, %v23872_v46 }
 0x6c1   : > { %16795 = vmatmul.mubr.msk.f32.gmra.mxu0 %vm493_vm4, %v24318_v1  ;;  %v11062_v1 = vrot.slane %v9673_v10, 1  ;;  %v17275_v10 = vld [vmem:[#allocation2 + $0x30] sm:$0xff] }
 0x6c2   : > { %v10245_v21 = vpop.f32.mrf.mxu0  ;;  %16849 = vmatprep.mubr.msk.f32.mxu0 %vm493_vm4, %v23516_v5  ;;  %v24337_v5 = vsel %vm608_vm2, %v11059_v54, %v11060_v30 }
 0x6c3   : > { %16739 = vmatmul.mubr.msk.f32.gmra.mxu1 %vm493_vm4, %v26623_v12 }
 0x6c4   : > { %16741 = vmatprep.mubr.msk.f32.mxu1 %vm493_vm4, %v26624_v28  ;;  %v16557_v32 = vpop.f32.mrf.mxu0 }
 0x6c5   : > { %16850 = vmatmul.mubr.msk.f32.vlgmr.msra.gmra.mxu0 %vm493_vm4, %v23519_v47  ;;  %v24346_v47 = vsel %vm608_vm2, %v11060_v30, %v11062_v1  ;;  %v17276_v30 = vld [vmem:[#allocation2 + $0x38] sm:$0xff] }
 0x6c6   : > { %16852 = vmatprep.mubr.msk.f32.mxu0 %vm493_vm4, %v23556_v18  ;;  %v10255_v20 = vpop.f32.mrf.mxu0 }
 0x6c7   : > { %16742 = vmatmul.mubr.msk.f32.gmra.mxu1 %vm493_vm4, %v26625_v8 }
 0x6c8   : > { %16744 = vmatprep.mubr.msk.f32.mxu1 %vm493_vm4, %v24337_v5  ;;  %v16560_v24 = vpop.f32.mrf.mxu0 }
 0x6c9   : > { %16853 = vmatmul.mubr.msk.f32.gmra.mxu0 %vm493_vm4, %v23574_v49 }
 0x6ca   : > { %16855 = vmatprep.mubr.msk.f32.mxu0 %vm493_vm4, %v23609_v57  ;;  %v16504_v18 = vpop.f32.mrf.mxu1  ;;  %v10265_v17 = vpop.f32.mrf.mxu0 }
 0x6cb   : > { %16745 = vmatmul.mubr.msk.f32.gmra.mxu1 %vm493_vm4, %v24346_v47  ;;  %v24352_v54 = vadd.f32 %v16554_v35, %v16504_v18  ;;  %v17277_v35 = vld [vmem:[#allocation2 + $0x48] sm:$0xff] }
 0x6cc   : > { %16799 = vmatprep.mubr.msk.f32.mxu1 %vm493_vm4, %v17275_v10  ;;  %v9956_v4 = vpop.f32.mrf.mxu1  ;;  %v16563_v14 = vpop.f32.mrf.mxu0 }
 0x6cd   : > { %16856 = vmatmul.mubr.msk.f32.gmra.mxu0 %vm493_vm4, %v23612_v38  ;;  %v24357_v49 = vadd.f32 %v10245_v21, %v9956_v4  ;;  %v17278_v21 = vld [vmem:[#allocation2 + $0x50] sm:$0xff] }
 0x6ce   : > { %16858 = vmatprep.mubr.msk.f32.mxu0 %vm493_vm4, %v23640_v55  ;;  %v10275_v57 = vpop.f32.mrf.mxu0 }
 0x6cf   : > { %16800 = vmatmul.mubr.msk.f32.vlgmr.msra.gmra.mxu1 %vm493_vm4, %v17276_v30  ;;  %v16507_v1 = vpop.f32.mrf.mxu1 }
 0x6d0   : > { %16898 = vmatpush3.msra.mxu1 %v24206_v34  ;;  %16802 = vmatprep.mubr.msk.f32.mxu1 %vm493_vm4, %v17277_v35  ;;  %v24364_v18 = vadd.f32 %v16557_v32, %v16507_v1  ;;  %v17279_v34 = vld [vmem:[#allocation2 + $0x60] sm:$0xff]  ;;  %v17281_v1 = vld [vmem:[#allocation2 + $0x78] sm:$0xff] }
 0x6d1   : > { %v16566_v10 = vpop.f32.mrf.mxu0  ;;  %16859 = vmatmul.mubr.msk.f32.gmra.mxu0 %vm493_vm4, %v26605_v61  ;;  %v9966_v38 = vpop.f32.mrf.mxu1 }
 0x6d2   : > { %v24368_v4 = vadd.f32 %v10255_v20, %v9966_v38  ;;  %16861 = vmatprep.mubr.msk.f32.mxu0 %vm493_vm4, %v26606_v7  ;;  %v17280_v20 = vld [vmem:[#allocation2 + $0x68] sm:$0xff] }
 0x6d3   : > { %v10285_v55 = vpop.f32.mrf.mxu0  ;;  %16803 = vmatmul.mubr.msk.f32.gmra.mxu1 %vm493_vm4, %v17278_v21  ;;  %v17283_v21 = vld [vmem:[#allocation2 + $0x90] sm:$0xff] }
 0x6d4   : > { %16805 = vmatprep.mubr.msk.f32.mxu1 %vm493_vm4, %v17279_v34 }
 0x6d5   : > { %v16569_v30 = vpop.f32.mrf.mxu0  ;;  %16862 = vmatmul.mubr.msk.f32.gmra.mxu0 %vm493_vm4, %v26607_v13 }
 0x6d6   : > { %v16510_v32 = vpop.f32.mrf.mxu1  ;;  %16864 = vmatprep.mubr.msk.f32.mxu0 %vm493_vm4, %v26608_v48  ;;  %v17282_v48 = vld [vmem:[#allocation2 + $0x80] sm:$0xff] }
 0x6d7   : > { %v10295_v61 = vpop.f32.mrf.mxu0  ;;  %16806 = vmatmul.mubr.msk.f32.gmra.mxu1 %vm493_vm4, %v17280_v20  ;;  %v24379_v7 = vadd.f32 %v16560_v24, %v16510_v32 }
 0x6d8   : > { %16808 = vmatprep.mubr.msk.f32.mxu1 %vm493_vm4, %v17281_v1  ;;  %v9976_v35 = vpop.f32.mrf.mxu1  ;;  %v17285_v1 = vld [vmem:[#allocation2 + $0xa8] sm:$0xff] }
 0x6d9   : > { %v24382_v38 = vadd.f32 %v10265_v17, %v9976_v35  ;;  %16865 = vmatmul.mubr.msk.f32.gmra.mxu0 %vm493_vm4, %v26609_v37 }
 0x6da   : > { %16867 = vmatprep.mubr.msk.f32.mxu0 %vm493_vm4, %v26610_v27  ;;  %v16572_v13 = vpop.f32.mrf.mxu0  ;;  %v17284_v27 = vld [vmem:[#allocation2 + $0x98] sm:$0xff] }
 0x6db   : > { %16809 = vmatmul.mubr.msk.f32.gmra.mxu1 %vm493_vm4, %v17282_v48 }
 0x6dc   : > { %16811 = vmatprep.mubr.msk.f32.mxu1 %vm493_vm4, %v17283_v21  ;;  %v16513_v24 = vpop.f32.mrf.mxu1  ;;  %v10305_v34 = vpop.f32.mrf.mxu0 }
 0x6dd   : > { %v24390_v32 = vadd.f32 %v16563_v14, %v16513_v24  ;;  %16868 = vmatmul.mubr.msk.f32.gmra.mxu0 %vm493_vm4, %v26611_v31 }
 0x6de   : > { %v9986_v17 = vpop.f32.mrf.mxu1  ;;  %16870 = vmatprep.mubr.msk.f32.mxu0 %vm493_vm4, %v26612_v0  ;;  %v16575_v37 = vpop.f32.mrf.mxu0  ;;  %v17286_v0 = vld [vmem:[#allocation2 + $0xb0] sm:$0xff] }
 0x6df   : > { %16812 = vmatmul.mubr.msk.f32.gmra.mxu1 %vm493_vm4, %v17284_v27  ;;  %v24397_v20 = vadd.f32 %v10275_v57, %v9986_v17 }
 0x6e0   : > { %16814 = vmatprep.mubr.msk.f32.mxu1 %vm493_vm4, %v17285_v1  ;;  %v10315_v35 = vpop.f32.mrf.mxu0  ;;  %v24471_v1 = vld [vmem:[#allocation2 + $0x1a8] sm:$0x3] }
 0x6e1   : > { %v16516_v48 = vpop.f32.mrf.mxu1  ;;  %16871 = vmatmul.mubr.msk.f32.gmra.mxu0 %vm493_vm4, %v26613_v51 }
 0x6e2   : > { %v24402_v14 = vadd.f32 %v16566_v10, %v16516_v48  ;;  %16873 = vmatprep.mubr.msk.f32.mxu0 %vm493_vm4, %v26614_v11  ;;  %v16578_v31 = vpop.f32.mrf.mxu0 }
 0x6e3   : > { %16815 = vmatmul.mubr.msk.f32.gmra.mxu1 %vm493_vm4, %v17286_v0  ;;  %v9996_v21 = vpop.f32.mrf.mxu1  ;;  %v26626_v0 = vld [vmem:[#allocation31_spill] sm:$0xff] }
 0x6e4   : > { %16817 = vmatprep.mubr.msk.f32.mxu1 %vm493_vm4, %v23618_v15  ;;  %v24409_v57 = vadd.f32 %v10285_v55, %v9996_v21  ;;  %v10325_v24 = vpop.f32.mrf.mxu0 }
 0x6e5   : > { %16874 = vmatmul.mubr.msk.f32.gmra.mxu0 %vm493_vm4, %v26615_v33 }
 0x6e6   : > { %16876 = vmatprep.mubr.msk.f32.mxu0 %vm493_vm4, %v26616_v53 }
 0x6e7   : > { %v16519_v51 = vpop.f32.mrf.mxu1  ;;  %16818 = vmatmul.mubr.msk.f32.gmra.mxu1 %vm493_vm4, %v23626_v42  ;;  %v16581_v11 = vpop.f32.mrf.mxu0 }
 0x6e8   : > { %v24417_v10 = vadd.f32 %v16569_v30, %v16519_v51  ;;  %16820 = vmatprep.mubr.msk.f32.mxu1 %vm493_vm4, %v23652_v19 }
 0x6e9   : > { %v10006_v15 = vpop.f32.mrf.mxu1  ;;  %16877 = vmatmul.mubr.msk.f32.gmra.mxu0 %vm493_vm4, %v26617_v44  ;;  %v10335_v55 = vpop.f32.mrf.mxu0 }
 0x6ea   : > { %v24423_v17 = vadd.f32 %v10295_v61, %v10006_v15  ;;  %16879 = vmatprep.mubr.msk.f32.mxu0 %vm493_vm4, %v26618_v40 }
 0x6eb   : > { %v16522_v53 = vpop.f32.mrf.mxu1  ;;  %16821 = vmatmul.mubr.msk.f32.gmra.mxu1 %vm493_vm4, %v23654_v3 }
 0x6ec   : > { %v16584_v42 = vpop.f32.mrf.mxu0  ;;  %v24429_v33 = vadd.f32 %v16572_v13, %v16522_v53  ;;  %16823 = vmatprep.mubr.msk.f32.mxu1 %vm493_vm4, %v23698_v39  ;;  %v24459_v13 = vld [vmem:[#allocation2 + $0x1a0] sm:$0xff]  ;;  %v26628_v53 = vld [vmem:[#allocation43_spill] sm:$0xff] }
 0x6ed   : > { %v10016_v19 = vpop.f32.mrf.mxu1  ;;  %16880 = vmatmul.mubr.msk.f32.gmra.mxu0 %vm493_vm4, %v26619_v58  ;;  %v11856_v27 = vrot.slane %v24459_v13, 1 }
 0x6ee   : > { %v24435_v44 = vadd.f32 %v10305_v34, %v10016_v19  ;;  %16882 = vmatprep.mubr.msk.f32.mxu0 %vm493_vm4, %v26620_v36  ;;  %v10345_v3 = vpop.f32.mrf.mxu0 }
 0x6ef   : > { %v16525_v40 = vpop.f32.mrf.mxu1  ;;  %16824 = vmatmul.mubr.msk.f32.gmra.mxu1 %vm493_vm4, %v23700_v6 }
 0x6f0   : > { %v24441_v30 = vadd.f32 %v16575_v37, %v16525_v40  ;;  %16826 = vmatprep.mubr.msk.f32.mxu1 %vm493_vm4, %v23729_v29  ;;  %v24457_v29 = vld [vmem:[#allocation2 + $0x198] sm:$0xff] }
 0x6f1   : > { %v10026_v39 = vpop.f32.mrf.mxu1  ;;  %16883 = vmatmul.mubr.msk.f32.gmra.mxu0 %vm493_vm4, %v23867_v62 }
 0x6f2   : > { %v24447_v58 = vadd.f32 %v10315_v35, %v10026_v39  ;;  %16885 = vmatprep.mubr.msk.f32.mxu0 %vm493_vm4, %v23872_v46 }
 0x6f3   : > { %v16528_v36 = vpop.f32.mrf.mxu1  ;;  %16827 = vmatmul.mubr.msk.f32.gmra.mxu1 %vm493_vm4, %v23731_v45  ;;  %v16587_v6 = vpop.f32.mrf.mxu0 }
 0x6f4   : > { %v24453_v61 = vadd.f32 %v16578_v31, %v16528_v36  ;;  %16829 = vmatprep.mubr.msk.f32.mxu1 %vm493_vm4, %v23778_v60  ;;  %v11855_v60 = vrot.slane %v24457_v29, 1 }
 0x6f5   : > { %v10036_v62 = vpop.f32.mrf.mxu1  ;;  %16886 = vmatmul.mubr.msk.f32.gmra.mxu0 %vm493_vm4, %v26623_v12  ;;  %v10355_v34 = vpop.f32.mrf.mxu0 }
 0x6f6   : > { %v24463_v46 = vadd.f32 %v10325_v24, %v10036_v62  ;;  %16888 = vmatprep.mubr.msk.f32.mxu0 %vm493_vm4, %v26624_v28  ;;  %v11857_v21 = vsel %vm608_vm2, %v11855_v60, %v11856_v27 }
 0x6f7   : > { %v16531_v45 = vpop.f32.mrf.mxu1  ;;  %16830 = vmatmul.mubr.msk.f32.gmra.mxu1 %vm493_vm4, %v23780_v41  ;;  %v16590_v37 = vpop.f32.mrf.mxu0  ;;  %v11858_v41 = vrot.slane %v24471_v1, 1 }
 0x6f8   : > { %v24473_v35 = vadd.f32 %v16581_v11, %v16531_v45  ;;  %16832 = vmatprep.mubr.msk.f32.mxu1 %vm493_vm4, %v23799_v23  ;;  %v26627_v23 = vld [vmem:[#allocation72_spill] sm:$0xff] }
 0x6f9   : > { %v10046_v12 = vpop.f32.mrf.mxu1  ;;  %16889 = vmatmul.mubr.msk.f32.gmra.mxu0 %vm493_vm4, %v26625_v8  ;;  %v10365_v28 = vpop.f32.mrf.mxu0  ;;  %v11859_v15 = vsel %vm608_vm2, %v11856_v27, %v11858_v41 }
 0x6fa   : > { %v24479_v48 = vadd.f32 %v10335_v55, %v10046_v12  ;;  %16891 = vmatprep.mubr.msk.f32.mxu0 %vm493_vm4, %v24337_v5 }
 0x6fb   : > { %v16534_v31 = vpop.f32.mrf.mxu1  ;;  %16833 = vmatmul.mubr.msk.f32.gmra.mxu1 %vm493_vm4, %v26626_v0 }
 0x6fc   : > { %v24487_v24 = vadd.f32 %v16584_v42, %v16534_v31  ;;  %16835 = vmatprep.mubr.msk.f32.mxu1 %vm493_vm4, %v26627_v23  ;;  %v16593_v8 = vpop.f32.mrf.mxu0  ;;  %v10236_v23 = vadd.f32 %v24302_v52, %v24341_v63 }
 0x6fd   : > { %v10056_v51 = vpop.f32.mrf.mxu1  ;;  %16892 = vmatmul.mubr.msk.f32.gmra.mxu0 %vm493_vm4, %v24346_v47 }
 0x6fe   : > { %v24493_v11 = vadd.f32 %v10345_v3, %v10056_v51  ;;  %v10375_v5 = vpop.f32.mrf.mxu0  ;;  %16894 = vmatprep.mubr.msk.f32.mxu0 %vm493_vm4, %v11857_v21 }
 0x6ff   : > { %v16537_v55 = vpop.f32.mrf.mxu1  ;;  %16836 = vmatmul.mubr.msk.f32.gmra.mxu1 %vm493_vm4, %v26628_v53 }
 0x700   : > { %v24499_v42 = vadd.f32 %v16587_v6, %v16537_v55  ;;  %16838 = vmatprep.mubr.msk.f32.mxu1 %vm493_vm4, %v23860_v25 }
 0x701   : > { %v10066_v19 = vpop.f32.mrf.mxu1  ;;  %v16596_v40 = vpop.f32.mrf.mxu0  ;;  %16895 = vmatmul.mubr.msk.f32.gmra.mxu0 %vm493_vm4, %v11859_v15 }
 0x702   : > { %v24504_v47 = vadd.f32 %v10355_v34, %v10066_v19 }
 0x703   : > { %v16540_v3 = vpop.f32.mrf.mxu1  ;;  %16839 = vmatmul.mubr.msk.f32.gmra.mxu1 %vm493_vm4, %v23862_v2  ;;  %v10385_v39 = vpop.f32.mrf.mxu0 }
 0x704   : > { %v24508_v36 = vadd.f32 %v16590_v37, %v16540_v3  ;;  %16841 = vmatprep.mubr.msk.f32.mxu1 %vm493_vm4, %v24136_v56 }
 0x705   : > { %v10076_v6 = vpop.f32.mrf.mxu1  ;;  %v16651_v62 = vpop.f32.mrf.mxu0 }
 0x706   : > { %v24512_v45 = vadd.f32 %v10365_v28, %v10076_v6 }
 0x707   : > { %v16543_v25 = vpop.f32.mrf.mxu1  ;;  %16842 = vmatmul.mubr.msk.f32.gmra.mxu1 %vm493_vm4, %v24153_v9  ;;  %v10867_v34 = vpop.f32.mrf.mxu0 }
 0x708   : > { %v24516_v60 = vadd.f32 %v16593_v8, %v16543_v25  ;;  %16844 = vmatprep.mubr.msk.f32.mxu1 %vm493_vm4, %v24457_v29  ;;  %v26629_v8 = vld [vmem:[#allocation12_spill] sm:$0xff] }
 0x709   : > { %v10086_v2 = vpop.f32.mrf.mxu1  ;;  %v16654_v37 = vpop.f32.mrf.mxu0 }
 0x70a   : > { %v24520_v27 = vadd.f32 %v10375_v5, %v10086_v2 }
 0x70b   : > { %v16546_v12 = vpop.f32.mrf.mxu1  ;;  %16845 = vmatmul.mubr.msk.f32.gmra.mxu1 %vm493_vm4, %v24459_v13  ;;  %v10877_v56 = vpop.f32.mrf.mxu0 }
 0x70c   : > { %v24524_v28 = vadd.f32 %v16596_v40, %v16546_v12  ;;  %16899 = vmatprep.mubr.msk.f32.mxu1 %vm493_vm4, %v23955_v59 }
 0x70d   : > { %v10096_v9 = vpop.f32.mrf.mxu1  ;;  %v16657_v41 = vpop.f32.mrf.mxu0 }
 0x70e   : > { %v24528_v31 = vadd.f32 %v10385_v39, %v10096_v9  ;;  %v26632_v9 = vld [vmem:[#allocation49_spill] sm:$0xff] }
 0x70f   : > { %v16601_v0 = vpop.f32.mrf.mxu1  ;;  %16900 = vmatmul.mubr.msk.f32.vlgmr.msra.gmra.mxu1 %vm493_vm4, %v23965_v16  ;;  %v10887_v21 = vpop.f32.mrf.mxu0 }
 0x710   : > { %v10764_v51 = vadd.f32 %v16601_v0, %v26629_v8  ;;  %16902 = vmatprep.mubr.msk.f32.mxu1 %vm493_vm4, %v23972_v50 }
 0x711   : > { %v10604_v5 = vpop.f32.mrf.mxu1  ;;  %v16660_v15 = vpop.f32.mrf.mxu0 }
 0x712   : > { %v10763_v59 = vadd.f32 %v10604_v5, %v10236_v23  ;;  %v24537_v55 = vadd.f32 %v16651_v62, %v10764_v51  ;;  %v26630_v62 = vld [vmem:[#allocation70_spill] sm:$0xff] }
 0x713   : > { %v16604_v53 = vpop.f32.mrf.mxu1  ;;  %16903 = vmatmul.mubr.msk.f32.gmra.mxu1 %vm493_vm4, %v23982_v26  ;;  %v10897_v19 = vpop.f32.mrf.mxu0 }
 0x714   : > { %v10766_v16 = vadd.f32 %v16604_v53, %v24352_v54  ;;  %16905 = vmatprep.mubr.msk.f32.mxu1 %vm493_vm4, %v23989_v22  ;;  %v24544_v63 = vadd.f32 %v10867_v34, %v10763_v59  ;;  %v26634_v59 = vld [vmem:[#allocation48_spill] sm:$0xff] }
 0x715   : > { %v10614_v52 = vpop.f32.mrf.mxu1  ;;  %v16663_v40 = vpop.f32.mrf.mxu0 }
 0x716   : > { %v10765_v50 = vadd.f32 %v10614_v52, %v24357_v49  ;;  %v24547_v3 = vadd.f32 %v16654_v37, %v10766_v16  ;;  %v26631_v37 = vld [vmem:[#allocation60_spill] sm:$0xff] }
 0x717   : > { %v16607_v39 = vpop.f32.mrf.mxu1  ;;  %16906 = vmatmul.mubr.msk.f32.gmra.mxu1 %vm493_vm4, %v23999_v43  ;;  %v10907_v6 = vpop.f32.mrf.mxu0 }
 0x718   : > { %v10768_v26 = vadd.f32 %v16607_v39, %v24364_v18  ;;  %16908 = vmatprep.mubr.msk.f32.mxu1 %vm493_vm4, %v26630_v62  ;;  %v24554_v54 = vadd.f32 %v10877_v56, %v10765_v50 }
 0x719   : > { %v10624_v22 = vpop.f32.mrf.mxu1  ;;  %v16666_v25 = vpop.f32.mrf.mxu0 }
 0x71a   : > { %v10767_v34 = vadd.f32 %v10624_v22, %v24368_v4  ;;  %v24557_v2 = vadd.f32 %v16657_v41, %v10768_v26  ;;  %v26633_v41 = vld [vmem:[#allocation36_spill] sm:$0xff] }
 0x71b   : > { %v16610_v49 = vpop.f32.mrf.mxu1  ;;  %16909 = vmatmul.mubr.msk.f32.gmra.mxu1 %vm493_vm4, %v26631_v37  ;;  %v10917_v12 = vpop.f32.mrf.mxu0  ;;  %v26636_v26 = vld [vmem:[#allocation44_spill] sm:$0xff] }
 0x71c   : > { %v10770_v43 = vadd.f32 %v16610_v49, %v24379_v7  ;;  %16911 = vmatprep.mubr.msk.f32.mxu1 %vm493_vm4, %v26632_v9  ;;  %v24564_v18 = vadd.f32 %v10887_v21, %v10767_v34 }
 0x71d   : > { %v10634_v56 = vpop.f32.mrf.mxu1  ;;  %v16669_v0 = vpop.f32.mrf.mxu0 }
 0x71e   : > { %v10769_v23 = vadd.f32 %v10634_v56, %v24382_v38  ;;  %v24567_v8 = vadd.f32 %v16660_v15, %v10770_v43  ;;  %v26635_v15 = vld [vmem:[#allocation21_spill] sm:$0xff]  ;;  %v26638_v43 = vld [vmem:[#allocation99_spill] sm:$0xff] }
 0x71f   : > { %v16613_v4 = vpop.f32.mrf.mxu1  ;;  %16912 = vmatmul.mubr.msk.f32.gmra.mxu1 %vm493_vm4, %v26633_v41  ;;  %v10927_v51 = vpop.f32.mrf.mxu0 }
 0x720   : > { %v10772_v5 = vadd.f32 %v16613_v4, %v24390_v32  ;;  %16914 = vmatprep.mubr.msk.f32.mxu1 %vm493_vm4, %v26634_v59  ;;  %v24574_v7 = vadd.f32 %v10897_v19, %v10769_v23 }
 0x721   : > { %v10644_v21 = vpop.f32.mrf.mxu1  ;;  %v16672_v53 = vpop.f32.mrf.mxu0 }
 0x722   : > { %v10771_v16 = vadd.f32 %v10644_v21, %v24397_v20  ;;  %v24577_v52 = vadd.f32 %v16663_v40, %v10772_v5  ;;  %v26637_v40 = vld [vmem:[#allocation18_spill] sm:$0xff]  ;;  %v26640_v5 = vld [vmem:[#allocation39_spill] sm:$0xff] }
 0x723   : > { %v16616_v38 = vpop.f32.mrf.mxu1  ;;  %16915 = vmatmul.mubr.msk.f32.gmra.mxu1 %vm493_vm4, %v26635_v15  ;;  %v10937_v50 = vpop.f32.mrf.mxu0 }
 0x724   : > { %v10774_v39 = vadd.f32 %v16616_v38, %v24402_v14  ;;  %16917 = vmatprep.mubr.msk.f32.mxu1 %vm493_vm4, %v26636_v26  ;;  %v24584_v32 = vadd.f32 %v10907_v6, %v10771_v16 }
 0x725   : > { %v10654_v19 = vpop.f32.mrf.mxu1  ;;  %v16675_v62 = vpop.f32.mrf.mxu0 }
 0x726   : > { %v10773_v22 = vadd.f32 %v10654_v19, %v24409_v57  ;;  %v24587_v34 = vadd.f32 %v16666_v25, %v10774_v39  ;;  %v26639_v25 = vld [vmem:[#allocation100_spill] sm:$0xff]  ;;  %v26642_v39 = vld [vmem:[#allocation42_spill] sm:$0xff] }
 0x727   : > { %v16619_v20 = vpop.f32.mrf.mxu1  ;;  %16918 = vmatmul.mubr.msk.f32.gmra.mxu1 %vm493_vm4, %v26637_v40  ;;  %v10947_v49 = vpop.f32.mrf.mxu0 }
 0x728   : > { %v10776_v37 = vadd.f32 %v16619_v20, %v24417_v10  ;;  %16920 = vmatprep.mubr.msk.f32.mxu1 %vm493_vm4, %v26638_v43  ;;  %v24594_v14 = vadd.f32 %v10917_v12, %v10773_v22 }
 0x729   : > { %v10664_v6 = vpop.f32.mrf.mxu1  ;;  %v16678_v9 = vpop.f32.mrf.mxu0 }
 0x72a   : > { %v10775_v56 = vadd.f32 %v10664_v6, %v24423_v17  ;;  %v24597_v23 = vadd.f32 %v16669_v0, %v10776_v37  ;;  %v26641_v0 = vld [vmem:[#allocation64_spill] sm:$0xff] }
 0x72b   : > { %v16622_v57 = vpop.f32.mrf.mxu1  ;;  %16921 = vmatmul.mubr.msk.f32.gmra.mxu1 %vm493_vm4, %v26639_v25  ;;  %v10957_v4 = vpop.f32.mrf.mxu0  ;;  %v26644_v37 = vld [vmem:[#allocation56_spill] sm:$0xff] }
 0x72c   : > { %v10778_v41 = vadd.f32 %v16622_v57, %v24429_v33  ;;  %16923 = vmatprep.mubr.msk.f32.mxu1 %vm493_vm4, %v26640_v5  ;;  %v24604_v10 = vadd.f32 %v10927_v51, %v10775_v56 }
 0x72d   : > { %v10674_v12 = vpop.f32.mrf.mxu1  ;;  %v16681_v59 = vpop.f32.mrf.mxu0 }
 0x72e   : > { %v10777_v21 = vadd.f32 %v10674_v12, %v24435_v44  ;;  %v24607_v16 = vadd.f32 %v16672_v53, %v10778_v41  ;;  %v26643_v53 = vld [vmem:[#allocation68_spill] sm:$0xff]  ;;  %v26646_v41 = vld [vmem:[#allocation53_spill] sm:$0xff] }
 0x72f   : > { %v16625_v17 = vpop.f32.mrf.mxu1  ;;  %16924 = vmatmul.mubr.msk.f32.gmra.mxu1 %vm493_vm4, %v26641_v0  ;;  %v10967_v38 = vpop.f32.mrf.mxu0 }
 0x730   : > { %v10780_v15 = vadd.f32 %v16625_v17, %v24441_v30  ;;  %16926 = vmatprep.mubr.msk.f32.mxu1 %vm493_vm4, %v26642_v39  ;;  %v24614_v33 = vadd.f32 %v10937_v50, %v10777_v21 }
 0x731   : > { %v10684_v51 = vpop.f32.mrf.mxu1  ;;  %v16684_v26 = vpop.f32.mrf.mxu0 }
 0x732   : > { %v10779_v19 = vadd.f32 %v10684_v51, %v24447_v58  ;;  %v24617_v22 = vadd.f32 %v16675_v62, %v10780_v15  ;;  %v26645_v62 = vld [vmem:[#allocation47_spill] sm:$0xff]  ;;  %v26648_v15 = vld [vmem:[#allocation97_spill] sm:$0xff] }
 0x733   : > { %v16628_v44 = vpop.f32.mrf.mxu1  ;;  %16927 = vmatmul.mubr.msk.f32.gmra.mxu1 %vm493_vm4, %v26643_v53  ;;  %v10977_v20 = vpop.f32.mrf.mxu0 }
 0x734   : > { %v10782_v40 = vadd.f32 %v16628_v44, %v24453_v61  ;;  %16929 = vmatprep.mubr.msk.f32.mxu1 %vm493_vm4, %v26644_v37  ;;  %v24624_v30 = vadd.f32 %v10947_v49, %v10779_v19 }
 0x735   : > { %v10694_v50 = vpop.f32.mrf.mxu1  ;;  %v16687_v43 = vpop.f32.mrf.mxu0 }
 0x736   : > { %v10781_v6 = vadd.f32 %v10694_v50, %v24463_v46  ;;  %v24627_v56 = vadd.f32 %v16678_v9, %v10782_v40  ;;  %v26647_v9 = vld [vmem:[#allocation52_spill] sm:$0xff]  ;;  %v26650_v40 = vld [vmem:[#allocation55_spill] sm:$0xff] }
 0x737   : > { %v16631_v58 = vpop.f32.mrf.mxu1  ;;  %16930 = vmatmul.mubr.msk.f32.gmra.mxu1 %vm493_vm4, %v26645_v62  ;;  %v10987_v57 = vpop.f32.mrf.mxu0  ;;  %v26651_v62 = vld [vmem:[#allocation57_spill] sm:$0xff] }
 0x738   : > { %v10784_v25 = vadd.f32 %v16631_v58, %v24473_v35  ;;  %16932 = vmatprep.mubr.msk.f32.mxu1 %vm493_vm4, %v26646_v41  ;;  %v24634_v61 = vadd.f32 %v10957_v4, %v10781_v6  ;;  %v26652_v41 = vld [vmem:[#allocation82_spill] sm:$0xff] }
 0x739   : > { %v10704_v49 = vpop.f32.mrf.mxu1  ;;  %v16690_v5 = vpop.f32.mrf.mxu0 }
 0x73a   : > { %v10783_v12 = vadd.f32 %v10704_v49, %v24479_v48  ;;  %v24637_v21 = vadd.f32 %v16681_v59, %v10784_v25  ;;  %v26649_v59 = vld [vmem:[#allocation73_spill] sm:$0xff] }
 0x73b   : > { %v16634_v46 = vpop.f32.mrf.mxu1  ;;  %16933 = vmatmul.mubr.msk.f32.gmra.mxu1 %vm493_vm4, %v26647_v9  ;;  %v10997_v17 = vpop.f32.mrf.mxu0  ;;  %v26653_v9 = vld [vmem:[#allocation96_spill] sm:$0xff] }
 0x73c   : > { %v10786_v0 = vadd.f32 %v16634_v46, %v24487_v24  ;;  %16935 = vmatprep.mubr.msk.f32.mxu1 %vm493_vm4, %v26648_v15  ;;  %v24644_v35 = vadd.f32 %v10967_v38, %v10783_v12  ;;  %v12121_v38 = vrot.slane %v24457_v29, 2  ;;  %v12124_v29 = vrot.slane %v24471_v1, 2 }
 0x73d   : > { %v10714_v4 = vpop.f32.mrf.mxu1  ;;  %v16693_v39 = vpop.f32.mrf.mxu0 }
 0x73e   : > { %v10785_v51 = vadd.f32 %v10714_v4, %v24493_v11  ;;  %v24647_v19 = vadd.f32 %v16684_v26, %v10786_v0  ;;  %v12122_v11 = vrot.slane %v24459_v13, 2 }
 0x73f   : > { %v16637_v48 = vpop.f32.mrf.mxu1  ;;  %16936 = vmatmul.mubr.msk.f32.gmra.mxu1 %vm493_vm4, %v26649_v59  ;;  %v11007_v44 = vpop.f32.mrf.mxu0 }
 0x740   : > { %v10788_v53 = vadd.f32 %v16637_v48, %v24499_v42  ;;  %16938 = vmatprep.mubr.msk.f32.mxu1 %vm493_vm4, %v26650_v40  ;;  %v24654_v24 = vadd.f32 %v10977_v20, %v10785_v51  ;;  %v12123_v13 = vsel %vm1275_vm3, %v12121_v38, %v12122_v11  ;;  %v12125_v1 = vsel %vm1275_vm3, %v12122_v11, %v12124_v29 }
 0x741   : > { %v10724_v37 = vpop.f32.mrf.mxu1  ;;  %v16696_v50 = vpop.f32.mrf.mxu0 }
 0x742   : > { %v10787_v26 = vadd.f32 %v10724_v37, %v24504_v47  ;;  %v24659_v6 = vadd.f32 %v16687_v43, %v10788_v53 }
 0x743   : > { %v16640_v58 = vpop.f32.mrf.mxu1  ;;  %16939 = vmatmul.mubr.msk.f32.gmra.mxu1 %vm493_vm4, %v26651_v62  ;;  %v11017_v42 = vpop.f32.mrf.mxu0 }
 0x744   : > { %v10790_v25 = vadd.f32 %v16640_v58, %v24508_v36  ;;  %16941 = vmatprep.mubr.msk.f32.mxu1 %vm493_vm4, %v26652_v41  ;;  %v24667_v20 = vadd.f32 %v10987_v57, %v10787_v26 }
 0x745   : > { %v10734_v49 = vpop.f32.mrf.mxu1  ;;  %v16751_v47 = vpop.f32.mrf.mxu0 }
 0x746   : > { %v10789_v43 = vadd.f32 %v10734_v49, %v24512_v45  ;;  %v24671_v12 = vadd.f32 %v16690_v5, %v10790_v25 }
 0x747   : > { %v16643_v46 = vpop.f32.mrf.mxu1  ;;  %16942 = vmatmul.mubr.msk.f32.gmra.mxu1 %vm493_vm4, %v26653_v9  ;;  %v11400_v36 = vpop.f32.mrf.mxu0 }
 0x748   : > { %v10792_v0 = vadd.f32 %v16643_v46, %v24516_v60  ;;  %16944 = vmatprep.mubr.msk.f32.mxu1 %vm493_vm4, %v12123_v13  ;;  %v24678_v57 = vadd.f32 %v10997_v17, %v10789_v43 }
 0x749   : > { %v10744_v15 = vpop.f32.mrf.mxu1  ;;  %v24680_v4 = vpop.f32.mrf.mxu0 }
 0x74a   : > { %v10791_v45 = vadd.f32 %v10744_v15, %v24520_v27  ;;  %v24683_v5 = vadd.f32 %v16693_v39, %v10792_v0 }
 0x74b   : > { %v16646_v51 = vpop.f32.mrf.mxu1  ;;  %16945 = vmatmul.mubr.msk.f32.gmra.mxu1 %vm493_vm4, %v12125_v1  ;;  %v24686_v48 = vpop.f32.mrf.mxu0 }
 0x74c   : > { %v10794_v60 = vadd.f32 %v16646_v51, %v24524_v28  ;;  %v24689_v59 = vadd.f32 %v11007_v44, %v10791_v45 }
 0x74d   : > { %v10754_v53 = vpop.f32.mrf.mxu1  ;;  %v16757_v40 = vpop.f32.mrf.mxu0 }
 0x74e   : > { %v10793_v17 = vadd.f32 %v10754_v53, %v24528_v31  ;;  %v24692_v38 = vadd.f32 %v16696_v50, %v10794_v60 }
 0x74f   : > { %v16701_v37 = vpop.f32.mrf.mxu1  ;;  %v11420_v11 = vpop.f32.mrf.mxu0 }
 0x750   : > { %v11294_v27 = vadd.f32 %v16701_v37, %v24537_v55  ;;  %v24695_v39 = vadd.f32 %v11017_v42, %v10793_v17 }
 0x751   : > { %v11134_v26 = vpop.f32.mrf.mxu1  ;;  %v24697_v58 = vpop.f32.mrf.mxu0 }
 0x752   : > { %v11293_v62 = vadd.f32 %v11134_v26, %v24544_v63  ;;  %v24700_v28 = vadd.f32 %v16751_v47, %v11294_v27 }
 0x753   : > { %v16704_v44 = vpop.f32.mrf.mxu1  ;;  %v24702_v25 = vpop.f32.mrf.mxu0 }
 0x754   : > { %v24705_v31 = vadd.f32 %v16704_v44, %v24547_v3  ;;  %v24707_v50 = vadd.f32 %v11400_v36, %v11293_v62 }
 0x755   : > { %v11144_v41 = vpop.f32.mrf.mxu1  ;;  %v16763_v29 = vpop.f32.mrf.mxu0 }
 0x756   : > { %v24710_v55 = vadd.f32 %v11144_v41, %v24554_v54 }
 0x757   : > { %v16707_v42 = vpop.f32.mrf.mxu1  ;;  %v11440_v49 = vpop.f32.mrf.mxu0 }
 0x758   : > { %v11298_v13 = vadd.f32 %v16707_v42, %v24557_v2 }
 0x759   : > { %v11154_v63 = vpop.f32.mrf.mxu1  ;;  %v24713_v47 = vpop.f32.mrf.mxu0 }
 0x75a   : > { %v11297_v43 = vadd.f32 %v11154_v63, %v24564_v18  ;;  %v24716_v46 = vadd.f32 %v16757_v40, %v11298_v13 }
 0x75b   : > { %v16710_v3 = vpop.f32.mrf.mxu1  ;;  %v24718_v9 = vpop.f32.mrf.mxu0 }
 0x75c   : > { %v24721_v36 = vadd.f32 %v16710_v3, %v24567_v8  ;;  %v24723_v0 = vadd.f32 %v11420_v11, %v11297_v43 }
 0x75d   : > { %v11164_v54 = vpop.f32.mrf.mxu1  ;;  %v16769_v1 = vpop.f32.mrf.mxu0 }
 0x75e   : > { %v24726_v15 = vadd.f32 %v11164_v54, %v24574_v7 }
 0x75f   : > { %v16713_v2 = vpop.f32.mrf.mxu1  ;;  %v11460_v45 = vpop.f32.mrf.mxu0 }
 0x760   : > { %v11302_v51 = vadd.f32 %v16713_v2, %v24577_v52 }
 0x761   : > { %v11174_v18 = vpop.f32.mrf.mxu1  ;;  %v24729_v60 = vpop.f32.mrf.mxu0 }
 0x762   : > { %v11301_v53 = vadd.f32 %v11174_v18, %v24584_v32  ;;  %v24732_v40 = vadd.f32 %v16763_v29, %v11302_v51 }
 0x763   : > { %v16716_v8 = vpop.f32.mrf.mxu1  ;;  %v24734_v17 = vpop.f32.mrf.mxu0 }
 0x764   : > { %v24737_v37 = vadd.f32 %v16716_v8, %v24587_v34  ;;  %v24739_v11 = vadd.f32 %v11440_v49, %v11301_v53 }
 0x765   : > { %v11184_v7 = vpop.f32.mrf.mxu1  ;;  %v16775_v27 = vpop.f32.mrf.mxu0 }
 0x766   : > { %v24742_v26 = vadd.f32 %v11184_v7, %v24594_v14 }
 0x767   : > { %v16719_v52 = vpop.f32.mrf.mxu1  ;;  %v11480_v62 = vpop.f32.mrf.mxu0 }
 0x768   : > { %v11306_v44 = vadd.f32 %v16719_v52, %v24597_v23 }
 0x769   : > { %v11194_v32 = vpop.f32.mrf.mxu1  ;;  %v24745_v41 = vpop.f32.mrf.mxu0 }
 0x76a   : > { %v11305_v29 = vadd.f32 %v11194_v32, %v24604_v10  ;;  %v24748_v42 = vadd.f32 %v16769_v1, %v11306_v44 }
 0x76b   : > { %v16722_v34 = vpop.f32.mrf.mxu1  ;;  %v24750_v13 = vpop.f32.mrf.mxu0 }
 0x76c   : > { %v24753_v49 = vadd.f32 %v16722_v34, %v24607_v16  ;;  %v24755_v63 = vadd.f32 %v11460_v45, %v11305_v29 }
 0x76d   : > { %v11204_v14 = vpop.f32.mrf.mxu1  ;;  %v16781_v43 = vpop.f32.mrf.mxu0 }
 0x76e   : > { %v24758_v3 = vadd.f32 %v11204_v14, %v24614_v33 }
 0x76f   : > { %v16725_v23 = vpop.f32.mrf.mxu1  ;;  %v11500_v54 = vpop.f32.mrf.mxu0 }
 0x770   : > { %v11310_v2 = vadd.f32 %v16725_v23, %v24617_v22 }
 0x771   : > { %v11214_v10 = vpop.f32.mrf.mxu1  ;;  %v16784_v1 = vpop.f32.mrf.mxu0 }
 0x772   : > { %v11309_v51 = vadd.f32 %v11214_v10, %v24624_v30  ;;  %v24762_v18 = vadd.f32 %v16775_v27, %v11310_v2 }
 0x773   : > { %v16728_v53 = vpop.f32.mrf.mxu1  ;;  %v24764_v16 = vpop.f32.mrf.mxu0 }
 0x774   : > { %v24767_v45 = vadd.f32 %v16728_v53, %v24627_v56  ;;  %v24769_v8 = vadd.f32 %v11480_v62, %v11309_v51 }
 0x775   : > { %v11224_v33 = vpop.f32.mrf.mxu1  ;;  %v16787_v7 = vpop.f32.mrf.mxu0 }
 0x776   : > { %v24772_v52 = vadd.f32 %v11224_v33, %v24634_v61 }
 0x777   : > { %v16731_v22 = vpop.f32.mrf.mxu1  ;;  %v11520_v44 = vpop.f32.mrf.mxu0 }
 0x778   : > { %v11314_v32 = vadd.f32 %v16731_v22, %v24637_v21 }
 0x779   : > { %v11234_v30 = vpop.f32.mrf.mxu1  ;;  %v16790_v27 = vpop.f32.mrf.mxu0 }
 0x77a   : > { %v11313_v29 = vadd.f32 %v11234_v30, %v24644_v35  ;;  %v24776_v34 = vadd.f32 %v16781_v43, %v11314_v32 }
 0x77b   : > { %v16734_v14 = vpop.f32.mrf.mxu1  ;;  %v11530_v56 = vpop.f32.mrf.mxu0 }
 0x77c   : > { %v11316_v62 = vadd.f32 %v16734_v14, %v24647_v19  ;;  %v24779_v23 = vadd.f32 %v11500_v54, %v11313_v29 }
 0x77d   : > { %v11244_v2 = vpop.f32.mrf.mxu1  ;;  %v16793_v10 = vpop.f32.mrf.mxu0 }
 0x77e   : > { %v24782_v61 = vadd.f32 %v11244_v2, %v24654_v24  ;;  %v24784_v51 = vadd.f32 %v16784_v1, %v11316_v62 }
 0x77f   : > { %v16737_v21 = vpop.f32.mrf.mxu1  ;;  %v11540_v53 = vpop.f32.mrf.mxu0 }
 0x780   : > { %v11318_v33 = vadd.f32 %v16737_v21, %v24659_v6 }
 0x781   : > { %v11254_v35 = vpop.f32.mrf.mxu1  ;;  %v16796_v43 = vpop.f32.mrf.mxu0 }
 0x782   : > { %v11317_v22 = vadd.f32 %v11254_v35, %v24667_v20  ;;  %v24788_v32 = vadd.f32 %v16787_v7, %v11318_v33 }
 0x783   : > { %v16740_v19 = vpop.f32.mrf.mxu1  ;;  %v11550_v54 = vpop.f32.mrf.mxu0 }
 0x784   : > { %v11320_v30 = vadd.f32 %v16740_v19, %v24671_v12  ;;  %v24791_v29 = vadd.f32 %v11520_v44, %v11317_v22 }
 0x785   : > { %v11264_v24 = vpop.f32.mrf.mxu1  ;;  %v24793_v14 = vpop.f32.mrf.mxu0 }
 0x786   : > { %v11319_v1 = vadd.f32 %v11264_v24, %v24678_v57  ;;  %v24796_v62 = vadd.f32 %v16790_v27, %v11320_v30 }
 0x787   : > { %v16743_v6 = vpop.f32.mrf.mxu1  ;;  %v24798_v2 = vpop.f32.mrf.mxu0 }
 0x788   : > { %v11322_v20 = vadd.f32 %v16743_v6, %v24683_v5  ;;  %v24801_v7 = vadd.f32 %v11530_v56, %v11319_v1 }
 0x789   : > { %v11274_v21 = vpop.f32.mrf.mxu1  ;;  %v24803_v33 = vpop.f32.mrf.mxu0 }
 0x78a   : > { %v11321_v12 = vadd.f32 %v11274_v21, %v24689_v59  ;;  %v24806_v44 = vadd.f32 %v16793_v10, %v11322_v20 }
 0x78b   : > { %v16746_v35 = vpop.f32.mrf.mxu1  ;;  %v24808_v22 = vpop.f32.mrf.mxu0 }
 0x78c   : > { %v11324_v57 = vadd.f32 %v16746_v35, %v24692_v38  ;;  %v24811_v27 = vadd.f32 %v11540_v53, %v11321_v12 }
 0x78d   : > { %v11284_v19 = vpop.f32.mrf.mxu1  ;;  %v24813_v30 = vpop.f32.mrf.mxu0 }
 0x78e   : > { %v11323_v5 = vadd.f32 %v11284_v19, %v24695_v39  ;;  %v24816_v56 = vadd.f32 %v16796_v43, %v11324_v57 }
 0x78f   : > { %v16801_v24 = vpop.f32.mrf.mxu1  ;;  %v24818_v1 = vpop.f32.mrf.mxu0 }
 0x790   : > { %26654 = vst [vmem:[#allocation80_spill] sm:$0xff] %v24818_v1  ;;  %v24821_v59 = vadd.f32 %v16801_v24, %v24700_v28  ;;  %v24823_v10 = vadd.f32 %v11550_v54, %v11323_v5 }
 0x791   : > { %v11663_v6 = vpop.f32.mrf.mxu1  ;;  %v24825_v20 = vpop.f32.mrf.mxu0 }
 0x792   : > { %26655 = vst [vmem:[#allocation74_spill] sm:$0xff] %v24825_v20  ;;  %v24828_v38 = vadd.f32 %v11663_v6, %v24707_v50 }
 0x793   : > { %v24830_v53 = vpop.f32.mrf.mxu1  ;;  %v24832_v21 = vpop.f32.mrf.mxu0 }
 0x794   : > { %26656 = vst [vmem:[#allocation59_spill] sm:$0xff] %v24832_v21 }
 0x795   : > { %v24834_v39 = vpop.f32.mrf.mxu1  ;;  %v24836_v43 = vpop.f32.mrf.mxu0 }
 0x796   : > { %26657 = vst [vmem:[#allocation69_spill] sm:$0xff] %v24836_v43 }
 0x797   : > { %v16807_v12 = vpop.f32.mrf.mxu1  ;;  %v24838_v35 = vpop.f32.mrf.mxu0 }
 0x798   : > { %26658 = vst [vmem:[#allocation90_spill] sm:$0xff] %v24838_v35  ;;  %v24841_v28 = vadd.f32 %v16807_v12, %v24716_v46 }
 0x799   : > { %v11683_v54 = vpop.f32.mrf.mxu1  ;;  %v24843_v57 = vpop.f32.mrf.mxu0 }
 0x79a   : > { %26659 = vst [vmem:[#allocation66_spill] sm:$0xff] %v24843_v57  ;;  %v24846_v50 = vadd.f32 %v11683_v54, %v24723_v0 }
 0x79b   : > { %v24848_v19 = vpop.f32.mrf.mxu1  ;;  %v24850_v5 = vpop.f32.mrf.mxu0 }
 0x79c   : > { %26660 = vst [vmem:[#allocation81_spill] sm:$0xff] %v24850_v5 }
 0x79d   : > { %v24852_v24 = vpop.f32.mrf.mxu1  ;;  %v24854_v6 = vpop.f32.mrf.mxu0 }
 0x79e   : > { %26661 = vst [vmem:[#allocation77_spill] sm:$0xff] %v24854_v6 }
 0x79f   : > { %v16813_v43 = vpop.f32.mrf.mxu1  ;;  %v24859_v12 = vpop.f32.mrf.mxu0 }
 0x7a0   : > { %v24857_v35 = vadd.f32 %v16813_v43, %v24732_v40  ;;  %26662 = vst [vmem:[#allocation79_spill] sm:$0xff] %v24859_v12 }
 0x7a1   : > { %v11703_v46 = vpop.f32.mrf.mxu1  ;;  %v24868_v21 = vpop.f32.mrf.mxu0 }
 0x7a2   : > { %v24862_v57 = vadd.f32 %v11703_v46, %v24739_v11  ;;  %26664 = vst [vmem:[#allocation62_spill] sm:$0xff] %v24868_v21 }
 0x7a3   : > { %v24864_v0 = vpop.f32.mrf.mxu1  ;;  %v24873_v1 = vpop.f32.mrf.mxu0 }
 0x7a4   : > { %26663 = vst [vmem:[#allocation63_spill] sm:$0xff] %v24862_v57  ;;  %26666 = vst [vmem:[#allocation22_spill] sm:$0xff] %v24873_v1 }
 0x7a5   : > { %v24866_v54 = vpop.f32.mrf.mxu1  ;;  %v24880_v11 = vpop.f32.mrf.mxu0 }
 0x7a6   : > { %26668 = vst [vmem:[#allocation71_spill] sm:$0xff] %v24880_v11 }
 0x7a7   : > { %v16819_v5 = vpop.f32.mrf.mxu1  ;;  %v24887_v21 = vpop.f32.mrf.mxu0 }
 0x7a8   : > { %v24871_v20 = vadd.f32 %v16819_v5, %v24748_v42  ;;  %26670 = vst [vmem:[#allocation78_spill] sm:$0xff] %v24887_v21 }
 0x7a9   : > { %v11723_v6 = vpop.f32.mrf.mxu1 }
 0x7aa   : > { %26665 = vst [vmem:[#allocation83_spill] sm:$0xff] %v24871_v20  ;;  %v24876_v40 = vadd.f32 %v11723_v6, %v24755_v63  ;;  %v24894_v63 = vpop.f32.mrf.mxu0 }
 0x7ab   : > { %v24878_v43 = vpop.f32.mrf.mxu1  ;;  %26672 = vst [vmem:[#allocation67_spill] sm:$0xff] %v24894_v63 }
 0x7ac   : > { %26667 = vst [vmem:[#allocation76_spill] sm:$0xff] %v24876_v40  ;;  %v24901_v20 = vpop.f32.mrf.mxu0 }
 0x7ad   : > { %v24882_v46 = vpop.f32.mrf.mxu1 }
 0x7af   : > { %v16825_v12 = vpop.f32.mrf.mxu1 }
 0x7b0   : > { %v24885_v57 = vadd.f32 %v16825_v12, %v24762_v18 }
 0x7b1   : > { %v11743_v42 = vpop.f32.mrf.mxu1 }
 0x7b2   : > { %26669 = vst [vmem:[#allocation93_spill] sm:$0xff] %v24885_v57  ;;  %v24890_v5 = vadd.f32 %v11743_v42, %v24769_v8  ;;  %v24909_v42 = vpop.f32.mrf.mxu0 }
 0x7b3   : > { %v24892_v1 = vpop.f32.mrf.mxu1 }
 0x7b4   : > { %26671 = vst [vmem:[#allocation65_spill] sm:$0xff] %v24890_v5 }
 0x7b5   : > { %v24896_v6 = vpop.f32.mrf.mxu1 }
 0x7b7   : > { %v16831_v40 = vpop.f32.mrf.mxu1 }
 0x7b8   : > { %v24899_v11 = vadd.f32 %v16831_v40, %v24776_v34  ;;  %v24916_v34 = vpop.f32.mrf.mxu0 }
 0x7b9   : > { %v11763_v18 = vpop.f32.mrf.mxu1 }
 0x7ba   : > { %26673 = vst [vmem:[#allocation89_spill] sm:$0xff] %v24899_v11  ;;  %v24904_v12 = vadd.f32 %v11763_v18, %v24779_v23 }
 0x7bb   : > { %v16834_v21 = vpop.f32.mrf.mxu1 }
 0x7bc   : > { %26674 = vst [vmem:[#allocation9_spill] sm:$0xff] %v24904_v12  ;;  %v24907_v8 = vadd.f32 %v16834_v21, %v24784_v51  ;;  %v24924_v51 = vpop.f32.mrf.mxu0 }
 0x7bd   : > { %v24911_v5 = vpop.f32.mrf.mxu1 }
 0x7be   : > { %26675 = vst [vmem:[#allocation84_spill] sm:$0xff] %v24907_v8 }
 0x7bf   : > { %v16837_v63 = vpop.f32.mrf.mxu1 }
 0x7c0   : > { %v24914_v57 = vadd.f32 %v16837_v63, %v24788_v32  ;;  %v24932_v63 = vpop.f32.mrf.mxu0 }
 0x7c1   : > { %v11783_v40 = vpop.f32.mrf.mxu1 }
 0x7c2   : > { %26676 = vst [vmem:[#allocation8_spill] sm:$0xff] %v24914_v57  ;;  %v24919_v11 = vadd.f32 %v11783_v40, %v24791_v29 }
 0x7c3   : > { %v16840_v23 = vpop.f32.mrf.mxu1 }
 0x7c4   : > { %v24922_v18 = vadd.f32 %v16840_v23, %v24796_v62  ;;  %v11562_v62 = vadd.f32 %v24680_v4, %v24705_v31  ;;  %v12090_v4 = vadd.f32 %v24793_v14, %v24821_v59  ;;  %v11574_v14 = vadd.f32 %v24729_v60, %v24753_v49  ;;  %v24983_v60 = vld [vmem:[%s25387_s12] ss:$0 sm:$0xff] }
 0x7c5   : > { %v11793_v21 = vpop.f32.mrf.mxu1  ;;  %v11573_v59 = vadd.f32 %v24734_v17, %v24758_v3  ;;  %v11581_v49 = vadd.f32 %v24764_v16, %v24782_v61 }
 0x7c6   : > { %v24927_v8 = vadd.f32 %v11793_v21, %v24801_v7  ;;  %v11561_v7 = vadd.f32 %v24686_v48, %v24710_v55  ;;  %v24944_v21 = vpop.f32.mrf.mxu0  ;;  %v11570_v48 = vadd.f32 %v24713_v47, %v24737_v37  ;;  %v11569_v55 = vadd.f32 %v24718_v9, %v24742_v26 }
 0x7c7   : > { %v16843_v12 = vpop.f32.mrf.mxu1  ;;  %v11577_v37 = vadd.f32 %v24750_v13, %v24772_v52 }
 0x7c8   : > { %v24930_v32 = vadd.f32 %v16843_v12, %v24806_v44  ;;  %v11825_v12 = vadd.f32 %v24830_v53, %v11562_v62  ;;  %v11824_v31 = vadd.f32 %v24834_v39, %v11561_v7  ;;  %v24978_v26 = vpop.f32.mrf.mxu0  ;;  %v11832_v13 = vadd.f32 %v24866_v54, %v11569_v55  ;;  %v26679_v54 = vld [vmem:[#allocation74_spill] sm:$0xff] }
 0x7c9   : > { %v11803_v57 = vpop.f32.mrf.mxu1  ;;  %v12094_v53 = vadd.f32 %v24813_v30, %v24841_v28  ;;  %v26681_v30 = vld [vmem:[#allocation69_spill] sm:$0xff] }
 0x7ca   : > { %26677 = vst [vmem:[#allocation92_spill] sm:$0xff] %v24930_v32  ;;  %v24935_v29 = vadd.f32 %v11803_v57, %v24811_v27  ;;  %v11566_v32 = vadd.f32 %v24697_v58, %v24721_v36  ;;  %v24964_v58 = vld [vmem:[%s25386_s11] ss:$0 sm:$0xff]  ;;  %v12091_v52 = vadd.f32 %v24808_v22, %v11824_v31  ;;  %v26678_v57 = vld [vmem:[#allocation80_spill] sm:$0xff]  ;;  %v26680_v22 = vld [vmem:[#allocation59_spill] sm:$0xff]  ;;  %v12098_v28 = vadd.f32 %v26681_v30, %v24857_v35 }
 0x7cb   : > { %v16846_v40 = vpop.f32.mrf.mxu1 }
 0x7cc   : > { %v24940_v23 = vadd.f32 %v16846_v40, %v24816_v56  ;;  %v11565_v56 = vadd.f32 %v24702_v25, %v24726_v15  ;;  %v12089_v25 = vadd.f32 %v24798_v2, %v24828_v38  ;;  %v11829_v47 = vadd.f32 %v24848_v19, %v11566_v32 }
 0x7cd   : > { %v11813_v44 = vpop.f32.mrf.mxu1  ;;  %v11578_v15 = vadd.f32 %v24745_v41, %v24767_v45  ;;  %v12092_v38 = vadd.f32 %v24803_v33, %v11825_v12  ;;  %v11833_v41 = vadd.f32 %v24864_v0, %v11570_v48  ;;  %v12093_v19 = vadd.f32 %v26678_v57, %v24846_v50  ;;  %v26682_v50 = vld [vmem:[#allocation63_spill] sm:$0xff]  ;;  %v26683_v12 = vld [vmem:[#allocation90_spill] sm:$0xff] }
 0x7ce   : > { %v24950_v27 = vadd.f32 %v11813_v44, %v24823_v10  ;;  %v11828_v9 = vadd.f32 %v24852_v24, %v11565_v56  ;;  %v11837_v33 = vadd.f32 %v24878_v43, %v11574_v14  ;;  %v25001_v24 = vpop.f32.mrf.mxu0  ;;  %v12096_v32 = vadd.f32 %v26679_v54, %v11829_v47  ;;  %v26684_v48 = vld [vmem:[#allocation66_spill] sm:$0xff]  ;;  %v26687_v47 = vld [vmem:[#allocation77_spill] sm:$0xff] }
 0x7cf   : > { %v16901_v36 = vpop.f32.mrf.mxu1  ;;  %v12097_v43 = vadd.f32 %v26683_v12, %v26682_v50  ;;  %v12100_v55 = vadd.f32 %v26684_v48, %v11833_v41  ;;  %v11840_v57 = vadd.f32 %v24896_v6, %v11577_v37 }
 0x7d0   : > { %v12356_v10 = vadd.f32 %v16901_v36, %v12090_v4  ;;  %v12095_v40 = vadd.f32 %v26680_v22, %v11828_v9  ;;  %v11836_v4 = vadd.f32 %v24882_v46, %v11573_v59  ;;  %v26685_v36 = vld [vmem:[#allocation81_spill] sm:$0xff]  ;;  %v26691_v22 = vld [vmem:[#allocation22_spill] sm:$0xff] }
 0x7d1   : > { %v12196_v17 = vpop.f32.mrf.mxu1  ;;  %v25017_v14 = vadd.f32 %v26685_v36, %v11832_v13  ;;  %v26690_v13 = vld [vmem:[#allocation62_spill] sm:$0xff] }
 0x7d2   : > { %v12394_v3 = vmul.f32 %v24964_v58, %v12356_v10  ;;  %v12355_v2 = vadd.f32 %v12196_v17, %v12089_v25  ;;  %v26686_v25 = vld [vmem:[#allocation83_spill] sm:$0xff]  ;;  %v12060_v17 = vpop.f32.mrf.mxu0  ;;  %v25043_v30 = vadd.f32 %v26691_v22, %v11836_v4  ;;  %v26695_v4 = vld [vmem:[#allocation78_spill] sm:$0xff]  ;;  %v26700_v22 = vld [vmem:[#allocation8_spill] sm:$0xff] }
 0x7d3   : > { %v16904_v45 = vpop.f32.mrf.mxu1  ;;  %v25025_v9 = vadd.f32 %v26687_v47, %v26686_v25  ;;  %v25068_v47 = vadd.f32 %v24901_v20, %v11840_v57 }
 0x7d4   : > { %v24995_v39 = vadd.f32 %v24983_v60, %v12394_v3  ;;  %v12393_v16 = vmul.f32 %v24964_v58, %v12355_v2  ;;  %v12358_v61 = vadd.f32 %v16904_v45, %v12092_v38  ;;  %v26688_v2 = vld [vmem:[#allocation76_spill] sm:$0xff]  ;;  %v26689_v38 = vld [vmem:[#allocation79_spill] sm:$0xff]  ;;  %v25033_v45 = vadd.f32 %v26690_v13, %v11837_v33  ;;  %v16893_v6 = vpop.f32.mrf.mxu0 }
 0x7d5   : > { %v12206_v0 = vpop.f32.mrf.mxu1  ;;  %v25030_v41 = vadd.f32 %v26689_v38, %v26688_v2  ;;  %v26698_v38 = vld [vmem:[#allocation9_spill] sm:$0xff] }
 0x7d6   : > { %v12496_v62 = vmul.f32 0.70710677, %v24995_v39  ;;  %v25009_v7 = vadd.f32 %v24983_v60, %v12393_v16  ;;  %v12396_v44 = vmul.f32 %v24964_v58, %v12358_v61  ;;  %v12357_v31 = vadd.f32 %v12206_v0, %v12091_v52 }
 0x7d7   : > { %v16907_v56 = vpop.f32.mrf.mxu1  ;;  %v11841_v52 = vadd.f32 %v24892_v1, %v11578_v15  ;;  %v26692_v1 = vld [vmem:[#allocation93_spill] sm:$0xff]  ;;  %v26693_v15 = vld [vmem:[#allocation71_spill] sm:$0xff]  ;;  %v25081_v13 = vadd.f32 %v24916_v34, %v26698_v38  ;;  %v25096_v34 = vadd.f32 %v24944_v21, %v26700_v22  ;;  %v25109_v21 = vadd.f32 %v12060_v17, %v24927_v8 }
 0x7d8   : > { %17182 = verf.f32 %v12496_v62  ;;  %v12495_v35 = vmul.f32 0.70710677, %v25009_v7  ;;  %v25021_v10 = vadd.f32 %v24983_v60, %v12396_v44  ;;  %v12395_v46 = vmul.f32 %v24964_v58, %v12357_v31  ;;  %v26694_v31 = vld [vmem:[#allocation65_spill] sm:$0xff] }
 0x7d9   : > { %v12360_v59 = vadd.f32 %v16907_v56, %v12094_v53  ;;  %v12216_v3 = vpop.f32.mrf.mxu1  ;;  %v25048_v44 = vadd.f32 %v26693_v15, %v26692_v1  ;;  %v25057_v56 = vadd.f32 %v26695_v4, %v26694_v31  ;;  %v12464_v4 = vmul.f32 0.5, %v24995_v39 }
 0x7da   : > { %17184 = verf.f32 %v12495_v35  ;;  %v12498_v16 = vmul.f32 0.70710677, %v25021_v10  ;;  %v12359_v61 = vadd.f32 %v12216_v3, %v12093_v19  ;;  %v25039_v0 = vadd.f32 %v24983_v60, %v12395_v46  ;;  %v26696_v35 = vld [vmem:[#allocation67_spill] sm:$0xff]  ;;  %v26697_v46 = vld [vmem:[#allocation89_spill] sm:$0xff] }
 0x7db   : > { %v12398_v53 = vmul.f32 %v24964_v58, %v12360_v59  ;;  %v16910_v54 = vpop.f32.mrf.mxu1  ;;  %v11844_v19 = vadd.f32 %v24911_v5, %v11581_v49  ;;  %v25064_v25 = vadd.f32 %v26696_v35, %v11841_v52  ;;  %v25072_v59 = vadd.f32 %v24909_v42, %v26697_v46  ;;  %v12070_v52 = vpop.f32.mrf.mxu0 }
 0x7dc   : > { %17186 = verf.f32 %v12498_v16  ;;  %v12397_v33 = vmul.f32 %v24964_v58, %v12359_v61  ;;  %v12362_v62 = vadd.f32 %v16910_v54, %v12096_v32  ;;  %v12497_v37 = vmul.f32 0.70710677, %v25039_v0  ;;  %v26699_v61 = vld [vmem:[#allocation84_spill] sm:$0xff] }
 0x7dd   : > { %v25053_v50 = vadd.f32 %v24983_v60, %v12398_v53  ;;  %v12226_v12 = vpop.f32.mrf.mxu1  ;;  %v25085_v57 = vadd.f32 %v24924_v51, %v26699_v61  ;;  %v25088_v42 = vadd.f32 %v24932_v63, %v11844_v19  ;;  %v25101_v51 = vadd.f32 %v24978_v26, %v24919_v11  ;;  %v26701_v11 = vld [vmem:[#allocation92_spill] sm:$0xff] }
 0x7de   : > { %v25060_v48 = vadd.f32 %v24983_v60, %v12397_v33  ;;  %v12400_v32 = vmul.f32 %v24964_v58, %v12362_v62  ;;  %v12361_v36 = vadd.f32 %v12226_v12, %v12095_v40  ;;  %17188 = verf.f32 %v12497_v37  ;;  %v16896_v33 = vpop.f32.mrf.mxu0 }
 0x7df   : > { %v12500_v5 = vmul.f32 0.70710677, %v25053_v50  ;;  %v16913_v49 = vpop.f32.mrf.mxu1  ;;  %v25105_v63 = vadd.f32 %v25001_v24, %v24922_v18  ;;  %v25116_v26 = vadd.f32 %v16893_v6, %v26701_v11  ;;  %v25119_v18 = vadd.f32 %v12070_v52, %v24935_v29 }
 0x7e0   : > { %v12499_v3 = vmul.f32 0.70710677, %v25060_v48  ;;  %v25076_v2 = vadd.f32 %v24983_v60, %v12400_v32  ;;  %v12399_v40 = vmul.f32 %v24964_v58, %v12361_v36  ;;  %v12364_v16 = vadd.f32 %v16913_v49, %v12098_v28 }
 0x7e1   : > { %17190 = verf.f32 %v12500_v5  ;;  %v12236_v20 = vpop.f32.mrf.mxu1  ;;  %v25122_v24 = vadd.f32 %v16896_v33, %v24940_v23  ;;  %v12463_v32 = vmul.f32 0.5, %v25009_v7  ;;  %v12466_v23 = vmul.f32 0.5, %v25021_v10 }
 0x7e2   : > { %17192 = verf.f32 %v12499_v3  ;;  %v12502_v53 = vmul.f32 0.70710677, %v25076_v2  ;;  %v25092_v54 = vadd.f32 %v24983_v60, %v12399_v40  ;;  %v12402_v28 = vmul.f32 %v24964_v58, %v12364_v16 }
 0x7e3   : > { %v12363_v62 = vadd.f32 %v12236_v20, %v12097_v43  ;;  %v16916_v1 = vpop.f32.mrf.mxu1  ;;  %v12465_v46 = vmul.f32 0.5, %v25039_v0  ;;  %v12468_v52 = vmul.f32 0.5, %v25053_v50  ;;  %v12467_v50 = vmul.f32 0.5, %v25060_v48 }
 0x7e4   : > { %17194 = verf.f32 %v12502_v53  ;;  %v12501_v15 = vmul.f32 0.70710677, %v25092_v54  ;;  %v12366_v19 = vadd.f32 %v16916_v1, %v12100_v55  ;;  %v25112_v12 = vadd.f32 %v24983_v60, %v12402_v28 }
 0x7e5   : > { %v17183_v37 = vpop.eup %17182  ;;  %v12401_v43 = vmul.f32 %v24964_v58, %v12363_v62  ;;  %v12246_v31 = vpop.f32.mrf.mxu1 }
 0x7e6   : > { %17196 = verf.f32 %v12501_v15  ;;  %v12404_v8 = vmul.f32 %v24964_v58, %v12366_v19  ;;  %v12365_v55 = vadd.f32 %v12246_v31, %v25017_v14  ;;  %v12504_v36 = vmul.f32 0.70710677, %v25112_v12 }
 0x7e7   : > { %v17185_v17 = vpop.eup %17184  ;;  %v25130_v6 = vadd.f32 %v24983_v60, %v12401_v43  ;;  %v16919_v29 = vpop.f32.mrf.mxu1  ;;  %v12560_v35 = vadd.f32 1.0, %v17183_v37 }
 0x7e8   : > { %v25134_v5 = vadd.f32 %v24983_v60, %v12404_v8  ;;  %v12403_v49 = vmul.f32 %v24964_v58, %v12365_v55  ;;  %17198 = verf.f32 %v12504_v36  ;;  %v12368_v7 = vadd.f32 %v16919_v29, %v25025_v9 }
 0x7e9   : > { %v17187_v14 = vpop.eup %17186  ;;  %v12503_v39 = vmul.f32 0.70710677, %v25130_v6  ;;  %v12256_v3 = vpop.f32.mrf.mxu1  ;;  %v12559_v40 = vadd.f32 1.0, %v17185_v17  ;;  %v12592_v22 = vmul.f32 %v12560_v35, %v12464_v4  ;;  %v12470_v17 = vmul.f32 0.5, %v25076_v2 }
 0x7ea   : > { %v12562_v38 = vadd.f32 1.0, %v17187_v14  ;;  %v12506_v10 = vmul.f32 0.70710677, %v25134_v5  ;;  %v25143_v16 = vadd.f32 %v24983_v60, %v12403_v49  ;;  %v12406_v20 = vmul.f32 %v24964_v58, %v12368_v7 }
 0x7eb   : > { %17200 = verf.f32 %v12503_v39  ;;  %v12367_v0 = vadd.f32 %v12256_v3, %v25030_v41  ;;  %v16922_v61 = vpop.f32.mrf.mxu1  ;;  %v17189_v53 = vpop.eup %17188  ;;  %v12591_v8 = vmul.f32 %v12559_v40, %v12463_v32  ;;  %v12469_v2 = vmul.f32 0.5, %v25092_v54 }
 0x7ec   : > { %v12594_v33 = vmul.f32 %v12562_v38, %v12466_v23  ;;  %17202 = verf.f32 %v12506_v10  ;;  %v12370_v9 = vadd.f32 %v16922_v61, %v25033_v45  ;;  %v12561_v28 = vadd.f32 1.0, %v17189_v53 }
 0x7ed   : > { %v12505_v62 = vmul.f32 0.70710677, %v25143_v16  ;;  %v25151_v1 = vadd.f32 %v24983_v60, %v12406_v20  ;;  %v12266_v15 = vpop.f32.mrf.mxu1  ;;  %v12405_v41 = vmul.f32 %v24964_v58, %v12367_v0  ;;  %v12472_v39 = vmul.f32 0.5, %v25112_v12 }
 0x7ee   : > { %v17191_v19 = vpop.eup %17190  ;;  %v12624_v37 = vmax.f32 %v12592_v22, %v12594_v33  ;;  %v12408_v43 = vmul.f32 %v24964_v58, %v12370_v9  ;;  %v12369_v31 = vadd.f32 %v12266_v15, %v25043_v30  ;;  %v12593_v45 = vmul.f32 %v12561_v28, %v12465_v46 }
 0x7ef   : > { %v17193_v11 = vpop.eup %17192  ;;  %v12564_v55 = vadd.f32 1.0, %v17191_v19  ;;  %17204 = verf.f32 %v12505_v62  ;;  %v16925_v48 = vpop.f32.mrf.mxu1  ;;  %v12508_v4 = vmul.f32 0.70710677, %v25151_v1  ;;  %v25160_v36 = vadd.f32 %v24983_v60, %v12405_v41 }
 0x7f0   : > { %12640 = vst.msk [vmem:[#allocation3 + $0x8] sm:$0xff] %vm493_vm4, %v12624_v37  ;;  %v25163_v29 = vadd.f32 %v24983_v60, %v12408_v43  ;;  %v12623_v30 = vmax.f32 %v12591_v8, %v12593_v45  ;;  %v12563_v23 = vadd.f32 1.0, %v17193_v11  ;;  %v12407_v32 = vmul.f32 %v24964_v58, %v12369_v31 }
 0x7f1   : > { %v17195_v35 = vpop.eup %17194  ;;  %v12372_v49 = vadd.f32 %v16925_v48, %v25048_v44  ;;  %v12276_v14 = vpop.f32.mrf.mxu1  ;;  %17206 = verf.f32 %v12508_v4  ;;  %v12596_v3 = vmul.f32 %v12564_v55, %v12468_v52  ;;  %v12507_v40 = vmul.f32 0.70710677, %v25160_v36 }
 0x7f2   : > { %v12566_v46 = vadd.f32 1.0, %v17195_v35  ;;  %12639 = vst.msk [vmem:[#allocation3] sm:$0xff] %vm493_vm4, %v12623_v30  ;;  %v12510_v38 = vmul.f32 0.70710677, %v25163_v29  ;;  %v25173_v10 = vadd.f32 %v24983_v60, %v12407_v32  ;;  %v12371_v54 = vadd.f32 %v12276_v14, %v25057_v56 }
 0x7f3   : > { %v17197_v7 = vpop.eup %17196  ;;  %v16928_v44 = vpop.f32.mrf.mxu1  ;;  %v12410_v61 = vmul.f32 %v24964_v58, %v12372_v49  ;;  %v12595_v12 = vmul.f32 %v12563_v23, %v12467_v50  ;;  %17208 = verf.f32 %v12507_v40  ;;  %v12471_v15 = vmul.f32 0.5, %v25130_v6 }
 0x7f4   : > { %v12598_v20 = vmul.f32 %v12566_v46, %v12470_v17  ;;  %v12565_v0 = vadd.f32 1.0, %v17197_v7  ;;  %v12509_v52 = vmul.f32 0.70710677, %v25173_v10  ;;  %v12374_v53 = vadd.f32 %v16928_v44, %v25064_v25 }
 0x7f5   : > { %v12286_v22 = vpop.f32.mrf.mxu1  ;;  %v17199_v33 = vpop.eup %17198  ;;  %17210 = verf.f32 %v12510_v38  ;;  %v25181_v62 = vadd.f32 %v24983_v60, %v12410_v61  ;;  %v12409_v56 = vmul.f32 %v24964_v58, %v12371_v54  ;;  %v12474_v8 = vmul.f32 0.5, %v25134_v5 }
 0x7f6   : > { %v12626_v9 = vmax.f32 %v12596_v3, %v12598_v20  ;;  %v12597_v28 = vmul.f32 %v12565_v0, %v12469_v2  ;;  %17212 = verf.f32 %v12509_v52  ;;  %v12412_v50 = vmul.f32 %v24964_v58, %v12374_v53 }
 0x7f7   : > { %v16931_v19 = vpop.f32.mrf.mxu1  ;;  %v12568_v41 = vadd.f32 1.0, %v17199_v33  ;;  %v12512_v43 = vmul.f32 0.70710677, %v25181_v62  ;;  %v12373_v31 = vadd.f32 %v12286_v22, %v25068_v47  ;;  %v25195_v45 = vadd.f32 %v24983_v60, %v12409_v56 }
 0x7f8   : > { %v17201_v25 = vpop.eup %17200  ;;  %12642 = vst.msk [vmem:[#allocation3 + $0x18] sm:$0xff] %vm493_vm4, %v12626_v9  ;;  %v12625_v37 = vmax.f32 %v12595_v12, %v12597_v28  ;;  %v25198_v55 = vadd.f32 %v24983_v60, %v12412_v50  ;;  %v12376_v47 = vadd.f32 %v16931_v19, %v25072_v59  ;;  %v12473_v5 = vmul.f32 0.5, %v25143_v16 }
 0x7f9   : > { %v17203_v11 = vpop.eup %17202  ;;  %v12567_v6 = vadd.f32 1.0, %v17201_v25  ;;  %v12296_v48 = vpop.f32.mrf.mxu1  ;;  %v12655_v17 = vld [vmem:[#allocation3] ss:$2 sm:$0xff]  ;;  %v12671_v4 = vld [vmem:[#allocation3 + $0x1] ss:$2 sm:$0xff]  ;;  %17214 = verf.f32 %v12512_v43  ;;  %v12411_v30 = vmul.f32 %v24964_v58, %v12373_v31  ;;  %v12476_v32 = vmul.f32 0.5, %v25151_v1 }
 0x7fa   : > { %12641 = vst.msk [vmem:[#allocation3 + $0x10] sm:$0xff] %vm493_vm4, %v12625_v37  ;;  %v12570_v35 = vadd.f32 1.0, %v17203_v11  ;;  %v12686_v23 = vmax.f32 %v12655_v17, %v12671_v4  ;;  %v12511_v49 = vmul.f32 0.70710677, %v25195_v45  ;;  %v12600_v2 = vmul.f32 %v12568_v41, %v12472_v39 }
 0x7fb   : > { %v16934_v14 = vpop.f32.mrf.mxu1  ;;  %v12514_v3 = vmul.f32 0.70710677, %v25198_v55  ;;  %v25208_v40 = vadd.f32 %v24983_v60, %v12411_v30  ;;  %v12414_v59 = vmul.f32 %v24964_v58, %v12376_v47  ;;  %v12375_v44 = vadd.f32 %v12296_v48, %v25081_v13 }
 0x7fc   : > { %v17205_v46 = vpop.eup %17204  ;;  %v12602_v7 = vmul.f32 %v12570_v35, %v12474_v8  ;;  %17216 = verf.f32 %v12511_v49  ;;  %12694 = vst.msk [vmem:[%s25213_s15] sm:$0xff] %vm493_vm4, %v12686_v23  ;;  %v12599_v1 = vmul.f32 %v12567_v6, %v12471_v15  ;;  %v12378_v13 = vadd.f32 %v16934_v14, %v25085_v57 }
 0x7fd   : > { %v12569_v38 = vadd.f32 1.0, %v17205_v46  ;;  %v12306_v16 = vpop.f32.mrf.mxu1  ;;  %17218 = verf.f32 %v12514_v3  ;;  %v12513_v20 = vmul.f32 0.70710677, %v25208_v40  ;;  %v25219_v54 = vadd.f32 %v24983_v60, %v12414_v59 }
 0x7fe   : > { %v12628_v39 = vmax.f32 %v12600_v2, %v12602_v7  ;;  %v17207_v0 = vpop.eup %17206  ;;  %v12413_v12 = vmul.f32 %v24964_v58, %v12375_v44  ;;  %v12475_v53 = vmul.f32 0.5, %v25160_v36  ;;  %v12377_v22 = vadd.f32 %v12306_v16, %v25088_v42 }
 0x7ff   : > { %v12601_v61 = vmul.f32 %v12569_v38, %v12473_v5  ;;  %v16937_v52 = vpop.f32.mrf.mxu1  ;;  %17220 = verf.f32 %v12513_v20  ;;  %v12572_v56 = vadd.f32 1.0, %v17207_v0  ;;  %v12416_v19 = vmul.f32 %v24964_v58, %v12378_v13 }
 0x800   : > { %12644 = vst.msk [vmem:[#allocation3 + $0x28] sm:$0xff] %vm493_vm4, %v12628_v39  ;;  %v12380_v33 = vadd.f32 %v16937_v52, %v25096_v34  ;;  %v25228_v50 = vadd.f32 %v24983_v60, %v12413_v12  ;;  %v17209_v25 = vpop.eup %17208  ;;  %v12478_v36 = vmul.f32 0.5, %v25163_v29  ;;  %v12516_v41 = vmul.f32 0.70710677, %v25219_v54 }
 0x801   : > { %v12657_v9 = vld [vmem:[#allocation3 + $0x10] ss:$2 sm:$0xff]  ;;  %v12673_v28 = vld [vmem:[#allocation3 + $0x11] ss:$2 sm:$0xff]  ;;  %v12627_v15 = vmax.f32 %v12599_v1, %v12601_v61  ;;  %v12316_v57 = vpop.f32.mrf.mxu1  ;;  %v12415_v42 = vmul.f32 %v24964_v58, %v12377_v22  ;;  %v12571_v43 = vadd.f32 1.0, %v17209_v25  ;;  %v12477_v31 = vmul.f32 0.5, %v25173_v10 }
 0x802   : > { %v12687_v37 = vmax.f32 %v12657_v9, %v12673_v28  ;;  %v17211_v34 = vpop.eup %17210  ;;  %v12515_v11 = vmul.f32 0.70710677, %v25228_v50  ;;  %v25238_v6 = vadd.f32 %v24983_v60, %v12416_v19  ;;  %17222 = verf.f32 %v12516_v41  ;;  %v12080_v9 = vpop.f32.mrf.mxu0 }
 0x803   : > { %12643 = vst.msk [vmem:[#allocation3 + $0x20] sm:$0xff] %vm493_vm4, %v12627_v15  ;;  %v16940_v8 = vpop.f32.mrf.mxu1  ;;  %v17213_v48 = vpop.eup %17212  ;;  %v12574_v17 = vadd.f32 1.0, %v17211_v34  ;;  %v25241_v29 = vadd.f32 %v24983_v60, %v12415_v42  ;;  %v12418_v4 = vmul.f32 %v24964_v58, %v12380_v33  ;;  %v12604_v35 = vmul.f32 %v12572_v56, %v12476_v32 }
 0x804   : > { %12695 = vst.msk [vmem:[%s25213_s15 + $0x8] sm:$0xff] %vm493_vm4, %v12687_v37  ;;  %v12573_v30 = vadd.f32 1.0, %v17213_v48  ;;  %v12480_v10 = vmul.f32 0.5, %v25181_v62  ;;  %17224 = verf.f32 %v12515_v11  ;;  %v12603_v23 = vmul.f32 %v12571_v43, %v12475_v53 }
 0x805   : > { %v12326_v47 = vpop.f32.mrf.mxu1  ;;  %v12606_v5 = vmul.f32 %v12574_v17, %v12478_v36  ;;  %v12518_v49 = vmul.f32 0.70710677, %v25238_v6  ;;  %v12517_v14 = vmul.f32 0.70710677, %v25241_v29  ;;  %v25250_v7 = vadd.f32 %v24983_v60, %v12418_v4 }
 0x806   : > { %v17215_v46 = vpop.eup %17214  ;;  %v12605_v2 = vmul.f32 %v12573_v30, %v12477_v31  ;;  %v12379_v3 = vadd.f32 %v12316_v57, %v25101_v51  ;;  %v12382_v32 = vadd.f32 %v16940_v8, %v25105_v63  ;;  %v12479_v62 = vmul.f32 0.5, %v25195_v45 }
 0x807   : > { %v16943_v38 = vpop.f32.mrf.mxu1  ;;  %v12630_v59 = vmax.f32 %v12604_v35, %v12606_v5  ;;  %17226 = verf.f32 %v12518_v49  ;;  %v12381_v44 = vadd.f32 %v12326_v47, %v25109_v21  ;;  %v12482_v1 = vmul.f32 0.5, %v25198_v55 }
 0x808   : > { %v12629_v16 = vmax.f32 %v12603_v23, %v12605_v2  ;;  %17228 = verf.f32 %v12517_v14  ;;  %v12520_v39 = vmul.f32 0.70710677, %v25250_v7  ;;  %v12576_v51 = vadd.f32 1.0, %v17215_v46 }
 0x809   : > { %v12336_v20 = vpop.f32.mrf.mxu1  ;;  %v17217_v0 = vpop.eup %17216  ;;  %12646 = vst.msk [vmem:[#allocation3 + $0x38] sm:$0xff] %vm493_vm4, %v12630_v59  ;;  %v12417_v63 = vmul.f32 %v24964_v58, %v12379_v3  ;;  %v12420_v45 = vmul.f32 %v24964_v58, %v12382_v32  ;;  %v12419_v13 = vmul.f32 %v24964_v58, %v12381_v44  ;;  %v12481_v53 = vmul.f32 0.5, %v25208_v40 }
 0x80a   : > { %v12659_v61 = vld [vmem:[#allocation3 + $0x20] ss:$2 sm:$0xff]  ;;  %v12675_v12 = vld [vmem:[#allocation3 + $0x21] ss:$2 sm:$0xff]  ;;  %v17219_v21 = vpop.eup %17218  ;;  %12645 = vst.msk [vmem:[#allocation3 + $0x30] sm:$0xff] %vm493_vm4, %v12629_v16  ;;  %v12575_v55 = vadd.f32 1.0, %v17217_v0  ;;  %v12384_v22 = vadd.f32 %v16943_v38, %v25116_v26  ;;  %17230 = verf.f32 %v12520_v39  ;;  %v12383_v40 = vadd.f32 %v12336_v20, %v25119_v18 }
 0x80b   : > { %v12688_v52 = vmax.f32 %v12659_v61, %v12675_v12  ;;  %v16946_v33 = vpop.f32.mrf.mxu1  ;;  %v12578_v28 = vadd.f32 1.0, %v17219_v21  ;;  %v25266_v15 = vadd.f32 %v24983_v60, %v12417_v63  ;;  %v25269_v56 = vadd.f32 %v24983_v60, %v12420_v45 }
 0x80c   : > { %v25272_v19 = vadd.f32 %v24983_v60, %v12419_v13  ;;  %v17221_v57 = vpop.eup %17220  ;;  %v12422_v25 = vmul.f32 %v24964_v58, %v12384_v22  ;;  %v12386_v26 = vadd.f32 %v16946_v33, %v25122_v24  ;;  %v12608_v37 = vmul.f32 %v12576_v51, %v12480_v10 }
 0x80d   : > { %12696 = vst.msk [vmem:[%s25213_s15 + $0x10] sm:$0xff] %vm493_vm4, %v12688_v52  ;;  %v12610_v36 = vmul.f32 %v12578_v28, %v12482_v1  ;;  %v12577_v41 = vadd.f32 1.0, %v17221_v57  ;;  %v12519_v42 = vmul.f32 0.70710677, %v25266_v15  ;;  %v12346_v34 = vpop.f32.mrf.mxu1  ;;  %v12119_v43 = vadd.f32 %v12080_v9, %v24950_v27 }
 0x80e   : > { %v12607_v31 = vmul.f32 %v12575_v55, %v12479_v62  ;;  %v12522_v11 = vmul.f32 0.70710677, %v25269_v56  ;;  %v12521_v8 = vmul.f32 0.70710677, %v25272_v19  ;;  %v25284_v18 = vadd.f32 %v24983_v60, %v12422_v25 }
 0x80f   : > { %v12632_v48 = vmax.f32 %v12608_v37, %v12610_v36  ;;  %v12609_v17 = vmul.f32 %v12577_v41, %v12481_v53  ;;  %17232 = verf.f32 %v12519_v42  ;;  %v17223_v24 = vpop.eup %17222  ;;  %v12421_v4 = vmul.f32 %v24964_v58, %v12383_v40 }
 0x810   : > { %17234 = verf.f32 %v12522_v11  ;;  %v12424_v35 = vmul.f32 %v24964_v58, %v12386_v26  ;;  %v12385_v30 = vadd.f32 %v12346_v34, %v12119_v43  ;;  %v12524_v49 = vmul.f32 0.70710677, %v25284_v18 }
 0x811   : > { %v17225_v10 = vpop.eup %17224  ;;  %v12661_v27 = vld [vmem:[#allocation3 + $0x30] ss:$2 sm:$0xff]  ;;  %v12677_v47 = vld [vmem:[#allocation3 + $0x31] ss:$2 sm:$0xff]  ;;  %12648 = vst.msk [vmem:[#allocation3 + $0x48] sm:$0xff] %vm493_vm4, %v12632_v48  ;;  %v12631_v23 = vmax.f32 %v12607_v31, %v12609_v17  ;;  %17236 = verf.f32 %v12521_v8  ;;  %v25291_v14 = vadd.f32 %v24983_v60, %v12421_v4  ;;  %v12580_v46 = vadd.f32 1.0, %v17223_v24 }
 0x812   : > { %v12689_v5 = vmax.f32 %v12661_v27, %v12677_v47  ;;  %v12462_v2 = vadd.f32 %v24983_v60, %v12424_v35  ;;  %v12423_v3 = vmul.f32 %v24964_v58, %v12385_v30  ;;  %v12484_v38 = vmul.f32 0.5, %v25219_v54 }
 0x813   : > { %12647 = vst.msk [vmem:[#allocation3 + $0x40] sm:$0xff] %vm493_vm4, %v12631_v23  ;;  %v12579_v59 = vadd.f32 1.0, %v17225_v10  ;;  %17238 = verf.f32 %v12524_v49  ;;  %v12523_v62 = vmul.f32 0.70710677, %v25291_v14  ;;  %v12486_v16 = vmul.f32 0.5, %v25238_v6 }
 0x814   : > { %v17227_v32 = vpop.eup %17226  ;;  %12697 = vst.msk [vmem:[%s25213_s15 + $0x18] sm:$0xff] %vm493_vm4, %v12689_v5  ;;  %v12526_v39 = vmul.f32 0.70710677, %v12462_v2  ;;  %v12461_v20 = vadd.f32 %v24983_v60, %v12423_v3  ;;  %v12483_v0 = vmul.f32 0.5, %v25228_v50  ;;  %v12485_v58 = vmul.f32 0.5, %v25241_v29 }
 0x815   : > { %v17229_v44 = vpop.eup %17228  ;;  %v12582_v1 = vadd.f32 1.0, %v17227_v32  ;;  %17240 = verf.f32 %v12523_v62  ;;  %v12612_v54 = vmul.f32 %v12580_v46, %v12484_v38  ;;  %v12488_v9 = vmul.f32 0.5, %v25250_v7 }
 0x816   : > { %v12581_v61 = vadd.f32 1.0, %v17229_v44  ;;  %17242 = verf.f32 %v12526_v39  ;;  %v12525_v51 = vmul.f32 0.70710677, %v12461_v20  ;;  %v12611_v63 = vmul.f32 %v12579_v59, %v12483_v0 }
 0x817   : > { %v12614_v12 = vmul.f32 %v12582_v1, %v12486_v16  ;;  %v17231_v13 = vpop.eup %17230  ;;  %v12490_v28 = vmul.f32 0.5, %v25269_v56  ;;  %v12487_v25 = vmul.f32 0.5, %v25266_v15  ;;  %v12489_v40 = vmul.f32 0.5, %v25272_v19 }
 0x818   : > { %v12613_v45 = vmul.f32 %v12581_v61, %v12485_v58  ;;  %17244 = verf.f32 %v12525_v51  ;;  %v12584_v29 = vadd.f32 1.0, %v17231_v13  ;;  %v12492_v15 = vmul.f32 0.5, %v25284_v18 }
 0x819   : > { %v12634_v21 = vmax.f32 %v12612_v54, %v12614_v12  ;;  %v12494_v24 = vmul.f32 0.5, %v12462_v2  ;;  %v12491_v30 = vmul.f32 0.5, %v25291_v14  ;;  %v12493_v47 = vmul.f32 0.5, %v12461_v20 }
 0x81a   : > { %v12663_v6 = vld [vmem:[#allocation3 + $0x40] ss:$2 sm:$0xff]  ;;  %v12679_v52 = vld [vmem:[#allocation3 + $0x41] ss:$2 sm:$0xff]  ;;  %v12633_v55 = vmax.f32 %v12611_v63, %v12613_v45  ;;  %v12616_v37 = vmul.f32 %v12584_v29, %v12488_v9 }
 0x81b   : > { %v12690_v60 = vmax.f32 %v12663_v6, %v12679_v52  ;;  %12650 = vst.msk [vmem:[#allocation3 + $0x58] sm:$0xff] %vm493_vm4, %v12634_v21 }
 0x81c   : > { %v17233_v50 = vpop.eup %17232  ;;  %12649 = vst.msk [vmem:[#allocation3 + $0x50] sm:$0xff] %vm493_vm4, %v12633_v55 }
 0x81d   : > { %v17235_v53 = vpop.eup %17234  ;;  %v12583_v22 = vadd.f32 1.0, %v17233_v50  ;;  %12698 = vst.msk [vmem:[%s25213_s15 + $0x20] sm:$0xff] %vm493_vm4, %v12690_v60 }
 0x81e   : > { %v17237_v33 = vpop.eup %17236  ;;  %v12586_v57 = vadd.f32 1.0, %v17235_v53 }
 0x81f   : > { %v12585_v26 = vadd.f32 1.0, %v17237_v33  ;;  %v12615_v42 = vmul.f32 %v12583_v22, %v12487_v25 }
 0x820   : > { %v12618_v36 = vmul.f32 %v12586_v57, %v12490_v28  ;;  %v17239_v41 = vpop.eup %17238 }
 0x821   : > { %v12617_v34 = vmul.f32 %v12585_v26, %v12489_v40  ;;  %v12588_v7 = vadd.f32 1.0, %v17239_v41 }
 0x822   : > { %v12636_v43 = vmax.f32 %v12616_v37, %v12618_v36  ;;  %v17241_v31 = vpop.eup %17240 }
 0x823   : > { %v12665_v11 = vld [vmem:[#allocation3 + $0x50] ss:$2 sm:$0xff]  ;;  %v12681_v8 = vld [vmem:[#allocation3 + $0x51] ss:$2 sm:$0xff]  ;;  %v12635_v48 = vmax.f32 %v12615_v42, %v12617_v34  ;;  %v17243_v17 = vpop.eup %17242  ;;  %v12587_v19 = vadd.f32 1.0, %v17241_v31  ;;  %v12620_v10 = vmul.f32 %v12588_v7, %v12492_v15 }
 0x824   : > { %v12691_v56 = vmax.f32 %v12665_v11, %v12681_v8  ;;  %12652 = vst.msk [vmem:[#allocation3 + $0x68] sm:$0xff] %vm493_vm4, %v12636_v43  ;;  %v12590_v4 = vadd.f32 1.0, %v17243_v17 }
 0x825   : > { %12651 = vst.msk [vmem:[#allocation3 + $0x60] sm:$0xff] %vm493_vm4, %v12635_v48  ;;  %v17245_v35 = vpop.eup %17244  ;;  %v12619_v5 = vmul.f32 %v12587_v19, %v12491_v30 }
 0x826   : > { %12699 = vst.msk [vmem:[%s25213_s15 + $0x28] sm:$0xff] %vm493_vm4, %v12691_v56  ;;  %v12622_v27 = vmul.f32 %v12590_v4, %v12494_v24  ;;  %v12589_v23 = vadd.f32 1.0, %v17245_v35 }
 0x828   : > { %v12638_v49 = vmax.f32 %v12620_v10, %v12622_v27  ;;  %v12621_v46 = vmul.f32 %v12589_v23, %v12493_v47 }
 0x82a   : > { %12654 = vst.msk [vmem:[#allocation3 + $0x78] sm:$0xff] %vm493_vm4, %v12638_v49  ;;  %v12637_v18 = vmax.f32 %v12619_v5, %v12621_v46 }
 0x82c   : > { %v12667_v2 = vld [vmem:[#allocation3 + $0x60] ss:$2 sm:$0xff]  ;;  %v12683_v3 = vld [vmem:[#allocation3 + $0x61] ss:$2 sm:$0xff]  ;;  %12653 = vst.msk [vmem:[#allocation3 + $0x70] sm:$0xff] %vm493_vm4, %v12637_v18 }
 0x82d   : > { %v12692_v14 = vmax.f32 %v12667_v2, %v12683_v3 }
 0x82f   : > { %12700 = vst.msk [vmem:[%s25213_s15 + $0x30] sm:$0xff] %vm493_vm4, %v12692_v14 }
 0x833   : > { %v12669_v32 = vld [vmem:[#allocation3 + $0x70] ss:$2 sm:$0xff]  ;;  %v12685_v38 = vld [vmem:[#allocation3 + $0x71] ss:$2 sm:$0xff] }
 0x834   : > { %v12693_v59 = vmax.f32 %v12669_v32, %v12685_v38 }
 0x836   : > { %12701 = vst.msk [vmem:[%s25213_s15 + $0x38] sm:$0xff] %vm493_vm4, %v12693_v59 }
 0x837   : > { %17300 = shalt.err (!%p17297_p3)
}
 0x838   : > { %s17301_s23 = scalar_lea.hbm %s25327_s22, 1024  ;;  %s17305_s0 = scalar_lea.hbm %s25388_s13, 2048 }
 0x839   : > { %p17302_p4 = scmp.ne.s32.totalorder %s25327_s22, %s17301_s23  ;;  %p17306_p9 = scmp.lt.s32.totalorder %s25327_s22, %s25388_s13 }
 0x83a   : > { %p17307_p10 = scmp.lt.s32.totalorder %s17305_s0, %s17301_s23 }
 0x83b   : > { %p17303_p7 = pnand %p17302_p4, %p17461_p5 }
 0x83c   : > { %p17308_p11 = por %p17307_p10, %p17306_p9 }
 0x83d   : > { %p17304_p8 = pneg %p17303_p7 }
 0x83f   : > { %p17309_p12 = pnand %p17308_p11, %p17304_p8 }
 0x841   : > { %17312 = shalt.err (!%p17309_p12)
}
 0x842   : > { %s17351_s29 = smov 128   ;;  %s17352_s20 = smov 8  }
 0x843   : > { %16948 = dma.vmem_to_hbm [thread:$0]  (%p17461_p5), %s25329_s24, 1024, %s25327_s22, %s25335_s30, %s17351_s29, %s17351_s29, %s17352_s20  }
 0x844 PF: > { %p16954_p13 = scmp.ge.s32.totalorder %s17347_s28, 2  ;;  %s12731_s16 = sand.u32 1, %s17335_s25  }
 0x845   : > { %s12732_s1 = scalar_lea.sflag [#allocation5], %s12731_s16 }
 0x846   : > { %p16951_p0 = pnand %p16954_p13, %p17465_p6 }
 0x848   : > { %p16952_p1 = pneg %p16951_p0 }
 0x84a   : > { %17330 = dma.done.wait (%p16952_p1), %s12732_s1, 1024  }
 0x84b   : > { %17332 = vsyncadd (%p16952_p1), %s12732_s1, 4294966272  ;;  %p23_p2 = scmp.ge.s32.totalorder %s17448_s14, 4   ;;  %s26702_s25 = smov %s17339_s26 }
 0x84c   : > { %s26703_s26 = smov %s17343_s27  ;;  %s26704_s27 = smov %s17459_s17 }
 0x84d   : > { %s26705_s28 = smov %s17448_s14  ;;  %25 = sbr.rel (!%p23_p2) target bundleno = 7 (0x7), region = 123 }
 0x852   :  { %12737 = vsyncpa [#allocation5], 1 }
 0x853   :  { %12739 = vsyncpa [#allocation5 + $0x1], 1 }

</bundles_post_ra>
